<compile_context>
chip_gen: v5e
topology: v5e:2x2
jax: 0.10.0
libtpu: 0.0.40
codegen_flags: <defaults>
</compile_context>

<pallas_src>
import functools

import jax
import jax.numpy as jnp
from jax import lax
from jax.experimental import pallas as pl
from jax.experimental.pallas import tpu as pltpu

NEG_SLOPE = 0.1


def _round_up(x, m):
    return (x + m - 1) // m * m


@functools.lru_cache(maxsize=None)
def _vmem_budget_bytes():
    """~3/4 of physical VMEM (48 MiB on v7x, 96 MiB on v5e/v6e)."""
    cap = 64 * 1024 * 1024
    try:
        cap = int(getattr(pltpu.get_tpu_info(), "vmem_capacity_bytes", cap))
    except Exception:
        pass
    return (3 * cap) // 4


# --------------------------- shared kernel body ------------------------------

def _tap_accumulate(v_ref, w_ref, bias, o_ref, *, offsets, sub_rows, rows,
                    out_offset=0, mask_ref=None):
    """Accumulate `len(offsets)` shifted-window matmuls into `o_ref`.

    Works on sub-tiles of <=sub_rows rows with the taps innermost, so the f32
    accumulator is a small short-lived value (register/VMEM-temp resident) and
    each output row is written exactly once (single bf16 store per sub-tile).
    """
    cout = o_ref.shape[-1]
    for s in range(0, rows, sub_rows):
        size = min(sub_rows, rows - s)
        acc = jnp.zeros((size, cout), jnp.float32)
        for t, off in enumerate(offsets):         # statically unrolled taps
            acc = acc + jnp.dot(v_ref[pl.ds(off + s, size), :], w_ref[t],
                                preferred_element_type=jnp.float32)
        acc = acc + bias                          # bias in f32
        act = jnp.where(acc >= 0.0, acc, NEG_SLOPE * acc)
        if mask_ref is not None:                  # zero wrap/border columns
            act = act * mask_ref[pl.ds(s, size), :]
        o_ref[pl.ds(out_offset + s, size), :] = act.astype(o_ref.dtype)


def _conv_taps_kernel(v_ref, w_ref, b_ref, o_ref, *, offsets, sub_rows):
    # Whole-slab path: v/weights/bias auto-pipelined into VMEM by BlockSpecs.
    _tap_accumulate(v_ref, w_ref, b_ref[...], o_ref,
                    offsets=offsets, sub_rows=sub_rows, rows=o_ref.shape[0])


def _conv_taps_dma_kernel(v_any, w_ref, b_ref, o_ref, vbuf, sem, *,
                          offsets, tile_rows, win_rows, sub_rows):
    # Row-tiled path: input stays in HBM; DMA only the halo'd row window of
    # this tile into a VMEM scratch, so VMEM is bounded by the tile size.
    n = pl.program_id(0)
    t = pl.program_id(1)
    row0 = pl.multiple_of(t * tile_rows, tile_rows)
    cp = pltpu.make_async_copy(v_any.at[n, pl.ds(row0, win_rows), :], vbuf, sem)
    cp.start()
    cp.wait()
    _tap_accumulate(vbuf, w_ref, b_ref[...], o_ref,
                    offsets=offsets, sub_rows=sub_rows, rows=o_ref.shape[0])


def _fused_pair_kernel(mask_ref, v_ref, wa_ref, ba_ref, wb_ref, bb_ref,
                       o_ref, mid_ref, *, offsets_a, offsets_b, lz_a, mid_off,
                       sub_a, sub_b):
    # Stride-2 conv writes its (masked, border-zeroed) output directly into a
    # VMEM scratch laid out as the stride-1 conv's padded flattened input, so
    # the intermediate activation never leaves VMEM.
    mid_ref[...] = jnp.zeros_like(mid_ref)        # exact zero border
    _tap_accumulate(v_ref, wa_ref, ba_ref[...], mid_ref,
                    offsets=offsets_a, sub_rows=sub_a, rows=lz_a,
                    out_offset=mid_off, mask_ref=mask_ref)
    _tap_accumulate(mid_ref, wb_ref, bb_ref[...], o_ref,
                    offsets=offsets_b, sub_rows=sub_b, rows=o_ref.shape[0])


# ------------------------- generic tiled conv core ---------------------------

def _pick_tile_rows(lv, cin, lz, cout, ntap, halo, budget):
    """None -> whole-slab path; otherwise the row-tile size (multiple of 16)."""
    slack = 2 << 20
    whole = 2 * lv * cin * 2 + 2 * lz * cout * 2 + 2 * ntap * cin * cout * 2 \
        + 8 * cout + slack
    if whole <= budget:
        return None
    for t in (1024, 512, 256, 128, 64, 32, 16):
        win = t + _round_up(halo, 16)
        fp = win * cin * 2 + 2 * t * cout * 2 + 2 * ntap * cin * cout * 2 \
            + 8 * cout + slack
        if fp <= budget:
            return t
    return 16


def _conv_taps(v, w_taps, b, lz, offsets):
    """Shifted-window conv core: out[r] = act(sum_t v[r+off_t] @ W_t + b).

    v:      (N, Lv, Cin) bf16 flattened (phase-split for stride 2) activation.
    w_taps: (ntap, Cin, Cout); b: (Cout,).  Returns (N, lz, Cout) bf16.
    """
    N, Lv, Cin = v.shape
    ntap, _, Cout = w_taps.shape
    wt = w_taps.astype(jnp.bfloat16)
    b2 = b.reshape(1, Cout).astype(jnp.float32)
    budget = _vmem_budget_bytes()
    sub_rows = 128 if Cout <= 128 else 64
    halo = max(offsets)

    cost = pl.CostEstimate(
        flops=2 * N * lz * ntap * Cin * Cout,
        transcendentals=0,
        bytes_accessed=(N * Lv * Cin * 2 + ntap * Cin * Cout * 2
                        + Cout * 4 + N * lz * Cout * 2))

    tile = _pick_tile_rows(Lv, Cin, lz, Cout, ntap, halo, budget)

    if tile is None:
        # Whole-slab, auto-pipelined path (small / medium images).
        return pl.pallas_call(
            functools.partial(_conv_taps_kernel, offsets=offsets,
                              sub_rows=sub_rows),
            out_shape=jax.ShapeDtypeStruct((N, lz, Cout), jnp.bfloat16),
            grid=(N,),
            in_specs=[
                pl.BlockSpec((None, Lv, Cin), lambda n: (n, 0, 0)),
                pl.BlockSpec((ntap, Cin, Cout), lambda n: (0, 0, 0)),
                pl.BlockSpec((1, Cout), lambda n: (0, 0)),
            ],
            out_specs=pl.BlockSpec((None, lz, Cout), lambda n: (n, 0, 0)),
            compiler_params=pltpu.CompilerParams(
                dimension_semantics=("parallel",),
                vmem_limit_bytes=budget),
            cost_estimate=cost,
        )(v, wt, b2)

    # Row-tiled path: bounded VMEM, both grid axes parallel (v7x megacore).
    halo_pad = _round_up(halo, 16)
    win = tile + halo_pad
    lz_pad = _round_up(lz, tile)
    need_rows = lz_pad + halo_pad
    if Lv < need_rows:
        v = jnp.pad(v, ((0, 0), (0, need_rows - Lv), (0, 0)))

    z = pl.pallas_call(
        functools.partial(_conv_taps_dma_kernel, offsets=offsets,
                          tile_rows=tile, win_rows=win, sub_rows=sub_rows),
        out_shape=jax.ShapeDtypeStruct((N, lz_pad, Cout), jnp.bfloat16),
        grid=(N, lz_pad // tile),
        in_specs=[
            pl.BlockSpec(memory_space=pl.ANY),                   # raw HBM slab
            pl.BlockSpec((ntap, Cin, Cout), lambda n, t: (0, 0, 0)),
            pl.BlockSpec((1, Cout), lambda n, t: (0, 0)),
        ],
        out_specs=pl.BlockSpec((None, tile, Cout), lambda n, t: (n, t, 0)),
        scratch_shapes=[pltpu.VMEM((win, Cin), jnp.bfloat16),
                        pltpu.SemaphoreType.DMA(())],
        compiler_params=pltpu.CompilerParams(
            dimension_semantics=("parallel", "parallel"),
            vmem_limit_bytes=budget),
        cost_estimate=cost,
    )(v, wt, b2)
    return z[:, :lz]


# --------------------------- per-layer wrappers -------------------------------

def conv3x3_bias_lrelu(x_nhwc, w_hwio, b, stride):
    """Standalone 3x3 conv (pad=1, stride 1 or 2) + bias + LeakyReLU(0.1)."""
    N, H, W, Cin = x_nhwc.shape
    kh, kw, _, Cout = w_hwio.shape
    assert (kh, kw) == (3, 3) and stride in (1, 2)
    Ho = (H - 1) // stride + 1
    Wo = (W - 1) // stride + 1

    if stride == 1:
        R, Wq = Ho + 3, Wo + 2
        xp = jnp.pad(x_nhwc, ((0, 0), (1, R - H - 1), (1, Wq - W - 1), (0, 0)))
        v = xp.reshape(N, R * Wq, Cin)
        offsets = tuple(i * Wq + j for i in range(3) for j in range(3))
    else:
        # Space-to-depth into 4 parity phases (1x data); taps become unit
        # shifts inside each phase of the row-major flattened slab.
        R, Wq = Ho + 2, Wo + 2
        xp = jnp.pad(x_nhwc,
                     ((0, 0), (1, 2 * R - H - 1), (1, 2 * Wq - W - 1), (0, 0)))
        v = (xp.reshape(N, R, 2, Wq, 2, Cin).transpose(0, 2, 4, 1, 3, 5)
               .reshape(N, 4 * R * Wq, Cin))
        offsets = tuple(
            (2 * (i % 2) + (j % 2)) * R * Wq + (i // 2) * Wq + (j // 2)
            for i in range(3) for j in range(3))

    lz = Ho * Wq
    z = _conv_taps(v.astype(jnp.bfloat16), w_hwio.reshape(9, Cin, Cout), b,
                   lz, offsets)
    return z.reshape(N, Ho, Wq, Cout)[:, :, :Wo, :]


def conv3x3_folded_k(x_nhwc, w_hwio, b, stride):
    """First layer (tiny Cin): fold the 9 taps into the contraction dim."""
    N, H, W, Cin = x_nhwc.shape
    Cout = w_hwio.shape[3]
    Ho = (H - 1) // stride + 1
    Wo = (W - 1) // stride + 1
    xp = jnp.pad(x_nhwc, ((0, 0), (1, 2), (1, 2), (0, 0)))
    taps = []
    for di in range(3):
        for dj in range(3):
            taps.append(lax.slice(
                xp, (0, di, dj, 0),
                (N, di + stride * (Ho - 1) + 1, dj + stride * (Wo - 1) + 1,
                 Cin),
                (1, stride, stride, 1)))
    patches = jnp.concatenate(taps, axis=-1)           # (N, Ho, Wo, 9*Cin)
    K = 9 * Cin
    Kp = _round_up(K, 16)
    v = patches.reshape(N, Ho * Wo, K)
    wt = w_hwio.reshape(K, Cout)
    if Kp != K:
        v = jnp.pad(v, ((0, 0), (0, 0), (0, Kp - K)))
        wt = jnp.pad(wt, ((0, Kp - K), (0, 0)))
    z = _conv_taps(v.astype(jnp.bfloat16), wt[None], b, Ho * Wo, (0,))
    return z.reshape(N, Ho, Wo, Cout)


def conv_pair_s2_s1(x_nhwc, wa, ba, wb, bb):
    """Fused [stride-2 conv] -> [stride-1 conv] pair (one pallas_call) when
    everything fits VMEM; falls back to two row-tiled calls otherwise."""
    N, H, W, Cin_a = x_nhwc.shape
    Cm = wa.shape[3]
    Cout = wb.shape[3]
    Hm = (H - 1) // 2 + 1
    Wm = (W - 1) // 2 + 1
    Wq = Wm + 2                      # shared flattened width of both convs
    R = Hm + 2
    Lv_a = 4 * R * Wq
    Lz_a = Hm * Wq
    Lv_b = (Hm + 3) * Wq
    Lz_b = Hm * Wq
    budget = _vmem_budget_bytes()

    fp = (2 * Lv_a * Cin_a * 2 + Lv_b * Cm * 2 + 2 * Lz_b * Cout * 2
          + 2 * 9 * (Cin_a * Cm + Cm * Cout) * 2 + Lz_a * 4 + (2 << 20))
    if fp > budget // 2:
        # TODO(synk): row-tiled fused pair for large images.
        y = conv3x3_bias_lrelu(x_nhwc, wa, ba, 2)
        return conv3x3_bias_lrelu(y, wb, bb, 1)

    xp = jnp.pad(x_nhwc,
                 ((0, 0), (1, 2 * R - H - 1), (1, 2 * Wq - W - 1), (0, 0)))
    v = (xp.reshape(N, R, 2, Wq, 2, Cin_a).transpose(0, 2, 4, 1, 3, 5)
           .reshape(N, Lv_a, Cin_a).astype(jnp.bfloat16))
    offs_a = tuple((2 * (i % 2) + (j % 2)) * R * Wq + (i // 2) * Wq + (j // 2)
                   for i in range(3) for j in range(3))
    offs_b = tuple(i * Wq + j for i in range(3) for j in range(3))
    # Mask the wrap columns of the stride-2 conv's output: they land on the
    # zero border of the stride-1 conv's padded input and must be exact zeros.
    mask = (jnp.arange(Lz_a) % Wq < Wm).astype(jnp.float32).reshape(Lz_a, 1)
    wa_t = wa.reshape(9, Cin_a, Cm).astype(jnp.bfloat16)
    wb_t = wb.reshape(9, Cm, Cout).astype(jnp.bfloat16)
    ba2 = ba.reshape(1, Cm).astype(jnp.float32)
    bb2 = bb.reshape(1, Cout).astype(jnp.float32)
    sub_a = 128 if Cm <= 128 else 64
    sub_b = 128 if Cout <= 128 else 64

    cost = pl.CostEstimate(
        flops=2 * N * 9 * (Lz_a * Cin_a * Cm + Lz_b * Cm * Cout),
        transcendentals=0,
        bytes_accessed=(N * Lv_a * Cin_a * 2
                        + 9 * (Cin_a * Cm + Cm * Cout) * 2
                        + (Cm + Cout) * 4 + N * Lz_b * Cout * 2))

    z = pl.pallas_call(
        functools.partial(_fused_pair_kernel, offsets_a=offs_a,
                          offsets_b=offs_b, lz_a=Lz_a, mid_off=Wq + 1,
                          sub_a=sub_a, sub_b=sub_b),
        out_shape=jax.ShapeDtypeStruct((N, Lz_b, Cout), jnp.bfloat16),
        grid=(N,),
        in_specs=[
            pl.BlockSpec((Lz_a, 1), lambda n: (0, 0)),             # col mask
            pl.BlockSpec((None, Lv_a, Cin_a), lambda n: (n, 0, 0)),
            pl.BlockSpec((9, Cin_a, Cm), lambda n: (0, 0, 0)),
            pl.BlockSpec((1, Cm), lambda n: (0, 0)),
            pl.BlockSpec((9, Cm, Cout), lambda n: (0, 0, 0)),
            pl.BlockSpec((1, Cout), lambda n: (0, 0)),
        ],
        out_specs=pl.BlockSpec((None, Lz_b, Cout), lambda n: (n, 0, 0)),
        scratch_shapes=[pltpu.VMEM((Lv_b, Cm), jnp.bfloat16)],
        compiler_params=pltpu.CompilerParams(
            dimension_semantics=("parallel",),
            vmem_limit_bytes=budget),
        cost_estimate=cost,
    )(mask, v, wa_t, ba2, wb_t, bb2)
    return z.reshape(N, Hm, Wq, Cout)[:, :, :Wm, :]


# ---- exact zero-padding of channels so every output block is lane-dense -----

def _pad_out_channels(w, b, cout_p):
    pad = cout_p - w.shape[3]
    if pad == 0:
        return w, b
    return (jnp.pad(w, ((0, 0), (0, 0), (0, 0), (0, pad))),
            jnp.pad(b, ((0, pad),)))


def _pad_in_channels(w, cin_p):
    pad = cin_p - w.shape[2]
    if pad == 0:
        return w
    return jnp.pad(w, ((0, 0), (0, 0), (0, pad), (0, 0)))


# ---- deterministic parameter init (synthetic; mirrors kaiming_normal_) ------

_LAYER_CFG = [
    # (cin, cout, stride) for conv1..conv7 (k=3, pad=1 everywhere)
    (None, 64, 2),
    (64, 128, 2),
    (128, 128, 1),
    (128, 128, 2),
    (128, 128, 1),
    (128, 256, 2),
    (256, 256, 1),
]


def init_params(key, c_in):
    params = []
    cfg = [(c_in if cin is None else cin, cout, s) for cin, cout, s in _LAYER_CFG]
    for idx, (cin, cout, stride) in enumerate(cfg):
        kw_key, kb_key = jax.random.split(jax.random.fold_in(key, idx))
        fan_in = 3 * 3 * cin
        w = jax.random.normal(kw_key, (3, 3, cin, cout), jnp.float32) * jnp.sqrt(
            2.0 / fan_in)
        bias = jax.random.uniform(
            kb_key, (cout,), jnp.float32, minval=-0.1, maxval=0.1)
        params.append((w, bias, stride))
    return params


# ---- full FeatExtractor forward ---------------------------------------------

def feat_extractor(x_nchw, params):
    """Pallas forward pass.  x: NCHW f32 -> NCHW f32 (PyTorch convention)."""
    x = jnp.transpose(x_nchw, (0, 2, 3, 1)).astype(jnp.bfloat16)  # NCHW -> NHWC

    # Layer 1: tiny Cin -> fold taps into the contraction dimension.
    w0, b0, s0 = params[0]
    w0p, b0p = _pad_out_channels(w0, b0, _round_up(w0.shape[3], 128))
    if 9 * w0.shape[2] <= 256:
        x = conv3x3_folded_k(x, w0p, b0p, s0)
    else:
        x = conv3x3_bias_lrelu(x, w0p, b0p, s0)
    carried = x.shape[-1]

    # Remaining layers: fuse (stride-2, stride-1) pairs when possible.
    idx = 1
    while idx < len(params):
        wa, ba, sa = params[idx]
        pairable = (idx + 1 < len(params) and sa == 2
                    and params[idx + 1][2] == 1)
        if pairable:
            wb, bb, _ = params[idx + 1]
            cm_p = _round_up(wa.shape[3], 128)
            co_p = _round_up(wb.shape[3], 128)
            wa_ = _pad_in_channels(wa, carried)
            wa_, ba_ = _pad_out_channels(wa_, ba, cm_p)
            wb_ = _pad_in_channels(wb, cm_p)
            wb_, bb_ = _pad_out_channels(wb_, bb, co_p)
            x = conv_pair_s2_s1(x, wa_, ba_, wb_, bb_)
            idx += 2
        else:
            co_p = _round_up(wa.shape[3], 128)
            wa_ = _pad_in_channels(wa, carried)
            wa_, ba_ = _pad_out_channels(wa_, ba, co_p)
            x = conv3x3_bias_lrelu(x, wa_, ba_, sa)
            idx += 1
        carried = x.shape[-1]

    x = x[..., :params[-1][0].shape[3]]        # strip any channel padding
    return jnp.transpose(x.astype(jnp.float32), (0, 3, 1, 2))


def feat_extractor_ref(x_nchw, params):
    # Pure-JAX reference (lax.conv) with the same bf16-in / f32-accumulate
    # numerics as the kernel path.
    x = jnp.transpose(x_nchw, (0, 2, 3, 1)).astype(jnp.bfloat16)
    for w, b, stride in params:
        y = lax.conv_general_dilated(
            x, w.astype(jnp.bfloat16), (stride, stride), [(1, 1), (1, 1)],
            dimension_numbers=('NHWC', 'HWIO', 'NHWC'),
            preferred_element_type=jnp.float32)
        y = y + b
        x = jnp.where(y >= 0.0, y, NEG_SLOPE * y).astype(jnp.bfloat16)
    return jnp.transpose(x.astype(jnp.float32), (0, 3, 1, 2))


if __name__ == "__main__":
    key = jax.random.PRNGKey(0)
    c_in = 4
    x = jax.random.normal(jax.random.fold_in(key, 100), (2, c_in, 16, 16),
                          jnp.float32)
    params = init_params(key, c_in)

    fwd = jax.jit(lambda inp: feat_extractor(inp, params))
    out = jax.block_until_ready(fwd(x))
    ref = jax.block_until_ready(feat_extractor_ref(x, params))

    assert out.shape == (2, 256, 1, 1), out.shape
    assert jnp.allclose(out, ref, rtol=3e-2, atol=3e-2), (
        "mismatch vs reference; max abs diff = "
        f"{float(jnp.max(jnp.abs(out - ref)))}")

    # TODO(synk): batchNorm=True branch (Conv2d no-bias + BatchNorm2d) not
    # implemented; this script realizes the batchNorm=False configuration.
    print("KERNEL_OK")
</pallas_src>

<mosaic_0001>
module attributes {stable_mosaic.version = 11 : i64} {
  func.func @_conv_taps_kernel(%arg0: i32, %arg1: memref<1x64x48xbf16, #tpu.memory_space<vmem>>, %arg2: memref<1x48x128xbf16, #tpu.memory_space<vmem>>, %arg3: memref<1x128xf32, #tpu.memory_space<vmem>>, %arg4: memref<1x64x128xbf16, #tpu.memory_space<vmem>>) attributes {dimension_semantics = [#tpu.dimension_semantics<parallel>], iteration_bounds = array<i64: 2>, scalar_prefetch = 0 : i64, scratch_operands = 0 : i64, tpu.core_type = #tpu.core_type<tc>, window_params = [{transform_indices = @transform_0, window_bounds = array<i64: 1, 64, 48>}, {pipeline_mode = #tpu.pipeline_mode<synchronous>, transform_indices = @transform_1, window_bounds = array<i64: 1, 48, 128>}, {pipeline_mode = #tpu.pipeline_mode<synchronous>, transform_indices = @transform_2, window_bounds = array<i64: 1, 128>}, {transform_indices = @transform_3, window_bounds = array<i64: 1, 64, 128>}]} {
    %c0 = arith.constant 0 : index
    %c0_0 = arith.constant 0 : index
    %0 = vector.load %arg3[%c0, %c0_0] : memref<1x128xf32, #tpu.memory_space<vmem>>, vector<1x128xf32>
    %cst = arith.constant 0.000000e+00 : f32
    %1 = vector.broadcast %cst : f32 to vector<64x128xf32>
    %c0_1 = arith.constant 0 : index
    %c0_2 = arith.constant 0 : index
    %c0_3 = arith.constant 0 : index
    %2 = vector.load %arg1[%c0_1, %c0_2, %c0_3] : memref<1x64x48xbf16, #tpu.memory_space<vmem>>, vector<1x64x48xbf16>
    %3 = vector.shape_cast %2 : vector<1x64x48xbf16> to vector<64x48xbf16>
    %c0_4 = arith.constant 0 : index
    %c0_5 = arith.constant 0 : index
    %c0_6 = arith.constant 0 : index
    %4 = vector.load %arg2[%c0_4, %c0_5, %c0_6] : memref<1x48x128xbf16, #tpu.memory_space<vmem>>, vector<1x48x128xbf16>
    %5 = vector.shape_cast %4 : vector<1x48x128xbf16> to vector<48x128xbf16>
    %cst_7 = arith.constant dense<0.000000e+00> : vector<64x128xf32>
    %6 = tpu.matmul %3, %5, %cst_7 {dimension_numbers = #tpu.dot_dimension_numbers<[1], [0], [0], [1], [0, 0, 1, 1], [], []>} : vector<64x48xbf16>, vector<48x128xbf16>, vector<64x128xf32> -> vector<64x128xf32>
    %7 = arith.addf %1, %6 : vector<64x128xf32>
    %8 = vector.broadcast %0 : vector<1x128xf32> to vector<64x128xf32>
    %9 = arith.addf %7, %8 : vector<64x128xf32>
    %cst_8 = arith.constant 0.000000e+00 : f32
    %10 = vector.broadcast %cst_8 : f32 to vector<64x128xf32>
    %11 = arith.cmpf oge, %9, %10 : vector<64x128xf32>
    %cst_9 = arith.constant 1.000000e-01 : f32
    %12 = vector.broadcast %cst_9 : f32 to vector<64x128xf32>
    %13 = arith.mulf %12, %9 : vector<64x128xf32>
    %14 = arith.select %11, %9, %13 : vector<64x128xi1>, vector<64x128xf32>
    %15 = arith.truncf %14 : vector<64x128xf32> to vector<64x128xbf16>
    %c0_10 = arith.constant 0 : index
    %c0_11 = arith.constant 0 : index
    %c0_12 = arith.constant 0 : index
    %16 = vector.load %arg4[%c0_10, %c0_11, %c0_12] : memref<1x64x128xbf16, #tpu.memory_space<vmem>>, vector<1x64x128xbf16>
    %17 = vector.shape_cast %16 : vector<1x64x128xbf16> to vector<64x128xbf16>
    %18 = vector.shape_cast %15 : vector<64x128xbf16> to vector<1x64x128xbf16>
    tpu.vector_store %arg4[%c0_10, %c0_11, %c0_12], %18 {strides = array<i32>} : memref<1x64x128xbf16, #tpu.memory_space<vmem>>, vector<1x64x128xbf16>,
    return
  }
  func.func @transform_0(%arg0: i32) -> (i32, i32, i32) {
    %c0_i32 = arith.constant 0 : i32
    %c0_i32_0 = arith.constant 0 : i32
    %c0_i32_1 = arith.constant 0 : i32
    return %arg0, %c0_i32, %c0_i32_0 : i32, i32, i32
  }
  func.func @transform_1(%arg0: i32) -> (i32, i32, i32) {
    %c0_i32 = arith.constant 0 : i32
    %c0_i32_0 = arith.constant 0 : i32
    %c0_i32_1 = arith.constant 0 : i32
    %c0_i32_2 = arith.constant 0 : i32
    return %c0_i32, %c0_i32_0, %c0_i32_1 : i32, i32, i32
  }
  func.func @transform_2(%arg0: i32) -> (i32, i32) {
    %c0_i32 = arith.constant 0 : i32
    %c0_i32_0 = arith.constant 0 : i32
    %c0_i32_1 = arith.constant 0 : i32
    return %c0_i32, %c0_i32_0 : i32, i32
  }
  func.func @transform_3(%arg0: i32) -> (i32, i32, i32) {
    %c0_i32 = arith.constant 0 : i32
    %c0_i32_0 = arith.constant 0 : i32
    %c0_i32_1 = arith.constant 0 : i32
    return %arg0, %c0_i32, %c0_i32_0 : i32, i32, i32
  }
}

module attributes {stable_mosaic.version = 11 : i64} {
  func.func @_fused_pair_kernel(%arg0: i32, %arg1: memref<24x1xf32, #tpu.memory_space<vmem>>, %arg2: memref<1x144x128xbf16, #tpu.memory_space<vmem>>, %arg3: memref<9x128x128xbf16, #tpu.memory_space<vmem>>, %arg4: memref<1x128xf32, #tpu.memory_space<vmem>>, %arg5: memref<9x128x128xbf16, #tpu.memory_space<vmem>>, %arg6: memref<1x128xf32, #tpu.memory_space<vmem>>, %arg7: memref<1x24x128xbf16, #tpu.memory_space<vmem>>, %arg8: memref<42x128xbf16, #tpu.memory_space<vmem>>) attributes {dimension_semantics = [#tpu.dimension_semantics<parallel>], iteration_bounds = array<i64: 2>, scalar_prefetch = 0 : i64, scratch_operands = 1 : i64, tpu.core_type = #tpu.core_type<tc>, window_params = [{pipeline_mode = #tpu.pipeline_mode<synchronous>, transform_indices = @transform_0, window_bounds = array<i64: 24, 1>}, {transform_indices = @transform_1, window_bounds = array<i64: 1, 144, 128>}, {pipeline_mode = #tpu.pipeline_mode<synchronous>, transform_indices = @transform_2, window_bounds = array<i64: 9, 128, 128>}, {pipeline_mode = #tpu.pipeline_mode<synchronous>, transform_indices = @transform_3, window_bounds = array<i64: 1, 128>}, {pipeline_mode = #tpu.pipeline_mode<synchronous>, transform_indices = @transform_4, window_bounds = array<i64: 9, 128, 128>}, {pipeline_mode = #tpu.pipeline_mode<synchronous>, transform_indices = @transform_5, window_bounds = array<i64: 1, 128>}, {transform_indices = @transform_6, window_bounds = array<i64: 1, 24, 128>}]} {
    %cst = arith.constant 0.000000e+00 : bf16
    %0 = vector.broadcast %cst : bf16 to vector<42x128xbf16>
    %c0 = arith.constant 0 : index
    %c0_0 = arith.constant 0 : index
    %1 = vector.load %arg8[%c0, %c0_0] : memref<42x128xbf16, #tpu.memory_space<vmem>>, vector<42x128xbf16>
    tpu.vector_store %arg8[%c0, %c0_0], %0 {strides = array<i32>} : memref<42x128xbf16, #tpu.memory_space<vmem>>, vector<42x128xbf16>,
    %c0_1 = arith.constant 0 : index
    %c0_2 = arith.constant 0 : index
    %2 = vector.load %arg4[%c0_1, %c0_2] : memref<1x128xf32, #tpu.memory_space<vmem>>, vector<1x128xf32>
    %cst_3 = arith.constant 0.000000e+00 : f32
    %3 = vector.broadcast %cst_3 : f32 to vector<24x128xf32>
    %c0_4 = arith.constant 0 : index
    %c0_5 = arith.constant 0 : index
    %c0_6 = arith.constant 0 : index
    %4 = vector.load %arg2[%c0_4, %c0_5, %c0_6] : memref<1x144x128xbf16, #tpu.memory_space<vmem>>, vector<1x24x128xbf16>
    %5 = vector.shape_cast %4 : vector<1x24x128xbf16> to vector<24x128xbf16>
    %c0_7 = arith.constant 0 : index
    %c0_8 = arith.constant 0 : index
    %c0_9 = arith.constant 0 : index
    %6 = vector.load %arg3[%c0_7, %c0_8, %c0_9] : memref<9x128x128xbf16, #tpu.memory_space<vmem>>, vector<1x128x128xbf16>
    %7 = vector.shape_cast %6 : vector<1x128x128xbf16> to vector<128x128xbf16>
    %cst_10 = arith.constant dense<0.000000e+00> : vector<24x128xf32>
    %8 = tpu.matmul %5, %7, %cst_10 {dimension_numbers = #tpu.dot_dimension_numbers<[1], [0], [0], [1], [0, 0, 1, 1], [], []>} : vector<24x128xbf16>, vector<128x128xbf16>, vector<24x128xf32> -> vector<24x128xf32>
    %9 = arith.addf %3, %8 : vector<24x128xf32>
    %c0_11 = arith.constant 0 : index
    %c36 = arith.constant 36 : index
    %c0_12 = arith.constant 0 : index
    %10 = vector.load %arg2[%c0_11, %c36, %c0_12] : memref<1x144x128xbf16, #tpu.memory_space<vmem>>, vector<1x24x128xbf16>
    %11 = vector.shape_cast %10 : vector<1x24x128xbf16> to vector<24x128xbf16>
    %c1 = arith.constant 1 : index
    %c0_13 = arith.constant 0 : index
    %c0_14 = arith.constant 0 : index
    %12 = vector.load %arg3[%c1, %c0_13, %c0_14] : memref<9x128x128xbf16, #tpu.memory_space<vmem>>, vector<1x128x128xbf16>
    %13 = vector.shape_cast %12 : vector<1x128x128xbf16> to vector<128x128xbf16>
    %cst_15 = arith.constant dense<0.000000e+00> : vector<24x128xf32>
    %14 = tpu.matmul %11, %13, %cst_15 {dimension_numbers = #tpu.dot_dimension_numbers<[1], [0], [0], [1], [0, 0, 1, 1], [], []>} : vector<24x128xbf16>, vector<128x128xbf16>, vector<24x128xf32> -> vector<24x128xf32>
    %15 = arith.addf %9, %14 : vector<24x128xf32>
    %c0_16 = arith.constant 0 : index
    %c1_17 = arith.constant 1 : index
    %c0_18 = arith.constant 0 : index
    %16 = vector.load %arg2[%c0_16, %c1_17, %c0_18] : memref<1x144x128xbf16, #tpu.memory_space<vmem>>, vector<1x24x128xbf16>
    %17 = vector.shape_cast %16 : vector<1x24x128xbf16> to vector<24x128xbf16>
    %c2 = arith.constant 2 : index
    %c0_19 = arith.constant 0 : index
    %c0_20 = arith.constant 0 : index
    %18 = vector.load %arg3[%c2, %c0_19, %c0_20] : memref<9x128x128xbf16, #tpu.memory_space<vmem>>, vector<1x128x128xbf16>
    %19 = vector.shape_cast %18 : vector<1x128x128xbf16> to vector<128x128xbf16>
    %cst_21 = arith.constant dense<0.000000e+00> : vector<24x128xf32>
    %20 = tpu.matmul %17, %19, %cst_21 {dimension_numbers = #tpu.dot_dimension_numbers<[1], [0], [0], [1], [0, 0, 1, 1], [], []>} : vector<24x128xbf16>, vector<128x128xbf16>, vector<24x128xf32> -> vector<24x128xf32>
    %21 = arith.addf %15, %20 : vector<24x128xf32>
    %c0_22 = arith.constant 0 : index
    %c72 = arith.constant 72 : index
    %c0_23 = arith.constant 0 : index
    %22 = vector.load %arg2[%c0_22, %c72, %c0_23] : memref<1x144x128xbf16, #tpu.memory_space<vmem>>, vector<1x24x128xbf16>
    %23 = vector.shape_cast %22 : vector<1x24x128xbf16> to vector<24x128xbf16>
    %c3 = arith.constant 3 : index
    %c0_24 = arith.constant 0 : index
    %c0_25 = arith.constant 0 : index
    %24 = vector.load %arg3[%c3, %c0_24, %c0_25] : memref<9x128x128xbf16, #tpu.memory_space<vmem>>, vector<1x128x128xbf16>
    %25 = vector.shape_cast %24 : vector<1x128x128xbf16> to vector<128x128xbf16>
    %cst_26 = arith.constant dense<0.000000e+00> : vector<24x128xf32>
    %26 = tpu.matmul %23, %25, %cst_26 {dimension_numbers = #tpu.dot_dimension_numbers<[1], [0], [0], [1], [0, 0, 1, 1], [], []>} : vector<24x128xbf16>, vector<128x128xbf16>, vector<24x128xf32> -> vector<24x128xf32>
    %27 = arith.addf %21, %26 : vector<24x128xf32>
    %c0_27 = arith.constant 0 : index
    %c108 = arith.constant 108 : index
    %c0_28 = arith.constant 0 : index
    %28 = vector.load %arg2[%c0_27, %c108, %c0_28] : memref<1x144x128xbf16, #tpu.memory_space<vmem>>, vector<1x24x128xbf16>
    %29 = vector.shape_cast %28 : vector<1x24x128xbf16> to vector<24x128xbf16>
    %c4 = arith.constant 4 : index
    %c0_29 = arith.constant 0 : index
    %c0_30 = arith.constant 0 : index
    %30 = vector.load %arg3[%c4, %c0_29, %c0_30] : memref<9x128x128xbf16, #tpu.memory_space<vmem>>, vector<1x128x128xbf16>
    %31 = vector.shape_cast %30 : vector<1x128x128xbf16> to vector<128x128xbf16>
    %cst_31 = arith.constant dense<0.000000e+00> : vector<24x128xf32>
    %32 = tpu.matmul %29, %31, %cst_31 {dimension_numbers = #tpu.dot_dimension_numbers<[1], [0], [0], [1], [0, 0, 1, 1], [], []>} : vector<24x128xbf16>, vector<128x128xbf16>, vector<24x128xf32> -> vector<24x128xf32>
    %33 = arith.addf %27, %32 : vector<24x128xf32>
    %c0_32 = arith.constant 0 : index
    %c73 = arith.constant 73 : index
    %c0_33 = arith.constant 0 : index
    %34 = vector.load %arg2[%c0_32, %c73, %c0_33] : memref<1x144x128xbf16, #tpu.memory_space<vmem>>, vector<1x24x128xbf16>
    %35 = vector.shape_cast %34 : vector<1x24x128xbf16> to vector<24x128xbf16>
    %c5 = arith.constant 5 : index
    %c0_34 = arith.constant 0 : index
    %c0_35 = arith.constant 0 : index
    %36 = vector.load %arg3[%c5, %c0_34, %c0_35] : memref<9x128x128xbf16, #tpu.memory_space<vmem>>, vector<1x128x128xbf16>
    %37 = vector.shape_cast %36 : vector<1x128x128xbf16> to vector<128x128xbf16>
    %cst_36 = arith.constant dense<0.000000e+00> : vector<24x128xf32>
    %38 = tpu.matmul %35, %37, %cst_36 {dimension_numbers = #tpu.dot_dimension_numbers<[1], [0], [0], [1], [0, 0, 1, 1], [], []>} : vector<24x128xbf16>, vector<128x128xbf16>, vector<24x128xf32> -> vector<24x128xf32>
    %39 = arith.addf %33, %38 : vector<24x128xf32>
    %c0_37 = arith.constant 0 : index
    %c6 = arith.constant 6 : index
    %c0_38 = arith.constant 0 : index
    %40 = vector.load %arg2[%c0_37, %c6, %c0_38] : memref<1x144x128xbf16, #tpu.memory_space<vmem>>, vector<1x24x128xbf16>
    %41 = vector.shape_cast %40 : vector<1x24x128xbf16> to vector<24x128xbf16>
    %c6_39 = arith.constant 6 : index
    %c0_40 = arith.constant 0 : index
    %c0_41 = arith.constant 0 : index
    %42 = vector.load %arg3[%c6_39, %c0_40, %c0_41] : memref<9x128x128xbf16, #tpu.memory_space<vmem>>, vector<1x128x128xbf16>
    %43 = vector.shape_cast %42 : vector<1x128x128xbf16> to vector<128x128xbf16>
    %cst_42 = arith.constant dense<0.000000e+00> : vector<24x128xf32>
    %44 = tpu.matmul %41, %43, %cst_42 {dimension_numbers = #tpu.dot_dimension_numbers<[1], [0], [0], [1], [0, 0, 1, 1], [], []>} : vector<24x128xbf16>, vector<128x128xbf16>, vector<24x128xf32> -> vector<24x128xf32>
    %45 = arith.addf %39, %44 : vector<24x128xf32>
    %c0_43 = arith.constant 0 : index
    %c42 = arith.constant 42 : index
    %c0_44 = arith.constant 0 : index
    %46 = vector.load %arg2[%c0_43, %c42, %c0_44] : memref<1x144x128xbf16, #tpu.memory_space<vmem>>, vector<1x24x128xbf16>
    %47 = vector.shape_cast %46 : vector<1x24x128xbf16> to vector<24x128xbf16>
    %c7 = arith.constant 7 : index
    %c0_45 = arith.constant 0 : index
    %c0_46 = arith.constant 0 : index
    %48 = vector.load %arg3[%c7, %c0_45, %c0_46] : memref<9x128x128xbf16, #tpu.memory_space<vmem>>, vector<1x128x128xbf16>
    %49 = vector.shape_cast %48 : vector<1x128x128xbf16> to vector<128x128xbf16>
    %cst_47 = arith.constant dense<0.000000e+00> : vector<24x128xf32>
    %50 = tpu.matmul %47, %49, %cst_47 {dimension_numbers = #tpu.dot_dimension_numbers<[1], [0], [0], [1], [0, 0, 1, 1], [], []>} : vector<24x128xbf16>, vector<128x128xbf16>, vector<24x128xf32> -> vector<24x128xf32>
    %51 = arith.addf %45, %50 : vector<24x128xf32>
    %c0_48 = arith.constant 0 : index
    %c7_49 = arith.constant 7 : index
    %c0_50 = arith.constant 0 : index
    %52 = vector.load %arg2[%c0_48, %c7_49, %c0_50] : memref<1x144x128xbf16, #tpu.memory_space<vmem>>, vector<1x24x128xbf16>
    %53 = vector.shape_cast %52 : vector<1x24x128xbf16> to vector<24x128xbf16>
    %c8 = arith.constant 8 : index
    %c0_51 = arith.constant 0 : index
    %c0_52 = arith.constant 0 : index
    %54 = vector.load %arg3[%c8, %c0_51, %c0_52] : memref<9x128x128xbf16, #tpu.memory_space<vmem>>, vector<1x128x128xbf16>
    %55 = vector.shape_cast %54 : vector<1x128x128xbf16> to vector<128x128xbf16>
    %cst_53 = arith.constant dense<0.000000e+00> : vector<24x128xf32>
    %56 = tpu.matmul %53, %55, %cst_53 {dimension_numbers = #tpu.dot_dimension_numbers<[1], [0], [0], [1], [0, 0, 1, 1], [], []>} : vector<24x128xbf16>, vector<128x128xbf16>, vector<24x128xf32> -> vector<24x128xf32>
    %57 = arith.addf %51, %56 : vector<24x128xf32>
    %58 = vector.broadcast %2 : vector<1x128xf32> to vector<24x128xf32>
    %59 = arith.addf %57, %58 : vector<24x128xf32>
    %cst_54 = arith.constant 0.000000e+00 : f32
    %60 = vector.broadcast %cst_54 : f32 to vector<24x128xf32>
    %61 = arith.cmpf oge, %59, %60 : vector<24x128xf32>
    %cst_55 = arith.constant 1.000000e-01 : f32
    %62 = vector.broadcast %cst_55 : f32 to vector<24x128xf32>
    %63 = arith.mulf %62, %59 : vector<24x128xf32>
    %64 = arith.select %61, %59, %63 : vector<24x128xi1>, vector<24x128xf32>
    %c0_56 = arith.constant 0 : index
    %c0_57 = arith.constant 0 : index
    %65 = vector.load %arg1[%c0_56, %c0_57] : memref<24x1xf32, #tpu.memory_space<vmem>>, vector<24x1xf32>
    %66 = vector.broadcast %65 : vector<24x1xf32> to vector<24x128xf32>
    %67 = arith.mulf %64, %66 : vector<24x128xf32>
    %68 = arith.truncf %67 : vector<24x128xf32> to vector<24x128xbf16>
    %c7_58 = arith.constant 7 : index
    %c0_59 = arith.constant 0 : index
    %69 = vector.load %arg8[%c7_58, %c0_59] : memref<42x128xbf16, #tpu.memory_space<vmem>>, vector<24x128xbf16>
    tpu.vector_store %arg8[%c7_58, %c0_59], %68 {strides = array<i32>} : memref<42x128xbf16, #tpu.memory_space<vmem>>, vector<24x128xbf16>,
    %c0_60 = arith.constant 0 : index
    %c0_61 = arith.constant 0 : index
    %70 = vector.load %arg6[%c0_60, %c0_61] : memref<1x128xf32, #tpu.memory_space<vmem>>, vector<1x128xf32>
    %cst_62 = arith.constant 0.000000e+00 : f32
    %71 = vector.broadcast %cst_62 : f32 to vector<24x128xf32>
    %c0_63 = arith.constant 0 : index
    %c0_64 = arith.constant 0 : index
    %72 = vector.load %arg8[%c0_63, %c0_64] : memref<42x128xbf16, #tpu.memory_space<vmem>>, vector<24x128xbf16>
    %c0_65 = arith.constant 0 : index
    %c0_66 = arith.constant 0 : index
    %c0_67 = arith.constant 0 : index
    %73 = vector.load %arg5[%c0_65, %c0_66, %c0_67] : memref<9x128x128xbf16, #tpu.memory_space<vmem>>, vector<1x128x128xbf16>
    %74 = vector.shape_cast %73 : vector<1x128x128xbf16> to vector<128x128xbf16>
    %cst_68 = arith.constant dense<0.000000e+00> : vector<24x128xf32>
    %75 = tpu.matmul %72, %74, %cst_68 {dimension_numbers = #tpu.dot_dimension_numbers<[1], [0], [0], [1], [0, 0, 1, 1], [], []>} : vector<24x128xbf16>, vector<128x128xbf16>, vector<24x128xf32> -> vector<24x128xf32>
    %76 = arith.addf %71, %75 : vector<24x128xf32>
    %c1_69 = arith.constant 1 : index
    %c0_70 = arith.constant 0 : index
    %77 = vector.load %arg8[%c1_69, %c0_70] : memref<42x128xbf16, #tpu.memory_space<vmem>>, vector<24x128xbf16>
    %c1_71 = arith.constant 1 : index
    %c0_72 = arith.constant 0 : index
    %c0_73 = arith.constant 0 : index
    %78 = vector.load %arg5[%c1_71, %c0_72, %c0_73] : memref<9x128x128xbf16, #tpu.memory_space<vmem>>, vector<1x128x128xbf16>
    %79 = vector.shape_cast %78 : vector<1x128x128xbf16> to vector<128x128xbf16>
    %cst_74 = arith.constant dense<0.000000e+00> : vector<24x128xf32>
    %80 = tpu.matmul %77, %79, %cst_74 {dimension_numbers = #tpu.dot_dimension_numbers<[1], [0], [0], [1], [0, 0, 1, 1], [], []>} : vector<24x128xbf16>, vector<128x128xbf16>, vector<24x128xf32> -> vector<24x128xf32>
    %81 = arith.addf %76, %80 : vector<24x128xf32>
    %c2_75 = arith.constant 2 : index
    %c0_76 = arith.constant 0 : index
    %82 = vector.load %arg8[%c2_75, %c0_76] : memref<42x128xbf16, #tpu.memory_space<vmem>>, vector<24x128xbf16>
    %c2_77 = arith.constant 2 : index
    %c0_78 = arith.constant 0 : index
    %c0_79 = arith.constant 0 : index
    %83 = vector.load %arg5[%c2_77, %c0_78, %c0_79] : memref<9x128x128xbf16, #tpu.memory_space<vmem>>, vector<1x128x128xbf16>
    %84 = vector.shape_cast %83 : vector<1x128x128xbf16> to vector<128x128xbf16>
    %cst_80 = arith.constant dense<0.000000e+00> : vector<24x128xf32>
    %85 = tpu.matmul %82, %84, %cst_80 {dimension_numbers = #tpu.dot_dimension_numbers<[1], [0], [0], [1], [0, 0, 1, 1], [], []>} : vector<24x128xbf16>, vector<128x128xbf16>, vector<24x128xf32> -> vector<24x128xf32>
    %86 = arith.addf %81, %85 : vector<24x128xf32>
    %c6_81 = arith.constant 6 : index
    %c0_82 = arith.constant 0 : index
    %87 = vector.load %arg8[%c6_81, %c0_82] : memref<42x128xbf16, #tpu.memory_space<vmem>>, vector<24x128xbf16>
    %c3_83 = arith.constant 3 : index
    %c0_84 = arith.constant 0 : index
    %c0_85 = arith.constant 0 : index
    %88 = vector.load %arg5[%c3_83, %c0_84, %c0_85] : memref<9x128x128xbf16, #tpu.memory_space<vmem>>, vector<1x128x128xbf16>
    %89 = vector.shape_cast %88 : vector<1x128x128xbf16> to vector<128x128xbf16>
    %cst_86 = arith.constant dense<0.000000e+00> : vector<24x128xf32>
    %90 = tpu.matmul %87, %89, %cst_86 {dimension_numbers = #tpu.dot_dimension_numbers<[1], [0], [0], [1], [0, 0, 1, 1], [], []>} : vector<24x128xbf16>, vector<128x128xbf16>, vector<24x128xf32> -> vector<24x128xf32>
    %91 = arith.addf %86, %90 : vector<24x128xf32>
    %c7_87 = arith.constant 7 : index
    %c0_88 = arith.constant 0 : index
    %92 = vector.load %arg8[%c7_87, %c0_88] : memref<42x128xbf16, #tpu.memory_space<vmem>>, vector<24x128xbf16>
    %c4_89 = arith.constant 4 : index
    %c0_90 = arith.constant 0 : index
    %c0_91 = arith.constant 0 : index
    %93 = vector.load %arg5[%c4_89, %c0_90, %c0_91] : memref<9x128x128xbf16, #tpu.memory_space<vmem>>, vector<1x128x128xbf16>
    %94 = vector.shape_cast %93 : vector<1x128x128xbf16> to vector<128x128xbf16>
    %cst_92 = arith.constant dense<0.000000e+00> : vector<24x128xf32>
    %95 = tpu.matmul %92, %94, %cst_92 {dimension_numbers = #tpu.dot_dimension_numbers<[1], [0], [0], [1], [0, 0, 1, 1], [], []>} : vector<24x128xbf16>, vector<128x128xbf16>, vector<24x128xf32> -> vector<24x128xf32>
    %96 = arith.addf %91, %95 : vector<24x128xf32>
    %c8_93 = arith.constant 8 : index
    %c0_94 = arith.constant 0 : index
    %97 = vector.load %arg8[%c8_93, %c0_94] : memref<42x128xbf16, #tpu.memory_space<vmem>>, vector<24x128xbf16>
    %c5_95 = arith.constant 5 : index
    %c0_96 = arith.constant 0 : index
    %c0_97 = arith.constant 0 : index
    %98 = vector.load %arg5[%c5_95, %c0_96, %c0_97] : memref<9x128x128xbf16, #tpu.memory_space<vmem>>, vector<1x128x128xbf16>
    %99 = vector.shape_cast %98 : vector<1x128x128xbf16> to vector<128x128xbf16>
    %cst_98 = arith.constant dense<0.000000e+00> : vector<24x128xf32>
    %100 = tpu.matmul %97, %99, %cst_98 {dimension_numbers = #tpu.dot_dimension_numbers<[1], [0], [0], [1], [0, 0, 1, 1], [], []>} : vector<24x128xbf16>, vector<128x128xbf16>, vector<24x128xf32> -> vector<24x128xf32>
    %101 = arith.addf %96, %100 : vector<24x128xf32>
    %c12 = arith.constant 12 : index
    %c0_99 = arith.constant 0 : index
    %102 = vector.load %arg8[%c12, %c0_99] : memref<42x128xbf16, #tpu.memory_space<vmem>>, vector<24x128xbf16>
    %c6_100 = arith.constant 6 : index
    %c0_101 = arith.constant 0 : index
    %c0_102 = arith.constant 0 : index
    %103 = vector.load %arg5[%c6_100, %c0_101, %c0_102] : memref<9x128x128xbf16, #tpu.memory_space<vmem>>, vector<1x128x128xbf16>
    %104 = vector.shape_cast %103 : vector<1x128x128xbf16> to vector<128x128xbf16>
    %cst_103 = arith.constant dense<0.000000e+00> : vector<24x128xf32>
    %105 = tpu.matmul %102, %104, %cst_103 {dimension_numbers = #tpu.dot_dimension_numbers<[1], [0], [0], [1], [0, 0, 1, 1], [], []>} : vector<24x128xbf16>, vector<128x128xbf16>, vector<24x128xf32> -> vector<24x128xf32>
    %106 = arith.addf %101, %105 : vector<24x128xf32>
    %c13 = arith.constant 13 : index
    %c0_104 = arith.constant 0 : index
    %107 = vector.load %arg8[%c13, %c0_104] : memref<42x128xbf16, #tpu.memory_space<vmem>>, vector<24x128xbf16>
    %c7_105 = arith.constant 7 : index
    %c0_106 = arith.constant 0 : index
    %c0_107 = arith.constant 0 : index
    %108 = vector.load %arg5[%c7_105, %c0_106, %c0_107] : memref<9x128x128xbf16, #tpu.memory_space<vmem>>, vector<1x128x128xbf16>
    %109 = vector.shape_cast %108 : vector<1x128x128xbf16> to vector<128x128xbf16>
    %cst_108 = arith.constant dense<0.000000e+00> : vector<24x128xf32>
    %110 = tpu.matmul %107, %109, %cst_108 {dimension_numbers = #tpu.dot_dimension_numbers<[1], [0], [0], [1], [0, 0, 1, 1], [], []>} : vector<24x128xbf16>, vector<128x128xbf16>, vector<24x128xf32> -> vector<24x128xf32>
    %111 = arith.addf %106, %110 : vector<24x128xf32>
    %c14 = arith.constant 14 : index
    %c0_109 = arith.constant 0 : index
    %112 = vector.load %arg8[%c14, %c0_109] : memref<42x128xbf16, #tpu.memory_space<vmem>>, vector<24x128xbf16>
    %c8_110 = arith.constant 8 : index
    %c0_111 = arith.constant 0 : index
    %c0_112 = arith.constant 0 : index
    %113 = vector.load %arg5[%c8_110, %c0_111, %c0_112] : memref<9x128x128xbf16, #tpu.memory_space<vmem>>, vector<1x128x128xbf16>
    %114 = vector.shape_cast %113 : vector<1x128x128xbf16> to vector<128x128xbf16>
    %cst_113 = arith.constant dense<0.000000e+00> : vector<24x128xf32>
    %115 = tpu.matmul %112, %114, %cst_113 {dimension_numbers = #tpu.dot_dimension_numbers<[1], [0], [0], [1], [0, 0, 1, 1], [], []>} : vector<24x128xbf16>, vector<128x128xbf16>, vector<24x128xf32> -> vector<24x128xf32>
    %116 = arith.addf %111, %115 : vector<24x128xf32>
    %117 = vector.broadcast %70 : vector<1x128xf32> to vector<24x128xf32>
    %118 = arith.addf %116, %117 : vector<24x128xf32>
    %cst_114 = arith.constant 0.000000e+00 : f32
    %119 = vector.broadcast %cst_114 : f32 to vector<24x128xf32>
    %120 = arith.cmpf oge, %118, %119 : vector<24x128xf32>
    %cst_115 = arith.constant 1.000000e-01 : f32
    %121 = vector.broadcast %cst_115 : f32 to vector<24x128xf32>
    %122 = arith.mulf %121, %118 : vector<24x128xf32>
    %123 = arith.select %120, %118, %122 : vector<24x128xi1>, vector<24x128xf32>
    %124 = arith.truncf %123 : vector<24x128xf32> to vector<24x128xbf16>
    %c0_116 = arith.constant 0 : index
    %c0_117 = arith.constant 0 : index
    %c0_118 = arith.constant 0 : index
    %125 = vector.load %arg7[%c0_116, %c0_117, %c0_118] : memref<1x24x128xbf16, #tpu.memory_space<vmem>>, vector<1x24x128xbf16>
    %126 = vector.shape_cast %125 : vector<1x24x128xbf16> to vector<24x128xbf16>
    %127 = vector.shape_cast %124 : vector<24x128xbf16> to vector<1x24x128xbf16>
    tpu.vector_store %arg7[%c0_116, %c0_117, %c0_118], %127 {strides = array<i32>} : memref<1x24x128xbf16, #tpu.memory_space<vmem>>, vector<1x24x128xbf16>,
    return
  }
  func.func @transform_0(%arg0: i32) -> (i32, i32) {
    %c0_i32 = arith.constant 0 : i32
    %c0_i32_0 = arith.constant 0 : i32
    %c0_i32_1 = arith.constant 0 : i32
    return %c0_i32, %c0_i32_0 : i32, i32
  }
  func.func @transform_1(%arg0: i32) -> (i32, i32, i32) {
    %c0_i32 = arith.constant 0 : i32
    %c0_i32_0 = arith.constant 0 : i32
    %c0_i32_1 = arith.constant 0 : i32
    return %arg0, %c0_i32, %c0_i32_0 : i32, i32, i32
  }
  func.func @transform_2(%arg0: i32) -> (i32, i32, i32) {
    %c0_i32 = arith.constant 0 : i32
    %c0_i32_0 = arith.constant 0 : i32
    %c0_i32_1 = arith.constant 0 : i32
    %c0_i32_2 = arith.constant 0 : i32
    return %c0_i32, %c0_i32_0, %c0_i32_1 : i32, i32, i32
  }
  func.func @transform_3(%arg0: i32) -> (i32, i32) {
    %c0_i32 = arith.constant 0 : i32
    %c0_i32_0 = arith.constant 0 : i32
    %c0_i32_1 = arith.constant 0 : i32
    return %c0_i32, %c0_i32_0 : i32, i32
  }
  func.func @transform_4(%arg0: i32) -> (i32, i32, i32) {
    %c0_i32 = arith.constant 0 : i32
    %c0_i32_0 = arith.constant 0 : i32
    %c0_i32_1 = arith.constant 0 : i32
    %c0_i32_2 = arith.constant 0 : i32
    return %c0_i32, %c0_i32_0, %c0_i32_1 : i32, i32, i32
  }
  func.func @transform_5(%arg0: i32) -> (i32, i32) {
    %c0_i32 = arith.constant 0 : i32
    %c0_i32_0 = arith.constant 0 : i32
    %c0_i32_1 = arith.constant 0 : i32
    return %c0_i32, %c0_i32_0 : i32, i32
  }
  func.func @transform_6(%arg0: i32) -> (i32, i32, i32) {
    %c0_i32 = arith.constant 0 : i32
    %c0_i32_0 = arith.constant 0 : i32
    %c0_i32_1 = arith.constant 0 : i32
    return %arg0, %c0_i32, %c0_i32_0 : i32, i32, i32
  }
}

module attributes {stable_mosaic.version = 11 : i64} {
  func.func @_fused_pair_kernel(%arg0: i32, %arg1: memref<8x1xf32, #tpu.memory_space<vmem>>, %arg2: memref<1x64x128xbf16, #tpu.memory_space<vmem>>, %arg3: memref<9x128x128xbf16, #tpu.memory_space<vmem>>, %arg4: memref<1x128xf32, #tpu.memory_space<vmem>>, %arg5: memref<9x128x128xbf16, #tpu.memory_space<vmem>>, %arg6: memref<1x128xf32, #tpu.memory_space<vmem>>, %arg7: memref<1x8x128xbf16, #tpu.memory_space<vmem>>, %arg8: memref<20x128xbf16, #tpu.memory_space<vmem>>) attributes {dimension_semantics = [#tpu.dimension_semantics<parallel>], iteration_bounds = array<i64: 2>, scalar_prefetch = 0 : i64, scratch_operands = 1 : i64, tpu.core_type = #tpu.core_type<tc>, window_params = [{pipeline_mode = #tpu.pipeline_mode<synchronous>, transform_indices = @transform_0, window_bounds = array<i64: 8, 1>}, {transform_indices = @transform_1, window_bounds = array<i64: 1, 64, 128>}, {pipeline_mode = #tpu.pipeline_mode<synchronous>, transform_indices = @transform_2, window_bounds = array<i64: 9, 128, 128>}, {pipeline_mode = #tpu.pipeline_mode<synchronous>, transform_indices = @transform_3, window_bounds = array<i64: 1, 128>}, {pipeline_mode = #tpu.pipeline_mode<synchronous>, transform_indices = @transform_4, window_bounds = array<i64: 9, 128, 128>}, {pipeline_mode = #tpu.pipeline_mode<synchronous>, transform_indices = @transform_5, window_bounds = array<i64: 1, 128>}, {transform_indices = @transform_6, window_bounds = array<i64: 1, 8, 128>}]} {
    %cst = arith.constant 0.000000e+00 : bf16
    %0 = vector.broadcast %cst : bf16 to vector<20x128xbf16>
    %c0 = arith.constant 0 : index
    %c0_0 = arith.constant 0 : index
    %1 = vector.load %arg8[%c0, %c0_0] : memref<20x128xbf16, #tpu.memory_space<vmem>>, vector<20x128xbf16>
    tpu.vector_store %arg8[%c0, %c0_0], %0 {strides = array<i32>} : memref<20x128xbf16, #tpu.memory_space<vmem>>, vector<20x128xbf16>,
    %c0_1 = arith.constant 0 : index
    %c0_2 = arith.constant 0 : index
    %2 = vector.load %arg4[%c0_1, %c0_2] : memref<1x128xf32, #tpu.memory_space<vmem>>, vector<1x128xf32>
    %cst_3 = arith.constant 0.000000e+00 : f32
    %3 = vector.broadcast %cst_3 : f32 to vector<8x128xf32>
    %c0_4 = arith.constant 0 : index
    %c0_5 = arith.constant 0 : index
    %c0_6 = arith.constant 0 : index
    %4 = vector.load %arg2[%c0_4, %c0_5, %c0_6] : memref<1x64x128xbf16, #tpu.memory_space<vmem>>, vector<1x8x128xbf16>
    %5 = vector.shape_cast %4 : vector<1x8x128xbf16> to vector<8x128xbf16>
    %c0_7 = arith.constant 0 : index
    %c0_8 = arith.constant 0 : index
    %c0_9 = arith.constant 0 : index
    %6 = vector.load %arg3[%c0_7, %c0_8, %c0_9] : memref<9x128x128xbf16, #tpu.memory_space<vmem>>, vector<1x128x128xbf16>
    %7 = vector.shape_cast %6 : vector<1x128x128xbf16> to vector<128x128xbf16>
    %cst_10 = arith.constant dense<0.000000e+00> : vector<8x128xf32>
    %8 = tpu.matmul %5, %7, %cst_10 {dimension_numbers = #tpu.dot_dimension_numbers<[1], [0], [0], [1], [0, 0, 1, 1], [], []>} : vector<8x128xbf16>, vector<128x128xbf16>, vector<8x128xf32> -> vector<8x128xf32>
    %9 = arith.addf %3, %8 : vector<8x128xf32>
    %c0_11 = arith.constant 0 : index
    %c16 = arith.constant 16 : index
    %c0_12 = arith.constant 0 : index
    %10 = vector.load %arg2[%c0_11, %c16, %c0_12] : memref<1x64x128xbf16, #tpu.memory_space<vmem>>, vector<1x8x128xbf16>
    %11 = vector.shape_cast %10 : vector<1x8x128xbf16> to vector<8x128xbf16>
    %c1 = arith.constant 1 : index
    %c0_13 = arith.constant 0 : index
    %c0_14 = arith.constant 0 : index
    %12 = vector.load %arg3[%c1, %c0_13, %c0_14] : memref<9x128x128xbf16, #tpu.memory_space<vmem>>, vector<1x128x128xbf16>
    %13 = vector.shape_cast %12 : vector<1x128x128xbf16> to vector<128x128xbf16>
    %cst_15 = arith.constant dense<0.000000e+00> : vector<8x128xf32>
    %14 = tpu.matmul %11, %13, %cst_15 {dimension_numbers = #tpu.dot_dimension_numbers<[1], [0], [0], [1], [0, 0, 1, 1], [], []>} : vector<8x128xbf16>, vector<128x128xbf16>, vector<8x128xf32> -> vector<8x128xf32>
    %15 = arith.addf %9, %14 : vector<8x128xf32>
    %c0_16 = arith.constant 0 : index
    %c1_17 = arith.constant 1 : index
    %c0_18 = arith.constant 0 : index
    %16 = vector.load %arg2[%c0_16, %c1_17, %c0_18] : memref<1x64x128xbf16, #tpu.memory_space<vmem>>, vector<1x8x128xbf16>
    %17 = vector.shape_cast %16 : vector<1x8x128xbf16> to vector<8x128xbf16>
    %c2 = arith.constant 2 : index
    %c0_19 = arith.constant 0 : index
    %c0_20 = arith.constant 0 : index
    %18 = vector.load %arg3[%c2, %c0_19, %c0_20] : memref<9x128x128xbf16, #tpu.memory_space<vmem>>, vector<1x128x128xbf16>
    %19 = vector.shape_cast %18 : vector<1x128x128xbf16> to vector<128x128xbf16>
    %cst_21 = arith.constant dense<0.000000e+00> : vector<8x128xf32>
    %20 = tpu.matmul %17, %19, %cst_21 {dimension_numbers = #tpu.dot_dimension_numbers<[1], [0], [0], [1], [0, 0, 1, 1], [], []>} : vector<8x128xbf16>, vector<128x128xbf16>, vector<8x128xf32> -> vector<8x128xf32>
    %21 = arith.addf %15, %20 : vector<8x128xf32>
    %c0_22 = arith.constant 0 : index
    %c32 = arith.constant 32 : index
    %c0_23 = arith.constant 0 : index
    %22 = vector.load %arg2[%c0_22, %c32, %c0_23] : memref<1x64x128xbf16, #tpu.memory_space<vmem>>, vector<1x8x128xbf16>
    %23 = vector.shape_cast %22 : vector<1x8x128xbf16> to vector<8x128xbf16>
    %c3 = arith.constant 3 : index
    %c0_24 = arith.constant 0 : index
    %c0_25 = arith.constant 0 : index
    %24 = vector.load %arg3[%c3, %c0_24, %c0_25] : memref<9x128x128xbf16, #tpu.memory_space<vmem>>, vector<1x128x128xbf16>
    %25 = vector.shape_cast %24 : vector<1x128x128xbf16> to vector<128x128xbf16>
    %cst_26 = arith.constant dense<0.000000e+00> : vector<8x128xf32>
    %26 = tpu.matmul %23, %25, %cst_26 {dimension_numbers = #tpu.dot_dimension_numbers<[1], [0], [0], [1], [0, 0, 1, 1], [], []>} : vector<8x128xbf16>, vector<128x128xbf16>, vector<8x128xf32> -> vector<8x128xf32>
    %27 = arith.addf %21, %26 : vector<8x128xf32>
    %c0_27 = arith.constant 0 : index
    %c48 = arith.constant 48 : index
    %c0_28 = arith.constant 0 : index
    %28 = vector.load %arg2[%c0_27, %c48, %c0_28] : memref<1x64x128xbf16, #tpu.memory_space<vmem>>, vector<1x8x128xbf16>
    %29 = vector.shape_cast %28 : vector<1x8x128xbf16> to vector<8x128xbf16>
    %c4 = arith.constant 4 : index
    %c0_29 = arith.constant 0 : index
    %c0_30 = arith.constant 0 : index
    %30 = vector.load %arg3[%c4, %c0_29, %c0_30] : memref<9x128x128xbf16, #tpu.memory_space<vmem>>, vector<1x128x128xbf16>
    %31 = vector.shape_cast %30 : vector<1x128x128xbf16> to vector<128x128xbf16>
    %cst_31 = arith.constant dense<0.000000e+00> : vector<8x128xf32>
    %32 = tpu.matmul %29, %31, %cst_31 {dimension_numbers = #tpu.dot_dimension_numbers<[1], [0], [0], [1], [0, 0, 1, 1], [], []>} : vector<8x128xbf16>, vector<128x128xbf16>, vector<8x128xf32> -> vector<8x128xf32>
    %33 = arith.addf %27, %32 : vector<8x128xf32>
    %c0_32 = arith.constant 0 : index
    %c33 = arith.constant 33 : index
    %c0_33 = arith.constant 0 : index
    %34 = vector.load %arg2[%c0_32, %c33, %c0_33] : memref<1x64x128xbf16, #tpu.memory_space<vmem>>, vector<1x8x128xbf16>
    %35 = vector.shape_cast %34 : vector<1x8x128xbf16> to vector<8x128xbf16>
    %c5 = arith.constant 5 : index
    %c0_34 = arith.constant 0 : index
    %c0_35 = arith.constant 0 : index
    %36 = vector.load %arg3[%c5, %c0_34, %c0_35] : memref<9x128x128xbf16, #tpu.memory_space<vmem>>, vector<1x128x128xbf16>
    %37 = vector.shape_cast %36 : vector<1x128x128xbf16> to vector<128x128xbf16>
    %cst_36 = arith.constant dense<0.000000e+00> : vector<8x128xf32>
    %38 = tpu.matmul %35, %37, %cst_36 {dimension_numbers = #tpu.dot_dimension_numbers<[1], [0], [0], [1], [0, 0, 1, 1], [], []>} : vector<8x128xbf16>, vector<128x128xbf16>, vector<8x128xf32> -> vector<8x128xf32>
    %39 = arith.addf %33, %38 : vector<8x128xf32>
    %c0_37 = arith.constant 0 : index
    %c4_38 = arith.constant 4 : index
    %c0_39 = arith.constant 0 : index
    %40 = vector.load %arg2[%c0_37, %c4_38, %c0_39] : memref<1x64x128xbf16, #tpu.memory_space<vmem>>, vector<1x8x128xbf16>
    %41 = vector.shape_cast %40 : vector<1x8x128xbf16> to vector<8x128xbf16>
    %c6 = arith.constant 6 : index
    %c0_40 = arith.constant 0 : index
    %c0_41 = arith.constant 0 : index
    %42 = vector.load %arg3[%c6, %c0_40, %c0_41] : memref<9x128x128xbf16, #tpu.memory_space<vmem>>, vector<1x128x128xbf16>
    %43 = vector.shape_cast %42 : vector<1x128x128xbf16> to vector<128x128xbf16>
    %cst_42 = arith.constant dense<0.000000e+00> : vector<8x128xf32>
    %44 = tpu.matmul %41, %43, %cst_42 {dimension_numbers = #tpu.dot_dimension_numbers<[1], [0], [0], [1], [0, 0, 1, 1], [], []>} : vector<8x128xbf16>, vector<128x128xbf16>, vector<8x128xf32> -> vector<8x128xf32>
    %45 = arith.addf %39, %44 : vector<8x128xf32>
    %c0_43 = arith.constant 0 : index
    %c20 = arith.constant 20 : index
    %c0_44 = arith.constant 0 : index
    %46 = vector.load %arg2[%c0_43, %c20, %c0_44] : memref<1x64x128xbf16, #tpu.memory_space<vmem>>, vector<1x8x128xbf16>
    %47 = vector.shape_cast %46 : vector<1x8x128xbf16> to vector<8x128xbf16>
    %c7 = arith.constant 7 : index
    %c0_45 = arith.constant 0 : index
    %c0_46 = arith.constant 0 : index
    %48 = vector.load %arg3[%c7, %c0_45, %c0_46] : memref<9x128x128xbf16, #tpu.memory_space<vmem>>, vector<1x128x128xbf16>
    %49 = vector.shape_cast %48 : vector<1x128x128xbf16> to vector<128x128xbf16>
    %cst_47 = arith.constant dense<0.000000e+00> : vector<8x128xf32>
    %50 = tpu.matmul %47, %49, %cst_47 {dimension_numbers = #tpu.dot_dimension_numbers<[1], [0], [0], [1], [0, 0, 1, 1], [], []>} : vector<8x128xbf16>, vector<128x128xbf16>, vector<8x128xf32> -> vector<8x128xf32>
    %51 = arith.addf %45, %50 : vector<8x128xf32>
    %c0_48 = arith.constant 0 : index
    %c5_49 = arith.constant 5 : index
    %c0_50 = arith.constant 0 : index
    %52 = vector.load %arg2[%c0_48, %c5_49, %c0_50] : memref<1x64x128xbf16, #tpu.memory_space<vmem>>, vector<1x8x128xbf16>
    %53 = vector.shape_cast %52 : vector<1x8x128xbf16> to vector<8x128xbf16>
    %c8 = arith.constant 8 : index
    %c0_51 = arith.constant 0 : index
    %c0_52 = arith.constant 0 : index
    %54 = vector.load %arg3[%c8, %c0_51, %c0_52] : memref<9x128x128xbf16, #tpu.memory_space<vmem>>, vector<1x128x128xbf16>
    %55 = vector.shape_cast %54 : vector<1x128x128xbf16> to vector<128x128xbf16>
    %cst_53 = arith.constant dense<0.000000e+00> : vector<8x128xf32>
    %56 = tpu.matmul %53, %55, %cst_53 {dimension_numbers = #tpu.dot_dimension_numbers<[1], [0], [0], [1], [0, 0, 1, 1], [], []>} : vector<8x128xbf16>, vector<128x128xbf16>, vector<8x128xf32> -> vector<8x128xf32>
    %57 = arith.addf %51, %56 : vector<8x128xf32>
    %58 = vector.broadcast %2 : vector<1x128xf32> to vector<8x128xf32>
    %59 = arith.addf %57, %58 : vector<8x128xf32>
    %cst_54 = arith.constant 0.000000e+00 : f32
    %60 = vector.broadcast %cst_54 : f32 to vector<8x128xf32>
    %61 = arith.cmpf oge, %59, %60 : vector<8x128xf32>
    %cst_55 = arith.constant 1.000000e-01 : f32
    %62 = vector.broadcast %cst_55 : f32 to vector<8x128xf32>
    %63 = arith.mulf %62, %59 : vector<8x128xf32>
    %64 = arith.select %61, %59, %63 : vector<8x128xi1>, vector<8x128xf32>
    %c0_56 = arith.constant 0 : index
    %c0_57 = arith.constant 0 : index
    %65 = vector.load %arg1[%c0_56, %c0_57] : memref<8x1xf32, #tpu.memory_space<vmem>>, vector<8x1xf32>
    %66 = vector.broadcast %65 : vector<8x1xf32> to vector<8x128xf32>
    %67 = arith.mulf %64, %66 : vector<8x128xf32>
    %68 = arith.truncf %67 : vector<8x128xf32> to vector<8x128xbf16>
    %c5_58 = arith.constant 5 : index
    %c0_59 = arith.constant 0 : index
    %69 = vector.load %arg8[%c5_58, %c0_59] : memref<20x128xbf16, #tpu.memory_space<vmem>>, vector<8x128xbf16>
    tpu.vector_store %arg8[%c5_58, %c0_59], %68 {strides = array<i32>} : memref<20x128xbf16, #tpu.memory_space<vmem>>, vector<8x128xbf16>,
    %c0_60 = arith.constant 0 : index
    %c0_61 = arith.constant 0 : index
    %70 = vector.load %arg6[%c0_60, %c0_61] : memref<1x128xf32, #tpu.memory_space<vmem>>, vector<1x128xf32>
    %cst_62 = arith.constant 0.000000e+00 : f32
    %71 = vector.broadcast %cst_62 : f32 to vector<8x128xf32>
    %c0_63 = arith.constant 0 : index
    %c0_64 = arith.constant 0 : index
    %72 = vector.load %arg8[%c0_63, %c0_64] : memref<20x128xbf16, #tpu.memory_space<vmem>>, vector<8x128xbf16>
    %c0_65 = arith.constant 0 : index
    %c0_66 = arith.constant 0 : index
    %c0_67 = arith.constant 0 : index
    %73 = vector.load %arg5[%c0_65, %c0_66, %c0_67] : memref<9x128x128xbf16, #tpu.memory_space<vmem>>, vector<1x128x128xbf16>
    %74 = vector.shape_cast %73 : vector<1x128x128xbf16> to vector<128x128xbf16>
    %cst_68 = arith.constant dense<0.000000e+00> : vector<8x128xf32>
    %75 = tpu.matmul %72, %74, %cst_68 {dimension_numbers = #tpu.dot_dimension_numbers<[1], [0], [0], [1], [0, 0, 1, 1], [], []>} : vector<8x128xbf16>, vector<128x128xbf16>, vector<8x128xf32> -> vector<8x128xf32>
    %76 = arith.addf %71, %75 : vector<8x128xf32>
    %c1_69 = arith.constant 1 : index
    %c0_70 = arith.constant 0 : index
    %77 = vector.load %arg8[%c1_69, %c0_70] : memref<20x128xbf16, #tpu.memory_space<vmem>>, vector<8x128xbf16>
    %c1_71 = arith.constant 1 : index
    %c0_72 = arith.constant 0 : index
    %c0_73 = arith.constant 0 : index
    %78 = vector.load %arg5[%c1_71, %c0_72, %c0_73] : memref<9x128x128xbf16, #tpu.memory_space<vmem>>, vector<1x128x128xbf16>
    %79 = vector.shape_cast %78 : vector<1x128x128xbf16> to vector<128x128xbf16>
    %cst_74 = arith.constant dense<0.000000e+00> : vector<8x128xf32>
    %80 = tpu.matmul %77, %79, %cst_74 {dimension_numbers = #tpu.dot_dimension_numbers<[1], [0], [0], [1], [0, 0, 1, 1], [], []>} : vector<8x128xbf16>, vector<128x128xbf16>, vector<8x128xf32> -> vector<8x128xf32>
    %81 = arith.addf %76, %80 : vector<8x128xf32>
    %c2_75 = arith.constant 2 : index
    %c0_76 = arith.constant 0 : index
    %82 = vector.load %arg8[%c2_75, %c0_76] : memref<20x128xbf16, #tpu.memory_space<vmem>>, vector<8x128xbf16>
    %c2_77 = arith.constant 2 : index
    %c0_78 = arith.constant 0 : index
    %c0_79 = arith.constant 0 : index
    %83 = vector.load %arg5[%c2_77, %c0_78, %c0_79] : memref<9x128x128xbf16, #tpu.memory_space<vmem>>, vector<1x128x128xbf16>
    %84 = vector.shape_cast %83 : vector<1x128x128xbf16> to vector<128x128xbf16>
    %cst_80 = arith.constant dense<0.000000e+00> : vector<8x128xf32>
    %85 = tpu.matmul %82, %84, %cst_80 {dimension_numbers = #tpu.dot_dimension_numbers<[1], [0], [0], [1], [0, 0, 1, 1], [], []>} : vector<8x128xbf16>, vector<128x128xbf16>, vector<8x128xf32> -> vector<8x128xf32>
    %86 = arith.addf %81, %85 : vector<8x128xf32>
    %c4_81 = arith.constant 4 : index
    %c0_82 = arith.constant 0 : index
    %87 = vector.load %arg8[%c4_81, %c0_82] : memref<20x128xbf16, #tpu.memory_space<vmem>>, vector<8x128xbf16>
    %c3_83 = arith.constant 3 : index
    %c0_84 = arith.constant 0 : index
    %c0_85 = arith.constant 0 : index
    %88 = vector.load %arg5[%c3_83, %c0_84, %c0_85] : memref<9x128x128xbf16, #tpu.memory_space<vmem>>, vector<1x128x128xbf16>
    %89 = vector.shape_cast %88 : vector<1x128x128xbf16> to vector<128x128xbf16>
    %cst_86 = arith.constant dense<0.000000e+00> : vector<8x128xf32>
    %90 = tpu.matmul %87, %89, %cst_86 {dimension_numbers = #tpu.dot_dimension_numbers<[1], [0], [0], [1], [0, 0, 1, 1], [], []>} : vector<8x128xbf16>, vector<128x128xbf16>, vector<8x128xf32> -> vector<8x128xf32>
    %91 = arith.addf %86, %90 : vector<8x128xf32>
    %c5_87 = arith.constant 5 : index
    %c0_88 = arith.constant 0 : index
    %92 = vector.load %arg8[%c5_87, %c0_88] : memref<20x128xbf16, #tpu.memory_space<vmem>>, vector<8x128xbf16>
    %c4_89 = arith.constant 4 : index
    %c0_90 = arith.constant 0 : index
    %c0_91 = arith.constant 0 : index
    %93 = vector.load %arg5[%c4_89, %c0_90, %c0_91] : memref<9x128x128xbf16, #tpu.memory_space<vmem>>, vector<1x128x128xbf16>
    %94 = vector.shape_cast %93 : vector<1x128x128xbf16> to vector<128x128xbf16>
    %cst_92 = arith.constant dense<0.000000e+00> : vector<8x128xf32>
    %95 = tpu.matmul %92, %94, %cst_92 {dimension_numbers = #tpu.dot_dimension_numbers<[1], [0], [0], [1], [0, 0, 1, 1], [], []>} : vector<8x128xbf16>, vector<128x128xbf16>, vector<8x128xf32> -> vector<8x128xf32>
    %96 = arith.addf %91, %95 : vector<8x128xf32>
    %c6_93 = arith.constant 6 : index
    %c0_94 = arith.constant 0 : index
    %97 = vector.load %arg8[%c6_93, %c0_94] : memref<20x128xbf16, #tpu.memory_space<vmem>>, vector<8x128xbf16>
    %c5_95 = arith.constant 5 : index
    %c0_96 = arith.constant 0 : index
    %c0_97 = arith.constant 0 : index
    %98 = vector.load %arg5[%c5_95, %c0_96, %c0_97] : memref<9x128x128xbf16, #tpu.memory_space<vmem>>, vector<1x128x128xbf16>
    %99 = vector.shape_cast %98 : vector<1x128x128xbf16> to vector<128x128xbf16>
    %cst_98 = arith.constant dense<0.000000e+00> : vector<8x128xf32>
    %100 = tpu.matmul %97, %99, %cst_98 {dimension_numbers = #tpu.dot_dimension_numbers<[1], [0], [0], [1], [0, 0, 1, 1], [], []>} : vector<8x128xbf16>, vector<128x128xbf16>, vector<8x128xf32> -> vector<8x128xf32>
    %101 = arith.addf %96, %100 : vector<8x128xf32>
    %c8_99 = arith.constant 8 : index
    %c0_100 = arith.constant 0 : index
    %102 = vector.load %arg8[%c8_99, %c0_100] : memref<20x128xbf16, #tpu.memory_space<vmem>>, vector<8x128xbf16>
    %c6_101 = arith.constant 6 : index
    %c0_102 = arith.constant 0 : index
    %c0_103 = arith.constant 0 : index
    %103 = vector.load %arg5[%c6_101, %c0_102, %c0_103] : memref<9x128x128xbf16, #tpu.memory_space<vmem>>, vector<1x128x128xbf16>
    %104 = vector.shape_cast %103 : vector<1x128x128xbf16> to vector<128x128xbf16>
    %cst_104 = arith.constant dense<0.000000e+00> : vector<8x128xf32>
    %105 = tpu.matmul %102, %104, %cst_104 {dimension_numbers = #tpu.dot_dimension_numbers<[1], [0], [0], [1], [0, 0, 1, 1], [], []>} : vector<8x128xbf16>, vector<128x128xbf16>, vector<8x128xf32> -> vector<8x128xf32>
    %106 = arith.addf %101, %105 : vector<8x128xf32>
    %c9 = arith.constant 9 : index
    %c0_105 = arith.constant 0 : index
    %107 = vector.load %arg8[%c9, %c0_105] : memref<20x128xbf16, #tpu.memory_space<vmem>>, vector<8x128xbf16>
    %c7_106 = arith.constant 7 : index
    %c0_107 = arith.constant 0 : index
    %c0_108 = arith.constant 0 : index
    %108 = vector.load %arg5[%c7_106, %c0_107, %c0_108] : memref<9x128x128xbf16, #tpu.memory_space<vmem>>, vector<1x128x128xbf16>
    %109 = vector.shape_cast %108 : vector<1x128x128xbf16> to vector<128x128xbf16>
    %cst_109 = arith.constant dense<0.000000e+00> : vector<8x128xf32>
    %110 = tpu.matmul %107, %109, %cst_109 {dimension_numbers = #tpu.dot_dimension_numbers<[1], [0], [0], [1], [0, 0, 1, 1], [], []>} : vector<8x128xbf16>, vector<128x128xbf16>, vector<8x128xf32> -> vector<8x128xf32>
    %111 = arith.addf %106, %110 : vector<8x128xf32>
    %c10 = arith.constant 10 : index
    %c0_110 = arith.constant 0 : index
    %112 = vector.load %arg8[%c10, %c0_110] : memref<20x128xbf16, #tpu.memory_space<vmem>>, vector<8x128xbf16>
    %c8_111 = arith.constant 8 : index
    %c0_112 = arith.constant 0 : index
    %c0_113 = arith.constant 0 : index
    %113 = vector.load %arg5[%c8_111, %c0_112, %c0_113] : memref<9x128x128xbf16, #tpu.memory_space<vmem>>, vector<1x128x128xbf16>
    %114 = vector.shape_cast %113 : vector<1x128x128xbf16> to vector<128x128xbf16>
    %cst_114 = arith.constant dense<0.000000e+00> : vector<8x128xf32>
    %115 = tpu.matmul %112, %114, %cst_114 {dimension_numbers = #tpu.dot_dimension_numbers<[1], [0], [0], [1], [0, 0, 1, 1], [], []>} : vector<8x128xbf16>, vector<128x128xbf16>, vector<8x128xf32> -> vector<8x128xf32>
    %116 = arith.addf %111, %115 : vector<8x128xf32>
    %117 = vector.broadcast %70 : vector<1x128xf32> to vector<8x128xf32>
    %118 = arith.addf %116, %117 : vector<8x128xf32>
    %cst_115 = arith.constant 0.000000e+00 : f32
    %119 = vector.broadcast %cst_115 : f32 to vector<8x128xf32>
    %120 = arith.cmpf oge, %118, %119 : vector<8x128xf32>
    %cst_116 = arith.constant 1.000000e-01 : f32
    %121 = vector.broadcast %cst_116 : f32 to vector<8x128xf32>
    %122 = arith.mulf %121, %118 : vector<8x128xf32>
    %123 = arith.select %120, %118, %122 : vector<8x128xi1>, vector<8x128xf32>
    %124 = arith.truncf %123 : vector<8x128xf32> to vector<8x128xbf16>
    %c0_117 = arith.constant 0 : index
    %c0_118 = arith.constant 0 : index
    %c0_119 = arith.constant 0 : index
    %125 = vector.load %arg7[%c0_117, %c0_118, %c0_119] : memref<1x8x128xbf16, #tpu.memory_space<vmem>>, vector<1x8x128xbf16>
    %126 = vector.shape_cast %125 : vector<1x8x128xbf16> to vector<8x128xbf16>
    %127 = vector.shape_cast %124 : vector<8x128xbf16> to vector<1x8x128xbf16>
    tpu.vector_store %arg7[%c0_117, %c0_118, %c0_119], %127 {strides = array<i32>} : memref<1x8x128xbf16, #tpu.memory_space<vmem>>, vector<1x8x128xbf16>,
    return
  }
  func.func @transform_0(%arg0: i32) -> (i32, i32) {
    %c0_i32 = arith.constant 0 : i32
    %c0_i32_0 = arith.constant 0 : i32
    %c0_i32_1 = arith.constant 0 : i32
    return %c0_i32, %c0_i32_0 : i32, i32
  }
  func.func @transform_1(%arg0: i32) -> (i32, i32, i32) {
    %c0_i32 = arith.constant 0 : i32
    %c0_i32_0 = arith.constant 0 : i32
    %c0_i32_1 = arith.constant 0 : i32
    return %arg0, %c0_i32, %c0_i32_0 : i32, i32, i32
  }
  func.func @transform_2(%arg0: i32) -> (i32, i32, i32) {
    %c0_i32 = arith.constant 0 : i32
    %c0_i32_0 = arith.constant 0 : i32
    %c0_i32_1 = arith.constant 0 : i32
    %c0_i32_2 = arith.constant 0 : i32
    return %c0_i32, %c0_i32_0, %c0_i32_1 : i32, i32, i32
  }
  func.func @transform_3(%arg0: i32) -> (i32, i32) {
    %c0_i32 = arith.constant 0 : i32
    %c0_i32_0 = arith.constant 0 : i32
    %c0_i32_1 = arith.constant 0 : i32
    return %c0_i32, %c0_i32_0 : i32, i32
  }
  func.func @transform_4(%arg0: i32) -> (i32, i32, i32) {
    %c0_i32 = arith.constant 0 : i32
    %c0_i32_0 = arith.constant 0 : i32
    %c0_i32_1 = arith.constant 0 : i32
    %c0_i32_2 = arith.constant 0 : i32
    return %c0_i32, %c0_i32_0, %c0_i32_1 : i32, i32, i32
  }
  func.func @transform_5(%arg0: i32) -> (i32, i32) {
    %c0_i32 = arith.constant 0 : i32
    %c0_i32_0 = arith.constant 0 : i32
    %c0_i32_1 = arith.constant 0 : i32
    return %c0_i32, %c0_i32_0 : i32, i32
  }
  func.func @transform_6(%arg0: i32) -> (i32, i32, i32) {
    %c0_i32 = arith.constant 0 : i32
    %c0_i32_0 = arith.constant 0 : i32
    %c0_i32_1 = arith.constant 0 : i32
    return %arg0, %c0_i32, %c0_i32_0 : i32, i32, i32
  }
}

module attributes {stable_mosaic.version = 11 : i64} {
  func.func @_fused_pair_kernel(%arg0: i32, %arg1: memref<3x1xf32, #tpu.memory_space<vmem>>, %arg2: memref<1x36x128xbf16, #tpu.memory_space<vmem>>, %arg3: memref<9x128x256xbf16, #tpu.memory_space<vmem>>, %arg4: memref<1x256xf32, #tpu.memory_space<vmem>>, %arg5: memref<9x256x256xbf16, #tpu.memory_space<vmem>>, %arg6: memref<1x256xf32, #tpu.memory_space<vmem>>, %arg7: memref<1x3x256xbf16, #tpu.memory_space<vmem>>, %arg8: memref<12x256xbf16, #tpu.memory_space<vmem>>) attributes {dimension_semantics = [#tpu.dimension_semantics<parallel>], iteration_bounds = array<i64: 2>, scalar_prefetch = 0 : i64, scratch_operands = 1 : i64, tpu.core_type = #tpu.core_type<tc>, window_params = [{pipeline_mode = #tpu.pipeline_mode<synchronous>, transform_indices = @transform_0, window_bounds = array<i64: 3, 1>}, {transform_indices = @transform_1, window_bounds = array<i64: 1, 36, 128>}, {pipeline_mode = #tpu.pipeline_mode<synchronous>, transform_indices = @transform_2, window_bounds = array<i64: 9, 128, 256>}, {pipeline_mode = #tpu.pipeline_mode<synchronous>, transform_indices = @transform_3, window_bounds = array<i64: 1, 256>}, {pipeline_mode = #tpu.pipeline_mode<synchronous>, transform_indices = @transform_4, window_bounds = array<i64: 9, 256, 256>}, {pipeline_mode = #tpu.pipeline_mode<synchronous>, transform_indices = @transform_5, window_bounds = array<i64: 1, 256>}, {transform_indices = @transform_6, window_bounds = array<i64: 1, 3, 256>}]} {
    %cst = arith.constant 0.000000e+00 : bf16
    %0 = vector.broadcast %cst : bf16 to vector<12x256xbf16>
    %c0 = arith.constant 0 : index
    %c0_0 = arith.constant 0 : index
    %1 = vector.load %arg8[%c0, %c0_0] : memref<12x256xbf16, #tpu.memory_space<vmem>>, vector<12x256xbf16>
    tpu.vector_store %arg8[%c0, %c0_0], %0 {strides = array<i32>} : memref<12x256xbf16, #tpu.memory_space<vmem>>, vector<12x256xbf16>,
    %c0_1 = arith.constant 0 : index
    %c0_2 = arith.constant 0 : index
    %2 = vector.load %arg4[%c0_1, %c0_2] : memref<1x256xf32, #tpu.memory_space<vmem>>, vector<1x256xf32>
    %cst_3 = arith.constant 0.000000e+00 : f32
    %3 = vector.broadcast %cst_3 : f32 to vector<3x256xf32>
    %c0_4 = arith.constant 0 : index
    %c0_5 = arith.constant 0 : index
    %c0_6 = arith.constant 0 : index
    %4 = vector.load %arg2[%c0_4, %c0_5, %c0_6] : memref<1x36x128xbf16, #tpu.memory_space<vmem>>, vector<1x3x128xbf16>
    %5 = vector.shape_cast %4 : vector<1x3x128xbf16> to vector<3x128xbf16>
    %c0_7 = arith.constant 0 : index
    %c0_8 = arith.constant 0 : index
    %c0_9 = arith.constant 0 : index
    %6 = vector.load %arg3[%c0_7, %c0_8, %c0_9] : memref<9x128x256xbf16, #tpu.memory_space<vmem>>, vector<1x128x256xbf16>
    %7 = vector.shape_cast %6 : vector<1x128x256xbf16> to vector<128x256xbf16>
    %cst_10 = arith.constant dense<0.000000e+00> : vector<3x256xf32>
    %8 = tpu.matmul %5, %7, %cst_10 {dimension_numbers = #tpu.dot_dimension_numbers<[1], [0], [0], [1], [0, 0, 1, 1], [], []>} : vector<3x128xbf16>, vector<128x256xbf16>, vector<3x256xf32> -> vector<3x256xf32>
    %9 = arith.addf %3, %8 : vector<3x256xf32>
    %c0_11 = arith.constant 0 : index
    %c9 = arith.constant 9 : index
    %c0_12 = arith.constant 0 : index
    %10 = vector.load %arg2[%c0_11, %c9, %c0_12] : memref<1x36x128xbf16, #tpu.memory_space<vmem>>, vector<1x3x128xbf16>
    %11 = vector.shape_cast %10 : vector<1x3x128xbf16> to vector<3x128xbf16>
    %c1 = arith.constant 1 : index
    %c0_13 = arith.constant 0 : index
    %c0_14 = arith.constant 0 : index
    %12 = vector.load %arg3[%c1, %c0_13, %c0_14] : memref<9x128x256xbf16, #tpu.memory_space<vmem>>, vector<1x128x256xbf16>
    %13 = vector.shape_cast %12 : vector<1x128x256xbf16> to vector<128x256xbf16>
    %cst_15 = arith.constant dense<0.000000e+00> : vector<3x256xf32>
    %14 = tpu.matmul %11, %13, %cst_15 {dimension_numbers = #tpu.dot_dimension_numbers<[1], [0], [0], [1], [0, 0, 1, 1], [], []>} : vector<3x128xbf16>, vector<128x256xbf16>, vector<3x256xf32> -> vector<3x256xf32>
    %15 = arith.addf %9, %14 : vector<3x256xf32>
    %c0_16 = arith.constant 0 : index
    %c1_17 = arith.constant 1 : index
    %c0_18 = arith.constant 0 : index
    %16 = vector.load %arg2[%c0_16, %c1_17, %c0_18] : memref<1x36x128xbf16, #tpu.memory_space<vmem>>, vector<1x3x128xbf16>
    %17 = vector.shape_cast %16 : vector<1x3x128xbf16> to vector<3x128xbf16>
    %c2 = arith.constant 2 : index
    %c0_19 = arith.constant 0 : index
    %c0_20 = arith.constant 0 : index
    %18 = vector.load %arg3[%c2, %c0_19, %c0_20] : memref<9x128x256xbf16, #tpu.memory_space<vmem>>, vector<1x128x256xbf16>
    %19 = vector.shape_cast %18 : vector<1x128x256xbf16> to vector<128x256xbf16>
    %cst_21 = arith.constant dense<0.000000e+00> : vector<3x256xf32>
    %20 = tpu.matmul %17, %19, %cst_21 {dimension_numbers = #tpu.dot_dimension_numbers<[1], [0], [0], [1], [0, 0, 1, 1], [], []>} : vector<3x128xbf16>, vector<128x256xbf16>, vector<3x256xf32> -> vector<3x256xf32>
    %21 = arith.addf %15, %20 : vector<3x256xf32>
    %c0_22 = arith.constant 0 : index
    %c18 = arith.constant 18 : index
    %c0_23 = arith.constant 0 : index
    %22 = vector.load %arg2[%c0_22, %c18, %c0_23] : memref<1x36x128xbf16, #tpu.memory_space<vmem>>, vector<1x3x128xbf16>
    %23 = vector.shape_cast %22 : vector<1x3x128xbf16> to vector<3x128xbf16>
    %c3 = arith.constant 3 : index
    %c0_24 = arith.constant 0 : index
    %c0_25 = arith.constant 0 : index
    %24 = vector.load %arg3[%c3, %c0_24, %c0_25] : memref<9x128x256xbf16, #tpu.memory_space<vmem>>, vector<1x128x256xbf16>
    %25 = vector.shape_cast %24 : vector<1x128x256xbf16> to vector<128x256xbf16>
    %cst_26 = arith.constant dense<0.000000e+00> : vector<3x256xf32>
    %26 = tpu.matmul %23, %25, %cst_26 {dimension_numbers = #tpu.dot_dimension_numbers<[1], [0], [0], [1], [0, 0, 1, 1], [], []>} : vector<3x128xbf16>, vector<128x256xbf16>, vector<3x256xf32> -> vector<3x256xf32>
    %27 = arith.addf %21, %26 : vector<3x256xf32>
    %c0_27 = arith.constant 0 : index
    %c27 = arith.constant 27 : index
    %c0_28 = arith.constant 0 : index
    %28 = vector.load %arg2[%c0_27, %c27, %c0_28] : memref<1x36x128xbf16, #tpu.memory_space<vmem>>, vector<1x3x128xbf16>
    %29 = vector.shape_cast %28 : vector<1x3x128xbf16> to vector<3x128xbf16>
    %c4 = arith.constant 4 : index
    %c0_29 = arith.constant 0 : index
    %c0_30 = arith.constant 0 : index
    %30 = vector.load %arg3[%c4, %c0_29, %c0_30] : memref<9x128x256xbf16, #tpu.memory_space<vmem>>, vector<1x128x256xbf16>
    %31 = vector.shape_cast %30 : vector<1x128x256xbf16> to vector<128x256xbf16>
    %cst_31 = arith.constant dense<0.000000e+00> : vector<3x256xf32>
    %32 = tpu.matmul %29, %31, %cst_31 {dimension_numbers = #tpu.dot_dimension_numbers<[1], [0], [0], [1], [0, 0, 1, 1], [], []>} : vector<3x128xbf16>, vector<128x256xbf16>, vector<3x256xf32> -> vector<3x256xf32>
    %33 = arith.addf %27, %32 : vector<3x256xf32>
    %c0_32 = arith.constant 0 : index
    %c19 = arith.constant 19 : index
    %c0_33 = arith.constant 0 : index
    %34 = vector.load %arg2[%c0_32, %c19, %c0_33] : memref<1x36x128xbf16, #tpu.memory_space<vmem>>, vector<1x3x128xbf16>
    %35 = vector.shape_cast %34 : vector<1x3x128xbf16> to vector<3x128xbf16>
    %c5 = arith.constant 5 : index
    %c0_34 = arith.constant 0 : index
    %c0_35 = arith.constant 0 : index
    %36 = vector.load %arg3[%c5, %c0_34, %c0_35] : memref<9x128x256xbf16, #tpu.memory_space<vmem>>, vector<1x128x256xbf16>
    %37 = vector.shape_cast %36 : vector<1x128x256xbf16> to vector<128x256xbf16>
    %cst_36 = arith.constant dense<0.000000e+00> : vector<3x256xf32>
    %38 = tpu.matmul %35, %37, %cst_36 {dimension_numbers = #tpu.dot_dimension_numbers<[1], [0], [0], [1], [0, 0, 1, 1], [], []>} : vector<3x128xbf16>, vector<128x256xbf16>, vector<3x256xf32> -> vector<3x256xf32>
    %39 = arith.addf %33, %38 : vector<3x256xf32>
    %c0_37 = arith.constant 0 : index
    %c3_38 = arith.constant 3 : index
    %c0_39 = arith.constant 0 : index
    %40 = vector.load %arg2[%c0_37, %c3_38, %c0_39] : memref<1x36x128xbf16, #tpu.memory_space<vmem>>, vector<1x3x128xbf16>
    %41 = vector.shape_cast %40 : vector<1x3x128xbf16> to vector<3x128xbf16>
    %c6 = arith.constant 6 : index
    %c0_40 = arith.constant 0 : index
    %c0_41 = arith.constant 0 : index
    %42 = vector.load %arg3[%c6, %c0_40, %c0_41] : memref<9x128x256xbf16, #tpu.memory_space<vmem>>, vector<1x128x256xbf16>
    %43 = vector.shape_cast %42 : vector<1x128x256xbf16> to vector<128x256xbf16>
    %cst_42 = arith.constant dense<0.000000e+00> : vector<3x256xf32>
    %44 = tpu.matmul %41, %43, %cst_42 {dimension_numbers = #tpu.dot_dimension_numbers<[1], [0], [0], [1], [0, 0, 1, 1], [], []>} : vector<3x128xbf16>, vector<128x256xbf16>, vector<3x256xf32> -> vector<3x256xf32>
    %45 = arith.addf %39, %44 : vector<3x256xf32>
    %c0_43 = arith.constant 0 : index
    %c12 = arith.constant 12 : index
    %c0_44 = arith.constant 0 : index
    %46 = vector.load %arg2[%c0_43, %c12, %c0_44] : memref<1x36x128xbf16, #tpu.memory_space<vmem>>, vector<1x3x128xbf16>
    %47 = vector.shape_cast %46 : vector<1x3x128xbf16> to vector<3x128xbf16>
    %c7 = arith.constant 7 : index
    %c0_45 = arith.constant 0 : index
    %c0_46 = arith.constant 0 : index
    %48 = vector.load %arg3[%c7, %c0_45, %c0_46] : memref<9x128x256xbf16, #tpu.memory_space<vmem>>, vector<1x128x256xbf16>
    %49 = vector.shape_cast %48 : vector<1x128x256xbf16> to vector<128x256xbf16>
    %cst_47 = arith.constant dense<0.000000e+00> : vector<3x256xf32>
    %50 = tpu.matmul %47, %49, %cst_47 {dimension_numbers = #tpu.dot_dimension_numbers<[1], [0], [0], [1], [0, 0, 1, 1], [], []>} : vector<3x128xbf16>, vector<128x256xbf16>, vector<3x256xf32> -> vector<3x256xf32>
    %51 = arith.addf %45, %50 : vector<3x256xf32>
    %c0_48 = arith.constant 0 : index
    %c4_49 = arith.constant 4 : index
    %c0_50 = arith.constant 0 : index
    %52 = vector.load %arg2[%c0_48, %c4_49, %c0_50] : memref<1x36x128xbf16, #tpu.memory_space<vmem>>, vector<1x3x128xbf16>
    %53 = vector.shape_cast %52 : vector<1x3x128xbf16> to vector<3x128xbf16>
    %c8 = arith.constant 8 : index
    %c0_51 = arith.constant 0 : index
    %c0_52 = arith.constant 0 : index
    %54 = vector.load %arg3[%c8, %c0_51, %c0_52] : memref<9x128x256xbf16, #tpu.memory_space<vmem>>, vector<1x128x256xbf16>
    %55 = vector.shape_cast %54 : vector<1x128x256xbf16> to vector<128x256xbf16>
    %cst_53 = arith.constant dense<0.000000e+00> : vector<3x256xf32>
    %56 = tpu.matmul %53, %55, %cst_53 {dimension_numbers = #tpu.dot_dimension_numbers<[1], [0], [0], [1], [0, 0, 1, 1], [], []>} : vector<3x128xbf16>, vector<128x256xbf16>, vector<3x256xf32> -> vector<3x256xf32>
    %57 = arith.addf %51, %56 : vector<3x256xf32>
    %58 = vector.broadcast %2 : vector<1x256xf32> to vector<3x256xf32>
    %59 = arith.addf %57, %58 : vector<3x256xf32>
    %cst_54 = arith.constant 0.000000e+00 : f32
    %60 = vector.broadcast %cst_54 : f32 to vector<3x256xf32>
    %61 = arith.cmpf oge, %59, %60 : vector<3x256xf32>
    %cst_55 = arith.constant 1.000000e-01 : f32
    %62 = vector.broadcast %cst_55 : f32 to vector<3x256xf32>
    %63 = arith.mulf %62, %59 : vector<3x256xf32>
    %64 = arith.select %61, %59, %63 : vector<3x256xi1>, vector<3x256xf32>
    %c0_56 = arith.constant 0 : index
    %c0_57 = arith.constant 0 : index
    %65 = vector.load %arg1[%c0_56, %c0_57] : memref<3x1xf32, #tpu.memory_space<vmem>>, vector<3x1xf32>
    %66 = vector.broadcast %65 : vector<3x1xf32> to vector<3x256xf32>
    %67 = arith.mulf %64, %66 : vector<3x256xf32>
    %68 = arith.truncf %67 : vector<3x256xf32> to vector<3x256xbf16>
    %c4_58 = arith.constant 4 : index
    %c0_59 = arith.constant 0 : index
    %69 = vector.load %arg8[%c4_58, %c0_59] : memref<12x256xbf16, #tpu.memory_space<vmem>>, vector<3x256xbf16>
    tpu.vector_store %arg8[%c4_58, %c0_59], %68 {strides = array<i32>} : memref<12x256xbf16, #tpu.memory_space<vmem>>, vector<3x256xbf16>,
    %c0_60 = arith.constant 0 : index
    %c0_61 = arith.constant 0 : index
    %70 = vector.load %arg6[%c0_60, %c0_61] : memref<1x256xf32, #tpu.memory_space<vmem>>, vector<1x256xf32>
    %cst_62 = arith.constant 0.000000e+00 : f32
    %71 = vector.broadcast %cst_62 : f32 to vector<3x256xf32>
    %c0_63 = arith.constant 0 : index
    %c0_64 = arith.constant 0 : index
    %72 = vector.load %arg8[%c0_63, %c0_64] : memref<12x256xbf16, #tpu.memory_space<vmem>>, vector<3x256xbf16>
    %c0_65 = arith.constant 0 : index
    %c0_66 = arith.constant 0 : index
    %c0_67 = arith.constant 0 : index
    %73 = vector.load %arg5[%c0_65, %c0_66, %c0_67] : memref<9x256x256xbf16, #tpu.memory_space<vmem>>, vector<1x256x256xbf16>
    %74 = vector.shape_cast %73 : vector<1x256x256xbf16> to vector<256x256xbf16>
    %cst_68 = arith.constant dense<0.000000e+00> : vector<3x256xf32>
    %75 = tpu.matmul %72, %74, %cst_68 {dimension_numbers = #tpu.dot_dimension_numbers<[1], [0], [0], [1], [0, 0, 1, 1], [], []>} : vector<3x256xbf16>, vector<256x256xbf16>, vector<3x256xf32> -> vector<3x256xf32>
    %76 = arith.addf %71, %75 : vector<3x256xf32>
    %c1_69 = arith.constant 1 : index
    %c0_70 = arith.constant 0 : index
    %77 = vector.load %arg8[%c1_69, %c0_70] : memref<12x256xbf16, #tpu.memory_space<vmem>>, vector<3x256xbf16>
    %c1_71 = arith.constant 1 : index
    %c0_72 = arith.constant 0 : index
    %c0_73 = arith.constant 0 : index
    %78 = vector.load %arg5[%c1_71, %c0_72, %c0_73] : memref<9x256x256xbf16, #tpu.memory_space<vmem>>, vector<1x256x256xbf16>
    %79 = vector.shape_cast %78 : vector<1x256x256xbf16> to vector<256x256xbf16>
    %cst_74 = arith.constant dense<0.000000e+00> : vector<3x256xf32>
    %80 = tpu.matmul %77, %79, %cst_74 {dimension_numbers = #tpu.dot_dimension_numbers<[1], [0], [0], [1], [0, 0, 1, 1], [], []>} : vector<3x256xbf16>, vector<256x256xbf16>, vector<3x256xf32> -> vector<3x256xf32>
    %81 = arith.addf %76, %80 : vector<3x256xf32>
    %c2_75 = arith.constant 2 : index
    %c0_76 = arith.constant 0 : index
    %82 = vector.load %arg8[%c2_75, %c0_76] : memref<12x256xbf16, #tpu.memory_space<vmem>>, vector<3x256xbf16>
    %c2_77 = arith.constant 2 : index
    %c0_78 = arith.constant 0 : index
    %c0_79 = arith.constant 0 : index
    %83 = vector.load %arg5[%c2_77, %c0_78, %c0_79] : memref<9x256x256xbf16, #tpu.memory_space<vmem>>, vector<1x256x256xbf16>
    %84 = vector.shape_cast %83 : vector<1x256x256xbf16> to vector<256x256xbf16>
    %cst_80 = arith.constant dense<0.000000e+00> : vector<3x256xf32>
    %85 = tpu.matmul %82, %84, %cst_80 {dimension_numbers = #tpu.dot_dimension_numbers<[1], [0], [0], [1], [0, 0, 1, 1], [], []>} : vector<3x256xbf16>, vector<256x256xbf16>, vector<3x256xf32> -> vector<3x256xf32>
    %86 = arith.addf %81, %85 : vector<3x256xf32>
    %c3_81 = arith.constant 3 : index
    %c0_82 = arith.constant 0 : index
    %87 = vector.load %arg8[%c3_81, %c0_82] : memref<12x256xbf16, #tpu.memory_space<vmem>>, vector<3x256xbf16>
    %c3_83 = arith.constant 3 : index
    %c0_84 = arith.constant 0 : index
    %c0_85 = arith.constant 0 : index
    %88 = vector.load %arg5[%c3_83, %c0_84, %c0_85] : memref<9x256x256xbf16, #tpu.memory_space<vmem>>, vector<1x256x256xbf16>
    %89 = vector.shape_cast %88 : vector<1x256x256xbf16> to vector<256x256xbf16>
    %cst_86 = arith.constant dense<0.000000e+00> : vector<3x256xf32>
    %90 = tpu.matmul %87, %89, %cst_86 {dimension_numbers = #tpu.dot_dimension_numbers<[1], [0], [0], [1], [0, 0, 1, 1], [], []>} : vector<3x256xbf16>, vector<256x256xbf16>, vector<3x256xf32> -> vector<3x256xf32>
    %91 = arith.addf %86, %90 : vector<3x256xf32>
    %c4_87 = arith.constant 4 : index
    %c0_88 = arith.constant 0 : index
    %92 = vector.load %arg8[%c4_87, %c0_88] : memref<12x256xbf16, #tpu.memory_space<vmem>>, vector<3x256xbf16>
    %c4_89 = arith.constant 4 : index
    %c0_90 = arith.constant 0 : index
    %c0_91 = arith.constant 0 : index
    %93 = vector.load %arg5[%c4_89, %c0_90, %c0_91] : memref<9x256x256xbf16, #tpu.memory_space<vmem>>, vector<1x256x256xbf16>
    %94 = vector.shape_cast %93 : vector<1x256x256xbf16> to vector<256x256xbf16>
    %cst_92 = arith.constant dense<0.000000e+00> : vector<3x256xf32>
    %95 = tpu.matmul %92, %94, %cst_92 {dimension_numbers = #tpu.dot_dimension_numbers<[1], [0], [0], [1], [0, 0, 1, 1], [], []>} : vector<3x256xbf16>, vector<256x256xbf16>, vector<3x256xf32> -> vector<3x256xf32>
    %96 = arith.addf %91, %95 : vector<3x256xf32>
    %c5_93 = arith.constant 5 : index
    %c0_94 = arith.constant 0 : index
    %97 = vector.load %arg8[%c5_93, %c0_94] : memref<12x256xbf16, #tpu.memory_space<vmem>>, vector<3x256xbf16>
    %c5_95 = arith.constant 5 : index
    %c0_96 = arith.constant 0 : index
    %c0_97 = arith.constant 0 : index
    %98 = vector.load %arg5[%c5_95, %c0_96, %c0_97] : memref<9x256x256xbf16, #tpu.memory_space<vmem>>, vector<1x256x256xbf16>
    %99 = vector.shape_cast %98 : vector<1x256x256xbf16> to vector<256x256xbf16>
    %cst_98 = arith.constant dense<0.000000e+00> : vector<3x256xf32>
    %100 = tpu.matmul %97, %99, %cst_98 {dimension_numbers = #tpu.dot_dimension_numbers<[1], [0], [0], [1], [0, 0, 1, 1], [], []>} : vector<3x256xbf16>, vector<256x256xbf16>, vector<3x256xf32> -> vector<3x256xf32>
    %101 = arith.addf %96, %100 : vector<3x256xf32>
    %c6_99 = arith.constant 6 : index
    %c0_100 = arith.constant 0 : index
    %102 = vector.load %arg8[%c6_99, %c0_100] : memref<12x256xbf16, #tpu.memory_space<vmem>>, vector<3x256xbf16>
    %c6_101 = arith.constant 6 : index
    %c0_102 = arith.constant 0 : index
    %c0_103 = arith.constant 0 : index
    %103 = vector.load %arg5[%c6_101, %c0_102, %c0_103] : memref<9x256x256xbf16, #tpu.memory_space<vmem>>, vector<1x256x256xbf16>
    %104 = vector.shape_cast %103 : vector<1x256x256xbf16> to vector<256x256xbf16>
    %cst_104 = arith.constant dense<0.000000e+00> : vector<3x256xf32>
    %105 = tpu.matmul %102, %104, %cst_104 {dimension_numbers = #tpu.dot_dimension_numbers<[1], [0], [0], [1], [0, 0, 1, 1], [], []>} : vector<3x256xbf16>, vector<256x256xbf16>, vector<3x256xf32> -> vector<3x256xf32>
    %106 = arith.addf %101, %105 : vector<3x256xf32>
    %c7_105 = arith.constant 7 : index
    %c0_106 = arith.constant 0 : index
    %107 = vector.load %arg8[%c7_105, %c0_106] : memref<12x256xbf16, #tpu.memory_space<vmem>>, vector<3x256xbf16>
    %c7_107 = arith.constant 7 : index
    %c0_108 = arith.constant 0 : index
    %c0_109 = arith.constant 0 : index
    %108 = vector.load %arg5[%c7_107, %c0_108, %c0_109] : memref<9x256x256xbf16, #tpu.memory_space<vmem>>, vector<1x256x256xbf16>
    %109 = vector.shape_cast %108 : vector<1x256x256xbf16> to vector<256x256xbf16>
    %cst_110 = arith.constant dense<0.000000e+00> : vector<3x256xf32>
    %110 = tpu.matmul %107, %109, %cst_110 {dimension_numbers = #tpu.dot_dimension_numbers<[1], [0], [0], [1], [0, 0, 1, 1], [], []>} : vector<3x256xbf16>, vector<256x256xbf16>, vector<3x256xf32> -> vector<3x256xf32>
    %111 = arith.addf %106, %110 : vector<3x256xf32>
    %c8_111 = arith.constant 8 : index
    %c0_112 = arith.constant 0 : index
    %112 = vector.load %arg8[%c8_111, %c0_112] : memref<12x256xbf16, #tpu.memory_space<vmem>>, vector<3x256xbf16>
    %c8_113 = arith.constant 8 : index
    %c0_114 = arith.constant 0 : index
    %c0_115 = arith.constant 0 : index
    %113 = vector.load %arg5[%c8_113, %c0_114, %c0_115] : memref<9x256x256xbf16, #tpu.memory_space<vmem>>, vector<1x256x256xbf16>
    %114 = vector.shape_cast %113 : vector<1x256x256xbf16> to vector<256x256xbf16>
    %cst_116 = arith.constant dense<0.000000e+00> : vector<3x256xf32>
    %115 = tpu.matmul %112, %114, %cst_116 {dimension_numbers = #tpu.dot_dimension_numbers<[1], [0], [0], [1], [0, 0, 1, 1], [], []>} : vector<3x256xbf16>, vector<256x256xbf16>, vector<3x256xf32> -> vector<3x256xf32>
    %116 = arith.addf %111, %115 : vector<3x256xf32>
    %117 = vector.broadcast %70 : vector<1x256xf32> to vector<3x256xf32>
    %118 = arith.addf %116, %117 : vector<3x256xf32>
    %cst_117 = arith.constant 0.000000e+00 : f32
    %119 = vector.broadcast %cst_117 : f32 to vector<3x256xf32>
    %120 = arith.cmpf oge, %118, %119 : vector<3x256xf32>
    %cst_118 = arith.constant 1.000000e-01 : f32
    %121 = vector.broadcast %cst_118 : f32 to vector<3x256xf32>
    %122 = arith.mulf %121, %118 : vector<3x256xf32>
    %123 = arith.select %120, %118, %122 : vector<3x256xi1>, vector<3x256xf32>
    %124 = arith.truncf %123 : vector<3x256xf32> to vector<3x256xbf16>
    %c0_119 = arith.constant 0 : index
    %c0_120 = arith.constant 0 : index
    %c0_121 = arith.constant 0 : index
    %125 = vector.load %arg7[%c0_119, %c0_120, %c0_121] : memref<1x3x256xbf16, #tpu.memory_space<vmem>>, vector<1x3x256xbf16>
    %126 = vector.shape_cast %125 : vector<1x3x256xbf16> to vector<3x256xbf16>
    %127 = vector.shape_cast %124 : vector<3x256xbf16> to vector<1x3x256xbf16>
    tpu.vector_store %arg7[%c0_119, %c0_120, %c0_121], %127 {strides = array<i32>} : memref<1x3x256xbf16, #tpu.memory_space<vmem>>, vector<1x3x256xbf16>,
    return
  }
  func.func @transform_0(%arg0: i32) -> (i32, i32) {
    %c0_i32 = arith.constant 0 : i32
    %c0_i32_0 = arith.constant 0 : i32
    %c0_i32_1 = arith.constant 0 : i32
    return %c0_i32, %c0_i32_0 : i32, i32
  }
  func.func @transform_1(%arg0: i32) -> (i32, i32, i32) {
    %c0_i32 = arith.constant 0 : i32
    %c0_i32_0 = arith.constant 0 : i32
    %c0_i32_1 = arith.constant 0 : i32
    return %arg0, %c0_i32, %c0_i32_0 : i32, i32, i32
  }
  func.func @transform_2(%arg0: i32) -> (i32, i32, i32) {
    %c0_i32 = arith.constant 0 : i32
    %c0_i32_0 = arith.constant 0 : i32
    %c0_i32_1 = arith.constant 0 : i32
    %c0_i32_2 = arith.constant 0 : i32
    return %c0_i32, %c0_i32_0, %c0_i32_1 : i32, i32, i32
  }
  func.func @transform_3(%arg0: i32) -> (i32, i32) {
    %c0_i32 = arith.constant 0 : i32
    %c0_i32_0 = arith.constant 0 : i32
    %c0_i32_1 = arith.constant 0 : i32
    return %c0_i32, %c0_i32_0 : i32, i32
  }
  func.func @transform_4(%arg0: i32) -> (i32, i32, i32) {
    %c0_i32 = arith.constant 0 : i32
    %c0_i32_0 = arith.constant 0 : i32
    %c0_i32_1 = arith.constant 0 : i32
    %c0_i32_2 = arith.constant 0 : i32
    return %c0_i32, %c0_i32_0, %c0_i32_1 : i32, i32, i32
  }
  func.func @transform_5(%arg0: i32) -> (i32, i32) {
    %c0_i32 = arith.constant 0 : i32
    %c0_i32_0 = arith.constant 0 : i32
    %c0_i32_1 = arith.constant 0 : i32
    return %c0_i32, %c0_i32_0 : i32, i32
  }
  func.func @transform_6(%arg0: i32) -> (i32, i32, i32) {
    %c0_i32 = arith.constant 0 : i32
    %c0_i32_0 = arith.constant 0 : i32
    %c0_i32_1 = arith.constant 0 : i32
    return %arg0, %c0_i32, %c0_i32_0 : i32, i32, i32
  }
}

</mosaic_0001>

<bundles_post_ra>
// kernel: _lambda_.4
= control target key start
LH: loop header
LB: loop body
LE: loop exit
PB: predicated region body
PF: predicated region fallthrough
CT: control target
= control target key end

     0   :  { %s486_s12 = smov 0   ;;  %s522_s0 = inlined_call_operand.vmem [shape: bf16[2,64,48], index: 0, kind: input, shape index: {}]   ;;  %s523_s1 = inlined_call_operand.vmem [shape: bf16[1,48,128], index: 1, kind: input, shape index: {}]   ;;  %s524_s2 = inlined_call_operand.vmem [shape: f32[1,128], index: 2, kind: input, shape index: {}]   ;;  %s525_s3 = inlined_call_operand.vmem [shape: bf16[2,64,128], index: 3, kind: output, shape index: {}]  }
   0x1 LB: > { %s365_s13 = sadd.s32 4294967295, %s464_s12   ;;  %p369_p0 = scmp.ge.s32.totalorder %s464_s12, 1  ;;  %s464_s12 = sphi %s486_s12, %s13_s12  }
   0x2   : > { %p137_p1 = scmp.lt.s32.totalorder %s464_s12, 3 }
   0x4   : > { %p138_p2 = pnand %p369_p0, %p137_p1 }
   0x5   : > { %p161_p3 = scmp.lt.s32.totalorder (!%p138_p2), %s365_s13, 1 }
   0x6   : > { %141 = sbr.rel (%p138_p2) target bundleno = 173 (0xad), region = 32 }
   0xb   : > { %v416_v0 = vld [vmem:[%s523_s1 + $0x10] sm:$0xff]  ;;  %v415_v1 = vld [vmem:[%s523_s1 + $0x8] sm:$0xff]  ;;  %s527_s13 = smov (!%p161_p3, %s365_s13), 1  ;;  %v414_v2 = vld [vmem:[%s523_s1] sm:$0xff]  ;;  %vm228_vm0 = vcmask 392192  }
   0xc   : > { %246 = vmatpush.bf16.msra.mxu0 %v416_v0  ;;  %440 = vmatpush.bf16.msra.mxu1 %v416_v0  ;;  %s408_s18 = sshll.u32 %s527_s13, 5  ;;  %v457_v9 = vld [vmem:[%s524_s2] ss:$0 sm:$0xff] }
   0xd   : > { %441 = vmatpush.bf16.msra.mxu2 %v416_v0  ;;  %442 = vmatpush.bf16.msra.mxu3 %v416_v0  ;;  %s165_s23 = scalar_lea.vmem %s522_s0, %s408_s18  ;;  %s170_s28 = scalar_lea.vmem %s525_s3, %s408_s18 }
   0xe   : > { %v410_v3 = vld [vmem:[%s165_s23] sm:$0xff]  ;;  %v411_v4 = vld [vmem:[%s165_s23 + $0x8] sm:$0xff]  ;;  %v412_v5 = vld [vmem:[%s165_s23 + $0x10] sm:$0xff] }
   0xf   : > { %v413_v6 = vld [vmem:[%s165_s23 + $0x18] sm:$0xff] }
  0x10   : > { %247 = vmatpush.bf16.msra.mxu0 %v415_v1  ;;  %443 = vmatpush.bf16.msra.mxu1 %v415_v1 }
  0x11   : > { %444 = vmatpush.bf16.msra.mxu2 %v415_v1  ;;  %445 = vmatpush.bf16.msra.mxu3 %v415_v1 }
  0x14   : > { %248 = vmatpush.bf16.msra.mxu0 %v414_v2  ;;  %446 = vmatpush.bf16.msra.mxu1 %v414_v2 }
  0x15   : > { %447 = vmatpush.bf16.msra.mxu2 %v414_v2  ;;  %448 = vmatpush.bf16.msra.mxu3 %v414_v2 }
  0x17   : > { %402 = vmatmul.msk.bf16.vlgmr.msra.gmra.mxu0 %vm228_vm0, %v410_v3  ;;  %403 = vmatmul.msk.bf16.vlgmr.msra.gmra.mxu1 %vm228_vm0, %v411_v4 }
  0x18   : > { %404 = vmatmul.msk.bf16.vlgmr.msra.gmra.mxu2 %vm228_vm0, %v412_v5  ;;  %405 = vmatmul.msk.bf16.vlgmr.msra.gmra.mxu3 %vm228_vm0, %v413_v6 }
  0x94   : > { %v250_v7 = vpop.f32.mrf.mxu0  ;;  %v255_v8 = vpop.f32.mrf.mxu1 }
  0x95   : > { %v251_v10 = vadd.f32 %v457_v9, %v250_v7  ;;  %v256_v11 = vadd.f32 %v457_v9, %v255_v8 }
  0x97   : > { %v278_v16 = vmul.f32 0.1, %v251_v10  ;;  %v280_v17 = vmul.f32 0.1, %v256_v11  ;;  %vm270_vm1 = vcmp.ge.f32.partialorder %v251_v10, 0.0  ;;  %vm272_vm2 = vcmp.ge.f32.partialorder %v256_v11, 0.0 }
  0x99   : > { %v286_v24 = vsel %vm270_vm1, %v251_v10, %v278_v16  ;;  %v288_v25 = vsel %vm272_vm2, %v256_v11, %v280_v17 }
  0x9b   : > { %v260_v12 = vpop.f32.mrf.mxu2  ;;  %v265_v13 = vpop.f32.mrf.mxu3 }
  0x9c   : > { %v252_v14 = vpop.f32.mrf.mxu0  ;;  %v257_v15 = vpop.f32.mrf.mxu1  ;;  %v261_v22 = vadd.f32 %v457_v9, %v260_v12  ;;  %v266_v23 = vadd.f32 %v457_v9, %v265_v13 }
  0x9d   : > { %v253_v18 = vadd.f32 %v457_v9, %v252_v14  ;;  %v258_v19 = vadd.f32 %v457_v9, %v257_v15 }
  0x9e   : > { %v282_v32 = vmul.f32 0.1, %v261_v22  ;;  %v284_v33 = vmul.f32 0.1, %v266_v23  ;;  %vm274_vm5 = vcmp.ge.f32.partialorder %v261_v22, 0.0  ;;  %vm276_vm6 = vcmp.ge.f32.partialorder %v266_v23, 0.0 }
  0x9f   : > { %vm271_vm3 = vcmp.ge.f32.partialorder %v253_v18, 0.0  ;;  %v279_v20 = vmul.f32 0.1, %v253_v18  ;;  %vm273_vm4 = vcmp.ge.f32.partialorder %v258_v19, 0.0  ;;  %v281_v21 = vmul.f32 0.1, %v258_v19 }
  0xa0   : > { %v290_v38 = vsel %vm274_vm5, %v261_v22, %v282_v32  ;;  %v292_v39 = vsel %vm276_vm6, %v266_v23, %v284_v33 }
  0xa1   : > { %v287_v26 = vsel %vm271_vm3, %v253_v18, %v279_v20  ;;  %v289_v27 = vsel %vm273_vm4, %v258_v19, %v281_v21 }
  0xa2   : > { %v420_v28 = vpack.c.bf16 %v287_v26, %v286_v24  ;;  %v425_v29 = vpack.c.bf16 %v289_v27, %v288_v25 }
  0xa3   : > { %v262_v30 = vpop.f32.mrf.mxu2  ;;  %v267_v31 = vpop.f32.mrf.mxu3 }
  0xa4   : > { %421 = vst [vmem:[%s170_s28] sm:$0xff] %v420_v28   ;;  %v263_v34 = vadd.f32 %v457_v9, %v262_v30  ;;  %v268_v35 = vadd.f32 %v457_v9, %v267_v31 }
  0xa5   : > { %437 = vst [vmem:[%s170_s28 + $0x8] sm:$0xff] %v425_v29  }
  0xa6   : > { %vm275_vm7 = vcmp.ge.f32.partialorder %v263_v34, 0.0  ;;  %v283_v36 = vmul.f32 0.1, %v263_v34  ;;  %vm277_vm8 = vcmp.ge.f32.partialorder %v268_v35, 0.0  ;;  %v285_v37 = vmul.f32 0.1, %v268_v35 }
  0xa8   : > { %v291_v40 = vsel %vm275_vm7, %v263_v34, %v283_v36  ;;  %v293_v41 = vsel %vm277_vm8, %v268_v35, %v285_v37 }
  0xa9   : > { %v430_v42 = vpack.c.bf16 %v291_v40, %v290_v38  ;;  %v435_v43 = vpack.c.bf16 %v293_v41, %v292_v39 }
  0xab   : > { %438 = vst [vmem:[%s170_s28 + $0x10] sm:$0xff] %v430_v42  }
  0xac   : > { %439 = vst [vmem:[%s170_s28 + $0x18] sm:$0xff] %v435_v43  }
  0xad PF: > { %s13_s12 = sadd.s32 1, %s464_s12  }
  0xae   : > { %p10_p4 = scmp.ge.s32.totalorder %s13_s12, 4  }
  0xb0   :  { %12 = sbr.rel (!%p10_p4) target bundleno = 1 (0x1), region = 62 }

// kernel: _lambda_.5
= control target key start
LH: loop header
LB: loop body
LE: loop exit
PB: predicated region body
PF: predicated region fallthrough
CT: control target
= control target key end

     0   :  { %s3411_s21 = smov 0   ;;  %s4023_s0 = inlined_call_operand.vmem [shape: f32[24,1], index: 0, kind: input, shape index: {}]   ;;  %s4024_s1 = inlined_call_operand.vmem [shape: bf16[2,144,128], index: 1, kind: input, shape index: {}]   ;;  %s4025_s2 = inlined_call_operand.vmem [shape: bf16[9,128,128], index: 2, kind: input, shape index: {}]   ;;  %s4026_s3 = inlined_call_operand.vmem [shape: f32[1,128], index: 3, kind: input, shape index: {}]   ;;  %s4027_s4 = inlined_call_operand.vmem [shape: bf16[9,128,128], index: 4, kind: input, shape index: {}]   ;;  %s4028_s5 = inlined_call_operand.vmem [shape: f32[1,128], index: 5, kind: input, shape index: {}]   ;;  %s4029_s6 = inlined_call_operand.vmem [shape: bf16[2,24,128], index: 6, kind: output, shape index: {}]  }
   0x1 LB: > { %s2280_s22 = sadd.s32 4294967295, %s3373_s21   ;;  %p2284_p0 = scmp.ge.s32.totalorder %s3373_s21, 1  ;;  %s3373_s21 = sphi %s3411_s21, %s16_s21  }
   0x2   : > { %p212_p1 = scmp.lt.s32.totalorder %s3373_s21, 3 }
   0x4   : > { %p213_p2 = pnand %p2284_p0, %p212_p1 }
   0x5   : > { %p242_p3 = scmp.lt.s32.totalorder (!%p213_p2), %s2280_s22, 1 }
   0x6   : > { %216 = sbr.rel (%p213_p2) target bundleno = 495 (0x1ef), region = 44 }
   0xb   : > { %v3179_v0 = vld [vmem:[%s4025_s2 + $0x78] sm:$0xff]  ;;  %v3178_v4 = vld [vmem:[%s4025_s2 + $0x70] sm:$0xff]  ;;  %s4035_s22 = smov (!%p242_p3, %s2280_s22), 1  ;;  %v3177_v8 = vld [vmem:[%s4025_s2 + $0x68] sm:$0xff]  ;;  %vm310_vm0 = vcmask 1045504   ;;  %vm922_vm2 = vcmask 1044480  }
   0xc   : > { %v3169_v1 = vld [vmem:[%s4025_s2 + $0x38] sm:$0xff]  ;;  %364 = vmatpush.bf16.msra.mxu0 %v3179_v0  ;;  %v3168_v5 = vld [vmem:[%s4025_s2 + $0x30] sm:$0xff]  ;;  %s3352_s15 = smul.u32 72, %s4035_s22  ;;  %v3167_v9 = vld [vmem:[%s4025_s2 + $0x28] sm:$0xff]  ;;  %vm489_vm1 = vsmask.f32 7424 }
   0xd   : > { %v3187_v2 = vld [vmem:[%s4025_s2 + $0xb8] sm:$0xff]  ;;  %440 = vmatpush.bf16.msra.mxu1 %v3169_v1  ;;  %v3186_v6 = vld [vmem:[%s4025_s2 + $0xb0] sm:$0xff]  ;;  %v3185_v10 = vld [vmem:[%s4025_s2 + $0xa8] sm:$0xff]  ;;  %vm1028_vm3 = vcmask 1046528   ;;  %vm1124_vm4 = vsmask.f32 4352 }
   0xe   : > { %v3196_v3 = vld [vmem:[%s4025_s2 + $0xf8] sm:$0xff]  ;;  %555 = vmatpush.bf16.msra.mxu2 %v3187_v2  ;;  %v3195_v7 = vld [vmem:[%s4025_s2 + $0xf0] sm:$0xff]  ;;  %v3194_v11 = vld [vmem:[%s4025_s2 + $0xe8] sm:$0xff]  ;;  %s3461_s28 = scalar_lea.vmem %s4024_s1, %s3352_s15  ;;  %vm1288_vm6 = vcmask 1043459   ;;  %vm1289_vm7 = vsmask.f32 7950 }
   0xf   : > { %654 = vmatpush.bf16.msra.mxu3 %v3196_v3  ;;  %v3176_v12 = vld [vmem:[%s4025_s2 + $0x60] sm:$0xff]  ;;  %v3476_v16 = vld [vmem:[%s3461_s28 + $0x8] sm:$0xff]   ;;  %v3175_v18 = vld [vmem:[%s4025_s2 + $0x58] sm:$0xff]  ;;  %vm1252_vm10 = vsmask.f32 3328  ;;  %vm1296_vm14 = vcmask 1043456  }
  0x10   : > { %365 = vmatpush.bf16.msra.mxu0 %v3178_v4  ;;  %v3166_v13 = vld [vmem:[%s4025_s2 + $0x20] sm:$0xff]  ;;  %v461_v17 = vld [vmem:[%s3461_s28 + $0xc] sm:$0x1]  ;;  %v3165_v19 = vld [vmem:[%s4025_s2 + $0x18] sm:$0xff]  ;;  %v485_v22 = vunpack.c.l.b16 %v3476_v16  ;;  %vm1253_vm11 = vsmask.f32 7440 }
  0x11   : > { %441 = vmatpush.bf16.msra.mxu1 %v3168_v5  ;;  %v3184_v14 = vld [vmem:[%s4025_s2 + $0xa0] sm:$0xff]  ;;  %v3183_v20 = vld [vmem:[%s4025_s2 + $0x98] sm:$0xff]  ;;  %v486_v23 = vunpack.c.l.b16 %v461_v17  ;;  %v3174_v25 = vld [vmem:[%s4025_s2 + $0x50] sm:$0xff]  ;;  %s3353_s18 = smul.u32 12, %s4035_s22 }
  0x12   : > { %556 = vmatpush.bf16.msra.mxu2 %v3186_v6  ;;  %v3193_v15 = vld [vmem:[%s4025_s2 + $0xe0] sm:$0xff]  ;;  %v3192_v21 = vld [vmem:[%s4025_s2 + $0xd8] sm:$0xff]  ;;  %v3164_v26 = vld [vmem:[%s4025_s2 + $0x10] sm:$0xff] }
  0x13   : > { %655 = vmatpush.bf16.msra.mxu3 %v3195_v7  ;;  %v3316_v24 = vld [vmem:[%s3461_s28] sm:$0xff]   ;;  %v3182_v27 = vld [vmem:[%s4025_s2 + $0x90] sm:$0xff]  ;;  %v2309_v31 = vld [vmem:[%s3461_s28 + $0x18] sm:$0xf]  ;;  %v3511_v33 = vpack.c.b16 %v486_v23, %v485_v22  ;;  %s251_s23 = scalar_lea.vmem %s4029_s6, %s3353_s18 }
  0x14   : > { %366 = vmatpush.bf16.msra.mxu0 %v3177_v8  ;;  %v2305_v28 = vld [vmem:[%s3461_s28 + $0x10] sm:$0xc]  ;;  %v3170_v29 = vld [vmem:[%s3461_s28 + $0x10] sm:$0xf0]  ;;  %v3171_v32 = vld [vmem:[%s3461_s28 + $0x18] sm:$0x30] }
  0x15   : > { %442 = vmatpush.bf16.msra.mxu1 %v3167_v9  ;;  %v3191_v30 = vld [vmem:[%s4025_s2 + $0xd0] sm:$0xff]  ;;  %v493_v34 = vshll.u32 %v3316_v24, 16  ;;  %v3173_v35 = vld [vmem:[%s4025_s2 + $0x48] sm:$0xff]  ;;  %v2306_v37 = vor.u32 %v3170_v29, %v2305_v28  ;;  %v2310_v38 = vor.u32 %v3171_v32, %v2309_v31  ;;  %v491_v41 = vshrl.u32 %v3316_v24, 16  ;;  %v3172_v44 = vld [vmem:[%s4025_s2 + $0x40] sm:$0xff] }
  0x16   : > { %557 = vmatpush.bf16.msra.mxu2 %v3185_v10  ;;  %v3163_v36 = vld [vmem:[%s4025_s2 + $0x8] sm:$0xff]  ;;  %v498_v43 = vshll.u32 %v3511_v33, 16  ;;  %v3162_v45 = vld [vmem:[%s4025_s2] sm:$0xff]  ;;  %v3206_v52 = vld [vmem:[%s4025_s2 + $0x138] sm:$0xff]  ;;  %v502_v9 = vshrl.u32 %v3511_v33, 16 }
  0x17   : > { %656 = vmatpush.bf16.msra.mxu3 %v3194_v11  ;;  %v3181_v39 = vld [vmem:[%s4025_s2 + $0x88] sm:$0xff]  ;;  %v495_v42 = vrot.slane %v493_v34, 1  ;;  %v311_v46 = vrot.slane %v2306_v37, 2  ;;  %v3532_v47 = vrot.slane %v2310_v38, 2  ;;  %v3180_v48 = vld [vmem:[%s4025_s2 + $0x80] sm:$0xff]  ;;  %v3224_v53 = vld [vmem:[%s4025_s2 + $0x1b8] sm:$0xff] }
  0x18   : > { %367 = vmatpush.bf16.msra.mxu0 %v3176_v12  ;;  %v3190_v40 = vld [vmem:[%s4025_s2 + $0xc8] sm:$0xff]  ;;  %v3189_v49 = vld [vmem:[%s4025_s2 + $0xc0] sm:$0xff]  ;;  %v500_v51 = vrot.slane %v498_v43, 1  ;;  %v3216_v58 = vld [vmem:[%s4025_s2 + $0x178] sm:$0xff] }
  0x19   : > { %443 = vmatpush.bf16.msra.mxu1 %v3166_v13  ;;  %v496_v50 = vor.u32 %v495_v42, %v491_v41  ;;  %v3161_v54 = vld [vmem:[%s3461_s28] sm:$0xff]  ;;  %v313_v55 = vsel %vm310_vm0, %v311_v46, %v3532_v47  ;;  %v3234_v59 = vld [vmem:[%s4025_s2 + $0x1f8] sm:$0xff]  ;;  %v3205_v60 = vld [vmem:[%s4025_s2 + $0x130] sm:$0xff] }
  0x1a   : > { %558 = vmatpush.bf16.msra.mxu2 %v3184_v14  ;;  %v3188_v56 = vld [vmem:[%s3461_s28 + $0x24] sm:$0xff]  ;;  %v3223_v61 = vld [vmem:[%s4025_s2 + $0x1b0] sm:$0xff]  ;;  %v578_v5 = vld [vmem:[%s3461_s28 + $0x2c] sm:$0xf]  ;;  %v504_v17 = vor.u32 %v502_v9, %v500_v51 }
  0x1b   : > { %657 = vmatpush.bf16.msra.mxu3 %v3193_v15  ;;  %v501_v57 = vsel %vm489_vm1, %v496_v50, %v500_v51  ;;  %v3215_v62 = vld [vmem:[%s4025_s2 + $0x170] sm:$0xff]  ;;  %v3204_v0 = vld [vmem:[%s4025_s2 + $0x128] sm:$0xff]  ;;  %v3203_v6 = vld [vmem:[%s4025_s2 + $0x120] sm:$0xff]  ;;  %v601_v10 = vunpack.c.l.b16 %v578_v5 }
  0x1c   : > { %368 = vmatpush.bf16.msra.mxu0 %v3175_v18  ;;  %v3233_v63 = vld [vmem:[%s4025_s2 + $0x1f0] sm:$0xff]  ;;  %v3222_v1 = vld [vmem:[%s4025_s2 + $0x1a8] sm:$0xff]  ;;  %v3221_v7 = vld [vmem:[%s4025_s2 + $0x1a0] sm:$0xff] }
  0x1d   : > { %444 = vmatpush.bf16.msra.mxu1 %v3165_v19  ;;  %v262_v2 = vld [vmem:[%s3461_s28 + $0x8] sm:$0xf]  ;;  %v3213_v11 = vld [vmem:[%s4025_s2 + $0x160] sm:$0xff]  ;;  %v3202_v13 = vld [vmem:[%s4025_s2 + $0x118] sm:$0xff]  ;;  %v603_v18 = vpack.c.b16 %v601_v10, %v601_v10 }
  0x1e   : > { %559 = vmatpush.bf16.msra.mxu2 %v3183_v20  ;;  %v3214_v3 = vld [vmem:[%s4025_s2 + $0x168] sm:$0xff]  ;;  %v387_v8 = vunpack.c.l.b16 %v262_v2  ;;  %v3231_v12 = vld [vmem:[%s4025_s2 + $0x1e0] sm:$0xff]  ;;  %v3220_v14 = vld [vmem:[%s4025_s2 + $0x198] sm:$0xff] }
  0x1f   : > { %658 = vmatpush.bf16.msra.mxu3 %v3192_v21  ;;  %v3232_v4 = vld [vmem:[%s4025_s2 + $0x1e8] sm:$0xff]  ;;  %v3212_v19 = vld [vmem:[%s4025_s2 + $0x158] sm:$0xff]  ;;  %v3201_v21 = vld [vmem:[%s4025_s2 + $0x110] sm:$0xff] }
  0x20   : > { %369 = vmatpush.bf16.msra.mxu0 %v3174_v25  ;;  %v389_v15 = vpack.c.b16 %v387_v8, %v387_v8  ;;  %v3230_v20 = vld [vmem:[%s4025_s2 + $0x1d8] sm:$0xff]  ;;  %v898_v23 = vld [vmem:[%s3461_s28 + $0xc] sm:$0x7]  ;;  %v3207_v24 = vld [vmem:[%s3461_s28 + $0x24] sm:$0xff] }
  0x21   : > { %445 = vmatpush.bf16.msra.mxu1 %v3164_v26  ;;  %v3219_v25 = vld [vmem:[%s4025_s2 + $0x190] sm:$0xff]  ;;  %v2557_v26 = vld [vmem:[%s3461_s28 + $0x2c] sm:$0xf]  ;;  %v3197_v32 = vld [vmem:[%s3461_s28 + $0x34] sm:$0xf0]  ;;  %v919_v33 = vunpack.c.l.b16 %v898_v23  ;;  %v814_v38 = vshll.u32 %v3207_v24, 16 }
  0x22   : > { %560 = vmatpush.bf16.msra.mxu2 %v3182_v27  ;;  %v3208_v27 = vld [vmem:[%s3461_s28 + $0x2c] sm:$0x10]  ;;  %v2497_v31 = vld [vmem:[%s3461_s28 + $0x34] sm:$0xc]  ;;  %v3218_v34 = vld [vmem:[%s4025_s2 + $0x188] sm:$0xff]  ;;  %v812_v51 = vshrl.u32 %v3207_v24, 16 }
  0x23   : > { %659 = vmatpush.bf16.msra.mxu3 %v3191_v30  ;;  %v3211_v28 = vld [vmem:[%s4025_s2 + $0x150] sm:$0xff]  ;;  %v3200_v30 = vld [vmem:[%s4025_s2 + $0x108] sm:$0xff]  ;;  %v3635_v37 = vor.u32 %v3208_v27, %v2557_v26  ;;  %v3225_v42 = vld [vmem:[%s3461_s28 + $0x14] sm:$0xf0] }
  0x24   : > { %370 = vmatpush.bf16.msra.mxu0 %v3173_v35  ;;  %v3229_v29 = vld [vmem:[%s4025_s2 + $0x1d0] sm:$0xff]  ;;  %v2501_v35 = vld [vmem:[%s3461_s28 + $0x3c] sm:$0xf]  ;;  %v3240_v9 = vld [vmem:[%s4025_s2 + $0x228] sm:$0xff] }
  0x25   : > { %446 = vmatpush.bf16.msra.mxu1 %v3163_v36  ;;  %v3198_v36 = vld [vmem:[%s3461_s28 + $0x3c] sm:$0x30]  ;;  %v2657_v41 = vld [vmem:[%s3461_s28 + $0x14] sm:$0xe]  ;;  %v2661_v43 = vld [vmem:[%s3461_s28 + $0x1c] sm:$0xf] }
  0x26   : > { %561 = vmatpush.bf16.msra.mxu2 %v3181_v39  ;;  %v3332_v39 = vld [vmem:[%s3461_s28] sm:$0xf0]  ;;  %v2502_v46 = vor.u32 %v3198_v36, %v2501_v35  ;;  %v1229_v23 = vld [vmem:[%s4023_s0 + $0x8] sm:$0xff]  ;;  %vm3837_vm8 = vmand %vm1288_vm6, %vm1289_vm7 }
  0x27   : > { %660 = vmatpush.bf16.msra.mxu3 %v3190_v40  ;;  %v3333_v40 = vld [vmem:[%s3461_s28] sm:$0x8]  ;;  %v3236_v24 = vld [vmem:[%s4025_s2 + $0x208] sm:$0xff]  ;;  %vm3864_vm12 = vmor %vm1252_vm10, %vm1253_vm11 }
  0x28   : > { %371 = vmatpush.bf16.msra.mxu0 %v3172_v44  ;;  %v3226_v44 = vld [vmem:[%s3461_s28 + $0x1c] sm:$0x10]  ;;  %v3651_v50 = vor.u32 %v3333_v40, %v3332_v39  ;;  %vm1297_vm15 = vmand %vm1296_vm14, %vm1252_vm10 }
  0x29   : > { %447 = vmatpush.bf16.msra.mxu1 %v3162_v45  ;;  %v2498_v45 = vor.u32 %v3197_v32, %v2497_v31  ;;  %v3239_v10 = vld [vmem:[%s4025_s2 + $0x220] sm:$0xff]  ;;  %v1230_v31 = vld [vmem:[%s4023_s0 + $0x10] sm:$0xff] }
  0x2a   : > { %562 = vmatpush.bf16.msra.mxu2 %v3180_v48  ;;  %v3210_v48 = vld [vmem:[%s4025_s2 + $0x148] sm:$0xff] }
  0x2b   : > { %661 = vmatpush.bf16.msra.mxu3 %v3189_v49  ;;  %372 = vmatmul.bf16.vlgmr.msra.gmra.mxu0 %v313_v55  ;;  %v3228_v49 = vld [vmem:[%s4025_s2 + $0x1c8] sm:$0xff]  ;;  %v2658_v55 = vor.u32 %v3225_v42, %v2657_v41 }
  0x2c   : > { %759 = vmatpush.bf16.msrb.mxu0 %v3206_v52  ;;  %448 = vmatmul.bf16.vlgmr.msra.gmra.mxu1 %v3161_v54  ;;  %v816_v52 = vrot.slane %v814_v38, 1  ;;  %v3217_v54 = vld [vmem:[%s4025_s2 + $0x180] sm:$0xff] }
  0x2d   : > { %563 = vmatmul.bf16.vlgmr.msra.gmra.mxu2 %v501_v57  ;;  %876 = vmatpush.bf16.msrb.mxu1 %v3216_v58  ;;  %v3242_v57 = vld [vmem:[%s4025_s2 + $0x238] sm:$0xff]  ;;  %v706_v58 = vrot.slane %v2498_v45, 2  ;;  %v1029_v2 = vrot.slane %v2658_v55, 1 }
  0x2e   : > { %976 = vmatpush.bf16.msrb.mxu2 %v3224_v53  ;;  %662 = vmatmul.bf16.vlgmr.msra.gmra.mxu3 %v3188_v56  ;;  %v819_v53 = vshll.u32 %v3635_v37, 16  ;;  %v2662_v56 = vor.u32 %v3226_v44, %v2661_v43 }
  0x2f   : > { %1082 = vmatpush.bf16.msrb.mxu3 %v3234_v59  ;;  %v707_v59 = vrot.slane %v2502_v46, 2 }
  0x30   : > { %760 = vmatpush.bf16.msrb.mxu0 %v3205_v60  ;;  %v3209_v60 = vld [vmem:[%s4025_s2 + $0x140] sm:$0xff] }
  0x31   : > { %877 = vmatpush.bf16.msrb.mxu1 %v3215_v62  ;;  %v923_v62 = vrot.slane %v3651_v50, 3 }
  0x32   : > { %977 = vmatpush.bf16.msrb.mxu2 %v3223_v61  ;;  %v3227_v61 = vld [vmem:[%s4025_s2 + $0x1c0] sm:$0xff] }
  0x33   : > { %1083 = vmatpush.bf16.msrb.mxu3 %v3233_v63 }
  0x34   : > { %761 = vmatpush.bf16.msrb.mxu0 %v3204_v0  ;;  %v817_v0 = vor.u32 %v816_v52, %v812_v51  ;;  %v3250_v51 = vld [vmem:[%s4027_s4 + $0x38] sm:$0xff]  ;;  %v3249_v52 = vld [vmem:[%s4027_s4 + $0x30] sm:$0xff] }
  0x35   : > { %878 = vmatpush.bf16.msrb.mxu1 %v3214_v3  ;;  %v1030_v3 = vrot.slane %v2662_v56, 1  ;;  %v3248_v56 = vld [vmem:[%s4027_s4 + $0x28] sm:$0xff] }
  0x36   : > { %978 = vmatpush.bf16.msrb.mxu2 %v3222_v1  ;;  %v821_v1 = vrot.slane %v819_v53, 1 }
  0x37   : > { %1084 = vmatpush.bf16.msrb.mxu3 %v3232_v4  ;;  %v708_v4 = vsel %vm310_vm0, %v706_v58, %v707_v59  ;;  %v1031_v8 = vsel %vm1028_vm3, %v1029_v2, %v1030_v3  ;;  %v3247_v58 = vld [vmem:[%s4027_s4 + $0x20] sm:$0xff]  ;;  %v3266_v2 = vld [vmem:[%s4027_s4 + $0xb8] sm:$0xff] }
  0x38   : > { %762 = vmatpush.bf16.msrb.mxu0 %v3203_v6  ;;  %v822_v6 = vsel %vm489_vm1, %v817_v0, %v821_v1  ;;  %v3246_v0 = vld [vmem:[%s4027_s4 + $0x18] sm:$0xff] }
  0x39   : > { %879 = vmatpush.bf16.msrb.mxu1 %v3213_v11  ;;  %v823_v11 = vshrl.u32 %v3635_v37, 16 }
  0x3a   : > { %979 = vmatpush.bf16.msrb.mxu2 %v3221_v7  ;;  %v3241_v7 = vld [vmem:[%s4025_s2 + $0x230] sm:$0xff] }
  0x3b   : > { %1085 = vmatpush.bf16.msrb.mxu3 %v3231_v12  ;;  %377 = vmatmul.bf16.gmra.mxu0 %v3532_v47  ;;  %v921_v47 = vpack.c.b16 %v919_v33, %v485_v22  ;;  %v3199_v22 = vld [vmem:[%s4025_s2 + $0x100] sm:$0xff]  ;;  %v3238_v12 = vld [vmem:[%s4025_s2 + $0x218] sm:$0xff] }
  0x3c   : > { %763 = vmatpush.bf16.msrb.mxu0 %v3202_v13  ;;  %453 = vmatmul.bf16.gmra.mxu1 %v389_v15  ;;  %v825_v13 = vor.u32 %v823_v11, %v821_v1  ;;  %v1126_v15 = vshrl.u32 %v3651_v50, 16 }
  0x3d   : > { %568 = vmatmul.bf16.gmra.mxu2 %v504_v17  ;;  %880 = vmatpush.bf16.msrb.mxu1 %v3212_v19  ;;  %v924_v63 = vrot.slane %v921_v47, 3  ;;  %v1129_v17 = vshll.u32 %v3651_v50, 16  ;;  %v1137_v19 = vshll.u32 %v3476_v16, 16 }
  0x3e   : > { %980 = vmatpush.bf16.msrb.mxu2 %v3220_v14  ;;  %667 = vmatmul.bf16.gmra.mxu3 %v603_v18  ;;  %v3237_v14 = vld [vmem:[%s4025_s2 + $0x210] sm:$0xff]  ;;  %v1134_v18 = vshrl.u32 %v3476_v16, 16  ;;  %v1128_v16 = vrot.slane %v1126_v15, 3 }
  0x3f   : > { %1086 = vmatpush.bf16.msrb.mxu3 %v3230_v20  ;;  %v925_v5 = vsel %vm922_vm2, %v923_v62, %v924_v63  ;;  %v3375_v20 = vmov 0   ;;  %v1139_v27 = vrot.slane %v1137_v19, 4 }
  0x40   : > { %764 = vmatpush.bf16.msrb.mxu0 %v3201_v21  ;;  %257 = vst [vmem:[#allocation2 + $0x10] sm:$0xf] %v3375_v20  ;;  %v1228_v21 = vld [vmem:[%s4023_s0] sm:$0xff]  ;;  %3364 = vset.pattern.permute.xlu1 %v3375_v20  ;;  %v1136_v26 = vrot.slane %v1134_v18, 3  ;;  %v3257_v18 = vld [vmem:[%s4027_s4 + $0x70] sm:$0xff] }
  0x41   : > { %881 = vmatpush.bf16.msrb.mxu1 %v3211_v28  ;;  %253 = vst [vmem:[#allocation2] sm:$0xf] %v3375_v20  ;;  %3363 = vset.pattern.permute.xlu0 %v3375_v20  ;;  %v3235_v28 = vld [vmem:[%s4025_s2 + $0x200] sm:$0xff] }
  0x42   : > { %981 = vmatpush.bf16.msrb.mxu2 %v3219_v25  ;;  %254 = vst [vmem:[#allocation2 + $0x4] sm:$0xf] %v3375_v20  ;;  %1233 = vperm.xlu1 %3364, %v1228_v21   ;;  %v1131_v25 = vrot.slane %v1129_v17, 4  ;;  %v3244_v17 = vld [vmem:[%s4027_s4 + $0x8] sm:$0xff] }
  0x43   : > { %1087 = vmatpush.bf16.msrb.mxu3 %v3229_v29  ;;  %1238 = vperm.xlu0 %3363, %v1229_v23   ;;  %255 = vst [vmem:[#allocation2 + $0x8] sm:$0xf] %v3375_v20  ;;  %v3264_v21 = vld [vmem:[%s4027_s4 + $0xa8] sm:$0xff] }
  0x44   : > { %765 = vmatpush.bf16.msrb.mxu0 %v3200_v30  ;;  %256 = vst [vmem:[#allocation2 + $0xc] sm:$0xf] %v3375_v20  ;;  %v1132_v29 = vor.u32 %v1131_v25, %v1128_v16  ;;  %v1140_v30 = vor.u32 %v1139_v27, %v1136_v26  ;;  %v3272_v23 = vld [vmem:[%s4027_s4 + $0xe8] sm:$0xff]  ;;  %v3243_v25 = vld [vmem:[%s4027_s4] sm:$0xff] }
  0x45   : > { %882 = vmatpush.bf16.msrb.mxu1 %v3210_v48  ;;  %v3256_v26 = vld [vmem:[%s4027_s4 + $0x68] sm:$0xff] }
  0x46   : > { %982 = vmatpush.bf16.msrb.mxu2 %v3218_v34  ;;  %v1141_v32 = vsel %vm1124_vm4, %v1132_v29, %v1140_v30  ;;  %v3779_v29 = vld [vmem:[%s4026_s3] ss:$0 sm:$0xff] }
  0x47   : > { %1088 = vmatpush.bf16.msrb.mxu3 %v3228_v49 }
  0x48   : > { %766 = vmatpush.bf16.msrb.mxu0 %v3199_v22 }
  0x49   : > { %883 = vmatpush.bf16.msrb.mxu1 %v3209_v60 }
  0x4a   : > { %983 = vmatpush.bf16.msrb.mxu2 %v3217_v54 }
  0x4b   : > { %1089 = vmatpush.bf16.msrb.mxu3 %v3227_v61  ;;  %767 = vmatmul.bf16.vlgmr.msrb.gmra.mxu0 %v708_v4 }
  0x4c   : > { %1192 = vmatpush.bf16.msra.mxu0 %v3242_v57  ;;  %884 = vmatmul.bf16.vlgmr.msrb.gmra.mxu1 %v822_v6  ;;  %v3245_v6 = vld [vmem:[%s4027_s4 + $0x10] sm:$0xff] }
  0x4d   : > { %984 = vmatmul.bf16.vlgmr.msrb.gmra.mxu2 %v925_v5  ;;  %1243 = vperm.xlu0 %3363, %v1230_v31  }
  0x4e   : > { %1090 = vmatmul.bf16.vlgmr.msrb.gmra.mxu3 %v1031_v8  ;;  %1483 = vmatpush.bf16.msra.mxu2 %v3250_v51 }
  0x4f   : > { %1575 = vmatpush.bf16.msra.mxu3 %v3266_v2  ;;  %v3252_v2 = vld [vmem:[%s4027_s4 + $0x48] sm:$0xff] }
  0x50   : > { %1193 = vmatpush.bf16.msra.mxu0 %v3241_v7  ;;  %v3258_v7 = vld [vmem:[%s4027_s4 + $0x78] sm:$0xff] }
  0x51   : > { %1414 = vmatpush.bf16.msra.mxu1 %v3258_v7 }
  0x52   : > { %1484 = vmatpush.bf16.msra.mxu2 %v3249_v52 }
  0x54   : > { %1194 = vmatpush.bf16.msra.mxu0 %v3240_v9 }
  0x55   : > { %1415 = vmatpush.bf16.msra.mxu1 %v3257_v18 }
  0x56   : > { %1485 = vmatpush.bf16.msra.mxu2 %v3248_v56 }
  0x58   : > { %1195 = vmatpush.bf16.msra.mxu0 %v3239_v10 }
  0x59   : > { %1416 = vmatpush.bf16.msra.mxu1 %v3256_v26  ;;  %v3306_v26 = vld [vmem:[%s4027_s4 + $0x1f8] sm:$0xff] }
  0x5a   : > { %1486 = vmatpush.bf16.msra.mxu2 %v3247_v58 }
  0x5b   : > { %772 = vmatmul.bf16.gmra.mxu0 %v707_v59 }
  0x5c   : > { %1196 = vmatpush.bf16.msra.mxu0 %v3238_v12  ;;  %889 = vmatmul.bf16.gmra.mxu1 %v825_v13  ;;  %v3265_v12 = vld [vmem:[%s4027_s4 + $0xb0] sm:$0xff] }
  0x5d   : > { %989 = vmatmul.bf16.gmra.mxu2 %v924_v63  ;;  %v3273_v13 = vld [vmem:[%s4027_s4 + $0xf0] sm:$0xff]  ;;  %1576 = vmatpush.bf16.msra.mxu3 %v3265_v12 }
  0x5e   : > { %1095 = vmatmul.bf16.gmra.mxu3 %v1030_v3  ;;  %1487 = vmatpush.bf16.msra.mxu2 %v3246_v0  ;;  %v3274_v3 = vld [vmem:[%s4027_s4 + $0xf8] sm:$0xff] }
  0x60   : > { %1197 = vmatpush.bf16.msra.mxu0 %v3237_v14 }
  0x61   : > { %1577 = vmatpush.bf16.msra.mxu3 %v3264_v21 }
  0x62   : > { %1488 = vmatpush.bf16.msra.mxu2 %v3245_v6 }
  0x64   : > { %1198 = vmatpush.bf16.msra.mxu0 %v3236_v24 }
  0x66   : > { %1489 = vmatpush.bf16.msra.mxu2 %v3244_v17  ;;  %v3267_v17 = vld [vmem:[%s4027_s4 + $0xc0] sm:$0xff] }
  0x68   : > { %1199 = vmatpush.bf16.msra.mxu0 %v3235_v28 }
  0x6a   : > { %1490 = vmatpush.bf16.msra.mxu2 %v3243_v25  ;;  %v3298_v25 = vld [vmem:[%s4027_s4 + $0x1b8] sm:$0xff] }
  0x6b   : > { %1200 = vmatmul.bf16.vlgmr.msra.gmra.mxu0 %v1141_v32 }
  0x6c   : > { %1674 = vmatpush.bf16.msrb.mxu0 %v3274_v3 }
  0x70   : > { %1675 = vmatpush.bf16.msrb.mxu0 %v3273_v13 }
  0x74   : > { %1676 = vmatpush.bf16.msrb.mxu0 %v3272_v23 }
  0x7b   : > { %1205 = vmatmul.bf16.gmra.mxu0 %v1140_v30 }
  0xa8   : > { %v373_v33 = vpop.f32.mrf.mxu0 }
  0xa9   : > { %v449_v34 = vpop.f32.mrf.mxu1 }
  0xaa   : > { %v450_v57 = vadd.f32 %v449_v34, %v373_v33  ;;  %v3263_v33 = vld [vmem:[%s4027_s4 + $0xa0] sm:$0xff] }
  0xab   : > { %v3271_v34 = vld [vmem:[%s4027_s4 + $0xe0] sm:$0xff]  ;;  %1578 = vmatpush.bf16.msra.mxu3 %v3263_v33  ;;  %v3282_v33 = vld [vmem:[%s4027_s4 + $0x138] sm:$0xff] }
  0xac   : > { %1677 = vmatpush.bf16.msrb.mxu0 %v3271_v34  ;;  %v3297_v34 = vld [vmem:[%s4027_s4 + $0x1b0] sm:$0xff] }
  0xb0   : > { %v564_v35 = vpop.f32.mrf.mxu2  ;;  %v375_v37 = vpop.f32.mrf.mxu0 }
  0xb1   : > { %v663_v36 = vpop.f32.mrf.mxu3  ;;  %v451_v38 = vpop.f32.mrf.mxu1  ;;  %v573_v59 = vadd.f32 %v564_v35, %v450_v57 }
  0xb2   : > { %v452_v4 = vadd.f32 %v451_v38, %v375_v37  ;;  %v3290_v37 = vld [vmem:[%s4027_s4 + $0x178] sm:$0xff]  ;;  %v3255_v38 = vld [vmem:[%s4027_s4 + $0x60] sm:$0xff] }
  0xb3   : > { %v672_v1 = vadd.f32 %v663_v36, %v573_v59  ;;  %1873 = vmatpush.bf16.msrb.mxu2 %v3290_v37  ;;  %1417 = vmatpush.bf16.msra.mxu1 %v3255_v38  ;;  %v3260_v59 = vld [vmem:[%s4027_s4 + $0x88] sm:$0xff] }
  0xb4   : > { %v3284_v38 = vld [vmem:[%s4027_s4 + $0x148] sm:$0xff] }
  0xb8   : > { %v566_v39 = vpop.f32.mrf.mxu2  ;;  %v378_v41 = vpop.f32.mrf.mxu0 }
  0xb9   : > { %v665_v40 = vpop.f32.mrf.mxu3  ;;  %v454_v42 = vpop.f32.mrf.mxu1  ;;  %v574_v8 = vadd.f32 %v566_v39, %v452_v4  ;;  %v1291_v4 = vld [vmem:[#allocation2] sm:$0x8] }
  0xba   : > { %v455_v24 = vadd.f32 %v454_v42, %v378_v41  ;;  %v3262_v42 = vld [vmem:[%s4027_s4 + $0x98] sm:$0xff] }
  0xbb   : > { %v673_v19 = vadd.f32 %v665_v40, %v574_v8  ;;  %1579 = vmatpush.bf16.msra.mxu3 %v3262_v42  ;;  %v3281_v42 = vld [vmem:[%s4027_s4 + $0x130] sm:$0xff] }
  0xc0   : > { %v3710_v43 = vpop.f32.mrf.mxu2  ;;  %v380_v45 = vpop.f32.mrf.mxu0 }
  0xc1   : > { %v3712_v44 = vpop.f32.mrf.mxu3  ;;  %v456_v46 = vpop.f32.mrf.mxu1  ;;  %v575_v27 = vadd.f32 %v3710_v43, %v455_v24  ;;  %v3270_v43 = vld [vmem:[%s4027_s4 + $0xd8] sm:$0xff] }
  0xc2   : > { %v1234_v46 = vpop.permute.xlu1 %1233  ;;  %1678 = vmatpush.bf16.msrb.mxu0 %v3270_v43 }
  0xc3   : > { %v674_v39 = vadd.f32 %v3712_v44, %v575_v27  ;;  %v3254_v44 = vld [vmem:[%s4027_s4 + $0x58] sm:$0xff] }
  0xc4   : > { %1418 = vmatpush.bf16.msra.mxu1 %v3254_v44  ;;  %v3283_v44 = vld [vmem:[%s4027_s4 + $0x140] sm:$0xff] }
  0xc8   : > { %v571_v47 = vpop.f32.mrf.mxu2  ;;  %v768_v49 = vpop.f32.mrf.mxu0 }
  0xc9   : > { %v670_v48 = vpop.f32.mrf.mxu3  ;;  %v885_v50 = vpop.f32.mrf.mxu1  ;;  %v777_v5 = vadd.f32 %v768_v49, %v672_v1  ;;  %v3261_v49 = vld [vmem:[%s4027_s4 + $0x90] sm:$0xff] }
  0xca   : > { %v3289_v48 = vld [vmem:[%s4027_s4 + $0x170] sm:$0xff]  ;;  %1580 = vmatpush.bf16.msra.mxu3 %v3261_v49 }
  0xcb   : > { %v894_v14 = vadd.f32 %v885_v50, %v777_v5  ;;  %v3269_v50 = vld [vmem:[%s4027_s4 + $0xd0] sm:$0xff]  ;;  %1874 = vmatpush.bf16.msrb.mxu2 %v3289_v48  ;;  %v1239_v5 = vpop.permute.xlu0 %1238 }
  0xcc   : > { %1679 = vmatpush.bf16.msrb.mxu0 %v3269_v50  ;;  %v3280_v50 = vld [vmem:[%s4027_s4 + $0x128] sm:$0xff] }
  0xce   : > { %1581 = vmatpush.bf16.msra.mxu3 %v3260_v59  ;;  %v3279_v59 = vld [vmem:[%s4027_s4 + $0x120] sm:$0xff] }
  0xd0   : > { %v985_v53 = vpop.f32.mrf.mxu2  ;;  %v770_v22 = vpop.f32.mrf.mxu0 }
  0xd1   : > { %v1091_v54 = vpop.f32.mrf.mxu3  ;;  %v887_v55 = vpop.f32.mrf.mxu1  ;;  %v994_v20 = vadd.f32 %v985_v53, %v894_v14  ;;  %v778_v16 = vadd.f32 %v770_v22, %v673_v19  ;;  %v3288_v53 = vld [vmem:[%s4027_s4 + $0x168] sm:$0xff]  ;;  %v3286_v19 = vld [vmem:[%s4027_s4 + $0x158] sm:$0xff] }
  0xd2   : > { %1875 = vmatpush.bf16.msrb.mxu2 %v3288_v53 }
  0xd3   : > { %v1100_v28 = vadd.f32 %v1091_v54, %v994_v20  ;;  %v895_v35 = vadd.f32 %v887_v55, %v778_v16  ;;  %v3253_v55 = vld [vmem:[%s4027_s4 + $0x50] sm:$0xff] }
  0xd4   : > { %1419 = vmatpush.bf16.msra.mxu1 %v3253_v55 }
  0xd8   : > { %v987_v60 = vpop.f32.mrf.mxu2  ;;  %v3726_v61 = vpop.f32.mrf.mxu0  ;;  %1420 = vmatpush.bf16.msra.mxu1 %v3252_v2  ;;  %v3301_v2 = vld [vmem:[%s4027_s4 + $0x1d0] sm:$0xff] }
  0xd9   : > { %v3728_v62 = vpop.f32.mrf.mxu3  ;;  %v3730_v63 = vpop.f32.mrf.mxu1  ;;  %v995_v40 = vadd.f32 %v987_v60, %v895_v35  ;;  %v779_v45 = vadd.f32 %v3726_v61, %v674_v39  ;;  %v3268_v60 = vld [vmem:[%s4027_s4 + $0xc8] sm:$0xff]  ;;  %v3305_v35 = vld [vmem:[%s4027_s4 + $0x1f0] sm:$0xff] }
  0xda   : > { %1680 = vmatpush.bf16.msrb.mxu0 %v3268_v60 }
  0xdb   : > { %v1101_v51 = vadd.f32 %v3728_v62, %v995_v40  ;;  %v896_v56 = vadd.f32 %v3730_v63, %v779_v45  ;;  %v3287_v63 = vld [vmem:[%s4027_s4 + $0x160] sm:$0xff] }
  0xdc   : > { %1876 = vmatpush.bf16.msrb.mxu2 %v3287_v63  ;;  %v3302_v63 = vld [vmem:[%s4027_s4 + $0x1d8] sm:$0xff] }
  0xde   : > { %1681 = vmatpush.bf16.msrb.mxu0 %v3267_v17 }
  0xe0   : > { %v3747_v9 = vpop.f32.mrf.mxu2  ;;  %v775_v10 = vpop.f32.mrf.mxu0  ;;  %1877 = vmatpush.bf16.msrb.mxu2 %v3286_v19 }
  0xe1   : > { %v3749_v11 = vpop.f32.mrf.mxu3  ;;  %v892_v15 = vpop.f32.mrf.mxu1  ;;  %v996_v61 = vadd.f32 %v3747_v9, %v896_v56  ;;  %v3295_v56 = vld [vmem:[%s4027_s4 + $0x1a0] sm:$0xff] }
  0xe2   : > { %v3259_v15 = vld [vmem:[%s4027_s4 + $0x80] sm:$0xff]  ;;  %2088 = vmatpush.bf16.msra.mxu0 %v3306_v26 }
  0xe3   : > { %v1102_v9 = vadd.f32 %v3749_v11, %v996_v61  ;;  %v3251_v11 = vld [vmem:[%s4027_s4 + $0x40] sm:$0xff]  ;;  %1582 = vmatpush.bf16.msra.mxu3 %v3259_v15 }
  0xe4   : > { %1421 = vmatpush.bf16.msra.mxu1 %v3251_v11 }
  0xe6   : > { %2089 = vmatpush.bf16.msra.mxu0 %v3305_v35 }
  0xe7   : > { %1978 = vmatpush.bf16.msrb.mxu3 %v3298_v25 }
  0xe8   : > { %v992_v30 = vpop.f32.mrf.mxu2  ;;  %v1201_v31 = vpop.f32.mrf.mxu0  ;;  %1783 = vmatpush.bf16.msrb.mxu1 %v3282_v33 }
  0xe9   : > { %v1098_v32 = vpop.f32.mrf.mxu3  ;;  %v1210_v36 = vadd.f32 %v1201_v31, %v1100_v28 }
  0xeb   : > { %v1216_v41 = vadd.f32 %v3779_v29, %v1210_v36  ;;  %v1244_v36 = vpop.permute.xlu0 %1243  ;;  %1979 = vmatpush.bf16.msrb.mxu3 %v3297_v34  ;;  %v3275_v34 = vld [vmem:[%s4027_s4 + $0x100] sm:$0xff] }
  0xec   : > { %1784 = vmatpush.bf16.msrb.mxu1 %v3281_v42  ;;  %v3312_v42 = vld [vmem:[%s4027_s4 + $0x228] sm:$0xff] }
  0xed   : > { %vm1219_vm5 = vcmp.ge.f32.partialorder %v1216_v41, 0.0  ;;  %v1222_v47 = vmul.f32 0.1, %v1216_v41 }
  0xef   : > { %v1225_v52 = vsel %vm1219_vm5, %v1216_v41, %v1222_v47  ;;  %v3304_v47 = vld [vmem:[%s4027_s4 + $0x1e8] sm:$0xff] }
  0xf0   : > { %v1246_v22 = vmul.f32 %v1234_v46, %v1225_v52  ;;  %v1203_v54 = vpop.f32.mrf.mxu0  ;;  %v3296_v46 = vld [vmem:[%s4027_s4 + $0x1a8] sm:$0xff]  ;;  %2090 = vmatpush.bf16.msra.mxu0 %v3304_v47  ;;  %1785 = vmatpush.bf16.msrb.mxu1 %v3280_v50 }
  0xf1   : > { %v1211_v57 = vadd.f32 %v1203_v54, %v1101_v51  ;;  %1980 = vmatpush.bf16.msrb.mxu3 %v3296_v46 }
  0xf2   : > { %v1249_v58 = vpack.c.bf16 %v1246_v22, %v1246_v22 }
  0xf3   : > { %v1217_v62 = vadd.f32 %v3779_v29, %v1211_v57  ;;  %v3303_v57 = vld [vmem:[%s4027_s4 + $0x1e0] sm:$0xff] }
  0xf4   : > { %v1256_v0 = vshll.u32 %v1249_v58, 16  ;;  %v1259_v1 = vshrl.u32 %v1249_v58, 16  ;;  %v1298_v58 = vld [vmem:[#allocation2 + $0xc] sm:$0xf]  ;;  %2091 = vmatpush.bf16.msra.mxu0 %v3303_v57  ;;  %1786 = vmatpush.bf16.msrb.mxu1 %v3279_v59 }
  0xf5   : > { %vm1220_vm9 = vcmp.ge.f32.partialorder %v1217_v62, 0.0  ;;  %v1223_v6 = vmul.f32 0.1, %v1217_v62  ;;  %1981 = vmatpush.bf16.msrb.mxu3 %v3295_v56 }
  0xf6   : > { %v1258_v7 = vrot.slane %v1256_v0, 5  ;;  %v1261_v8 = vrot.slane %v1259_v1, 4  ;;  %v3278_v0 = vld [vmem:[%s4027_s4 + $0x118] sm:$0xff]  ;;  %v3293_v1 = vld [vmem:[%s4027_s4 + $0x190] sm:$0xff] }
  0xf7   : > { %v1226_v10 = vsel %vm1220_vm9, %v1217_v62, %v1223_v6  ;;  %v3294_v62 = vld [vmem:[%s4027_s4 + $0x198] sm:$0xff]  ;;  %v3277_v6 = vld [vmem:[%s4027_s4 + $0x110] sm:$0xff] }
  0xf8   : > { %v1292_v12 = vsel %vm3837_vm8, %v1258_v7, %v1291_v4  ;;  %v1247_v13 = vmul.f32 %v1239_v5, %v1226_v10  ;;  %v1206_v14 = vpop.f32.mrf.mxu0  ;;  %v1262_v20 = vor.u32 %v1261_v8, %v1258_v7  ;;  %2092 = vmatpush.bf16.msra.mxu0 %v3302_v63  ;;  %1787 = vmatpush.bf16.msrb.mxu1 %v3278_v0  ;;  %v3292_v8 = vld [vmem:[%s4027_s4 + $0x188] sm:$0xff] }
  0xf9   : > { %1293 = vst [vmem:[#allocation2] sm:$0x8] %v1292_v12  ;;  %v1212_v18 = vadd.f32 %v1206_v14, %v1102_v9  ;;  %1982 = vmatpush.bf16.msrb.mxu3 %v3294_v62  ;;  %v3300_v9 = vld [vmem:[%s4027_s4 + $0x1c8] sm:$0xff] }
  0xfa   : > { %v1250_v21 = vpack.c.bf16 %v1247_v13, %v1247_v13  ;;  %v1263_v30 = vrot.slane %v1262_v20, 4  ;;  %v3276_v13 = vld [vmem:[%s4027_s4 + $0x108] sm:$0xff] }
  0xfb   : > { %v1218_v23 = vadd.f32 %v3779_v29, %v1212_v18  ;;  %v3285_v29 = vld [vmem:[%s4027_s4 + $0x150] sm:$0xff] }
  0xfc   : > { %v1265_v24 = vshll.u32 %v1250_v21, 16  ;;  %v1269_v16 = vshrl.u32 %v1250_v21, 16  ;;  %1878 = vmatpush.bf16.msrb.mxu2 %v3285_v29  ;;  %2093 = vmatpush.bf16.msra.mxu0 %v3301_v2  ;;  %v3299_v29 = vld [vmem:[%s4027_s4 + $0x1c0] sm:$0xff] }
  0xfd   : > { %vm1221_vm13 = vcmp.ge.f32.partialorder %v1218_v23, 0.0  ;;  %v1224_v28 = vmul.f32 0.1, %v1218_v23  ;;  %1983 = vmatpush.bf16.msrb.mxu3 %v3293_v1  ;;  %1788 = vmatpush.bf16.msrb.mxu1 %v3277_v6 }
  0xfe   : > { %v1267_v31 = vrot.slane %v1265_v24, 5  ;;  %v1271_v32 = vrot.slane %v1269_v16, 4 }
  0xff   : > { %v1227_v37 = vsel %vm1221_vm13, %v1218_v23, %v1224_v28  ;;  %v3291_v28 = vld [vmem:[%s4027_s4 + $0x180] sm:$0xff] }
 0x100   : > { %v1268_v39 = vsel %vm3864_vm12, %v1263_v30, %v1267_v31  ;;  %v1248_v40 = vmul.f32 %v1244_v36, %v1227_v37  ;;  %v1208_v41 = vpop.f32.mrf.mxu0  ;;  %v1272_v43 = vor.u32 %v1271_v32, %v1267_v31  ;;  %1879 = vmatpush.bf16.msrb.mxu2 %v3284_v38  ;;  %v1501_v3 = vld [vmem:[#allocation2] sm:$0xe]  ;;  %2094 = vmatpush.bf16.msra.mxu0 %v3300_v9 }
 0x101   : > { %1294 = vst [vmem:[#allocation2 + $0x4] sm:$0xf] %v1268_v39  ;;  %v1596_v5 = vld [vmem:[#allocation2] sm:$0x8]  ;;  %v1520_v7 = vunpack.c.l.b16 %v1501_v3  ;;  %1984 = vmatpush.bf16.msrb.mxu3 %v3292_v8  ;;  %1789 = vmatpush.bf16.msrb.mxu1 %v3276_v13  ;;  %v3314_v39 = vld [vmem:[%s4027_s4 + $0x238] sm:$0xff]  ;;  %v3313_v41 = vld [vmem:[%s4027_s4 + $0x230] sm:$0xff] }
 0x102   : > { %v1251_v45 = vpack.c.bf16 %v1248_v40, %v1248_v40  ;;  %v1273_v51 = vrot.slane %v1272_v43, 4  ;;  %v1617_v12 = vunpack.c.l.b16 %v1596_v5 }
 0x104   : > { %v1275_v48 = vshll.u32 %v1251_v45, 16  ;;  %v1279_v49 = vshrl.u32 %v1251_v45, 16  ;;  %1880 = vmatpush.bf16.msrb.mxu2 %v3283_v44  ;;  %2095 = vmatpush.bf16.msra.mxu0 %v3299_v29  ;;  %v1999_v45 = vld [vmem:[#allocation2 + $0x10] sm:$0x7] }
 0x105   : > { %1985 = vmatpush.bf16.msrb.mxu3 %v3291_v28  ;;  %1790 = vmatpush.bf16.msrb.mxu1 %v3275_v34 }
 0x106   : > { %v1277_v52 = vrot.slane %v1275_v48, 5  ;;  %v1281_v53 = vrot.slane %v1279_v49, 4  ;;  %v2018_v49 = vunpack.c.l.b16 %v1999_v45 }
 0x108   : > { %v1278_v22 = vsel %vm3864_vm12, %v1273_v51, %v1277_v52  ;;  %v1282_v54 = vor.u32 %v1281_v53, %v1277_v52  ;;  %v3902_v55 = vld [vmem:[#allocation2] sm:$0xff]  }
 0x109   : > { %1295 = vst [vmem:[#allocation2 + $0x8] sm:$0xf] %v1278_v22  ;;  %1491 = vmatmul.bf16.vlgmr.msra.gmra.mxu2 %v3902_v55  ;;  %v3931_v4 = vunpack.c.h.b16 %v3902_v55  ;;  %v1352_v10 = vshll.u32 %v3902_v55, 16  ;;  %v1894_v46 = vld [vmem:[#allocation2 + $0x4] sm:$0xc] }
 0x10a   : > { %v1283_v60 = vrot.slane %v1282_v54, 4  ;;  %3336 = vmatpush.bf16.msra.mxu2 %v3306_v26  ;;  %v1350_v26 = vshrl.u32 %v3902_v55, 16  ;;  %v1919_v51 = vunpack.c.l.b16 %v1894_v46  ;;  %v3311_v52 = vld [vmem:[%s4027_s4 + $0x220] sm:$0xff]  ;;  %v1897_v22 = vld [vmem:[#allocation2 + $0x10] sm:$0x3] }
 0x10b   : > { %v1521_v17 = vpack.c.b16 %v3931_v4, %v1520_v7  ;;  %v3950_v11 = vpack.c.b16 %v3931_v4, %v1617_v12  ;;  %v1354_v23 = vrot.slane %v1352_v10, 1 }
 0x10c   : > { %v1299_v61 = vsel %vm1297_vm15, %v1283_v60, %v1298_v58  ;;  %v1922_v58 = vunpack.c.l.b16 %v1897_v22 }
 0x10d   : > { %1300 = vst [vmem:[#allocation2 + $0xc] sm:$0xf] %v1299_v61  ;;  %v1522_v27 = vrot.slane %v1521_v17, 1  ;;  %v1621_v31 = vrot.slane %v3950_v11, 3  ;;  %v1355_v37 = vor.u32 %v1354_v23, %v1350_v26  ;;  %v1717_v3 = vshrl.u32 %v3950_v11, 16 }
 0x10e   : > { %3337 = vmatpush.bf16.msra.mxu2 %v3305_v35  ;;  %v2109_v26 = vld [vmem:[#allocation2 + $0x4] sm:$0x8] }
 0x112   : > { %3338 = vmatpush.bf16.msra.mxu2 %v3304_v47 }
 0x114   : > { %v3946_v14 = vld [vmem:[#allocation2 + $0x8] sm:$0xff]  }
 0x115   : > { %v1321_v15 = vld [vmem:[#allocation2 + $0xc] sm:$0x1]  ;;  %v1345_v19 = vunpack.c.l.b16 %v3946_v14  ;;  %v1714_v50 = vunpack.c.h.b16 %v3946_v14  ;;  %v1725_v0 = vshrl.u32 %v3946_v14, 16  ;;  %v1728_v1 = vshll.u32 %v3946_v14, 16 }
 0x116   : > { %v1597_v18 = vld [vmem:[#allocation2 + $0xc] sm:$0x7]  ;;  %v1346_v20 = vunpack.c.l.b16 %v1321_v15  ;;  %3339 = vmatpush.bf16.msra.mxu2 %v3303_v57  ;;  %v3310_v57 = vld [vmem:[%s4027_s4 + $0x218] sm:$0xff]  ;;  %v1719_v15 = vrot.slane %v1717_v3, 3 }
 0x117   : > { %v1618_v21 = vunpack.c.l.b16 %v1597_v18  ;;  %v1432_v24 = vpack.c.b16 %v1345_v19, %v1345_v19  ;;  %v3976_v43 = vld [vmem:[#allocation2 + $0x8] sm:$0xff]   ;;  %v1821_v47 = vpack.c.b16 %v1345_v19, %v3931_v4  ;;  %v1720_v4 = vshll.u32 %v3950_v11, 16  ;;  %v3307_v11 = vld [vmem:[%s4027_s4 + $0x200] sm:$0xff] }
 0x118   : > { %v1348_v16 = vpack.c.b16 %v1346_v20, %v1345_v19  ;;  %v3325_v44 = vunpack.c.l.b16 %v3976_v43  ;;  %v3326_v48 = vunpack.c.h.b16 %v3976_v43  ;;  %v1727_v10 = vrot.slane %v1725_v0, 3 }
 0x119   : > { %v1620_v25 = vpack.c.b16 %v1618_v21, %v1345_v19  ;;  %1496 = vmatmul.bf16.gmra.mxu2 %v1432_v24  ;;  %v1730_v12 = vrot.slane %v1728_v1, 4  ;;  %v1822_v13 = vpack.c.b16 %v1714_v50, %v1714_v50  ;;  %v1722_v14 = vrot.slane %v1720_v4, 4 }
 0x11a   : > { %v1523_v30 = vrot.slane %v1348_v16, 1  ;;  %v1357_v33 = vshll.u32 %v1348_v16, 16  ;;  %3340 = vmatpush.bf16.msra.mxu2 %v3302_v63  ;;  %v1361_v53 = vshrl.u32 %v1348_v16, 16  ;;  %v1923_v54 = vpack.c.b16 %v3325_v44, %v1919_v51  ;;  %v3309_v63 = vld [vmem:[%s4027_s4 + $0x210] sm:$0xff] }
 0x11b   : > { %v1622_v32 = vrot.slane %v1620_v25, 3  ;;  %v3987_v55 = vpack.c.b16 %v2018_v49, %v3326_v48  ;;  %v1731_v21 = vor.u32 %v1730_v12, %v1727_v10  ;;  %v1723_v16 = vor.u32 %v1722_v14, %v1719_v15 }
 0x11c   : > { %v1524_v35 = vsel %vm1028_vm3, %v1522_v27, %v1523_v30  ;;  %v1359_v38 = vrot.slane %v1357_v33, 1  ;;  %v2022_v59 = vshrl.u32 %v1923_v54, 16  ;;  %v2025_v60 = vshll.u32 %v1923_v54, 16 }
 0x11d   : > { %v1623_v36 = vsel %vm922_vm2, %v1621_v31, %v1622_v32  ;;  %1583 = vmatmul.bf16.vlgmr.msra.gmra.mxu3 %v1524_v35  ;;  %v2030_v61 = vshrl.u32 %v3987_v55, 16  ;;  %v2033_v62 = vshll.u32 %v3987_v55, 16  ;;  %v1925_v17 = vrot.slane %v1923_v54, 2 }
 0x11e   : > { %1682 = vmatmul.bf16.vlgmr.msrb.gmra.mxu0 %v1623_v36  ;;  %v1360_v40 = vsel %vm489_vm1, %v1355_v37, %v1359_v38  ;;  %3344 = vmatpush.bf16.msra.mxu3 %v3314_v39  ;;  %v1363_v56 = vor.u32 %v1361_v53, %v1359_v38  ;;  %v2024_v5 = vrot.slane %v2022_v59, 2  ;;  %v2027_v6 = vrot.slane %v2025_v60, 3 }
 0x11f   : > { %1422 = vmatmul.bf16.vlgmr.msra.gmra.mxu1 %v1360_v40  ;;  %3341 = vmatpush.bf16.msra.mxu2 %v3301_v2  ;;  %v1924_v2 = vpack.c.b16 %v1922_v58, %v3326_v48  ;;  %v2032_v7 = vrot.slane %v2030_v61, 2  ;;  %v2035_v8 = vrot.slane %v2033_v62, 3  ;;  %vm2020_vm1 = vsmask.f32 5376 }
 0x120   : > { %2183 = vmatpush.bf16.msra.mxu1 %v3314_v39  ;;  %v2028_v19 = vor.u32 %v2027_v6, %v2024_v5  ;;  %v1732_v25 = vsel %vm1124_vm4, %v1723_v16, %v1731_v21  ;;  %v2128_v27 = vunpack.c.l.b16 %v2109_v26 }
 0x121   : > { %v1926_v18 = vrot.slane %v1924_v2, 2  ;;  %v2036_v20 = vor.u32 %v2035_v8, %v2032_v7 }
 0x122   : > { %3345 = vmatpush.bf16.msra.mxu3 %v3313_v41  ;;  %v2129_v28 = vpack.c.b16 %v3325_v44, %v2128_v27 }
 0x123   : > { %3342 = vmatpush.bf16.msra.mxu2 %v3300_v9  ;;  %v3308_v9 = vld [vmem:[%s4027_s4 + $0x208] sm:$0xff]  ;;  %v1927_v23 = vsel %vm310_vm0, %v1925_v17, %v1926_v18  ;;  %v2037_v24 = vsel %vm2020_vm1, %v2028_v19, %v2036_v20 }
 0x124   : > { %2184 = vmatpush.bf16.msra.mxu1 %v3313_v41 }
 0x126   : > { %3346 = vmatpush.bf16.msra.mxu3 %v3312_v42 }
 0x127   : > { %3343 = vmatpush.bf16.msra.mxu2 %v3299_v29  ;;  %v2131_v29 = vrot.slane %v3987_v55, 3 }
 0x128   : > { %2185 = vmatpush.bf16.msra.mxu1 %v3312_v42 }
 0x129   : > { %1881 = vmatmul.bf16.vlgmr.msrb.gmra.mxu2 %v1821_v47 }
 0x12a   : > { %3347 = vmatpush.bf16.msra.mxu3 %v3311_v52 }
 0x12c   : > { %2186 = vmatpush.bf16.msra.mxu1 %v3311_v52 }
 0x12d   : > { %1588 = vmatmul.bf16.gmra.mxu3 %v1523_v30  ;;  %v2130_v30 = vrot.slane %v2129_v28, 3 }
 0x12e   : > { %1687 = vmatmul.bf16.gmra.mxu0 %v1622_v32  ;;  %3348 = vmatpush.bf16.msra.mxu3 %v3310_v57 }
 0x12f   : > { %1427 = vmatmul.bf16.gmra.mxu1 %v1363_v56  ;;  %v2132_v31 = vsel %vm922_vm2, %v2130_v30, %v2131_v29 }
 0x130   : > { %2187 = vmatpush.bf16.msra.mxu1 %v3310_v57 }
 0x132   : > { %3349 = vmatpush.bf16.msra.mxu3 %v3309_v63 }
 0x134   : > { %2188 = vmatpush.bf16.msra.mxu1 %v3309_v63 }
 0x136   : > { %3350 = vmatpush.bf16.msra.mxu3 %v3308_v9 }
 0x138   : > { %2189 = vmatpush.bf16.msra.mxu1 %v3308_v9 }
 0x139   : > { %1886 = vmatmul.bf16.gmra.mxu2 %v1822_v13 }
 0x13a   : > { %3351 = vmatpush.bf16.msra.mxu3 %v3307_v11 }
 0x13c   : > { %2190 = vmatpush.bf16.msra.mxu1 %v3307_v11  ;;  %v3366_v11 = vld [vmem:[%s4028_s5] ss:$0 sm:$0xff] }
 0x13d   : > { %1986 = vmatmul.bf16.vlgmr.msrb.gmra.mxu3 %v1927_v23 }
 0x13e   : > { %2096 = vmatmul.bf16.vlgmr.msra.gmra.mxu0 %v2037_v24 }
 0x13f   : > { %1791 = vmatmul.bf16.vlgmr.msrb.gmra.mxu1 %v1732_v25 }
 0x149   : > { %2101 = vmatmul.bf16.vlgmr.msra.gmra.mxu2 %v2036_v20 }
 0x14d   : > { %1991 = vmatmul.bf16.gmra.mxu3 %v1926_v18 }
 0x14f   : > { %1796 = vmatmul.bf16.gmra.mxu1 %v1731_v21 }
 0x15d   : > { %2196 = vmatmul.bf16.vlgmr.msra.gmra.mxu3 %v2131_v29 }
 0x15f   : > { %2191 = vmatmul.bf16.vlgmr.msra.gmra.mxu1 %v2132_v31 }
 0x18c   : > { %v1492_v32 = vpop.f32.mrf.mxu2 }
 0x194   : > { %v1494_v33 = vpop.f32.mrf.mxu2 }
 0x19b   : > { %v1683_v34 = vpop.f32.mrf.mxu0 }
 0x19c   : > { %v1423_v35 = vpop.f32.mrf.mxu1  ;;  %v1497_v36 = vpop.f32.mrf.mxu2 }
 0x19d   : > { %v1493_v37 = vadd.f32 %v1492_v32, %v1423_v35 }
 0x1a0   : > { %v1584_v38 = vpop.f32.mrf.mxu3 }
 0x1a1   : > { %v1593_v39 = vadd.f32 %v1584_v38, %v1493_v37 }
 0x1a3   : > { %v1685_v40 = vpop.f32.mrf.mxu0  ;;  %v1692_v41 = vadd.f32 %v1683_v34, %v1593_v39 }
 0x1a4   : > { %v1425_v42 = vpop.f32.mrf.mxu1  ;;  %v1499_v43 = vpop.f32.mrf.mxu2 }
 0x1a5   : > { %v1495_v62 = vadd.f32 %v1494_v33, %v1425_v42 }
 0x1a8   : > { %v1586_v45 = vpop.f32.mrf.mxu3 }
 0x1a9   : > { %v1594_v0 = vadd.f32 %v1586_v45, %v1495_v62 }
 0x1ab   : > { %v1688_v46 = vpop.f32.mrf.mxu0  ;;  %v1693_v6 = vadd.f32 %v1685_v40, %v1594_v0 }
 0x1ac   : > { %v1428_v47 = vpop.f32.mrf.mxu1  ;;  %v1882_v44 = vpop.f32.mrf.mxu2 }
 0x1ad   : > { %v1498_v58 = vadd.f32 %v1497_v36, %v1428_v47 }
 0x1b0   : > { %v1589_v48 = vpop.f32.mrf.mxu3 }
 0x1b1   : > { %v1595_v60 = vadd.f32 %v1589_v48, %v1498_v58 }
 0x1b3   : > { %v1690_v49 = vpop.f32.mrf.mxu0  ;;  %v1694_v2 = vadd.f32 %v1688_v46, %v1595_v60 }
 0x1b4   : > { %v1430_v50 = vpop.f32.mrf.mxu1  ;;  %v1884_v51 = vpop.f32.mrf.mxu2 }
 0x1b8   : > { %v1591_v52 = vpop.f32.mrf.mxu3 }
 0x1bb   : > { %v2097_v10 = vpop.f32.mrf.mxu0 }
 0x1bc   : > { %v1792_v53 = vpop.f32.mrf.mxu1  ;;  %v1887_v22 = vpop.f32.mrf.mxu2 }
 0x1bd   : > { %v1801_v1 = vadd.f32 %v1792_v53, %v1692_v41 }
 0x1bf   : > { %v1891_v5 = vadd.f32 %v1882_v44, %v1801_v1 }
 0x1c0   : > { %v1987_v54 = vpop.f32.mrf.mxu3 }
 0x1c1   : > { %v1996_v13 = vadd.f32 %v1987_v54, %v1891_v5 }
 0x1c3   : > { %v2106_v18 = vadd.f32 %v2097_v10, %v1996_v13  ;;  %v2099_v16 = vpop.f32.mrf.mxu0 }
 0x1c4   : > { %v1794_v55 = vpop.f32.mrf.mxu1  ;;  %v1889_v56 = vpop.f32.mrf.mxu2 }
 0x1c5   : > { %v1802_v8 = vadd.f32 %v1794_v55, %v1693_v6 }
 0x1c7   : > { %v1892_v15 = vadd.f32 %v1884_v51, %v1802_v8 }
 0x1c8   : > { %v1989_v57 = vpop.f32.mrf.mxu3 }
 0x1c9   : > { %v1997_v19 = vadd.f32 %v1989_v57, %v1892_v15 }
 0x1cb   : > { %v2107_v27 = vadd.f32 %v2099_v16, %v1997_v19 }
 0x1cc   : > { %v1797_v59 = vpop.f32.mrf.mxu1  ;;  %v2102_v61 = vpop.f32.mrf.mxu2 }
 0x1cd   : > { %v1803_v3 = vadd.f32 %v1797_v59, %v1694_v2 }
 0x1cf   : > { %v1893_v9 = vadd.f32 %v1887_v22, %v1803_v3 }
 0x1d0   : > { %v1992_v63 = vpop.f32.mrf.mxu3 }
 0x1d1   : > { %v1998_v14 = vadd.f32 %v1992_v63, %v1893_v9 }
 0x1d3   : > { %v2108_v21 = vadd.f32 %v2102_v61, %v1998_v14 }
 0x1d4   : > { %v1799_v4 = vpop.f32.mrf.mxu1  ;;  %v2104_v7 = vpop.f32.mrf.mxu2 }
 0x1d8   : > { %v1994_v12 = vpop.f32.mrf.mxu3 }
 0x1dc   : > { %v2192_v17 = vpop.f32.mrf.mxu1 }
 0x1dd   : > { %v2201_v20 = vadd.f32 %v2192_v17, %v2106_v18 }
 0x1df   : > { %v2207_v25 = vadd.f32 %v3366_v11, %v2201_v20 }
 0x1e0   : > { %v2197_v23 = vpop.f32.mrf.mxu3 }
 0x1e1   : > { %v2203_v24 = vadd.f32 %v2197_v23, %v2108_v21  ;;  %v2213_v31 = vmul.f32 0.1, %v2207_v25  ;;  %vm2210_vm2 = vcmp.ge.f32.partialorder %v2207_v25, 0.0 }
 0x1e3   : > { %v2209_v26 = vadd.f32 %v3366_v11, %v2203_v24  ;;  %v2216_v37 = vsel %vm2210_vm2, %v2207_v25, %v2213_v31 }
 0x1e4   : > { %v2194_v28 = vpop.f32.mrf.mxu1 }
 0x1e5   : > { %vm2212_vm0 = vcmp.ge.f32.partialorder %v2209_v26, 0.0  ;;  %v2215_v29 = vmul.f32 0.1, %v2209_v26  ;;  %v2202_v30 = vadd.f32 %v2194_v28, %v2107_v27 }
 0x1e7   : > { %v2218_v32 = vsel %vm2212_vm0, %v2209_v26, %v2215_v29  ;;  %v2208_v33 = vadd.f32 %v3366_v11, %v2202_v30 }
 0x1e8   : > { %v2221_v34 = vpack.c.bf16 %v2218_v32, %v2218_v32  ;;  %v2199_v35 = vpop.f32.mrf.mxu3 }
 0x1e9   : > { %vm2211_vm3 = vcmp.ge.f32.partialorder %v2208_v33, 0.0  ;;  %v2214_v36 = vmul.f32 0.1, %v2208_v33 }
 0x1ea   : > { %2224 = vst [vmem:[%s251_s23 + $0x8] sm:$0xf] %v2221_v34 }
 0x1eb   : > { %v2217_v38 = vsel %vm2211_vm3, %v2208_v33, %v2214_v36 }
 0x1ec   : > { %v3330_v39 = vpack.c.bf16 %v2217_v38, %v2216_v37 }
 0x1ee   : > { %3331 = vst [vmem:[%s251_s23] sm:$0xff] %v3330_v39  }
 0x1ef PF: > { %s16_s21 = sadd.s32 1, %s3373_s21  }
 0x1f0   : > { %p13_p4 = scmp.ge.s32.totalorder %s16_s21, 4  }
 0x1f2   :  { %15 = sbr.rel (!%p13_p4) target bundleno = 1 (0x1), region = 90 }

// kernel: _lambda_.6
= control target key start
LH: loop header
LB: loop body
LE: loop exit
PB: predicated region body
PF: predicated region fallthrough
CT: control target
= control target key end

     0   :  { %s2966_s21 = smov 0   ;;  %s3452_s0 = inlined_call_operand.vmem [shape: f32[8,1], index: 0, kind: input, shape index: {}]   ;;  %s3453_s1 = inlined_call_operand.vmem [shape: bf16[2,64,128], index: 1, kind: input, shape index: {}]   ;;  %s3454_s2 = inlined_call_operand.vmem [shape: bf16[9,128,128], index: 2, kind: input, shape index: {}]   ;;  %s3455_s3 = inlined_call_operand.vmem [shape: f32[1,128], index: 3, kind: input, shape index: {}]   ;;  %s3456_s4 = inlined_call_operand.vmem [shape: bf16[9,128,128], index: 4, kind: input, shape index: {}]   ;;  %s3457_s5 = inlined_call_operand.vmem [shape: f32[1,128], index: 5, kind: input, shape index: {}]   ;;  %s3458_s6 = inlined_call_operand.vmem [shape: bf16[2,8,128], index: 6, kind: output, shape index: {}]  }
   0x1 LB: > { %s1908_s22 = sadd.s32 4294967295, %s2928_s21   ;;  %p1912_p0 = scmp.ge.s32.totalorder %s2928_s21, 1  ;;  %s2928_s21 = sphi %s2966_s21, %s16_s21  }
   0x2   : > { %p212_p1 = scmp.lt.s32.totalorder %s2928_s21, 3 }
   0x4   : > { %p213_p2 = pnand %p1912_p0, %p212_p1 }
   0x5   : > { %p241_p3 = scmp.lt.s32.totalorder (!%p213_p2), %s1908_s22, 1 }
   0x6   : > { %216 = sbr.rel (%p213_p2) target bundleno = 439 (0x1b7), region = 44 }
   0xb   : > { %v2778_v0 = vld [vmem:[%s3454_s2 + $0x78] sm:$0xff]  ;;  %v2777_v4 = vld [vmem:[%s3454_s2 + $0x70] sm:$0xff]  ;;  %s3460_s22 = smov (!%p241_p3, %s1908_s22), 1  ;;  %v2776_v8 = vld [vmem:[%s3454_s2 + $0x68] sm:$0xff]  ;;  %vm1054_vm1 = vcmask 1043458   ;;  %vm1060_vm3 = vcmask 1042432  }
   0xc   : > { %v2787_v1 = vld [vmem:[%s3454_s2 + $0xb8] sm:$0xff]  ;;  %338 = vmatpush.bf16.msra.mxu0 %v2778_v0  ;;  %v2786_v5 = vld [vmem:[%s3454_s2 + $0xb0] sm:$0xff]  ;;  %v2785_v9 = vld [vmem:[%s3454_s2 + $0xa8] sm:$0xff]  ;;  %s2762_s25 = sshll.u32 %s3460_s22, 5  ;;  %vm1055_vm2 = vsmask.f32 7946 }
   0xd   : > { %v2795_v2 = vld [vmem:[%s3454_s2 + $0xf8] sm:$0xff]  ;;  %492 = vmatpush.bf16.msra.mxu2 %v2787_v1  ;;  %v2794_v6 = vld [vmem:[%s3454_s2 + $0xf0] sm:$0xff]  ;;  %v2793_v10 = vld [vmem:[%s3454_s2 + $0xe8] sm:$0xff]  ;;  %s3028_s12 = scalar_lea.vmem %s3453_s1, %s2762_s25  ;;  %vm1061_vm4 = vsmask.f32 2304  ;;  %s1915_s16 = sshll.u32 %s3460_s22, 2 }
   0xe   : > { %v2770_v3 = vld [vmem:[%s3454_s2 + $0x38] sm:$0xff]  ;;  %572 = vmatpush.bf16.msra.mxu3 %v2795_v2  ;;  %v2769_v7 = vld [vmem:[%s3454_s2 + $0x30] sm:$0xff]  ;;  %v2768_v11 = vld [vmem:[%s3454_s2 + $0x28] sm:$0xff]  ;;  %s249_s18 = scalar_lea.vmem %s3458_s6, %s1915_s16 }
   0xf   : > { %399 = vmatpush.bf16.msra.mxu1 %v2770_v3  ;;  %v2775_v12 = vld [vmem:[%s3454_s2 + $0x60] sm:$0xff]  ;;  %v2774_v16 = vld [vmem:[%s3454_s2 + $0x58] sm:$0xff]  ;;  %v2773_v22 = vld [vmem:[%s3454_s2 + $0x50] sm:$0xff] }
  0x10   : > { %339 = vmatpush.bf16.msra.mxu0 %v2777_v4  ;;  %v2784_v13 = vld [vmem:[%s3454_s2 + $0xa0] sm:$0xff]  ;;  %v2783_v17 = vld [vmem:[%s3454_s2 + $0x98] sm:$0xff]  ;;  %v2782_v23 = vld [vmem:[%s3454_s2 + $0x90] sm:$0xff] }
  0x11   : > { %493 = vmatpush.bf16.msra.mxu2 %v2786_v5  ;;  %v2792_v14 = vld [vmem:[%s3454_s2 + $0xe0] sm:$0xff]  ;;  %v2791_v18 = vld [vmem:[%s3454_s2 + $0xd8] sm:$0xff]  ;;  %v2790_v25 = vld [vmem:[%s3454_s2 + $0xd0] sm:$0xff] }
  0x12   : > { %573 = vmatpush.bf16.msra.mxu3 %v2794_v6  ;;  %v2767_v15 = vld [vmem:[%s3454_s2 + $0x20] sm:$0xff]  ;;  %v2766_v19 = vld [vmem:[%s3454_s2 + $0x18] sm:$0xff]  ;;  %v2765_v26 = vld [vmem:[%s3454_s2 + $0x10] sm:$0xff] }
  0x13   : > { %400 = vmatpush.bf16.msra.mxu1 %v2769_v7  ;;  %v2014_v20 = vld [vmem:[%s3028_s12] sm:$0xf]  ;;  %v2779_v21 = vld [vmem:[%s3028_s12] sm:$0x10]  ;;  %v2772_v27 = vld [vmem:[%s3454_s2 + $0x48] sm:$0xff] }
  0x14   : > { %340 = vmatpush.bf16.msra.mxu0 %v2776_v8  ;;  %v2015_v24 = vor.u32 %v2779_v21, %v2014_v20  ;;  %v2781_v28 = vld [vmem:[%s3454_s2 + $0x88] sm:$0xff]  ;;  %v2771_v32 = vld [vmem:[%s3454_s2 + $0x40] sm:$0xff]  ;;  %v2803_v36 = vld [vmem:[%s3454_s2 + $0x138] sm:$0xff] }
  0x15   : > { %494 = vmatpush.bf16.msra.mxu2 %v2785_v9  ;;  %v2789_v30 = vld [vmem:[%s3454_s2 + $0xc8] sm:$0xff]  ;;  %v2780_v33 = vld [vmem:[%s3454_s2 + $0x80] sm:$0xff]  ;;  %v2820_v37 = vld [vmem:[%s3454_s2 + $0x1b8] sm:$0xff] }
  0x16   : > { %574 = vmatpush.bf16.msra.mxu3 %v2793_v10  ;;  %v439_v29 = vshll.u32 %v2015_v24, 16  ;;  %v2764_v31 = vld [vmem:[%s3454_s2 + $0x8] sm:$0xff]  ;;  %v437_v34 = vshrl.u32 %v2015_v24, 16  ;;  %v2788_v38 = vld [vmem:[%s3454_s2 + $0xc0] sm:$0xff]  ;;  %v2829_v40 = vld [vmem:[%s3454_s2 + $0x1f8] sm:$0xff] }
  0x17   : > { %401 = vmatpush.bf16.msra.mxu1 %v2768_v11  ;;  %v2763_v39 = vld [vmem:[%s3454_s2] sm:$0xff]  ;;  %v2812_v41 = vld [vmem:[%s3454_s2 + $0x178] sm:$0xff]  ;;  %v2802_v43 = vld [vmem:[%s3454_s2 + $0x130] sm:$0xff] }
  0x18   : > { %341 = vmatpush.bf16.msra.mxu0 %v2775_v12  ;;  %v441_v35 = vrot.slane %v439_v29, 1  ;;  %v2819_v44 = vld [vmem:[%s3454_s2 + $0x1b0] sm:$0xff]  ;;  %v272_v45 = vld [vmem:[%s3028_s12 + $0x8] sm:$0xf]  ;;  %v255_v49 = vld [vmem:[%s3028_s12] sm:$0xf] }
  0x19   : > { %495 = vmatpush.bf16.msra.mxu2 %v2784_v13  ;;  %v2828_v46 = vld [vmem:[%s3454_s2 + $0x1f0] sm:$0xff]  ;;  %v2801_v50 = vld [vmem:[%s3454_s2 + $0x128] sm:$0xff]  ;;  %v2800_v54 = vld [vmem:[%s3454_s2 + $0x120] sm:$0xff]  ;;  %v2930_v29 = vmov 0  }
  0x1a   : > { %575 = vmatpush.bf16.msra.mxu3 %v2792_v14  ;;  %v442_v42 = vor.u32 %v441_v35, %v437_v34  ;;  %v2811_v47 = vld [vmem:[%s3454_s2 + $0x170] sm:$0xff]  ;;  %v2818_v51 = vld [vmem:[%s3454_s2 + $0x1a8] sm:$0xff]  ;;  %v2817_v55 = vld [vmem:[%s3454_s2 + $0x1a0] sm:$0xff]  ;;  %2919 = vset.pattern.permute.xlu0 %v2930_v29  ;;  %251 = vst [vmem:[#allocation2] sm:$0xf] %v2930_v29 }
  0x1b   : > { %402 = vmatpush.bf16.msra.mxu1 %v2767_v15  ;;  %v506_v48 = vld [vmem:[%s3028_s12 + $0x10] sm:$0xf]  ;;  %v2827_v52 = vld [vmem:[%s3454_s2 + $0x1e8] sm:$0xff]  ;;  %v2826_v56 = vld [vmem:[%s3454_s2 + $0x1e0] sm:$0xff]  ;;  %252 = vst [vmem:[#allocation2 + $0x4] sm:$0xf] %v2930_v29 }
  0x1c   : > { %342 = vmatpush.bf16.msra.mxu0 %v2774_v16  ;;  %v2810_v53 = vld [vmem:[%s3454_s2 + $0x168] sm:$0xff]  ;;  %v2809_v57 = vld [vmem:[%s3454_s2 + $0x160] sm:$0xff]  ;;  %v2799_v58 = vld [vmem:[%s3454_s2 + $0x118] sm:$0xff]  ;;  %253 = vst [vmem:[#allocation2 + $0x8] sm:$0x3] %v2930_v29 }
  0x1d   : > { %496 = vmatpush.bf16.msra.mxu2 %v2783_v17  ;;  %v2816_v59 = vld [vmem:[%s3454_s2 + $0x198] sm:$0xff]  ;;  %v2798_v62 = vld [vmem:[%s3454_s2 + $0x110] sm:$0xff]  ;;  %v3152_v2 = vld [vmem:[%s3028_s12] sm:$0xc] }
  0x1e   : > { %576 = vmatpush.bf16.msra.mxu3 %v2791_v18  ;;  %v2825_v60 = vld [vmem:[%s3454_s2 + $0x1d8] sm:$0xff]  ;;  %v2162_v63 = vld [vmem:[%s3028_s12 + $0x10] sm:$0xf]  ;;  %v2804_v0 = vld [vmem:[%s3028_s12 + $0x10] sm:$0x10]  ;;  %v781_v7 = vunpack.c.l.b16 %v3152_v2 }
  0x1f   : > { %403 = vmatpush.bf16.msra.mxu1 %v2766_v19  ;;  %v2808_v61 = vld [vmem:[%s3454_s2 + $0x158] sm:$0xff]  ;;  %v2815_v1 = vld [vmem:[%s3454_s2 + $0x190] sm:$0xff]  ;;  %v761_v3 = vld [vmem:[%s3028_s12 + $0x4] sm:$0x3]  ;;  %v2163_v6 = vor.u32 %v2804_v0, %v2162_v63 }
  0x20   : > { %343 = vmatpush.bf16.msra.mxu0 %v2773_v22  ;;  %v2824_v4 = vld [vmem:[%s3454_s2 + $0x1d0] sm:$0xff]  ;;  %v782_v8 = vunpack.c.l.b16 %v761_v3  ;;  %v2797_v9 = vld [vmem:[%s3454_s2 + $0x108] sm:$0xff]  ;;  %v2796_v17 = vld [vmem:[%s3454_s2 + $0x100] sm:$0xff] }
  0x21   : > { %497 = vmatpush.bf16.msra.mxu2 %v2782_v23  ;;  %v2807_v5 = vld [vmem:[%s3454_s2 + $0x150] sm:$0xff]  ;;  %v2814_v10 = vld [vmem:[%s3454_s2 + $0x188] sm:$0xff]  ;;  %v693_v15 = vshll.u32 %v2163_v6, 16  ;;  %v2813_v18 = vld [vmem:[%s3454_s2 + $0x180] sm:$0xff]  ;;  %v691_v23 = vshrl.u32 %v2163_v6, 16 }
  0x22   : > { %577 = vmatpush.bf16.msra.mxu3 %v2790_v25  ;;  %v2823_v11 = vld [vmem:[%s3454_s2 + $0x1c8] sm:$0xff]  ;;  %v783_v16 = vpack.c.b16 %v782_v8, %v781_v7  ;;  %v2837_v19 = vld [vmem:[%s3454_s2 + $0x238] sm:$0xff]  ;;  %v2822_v21 = vld [vmem:[%s3454_s2 + $0x1c0] sm:$0xff] }
  0x23   : > { %404 = vmatpush.bf16.msra.mxu1 %v2765_v26  ;;  %v2806_v12 = vld [vmem:[%s3454_s2 + $0x148] sm:$0xff]  ;;  %v2805_v22 = vld [vmem:[%s3454_s2 + $0x140] sm:$0xff]  ;;  %v695_v24 = vrot.slane %v693_v15, 1  ;;  %v586_v26 = vld [vmem:[%s3028_s12 + $0x18] sm:$0xf] }
  0x24   : > { %344 = vmatpush.bf16.msra.mxu0 %v2772_v27  ;;  %v2262_v13 = vld [vmem:[%s3028_s12 + $0x8] sm:$0xc]  ;;  %v2821_v14 = vld [vmem:[%s3028_s12 + $0x8] sm:$0x30]  ;;  %v784_v25 = vrot.slane %v783_v16, 2  ;;  %v2836_v27 = vld [vmem:[%s3454_s2 + $0x230] sm:$0xff] }
  0x25   : > { %498 = vmatpush.bf16.msra.mxu2 %v2781_v28  ;;  %v2263_v20 = vor.u32 %v2821_v14, %v2262_v13  ;;  %v2834_v34 = vld [vmem:[%s3454_s2 + $0x220] sm:$0xff]  ;;  %v2867_v63 = vld [vmem:[%s3456_s4 + $0xe8] sm:$0xff]  ;;  %v2848_v6 = vld [vmem:[%s3456_s4 + $0x50] sm:$0xff] }
  0x26   : > { %578 = vmatpush.bf16.msra.mxu3 %v2789_v30  ;;  %v1035_v30 = vld [vmem:[%s3452_s0] sm:$0xff]  ;;  %v2857_v13 = vld [vmem:[%s3456_s4 + $0x98] sm:$0xff]  ;;  %v2876_v29 = vld [vmem:[%s3456_s4 + $0x130] sm:$0xff] }
  0x27   : > { %405 = vmatpush.bf16.msra.mxu1 %v2764_v31  ;;  %v872_v28 = vrot.slane %v2263_v20, 2  ;;  %v696_v31 = vor.u32 %v695_v24, %v691_v23  ;;  %1038 = vperm.xlu0 %2919, %v1035_v30   ;;  %v2842_v2 = vld [vmem:[%s3456_s4 + $0x20] sm:$0xff]  ;;  %v2865_v15 = vld [vmem:[%s3456_s4 + $0xd8] sm:$0xff]  ;;  %v2856_v20 = vld [vmem:[%s3456_s4 + $0x90] sm:$0xff] }
  0x28   : > { %345 = vmatpush.bf16.msra.mxu0 %v2771_v32  ;;  %v2835_v32 = vld [vmem:[%s3454_s2 + $0x228] sm:$0xff]  ;;  %v2858_v8 = vld [vmem:[%s3456_s4 + $0xa0] sm:$0xff]  ;;  %v2885_v23 = vld [vmem:[%s3456_s4 + $0x178] sm:$0xff] }
  0x29   : > { %499 = vmatpush.bf16.msra.mxu2 %v2780_v33  ;;  %v936_v33 = vld [vmem:[%s3028_s12 + $0x4] sm:$0x7]  ;;  %vm1056_vm5 = vmand %vm1054_vm1, %vm1055_vm2 }
  0x2a   : > { %579 = vmatpush.bf16.msra.mxu3 %v2788_v38  ;;  %v955_v35 = vunpack.c.l.b16 %v936_v33  ;;  %v2832_v38 = vld [vmem:[%s3454_s2 + $0x210] sm:$0xff]  ;;  %vm1062_vm6 = vmand %vm1060_vm3, %vm1061_vm4 }
  0x2b   : > { %406 = vmatpush.bf16.msra.mxu1 %v2763_v39  ;;  %346 = vmatmul.bf16.vlgmr.msra.gmra.mxu0 %v272_v45 }
  0x2c   : > { %652 = vmatpush.bf16.msrb.mxu0 %v2803_v36  ;;  %500 = vmatmul.bf16.vlgmr.msra.gmra.mxu2 %v442_v42  ;;  %v2833_v36 = vld [vmem:[%s3454_s2 + $0x218] sm:$0xff] }
  0x2d   : > { %834 = vmatpush.bf16.msrb.mxu2 %v2820_v37  ;;  %580 = vmatmul.bf16.vlgmr.msra.gmra.mxu3 %v506_v48  ;;  %v956_v37 = vpack.c.b16 %v955_v35, %v781_v7  ;;  %v2853_v48 = vld [vmem:[%s3456_s4 + $0x78] sm:$0xff]  ;;  %v2840_v7 = vld [vmem:[%s3456_s4 + $0x10] sm:$0xff]  ;;  %v2862_v35 = vld [vmem:[%s3456_s4 + $0xc0] sm:$0xff] }
  0x2e   : > { %922 = vmatpush.bf16.msrb.mxu3 %v2829_v40  ;;  %407 = vmatmul.bf16.vlgmr.msra.gmra.mxu1 %v255_v49  ;;  %v2845_v49 = vld [vmem:[%s3456_s4 + $0x38] sm:$0xff] }
  0x2f   : > { %746 = vmatpush.bf16.msrb.mxu1 %v2812_v41  ;;  %v958_v39 = vshrl.u32 %v956_v37, 16  ;;  %v961_v40 = vshll.u32 %v956_v37, 16  ;;  %v2831_v41 = vld [vmem:[%s3454_s2 + $0x208] sm:$0xff] }
  0x30   : > { %653 = vmatpush.bf16.msrb.mxu0 %v2802_v43  ;;  %v2883_v37 = vld [vmem:[%s3456_s4 + $0x168] sm:$0xff] }
  0x31   : > { %835 = vmatpush.bf16.msrb.mxu2 %v2819_v44  ;;  %v960_v42 = vrot.slane %v958_v39, 2  ;;  %v963_v43 = vrot.slane %v961_v40, 3  ;;  %v2830_v44 = vld [vmem:[%s3454_s2 + $0x200] sm:$0xff] }
  0x32   : > { %923 = vmatpush.bf16.msrb.mxu3 %v2828_v46 }
  0x33   : > { %747 = vmatpush.bf16.msrb.mxu1 %v2811_v47  ;;  %v964_v45 = vor.u32 %v963_v43, %v960_v42  ;;  %v2874_v42 = vld [vmem:[%s3456_s4 + $0x120] sm:$0xff] }
  0x34   : > { %654 = vmatpush.bf16.msrb.mxu0 %v2801_v50  ;;  %v2882_v43 = vld [vmem:[%s3456_s4 + $0x160] sm:$0xff] }
  0x35   : > { %836 = vmatpush.bf16.msrb.mxu2 %v2818_v51  ;;  %v2852_v51 = vld [vmem:[%s3456_s4 + $0x70] sm:$0xff] }
  0x36   : > { %924 = vmatpush.bf16.msrb.mxu3 %v2827_v52  ;;  %v2844_v52 = vld [vmem:[%s3456_s4 + $0x30] sm:$0xff] }
  0x37   : > { %748 = vmatpush.bf16.msrb.mxu1 %v2810_v53  ;;  %v2861_v53 = vld [vmem:[%s3456_s4 + $0xb8] sm:$0xff] }
  0x38   : > { %655 = vmatpush.bf16.msrb.mxu0 %v2800_v54  ;;  %v2869_v54 = vld [vmem:[%s3456_s4 + $0xf8] sm:$0xff] }
  0x39   : > { %837 = vmatpush.bf16.msrb.mxu2 %v2817_v55 }
  0x3a   : > { %925 = vmatpush.bf16.msrb.mxu3 %v2826_v56 }
  0x3b   : > { %749 = vmatpush.bf16.msrb.mxu1 %v2809_v57  ;;  %v2860_v57 = vld [vmem:[%s3456_s4 + $0xb0] sm:$0xff] }
  0x3c   : > { %656 = vmatpush.bf16.msrb.mxu0 %v2799_v58  ;;  %v2868_v58 = vld [vmem:[%s3456_s4 + $0xf0] sm:$0xff] }
  0x3d   : > { %838 = vmatpush.bf16.msrb.mxu2 %v2816_v59 }
  0x3e   : > { %926 = vmatpush.bf16.msrb.mxu3 %v2825_v60  ;;  %v2851_v60 = vld [vmem:[%s3456_s4 + $0x68] sm:$0xff] }
  0x3f   : > { %750 = vmatpush.bf16.msrb.mxu1 %v2808_v61  ;;  %v2843_v61 = vld [vmem:[%s3456_s4 + $0x28] sm:$0xff] }
  0x40   : > { %657 = vmatpush.bf16.msrb.mxu0 %v2798_v62  ;;  %v2859_v62 = vld [vmem:[%s3456_s4 + $0xa8] sm:$0xff] }
  0x41   : > { %839 = vmatpush.bf16.msrb.mxu2 %v2815_v1  ;;  %v2850_v1 = vld [vmem:[%s3456_s4 + $0x60] sm:$0xff] }
  0x42   : > { %927 = vmatpush.bf16.msrb.mxu3 %v2824_v4  ;;  %v2849_v4 = vld [vmem:[%s3456_s4 + $0x58] sm:$0xff] }
  0x43   : > { %751 = vmatpush.bf16.msrb.mxu1 %v2807_v5  ;;  %v2841_v5 = vld [vmem:[%s3456_s4 + $0x18] sm:$0xff] }
  0x44   : > { %658 = vmatpush.bf16.msrb.mxu0 %v2797_v9  ;;  %v2866_v9 = vld [vmem:[%s3456_s4 + $0xe0] sm:$0xff] }
  0x45   : > { %840 = vmatpush.bf16.msrb.mxu2 %v2814_v10 }
  0x46   : > { %928 = vmatpush.bf16.msrb.mxu3 %v2823_v11  ;;  %v2847_v11 = vld [vmem:[%s3456_s4 + $0x48] sm:$0xff] }
  0x47   : > { %752 = vmatpush.bf16.msrb.mxu1 %v2806_v12  ;;  %v2839_v12 = vld [vmem:[%s3456_s4 + $0x8] sm:$0xff] }
  0x48   : > { %659 = vmatpush.bf16.msrb.mxu0 %v2796_v17  ;;  %v2846_v17 = vld [vmem:[%s3456_s4 + $0x40] sm:$0xff] }
  0x49   : > { %841 = vmatpush.bf16.msrb.mxu2 %v2813_v18 }
  0x4a   : > { %929 = vmatpush.bf16.msrb.mxu3 %v2822_v21  ;;  %v2864_v21 = vld [vmem:[%s3456_s4 + $0xd0] sm:$0xff] }
  0x4b   : > { %753 = vmatpush.bf16.msrb.mxu1 %v2805_v22  ;;  %660 = vmatmul.bf16.vlgmr.msrb.gmra.mxu0 %v586_v26  ;;  %v2877_v22 = vld [vmem:[%s3456_s4 + $0x138] sm:$0xff] }
  0x4c   : > { %1014 = vmatpush.bf16.msra.mxu0 %v2837_v19  ;;  %842 = vmatmul.bf16.vlgmr.msrb.gmra.mxu2 %v784_v25  ;;  %v2838_v19 = vld [vmem:[%s3456_s4] sm:$0xff] }
  0x4d   : > { %930 = vmatmul.bf16.vlgmr.msrb.gmra.mxu3 %v872_v28  ;;  %1224 = vmatpush.bf16.msra.mxu2 %v2845_v49  ;;  %v2863_v28 = vld [vmem:[%s3456_s4 + $0xc8] sm:$0xff] }
  0x4e   : > { %754 = vmatmul.bf16.vlgmr.msrb.gmra.mxu1 %v696_v31  ;;  %1308 = vmatpush.bf16.msra.mxu3 %v2861_v53  ;;  %v2884_v31 = vld [vmem:[%s3456_s4 + $0x170] sm:$0xff]  ;;  %v2891_v49 = vld [vmem:[%s3456_s4 + $0x1a8] sm:$0xff] }
  0x4f   : > { %1163 = vmatpush.bf16.msra.mxu1 %v2853_v48  ;;  %v2881_v48 = vld [vmem:[%s3456_s4 + $0x158] sm:$0xff]  ;;  %v2880_v53 = vld [vmem:[%s3456_s4 + $0x150] sm:$0xff] }
  0x50   : > { %1015 = vmatpush.bf16.msra.mxu0 %v2836_v27  ;;  %v2855_v27 = vld [vmem:[%s3456_s4 + $0x88] sm:$0xff] }
  0x51   : > { %1225 = vmatpush.bf16.msra.mxu2 %v2844_v52  ;;  %v2872_v52 = vld [vmem:[%s3456_s4 + $0x110] sm:$0xff] }
  0x52   : > { %1309 = vmatpush.bf16.msra.mxu3 %v2860_v57  ;;  %v2920_v57 = vld [vmem:[%s3455_s3] ss:$0 sm:$0xff] }
  0x53   : > { %1164 = vmatpush.bf16.msra.mxu1 %v2852_v51 }
  0x54   : > { %1016 = vmatpush.bf16.msra.mxu0 %v2835_v32 }
  0x55   : > { %1226 = vmatpush.bf16.msra.mxu2 %v2843_v61  ;;  %v2879_v61 = vld [vmem:[%s3456_s4 + $0x148] sm:$0xff] }
  0x56   : > { %1310 = vmatpush.bf16.msra.mxu3 %v2859_v62  ;;  %v2889_v62 = vld [vmem:[%s3456_s4 + $0x198] sm:$0xff] }
  0x57   : > { %1165 = vmatpush.bf16.msra.mxu1 %v2851_v60  ;;  %v2871_v60 = vld [vmem:[%s3456_s4 + $0x108] sm:$0xff] }
  0x58   : > { %1017 = vmatpush.bf16.msra.mxu0 %v2834_v34  ;;  %v2854_v34 = vld [vmem:[%s3456_s4 + $0x80] sm:$0xff] }
  0x59   : > { %1227 = vmatpush.bf16.msra.mxu2 %v2842_v2 }
  0x5a   : > { %1311 = vmatpush.bf16.msra.mxu3 %v2858_v8 }
  0x5b   : > { %1166 = vmatpush.bf16.msra.mxu1 %v2850_v1 }
  0x5c   : > { %1018 = vmatpush.bf16.msra.mxu0 %v2833_v36  ;;  %v2875_v36 = vld [vmem:[%s3456_s4 + $0x128] sm:$0xff] }
  0x5d   : > { %1228 = vmatpush.bf16.msra.mxu2 %v2841_v5  ;;  %v2888_v5 = vld [vmem:[%s3456_s4 + $0x190] sm:$0xff] }
  0x5e   : > { %1312 = vmatpush.bf16.msra.mxu3 %v2857_v13 }
  0x5f   : > { %1167 = vmatpush.bf16.msra.mxu1 %v2849_v4  ;;  %v2878_v4 = vld [vmem:[%s3456_s4 + $0x140] sm:$0xff] }
  0x60   : > { %1019 = vmatpush.bf16.msra.mxu0 %v2832_v38  ;;  %v2893_v38 = vld [vmem:[%s3456_s4 + $0x1b8] sm:$0xff] }
  0x61   : > { %1229 = vmatpush.bf16.msra.mxu2 %v2840_v7 }
  0x62   : > { %1313 = vmatpush.bf16.msra.mxu3 %v2856_v20 }
  0x63   : > { %1168 = vmatpush.bf16.msra.mxu1 %v2848_v6  ;;  %v2896_v6 = vld [vmem:[%s3456_s4 + $0x1d0] sm:$0xff] }
  0x64   : > { %1020 = vmatpush.bf16.msra.mxu0 %v2831_v41  ;;  %v2901_v41 = vld [vmem:[%s3456_s4 + $0x1f8] sm:$0xff] }
  0x65   : > { %1230 = vmatpush.bf16.msra.mxu2 %v2839_v12  ;;  %v2895_v12 = vld [vmem:[%s3456_s4 + $0x1c8] sm:$0xff] }
  0x66   : > { %1314 = vmatpush.bf16.msra.mxu3 %v2855_v27 }
  0x67   : > { %1169 = vmatpush.bf16.msra.mxu1 %v2847_v11  ;;  %v2887_v11 = vld [vmem:[%s3456_s4 + $0x188] sm:$0xff] }
  0x68   : > { %1021 = vmatpush.bf16.msra.mxu0 %v2830_v44  ;;  %v2892_v44 = vld [vmem:[%s3456_s4 + $0x1b0] sm:$0xff] }
  0x69   : > { %1231 = vmatpush.bf16.msra.mxu2 %v2838_v19  ;;  %v1057_v19 = vld [vmem:[#allocation2] sm:$0xc] }
  0x6a   : > { %1315 = vmatpush.bf16.msra.mxu3 %v2854_v34 }
  0x6b   : > { %1022 = vmatmul.bf16.vlgmr.msra.gmra.mxu0 %v964_v45  ;;  %1170 = vmatpush.bf16.msra.mxu1 %v2846_v17  ;;  %v2900_v45 = vld [vmem:[%s3456_s4 + $0x1f0] sm:$0xff] }
  0x6c   : > { %1396 = vmatpush.bf16.msrb.mxu0 %v2869_v54  ;;  %v2890_v54 = vld [vmem:[%s3456_s4 + $0x1a0] sm:$0xff] }
  0x6d   : > { %1573 = vmatpush.bf16.msrb.mxu2 %v2885_v23 }
  0x6e   : > { %1653 = vmatpush.bf16.msrb.mxu3 %v2893_v38 }
  0x6f   : > { %1488 = vmatpush.bf16.msrb.mxu1 %v2877_v22 }
  0x70   : > { %1397 = vmatpush.bf16.msrb.mxu0 %v2868_v58 }
  0x71   : > { %1574 = vmatpush.bf16.msrb.mxu2 %v2884_v31 }
  0x72   : > { %1654 = vmatpush.bf16.msrb.mxu3 %v2892_v44 }
  0x73   : > { %1489 = vmatpush.bf16.msrb.mxu1 %v2876_v29 }
  0x74   : > { %1398 = vmatpush.bf16.msrb.mxu0 %v2867_v63  ;;  %v2897_v63 = vld [vmem:[%s3456_s4 + $0x1d8] sm:$0xff] }
  0x75   : > { %1575 = vmatpush.bf16.msrb.mxu2 %v2883_v37 }
  0x76   : > { %1655 = vmatpush.bf16.msrb.mxu3 %v2891_v49 }
  0x77   : > { %1490 = vmatpush.bf16.msrb.mxu1 %v2875_v36  ;;  %v1668_v36 = vld [vmem:[#allocation2 + $0x8] sm:$0x1] }
  0x78   : > { %1399 = vmatpush.bf16.msrb.mxu0 %v2866_v9 }
  0x79   : > { %1576 = vmatpush.bf16.msrb.mxu2 %v2882_v43  ;;  %v1689_v43 = vunpack.c.l.b16 %v1668_v36 }
  0x7a   : > { %1656 = vmatpush.bf16.msrb.mxu3 %v2890_v54 }
  0x7b   : > { %1491 = vmatpush.bf16.msrb.mxu1 %v2874_v42 }
  0x7c   : > { %1400 = vmatpush.bf16.msrb.mxu0 %v2865_v15  ;;  %v2886_v15 = vld [vmem:[%s3456_s4 + $0x180] sm:$0xff] }
  0x7d   : > { %1577 = vmatpush.bf16.msrb.mxu2 %v2881_v48 }
  0x7e   : > { %1657 = vmatpush.bf16.msrb.mxu3 %v2889_v62 }
  0x80   : > { %1401 = vmatpush.bf16.msrb.mxu0 %v2864_v21  ;;  %v1063_v21 = vld [vmem:[#allocation2 + $0x4] sm:$0x7] }
  0x81   : > { %1578 = vmatpush.bf16.msrb.mxu2 %v2880_v53 }
  0x82   : > { %1658 = vmatpush.bf16.msrb.mxu3 %v2888_v5  ;;  %v2905_v5 = vld [vmem:[%s3456_s4 + $0x218] sm:$0xff] }
  0x84   : > { %1402 = vmatpush.bf16.msrb.mxu0 %v2863_v28 }
  0x85   : > { %1579 = vmatpush.bf16.msrb.mxu2 %v2879_v61 }
  0x86   : > { %1659 = vmatpush.bf16.msrb.mxu3 %v2887_v11  ;;  %v2902_v11 = vld [vmem:[%s3456_s4 + $0x200] sm:$0xff] }
  0x88   : > { %1403 = vmatpush.bf16.msrb.mxu0 %v2862_v35 }
  0x89   : > { %1580 = vmatpush.bf16.msrb.mxu2 %v2878_v4 }
  0x8a   : > { %1660 = vmatpush.bf16.msrb.mxu3 %v2886_v15 }
  0x8c   : > { %1747 = vmatpush.bf16.msra.mxu0 %v2901_v41 }
  0x90   : > { %1748 = vmatpush.bf16.msra.mxu0 %v2900_v45 }
  0x99   : > { %v1039_v1 = vpop.permute.xlu0 %1038 }
  0xa8   : > { %v347_v46 = vpop.f32.mrf.mxu0 }
  0xab   : > { %v408_v47 = vpop.f32.mrf.mxu1 }
  0xac   : > { %v409_v16 = vadd.f32 %v408_v47, %v347_v46  ;;  %v2873_v47 = vld [vmem:[%s3456_s4 + $0x118] sm:$0xff] }
  0xad   : > { %1492 = vmatpush.bf16.msrb.mxu1 %v2873_v47 }
  0xaf   : > { %v3223_v50 = vpop.f32.mrf.mxu2 }
  0xb0   : > { %v3237_v55 = vpop.f32.mrf.mxu3  ;;  %v349_v56 = vpop.f32.mrf.mxu0  ;;  %v505_v24 = vadd.f32 %v3223_v50, %v409_v16  ;;  %v2899_v50 = vld [vmem:[%s3456_s4 + $0x1e8] sm:$0xff] }
  0xb1   : > { %1749 = vmatpush.bf16.msra.mxu0 %v2899_v50  ;;  %1493 = vmatpush.bf16.msrb.mxu1 %v2872_v52 }
  0xb2   : > { %v585_v32 = vadd.f32 %v3237_v55, %v505_v24  ;;  %v2898_v55 = vld [vmem:[%s3456_s4 + $0x1e0] sm:$0xff] }
  0xb3   : > { %v410_v59 = vpop.f32.mrf.mxu1 }
  0xb5   : > { %1750 = vmatpush.bf16.msra.mxu0 %v2898_v55  ;;  %1494 = vmatpush.bf16.msrb.mxu1 %v2871_v60  ;;  %v2908_v55 = vld [vmem:[%s3456_s4 + $0x230] sm:$0xff] }
  0xb7   : > { %v503_v0 = vpop.f32.mrf.mxu2 }
  0xb8   : > { %v583_v3 = vpop.f32.mrf.mxu3 }
  0xb9   : > { %v2870_v3 = vld [vmem:[%s3456_s4 + $0x100] sm:$0xff]  ;;  %1751 = vmatpush.bf16.msra.mxu0 %v2897_v63 }
  0xba   : > { %1495 = vmatpush.bf16.msrb.mxu1 %v2870_v3 }
  0xbd   : > { %1752 = vmatpush.bf16.msra.mxu0 %v2896_v6 }
  0xc1   : > { %1753 = vmatpush.bf16.msra.mxu0 %v2895_v12 }
  0xc8   : > { %v661_v10 = vpop.f32.mrf.mxu0 }
  0xc9   : > { %v665_v39 = vadd.f32 %v661_v10, %v585_v32 }
  0xcb   : > { %v755_v14 = vpop.f32.mrf.mxu1 }
  0xcc   : > { %v759_v46 = vadd.f32 %v755_v14, %v665_v39 }
  0xcf   : > { %v843_v18 = vpop.f32.mrf.mxu2 }
  0xd0   : > { %v931_v25 = vpop.f32.mrf.mxu3  ;;  %v663_v26 = vpop.f32.mrf.mxu0  ;;  %v847_v51 = vadd.f32 %v843_v18, %v759_v46  ;;  %v2894_v18 = vld [vmem:[%s3456_s4 + $0x1c0] sm:$0xff] }
  0xd1   : > { %1754 = vmatpush.bf16.msra.mxu0 %v2894_v18 }
  0xd2   : > { %v935_v56 = vadd.f32 %v931_v25, %v847_v51  ;;  %v2909_v51 = vld [vmem:[%s3456_s4 + $0x238] sm:$0xff] }
  0xd3   : > { %v757_v30 = vpop.f32.mrf.mxu1 }
  0xd7   : > { %v845_v33 = vpop.f32.mrf.mxu2 }
  0xd8   : > { %v933_v40 = vpop.f32.mrf.mxu3 }
  0xe8   : > { %v1023_v58 = vpop.f32.mrf.mxu0 }
  0xe9   : > { %v1027_v59 = vadd.f32 %v1023_v58, %v935_v56 }
  0xeb   : > { %v1031_v0 = vadd.f32 %v2920_v57, %v1027_v59  ;;  %v2907_v59 = vld [vmem:[%s3456_s4 + $0x228] sm:$0xff] }
  0xed   : > { %vm1032_vm0 = vcmp.ge.f32.partialorder %v1031_v0, 0.0  ;;  %v1033_v2 = vmul.f32 0.1, %v1031_v0 }
  0xef   : > { %v1034_v7 = vsel %vm1032_vm0, %v1031_v0, %v1033_v2  ;;  %v2906_v0 = vld [vmem:[%s3456_s4 + $0x220] sm:$0xff] }
  0xf0   : > { %v1041_v8 = vmul.f32 %v1039_v1, %v1034_v7  ;;  %v1025_v9 = vpop.f32.mrf.mxu0  ;;  %v2904_v7 = vld [vmem:[%s3456_s4 + $0x210] sm:$0xff] }
  0xf1   : > { %v2903_v9 = vld [vmem:[%s3456_s4 + $0x208] sm:$0xff] }
  0xf2   : > { %v1042_v10 = vpack.c.bf16 %v1041_v8, %v1041_v8 }
  0xf4   : > { %v1044_v13 = vshrl.u32 %v1042_v10, 16  ;;  %v1047_v14 = vshll.u32 %v1042_v10, 16 }
  0xf6   : > { %v1046_v16 = vrot.slane %v1044_v13, 5  ;;  %v1049_v17 = vrot.slane %v1047_v14, 6 }
  0xf8   : > { %v1050_v20 = vor.u32 %v1049_v17, %v1046_v16 }
  0xfa   : > { %v1051_v22 = vrot.slane %v1050_v20, 4  ;;  %v1058_v23 = vsel %vm1056_vm5, %v1050_v20, %v1057_v19 }
  0xfb   : > { %1059 = vst [vmem:[#allocation2] sm:$0xc] %v1058_v23 }
  0xfc   : > { %v1064_v24 = vsel %vm1062_vm6, %v1051_v22, %v1063_v21 }
  0xfd   : > { %1065 = vst [vmem:[#allocation2 + $0x4] sm:$0x7] %v1064_v24 }
 0x102   : > { %v1067_v25 = vld [vmem:[#allocation2] sm:$0xf] }
 0x103   : > { %v1237_v26 = vld [vmem:[#allocation2] sm:$0xe]  ;;  %1232 = vmatmul.bf16.vlgmr.msra.gmra.mxu2 %v1067_v25  ;;  %v1104_v29 = vunpack.c.l.b16 %v1067_v25 }
 0x104   : > { %v1322_v27 = vld [vmem:[#allocation2] sm:$0xc]  ;;  %v1084_v28 = vld [vmem:[#allocation2 + $0x4] sm:$0x1]  ;;  %v1256_v32 = vunpack.c.l.b16 %v1237_v26  ;;  %v1761_v8 = vld [vmem:[#allocation2 + $0x4] sm:$0xe] }
 0x105   : > { %v1323_v30 = vld [vmem:[#allocation2 + $0x4] sm:$0x3]  ;;  %v1105_v31 = vunpack.c.l.b16 %v1084_v28  ;;  %v1343_v33 = vunpack.c.l.b16 %v1322_v27  ;;  %v1502_v42 = vld [vmem:[#allocation2] sm:$0x8]  ;;  %v1780_v10 = vunpack.c.l.b16 %v1761_v8 }
 0x106   : > { %v1344_v34 = vunpack.c.l.b16 %v1323_v30  ;;  %v1410_v35 = vld [vmem:[#allocation2 + $0x4] sm:$0x7]  ;;  %v1521_v50 = vunpack.c.l.b16 %v1502_v42 }
 0x107   : > { %v1667_v37 = vld [vmem:[#allocation2 + $0x4] sm:$0xf]  ;;  %v1106_v38 = vpack.c.b16 %v1105_v31, %v1104_v29  ;;  %v1257_v39 = vpack.c.b16 %v1105_v31, %v1256_v32  ;;  %v1429_v41 = vunpack.c.l.b16 %v1410_v35  ;;  %v1781_v12 = vpack.c.b16 %v1689_v43, %v1780_v10 }
 0x108   : > { %v1345_v40 = vpack.c.b16 %v1344_v34, %v1343_v33  ;;  %v1688_v47 = vunpack.c.l.b16 %v1667_v37  ;;  %v1587_v4 = vld [vmem:[#allocation2 + $0x4] sm:$0xf]  ;;  %v2921_v37 = vld [vmem:[%s3457_s5] ss:$0 sm:$0xff] }
 0x109   : > { %v1110_v44 = vshll.u32 %v1106_v38, 16  ;;  %v1258_v45 = vrot.slane %v1257_v39, 1  ;;  %v1108_v48 = vshrl.u32 %v1106_v38, 16  ;;  %v1522_v53 = vpack.c.b16 %v1429_v41, %v1521_v50 }
 0x10a   : > { %v1346_v46 = vrot.slane %v1345_v40, 2  ;;  %v1690_v54 = vpack.c.b16 %v1689_v43, %v1688_v47  ;;  %v1430_v58 = vpack.c.b16 %v1429_v41, %v1343_v33  ;;  %v1782_v13 = vrot.slane %v1781_v12, 1 }
 0x10b   : > { %v1112_v49 = vrot.slane %v1110_v44, 1  ;;  %1316 = vmatmul.bf16.vlgmr.msra.gmra.mxu3 %v1258_v45  ;;  %v1523_v56 = vrot.slane %v1522_v53, 3 }
 0x10c   : > { %1404 = vmatmul.bf16.vlgmr.msrb.gmra.mxu0 %v1346_v46  ;;  %v1694_v57 = vshll.u32 %v1690_v54, 16  ;;  %v1432_v61 = vshrl.u32 %v1430_v58, 16  ;;  %v1435_v62 = vshll.u32 %v1430_v58, 16  ;;  %v1692_v63 = vshrl.u32 %v1690_v54, 16 }
 0x10d   : > { %v1113_v52 = vor.u32 %v1112_v49, %v1108_v48 }
 0x10e   : > { %v1696_v60 = vrot.slane %v1694_v57, 1  ;;  %v1434_v2 = vrot.slane %v1432_v61, 2  ;;  %v1437_v3 = vrot.slane %v1435_v62, 3 }
 0x10f   : > { %1171 = vmatmul.bf16.vlgmr.msra.gmra.mxu1 %v1113_v52 }
 0x110   : > { %1832 = vmatpush.bf16.msra.mxu1 %v2909_v51  ;;  %v1697_v1 = vor.u32 %v1696_v60, %v1692_v63  ;;  %v1438_v6 = vor.u32 %v1437_v3, %v1434_v2 }
 0x113   : > { %1581 = vmatmul.bf16.vlgmr.msrb.gmra.mxu2 %v1523_v56 }
 0x114   : > { %1833 = vmatpush.bf16.msra.mxu1 %v2908_v55 }
 0x118   : > { %1834 = vmatpush.bf16.msra.mxu1 %v2907_v59 }
 0x11b   : > { %1661 = vmatmul.bf16.vlgmr.msrb.gmra.mxu3 %v1587_v4 }
 0x11c   : > { %1755 = vmatmul.bf16.vlgmr.msra.gmra.mxu0 %v1697_v1  ;;  %1835 = vmatpush.bf16.msra.mxu1 %v2906_v0 }
 0x11f   : > { %1496 = vmatmul.bf16.vlgmr.msrb.gmra.mxu1 %v1438_v6 }
 0x120   : > { %1836 = vmatpush.bf16.msra.mxu1 %v2905_v5 }
 0x124   : > { %1837 = vmatpush.bf16.msra.mxu1 %v2904_v7 }
 0x128   : > { %1838 = vmatpush.bf16.msra.mxu1 %v2903_v9 }
 0x12c   : > { %1839 = vmatpush.bf16.msra.mxu1 %v2902_v11 }
 0x12f   : > { %1840 = vmatmul.bf16.vlgmr.msra.gmra.mxu1 %v1782_v13 }
 0x186   : > { %v1233_v14 = vpop.f32.mrf.mxu2 }
 0x189   : > { %v1405_v15 = vpop.f32.mrf.mxu0 }
 0x18c   : > { %v1172_v16 = vpop.f32.mrf.mxu1 }
 0x18d   : > { %v1234_v21 = vadd.f32 %v1233_v14, %v1172_v16 }
 0x18e   : > { %v1235_v17 = vpop.f32.mrf.mxu2  ;;  %v1317_v18 = vpop.f32.mrf.mxu3 }
 0x18f   : > { %v1321_v25 = vadd.f32 %v1317_v18, %v1234_v21 }
 0x191   : > { %v1407_v19 = vpop.f32.mrf.mxu0  ;;  %v1409_v27 = vadd.f32 %v1405_v15, %v1321_v25 }
 0x194   : > { %v1174_v20 = vpop.f32.mrf.mxu1 }
 0x196   : > { %v1319_v22 = vpop.f32.mrf.mxu3  ;;  %v1582_v23 = vpop.f32.mrf.mxu2 }
 0x199   : > { %v1756_v24 = vpop.f32.mrf.mxu0 }
 0x19c   : > { %v1497_v26 = vpop.f32.mrf.mxu1 }
 0x19d   : > { %v1501_v30 = vadd.f32 %v1497_v26, %v1409_v27 }
 0x19e   : > { %v1584_v28 = vpop.f32.mrf.mxu2  ;;  %v1662_v29 = vpop.f32.mrf.mxu3 }
 0x19f   : > { %v1586_v32 = vadd.f32 %v1582_v23, %v1501_v30 }
 0x1a1   : > { %v1758_v31 = vpop.f32.mrf.mxu0  ;;  %v1666_v35 = vadd.f32 %v1662_v29, %v1586_v32 }
 0x1a3   : > { %v1760_v36 = vadd.f32 %v1756_v24, %v1666_v35 }
 0x1a4   : > { %v1499_v33 = vpop.f32.mrf.mxu1 }
 0x1a6   : > { %v1664_v34 = vpop.f32.mrf.mxu3 }
 0x1ac   : > { %v1841_v38 = vpop.f32.mrf.mxu1 }
 0x1ad   : > { %v1845_v39 = vadd.f32 %v1841_v38, %v1760_v36 }
 0x1af   : > { %v1849_v40 = vadd.f32 %v2921_v37, %v1845_v39 }
 0x1b1   : > { %vm1850_vm7 = vcmp.ge.f32.partialorder %v1849_v40, 0.0  ;;  %v1851_v41 = vmul.f32 0.1, %v1849_v40 }
 0x1b3   : > { %v1852_v42 = vsel %vm1850_vm7, %v1849_v40, %v1851_v41 }
 0x1b4   : > { %v1853_v43 = vpack.c.bf16 %v1852_v42, %v1852_v42  ;;  %v1843_v44 = vpop.f32.mrf.mxu1 }
 0x1b6   : > { %1854 = vst [vmem:[%s249_s18] sm:$0xf] %v1853_v43 }
 0x1b7 PF: > { %s16_s21 = sadd.s32 1, %s2928_s21  }
 0x1b8   : > { %p13_p4 = scmp.ge.s32.totalorder %s16_s21, 4  }
 0x1ba   :  { %15 = sbr.rel (!%p13_p4) target bundleno = 1 (0x1), region = 90 }

// kernel: _lambda_.7
= control target key start
LH: loop header
LB: loop body
LE: loop exit
PB: predicated region body
PF: predicated region fallthrough
CT: control target
= control target key end

     0   :  { %s6530_s21 = smov 0   ;;  %s9280_s0 = inlined_call_operand.vmem [shape: f32[3,1], index: 0, kind: input, shape index: {}]   ;;  %s9281_s1 = inlined_call_operand.vmem [shape: bf16[2,36,128], index: 1, kind: input, shape index: {}]   ;;  %s9282_s2 = inlined_call_operand.vmem [shape: bf16[9,128,256], index: 2, kind: input, shape index: {}]   ;;  %s9283_s3 = inlined_call_operand.vmem [shape: f32[1,256], index: 3, kind: input, shape index: {}]   ;;  %s9284_s4 = inlined_call_operand.vmem [shape: bf16[9,256,256], index: 4, kind: input, shape index: {}]   ;;  %s9285_s5 = inlined_call_operand.vmem [shape: f32[1,256], index: 5, kind: input, shape index: {}]   ;;  %s9286_s6 = inlined_call_operand.vmem [shape: bf16[2,3,256], index: 6, kind: output, shape index: {}]  }
   0x1 LB: > { %s3910_s22 = sadd.s32 4294967295, %s6492_s21   ;;  %p3914_p0 = scmp.ge.s32.totalorder %s6492_s21, 1  ;;  %s6492_s21 = sphi %s6530_s21, %s16_s21  }
   0x2   : > { %p212_p1 = scmp.lt.s32.totalorder %s6492_s21, 3 }
   0x4   : > { %p213_p2 = pnand %p3914_p0, %p212_p1 }
   0x5   : > { %p242_p3 = scmp.lt.s32.totalorder (!%p213_p2), %s3910_s22, 1 }
   0x6   : > { %216 = sbr.rel (%p213_p2) target bundleno = 637 (0x27d), region = 44 }
   0xb   : > { %v3992_v0 = vld [vmem:[%s9282_s2 + $0xf0] sm:$0xf]  ;;  %v6072_v1 = vld [vmem:[%s9282_s2 + $0xf4] sm:$0xf0]  ;;  %v6071_v2 = vld [vmem:[%s9282_s2 + $0xf4] sm:$0xf] }
   0xc   : > { %v3993_v3 = vor.u32 %v6072_v1, %v3992_v0  ;;  %v3994_v4 = vld [vmem:[%s9282_s2 + $0xf8] sm:$0xf0]  ;;  %v4056_v5 = vld [vmem:[%s9282_s2 + $0x70] sm:$0xf]  ;;  %v6056_v6 = vld [vmem:[%s9282_s2 + $0x74] sm:$0xf0] }
   0xd   : > { %v3997_v7 = vor.u32 %v6071_v2, %v3994_v4  ;;  %v4057_v8 = vor.u32 %v6056_v6, %v4056_v5  ;;  %v6055_v9 = vld [vmem:[%s9282_s2 + $0x74] sm:$0xf]  ;;  %v4058_v10 = vld [vmem:[%s9282_s2 + $0x78] sm:$0xf0]  ;;  %v3984_v11 = vld [vmem:[%s9282_s2 + $0xe0] sm:$0xf] }
   0xe   : > { %382 = vmatpush.bf16.msra.mxu0 %v3993_v3  ;;  %v4061_v12 = vor.u32 %v6055_v9, %v4058_v10  ;;  %v6070_v13 = vld [vmem:[%s9282_s2 + $0xe4] sm:$0xf0]  ;;  %v6069_v14 = vld [vmem:[%s9282_s2 + $0xe4] sm:$0xf]  ;;  %v3986_v15 = vld [vmem:[%s9282_s2 + $0xe8] sm:$0xf0] }
   0xf   : > { %395 = vmatpush.bf16.msra.mxu1 %v3997_v7  ;;  %488 = vmatpush.bf16.msra.mxu2 %v4057_v8  ;;  %v3985_v16 = vor.u32 %v6070_v13, %v3984_v11  ;;  %v3989_v17 = vor.u32 %v6069_v14, %v3986_v15  ;;  %v4048_v18 = vld [vmem:[%s9282_s2 + $0x60] sm:$0xf]  ;;  %v6054_v19 = vld [vmem:[%s9282_s2 + $0x64] sm:$0xf0]  ;;  %v6053_v20 = vld [vmem:[%s9282_s2 + $0x64] sm:$0xf] }
  0x10   : > { %501 = vmatpush.bf16.msra.mxu3 %v4061_v12  ;;  %v4049_v21 = vor.u32 %v6054_v19, %v4048_v18  ;;  %v4050_v22 = vld [vmem:[%s9282_s2 + $0x68] sm:$0xf0]  ;;  %v3976_v23 = vld [vmem:[%s9282_s2 + $0xd0] sm:$0xf]  ;;  %v6068_v24 = vld [vmem:[%s9282_s2 + $0xd4] sm:$0xf0] }
  0x11   : > { %v4053_v25 = vor.u32 %v6053_v20, %v4050_v22  ;;  %v6067_v26 = vld [vmem:[%s9282_s2 + $0xd4] sm:$0xf]  ;;  %v3978_v27 = vld [vmem:[%s9282_s2 + $0xd8] sm:$0xf0]  ;;  %v4040_v28 = vld [vmem:[%s9282_s2 + $0x50] sm:$0xf]  ;;  %v3977_v29 = vor.u32 %v6068_v24, %v3976_v23 }
  0x12   : > { %383 = vmatpush.bf16.msra.mxu0 %v3985_v16  ;;  %v6052_v30 = vld [vmem:[%s9282_s2 + $0x54] sm:$0xf0]  ;;  %v6051_v31 = vld [vmem:[%s9282_s2 + $0x54] sm:$0xf]  ;;  %v4042_v32 = vld [vmem:[%s9282_s2 + $0x58] sm:$0xf0]  ;;  %v3981_v33 = vor.u32 %v6067_v26, %v3978_v27 }
  0x13   : > { %396 = vmatpush.bf16.msra.mxu1 %v3989_v17  ;;  %489 = vmatpush.bf16.msra.mxu2 %v4049_v21  ;;  %v4041_v34 = vor.u32 %v6052_v30, %v4040_v28  ;;  %v3968_v35 = vld [vmem:[%s9282_s2 + $0xc0] sm:$0xf]  ;;  %v6066_v36 = vld [vmem:[%s9282_s2 + $0xc4] sm:$0xf0]  ;;  %v6065_v37 = vld [vmem:[%s9282_s2 + $0xc4] sm:$0xf]  ;;  %v4045_v38 = vor.u32 %v6051_v31, %v4042_v32 }
  0x14   : > { %502 = vmatpush.bf16.msra.mxu3 %v4053_v25  ;;  %v3970_v39 = vld [vmem:[%s9282_s2 + $0xc8] sm:$0xf0]  ;;  %v4032_v40 = vld [vmem:[%s9282_s2 + $0x40] sm:$0xf]  ;;  %v6050_v41 = vld [vmem:[%s9282_s2 + $0x44] sm:$0xf0]  ;;  %v3969_v44 = vor.u32 %v6066_v36, %v3968_v35 }
  0x15   : > { %v6049_v42 = vld [vmem:[%s9282_s2 + $0x44] sm:$0xf]  ;;  %v4034_v43 = vld [vmem:[%s9282_s2 + $0x48] sm:$0xf0]  ;;  %v3973_v45 = vor.u32 %v6065_v37, %v3970_v39  ;;  %v4033_v46 = vor.u32 %v6050_v41, %v4032_v40  ;;  %v3960_v47 = vld [vmem:[%s9282_s2 + $0xb0] sm:$0xf] }
  0x16   : > { %384 = vmatpush.bf16.msra.mxu0 %v3977_v29  ;;  %v6064_v48 = vld [vmem:[%s9282_s2 + $0xb4] sm:$0xf0]  ;;  %v6063_v49 = vld [vmem:[%s9282_s2 + $0xb4] sm:$0xf]  ;;  %v4037_v50 = vor.u32 %v6049_v42, %v4034_v43  ;;  %v3962_v51 = vld [vmem:[%s9282_s2 + $0xb8] sm:$0xf0] }
  0x17   : > { %397 = vmatpush.bf16.msra.mxu1 %v3981_v33  ;;  %490 = vmatpush.bf16.msra.mxu2 %v4041_v34  ;;  %v4024_v52 = vld [vmem:[%s9282_s2 + $0x30] sm:$0xf]  ;;  %v6048_v53 = vld [vmem:[%s9282_s2 + $0x34] sm:$0xf0]  ;;  %v6047_v54 = vld [vmem:[%s9282_s2 + $0x34] sm:$0xf]  ;;  %v3961_v56 = vor.u32 %v6064_v48, %v3960_v47  ;;  %v3965_v57 = vor.u32 %v6063_v49, %v3962_v51 }
  0x18   : > { %503 = vmatpush.bf16.msra.mxu3 %v4045_v38  ;;  %v4026_v55 = vld [vmem:[%s9282_s2 + $0x38] sm:$0xf0]  ;;  %v4025_v58 = vor.u32 %v6048_v53, %v4024_v52  ;;  %v3952_v59 = vld [vmem:[%s9282_s2 + $0xa0] sm:$0xf]  ;;  %v6062_v60 = vld [vmem:[%s9282_s2 + $0xa4] sm:$0xf0] }
  0x19   : > { %v6061_v61 = vld [vmem:[%s9282_s2 + $0xa4] sm:$0xf]  ;;  %v4029_v62 = vor.u32 %v6047_v54, %v4026_v55  ;;  %v3954_v63 = vld [vmem:[%s9282_s2 + $0xa8] sm:$0xf0]  ;;  %v4016_v0 = vld [vmem:[%s9282_s2 + $0x20] sm:$0xf]  ;;  %v3953_v4 = vor.u32 %v6062_v60, %v3952_v59 }
  0x1a   : > { %385 = vmatpush.bf16.msra.mxu0 %v3969_v44  ;;  %v6046_v1 = vld [vmem:[%s9282_s2 + $0x24] sm:$0xf0]  ;;  %v6045_v2 = vld [vmem:[%s9282_s2 + $0x24] sm:$0xf]  ;;  %v4018_v3 = vld [vmem:[%s9282_s2 + $0x28] sm:$0xf0]  ;;  %v3957_v5 = vor.u32 %v6061_v61, %v3954_v63 }
  0x1b   : > { %398 = vmatpush.bf16.msra.mxu1 %v3973_v45  ;;  %491 = vmatpush.bf16.msra.mxu2 %v4033_v46  ;;  %v4017_v6 = vor.u32 %v6046_v1, %v4016_v0  ;;  %v3944_v7 = vld [vmem:[%s9282_s2 + $0x90] sm:$0xf]  ;;  %v6060_v8 = vld [vmem:[%s9282_s2 + $0x94] sm:$0xf0]  ;;  %v6059_v9 = vld [vmem:[%s9282_s2 + $0x94] sm:$0xf]  ;;  %v4021_v10 = vor.u32 %v6045_v2, %v4018_v3 }
  0x1c   : > { %504 = vmatpush.bf16.msra.mxu3 %v4037_v50  ;;  %v3946_v11 = vld [vmem:[%s9282_s2 + $0x98] sm:$0xf0]  ;;  %v4008_v12 = vld [vmem:[%s9282_s2 + $0x10] sm:$0xf]  ;;  %v6044_v13 = vld [vmem:[%s9282_s2 + $0x14] sm:$0xf0]  ;;  %v3945_v16 = vor.u32 %v6060_v8, %v3944_v7 }
  0x1d   : > { %v6043_v14 = vld [vmem:[%s9282_s2 + $0x14] sm:$0xf]  ;;  %v4010_v15 = vld [vmem:[%s9282_s2 + $0x18] sm:$0xf0]  ;;  %v3936_v17 = vld [vmem:[%s9282_s2 + $0x80] sm:$0xf]  ;;  %v3949_v19 = vor.u32 %v6059_v9, %v3946_v11  ;;  %v4009_v20 = vor.u32 %v6044_v13, %v4008_v12 }
  0x1e   : > { %386 = vmatpush.bf16.msra.mxu0 %v3961_v56  ;;  %v6058_v18 = vld [vmem:[%s9282_s2 + $0x84] sm:$0xf0]  ;;  %v6057_v21 = vld [vmem:[%s9282_s2 + $0x84] sm:$0xf]  ;;  %v3938_v22 = vld [vmem:[%s9282_s2 + $0x88] sm:$0xf0]  ;;  %v4013_v24 = vor.u32 %v6043_v14, %v4010_v15 }
  0x1f   : > { %399 = vmatpush.bf16.msra.mxu1 %v3965_v57  ;;  %492 = vmatpush.bf16.msra.mxu2 %v4025_v58  ;;  %v4000_v23 = vld [vmem:[%s9282_s2] sm:$0xf]  ;;  %v6042_v25 = vld [vmem:[%s9282_s2 + $0x4] sm:$0xf0]  ;;  %v6041_v26 = vld [vmem:[%s9282_s2 + $0x4] sm:$0xf]  ;;  %v3937_v31 = vor.u32 %v6058_v18, %v3936_v17  ;;  %v3941_v35 = vor.u32 %v6057_v21, %v3938_v22 }
  0x20   : > { %505 = vmatpush.bf16.msra.mxu3 %v4029_v62  ;;  %v4002_v27 = vld [vmem:[%s9282_s2 + $0x8] sm:$0xf0]  ;;  %v4136_v28 = vld [vmem:[%s9282_s2 + $0x170] sm:$0xf]  ;;  %v6088_v29 = vld [vmem:[%s9282_s2 + $0x174] sm:$0xf0]  ;;  %v4001_v36 = vor.u32 %v6042_v25, %v4000_v23 }
  0x21   : > { %v6087_v30 = vld [vmem:[%s9282_s2 + $0x174] sm:$0xf]  ;;  %v4138_v32 = vld [vmem:[%s9282_s2 + $0x178] sm:$0xf0]  ;;  %v4216_v33 = vld [vmem:[%s9282_s2 + $0x1f0] sm:$0xf]  ;;  %v4005_v39 = vor.u32 %v6041_v26, %v4002_v27  ;;  %v4137_v40 = vor.u32 %v6088_v29, %v4136_v28 }
  0x22   : > { %387 = vmatpush.bf16.msra.mxu0 %v3953_v4  ;;  %v6104_v34 = vld [vmem:[%s9282_s2 + $0x1f4] sm:$0xf0]  ;;  %v6103_v37 = vld [vmem:[%s9282_s2 + $0x1f4] sm:$0xf]  ;;  %v4218_v38 = vld [vmem:[%s9282_s2 + $0x1f8] sm:$0xf0]  ;;  %v4141_v41 = vor.u32 %v6087_v30, %v4138_v32 }
  0x23   : > { %400 = vmatpush.bf16.msra.mxu1 %v3957_v5  ;;  %493 = vmatpush.bf16.msra.mxu2 %v4017_v6  ;;  %v4217_v42 = vor.u32 %v6104_v34, %v4216_v33  ;;  %v4128_v43 = vld [vmem:[%s9282_s2 + $0x160] sm:$0xf]  ;;  %v6086_v44 = vld [vmem:[%s9282_s2 + $0x164] sm:$0xf0]  ;;  %v6085_v45 = vld [vmem:[%s9282_s2 + $0x164] sm:$0xf]  ;;  %v4221_v46 = vor.u32 %v6103_v37, %v4218_v38 }
  0x24   : > { %506 = vmatpush.bf16.msra.mxu3 %v4021_v10  ;;  %v4130_v47 = vld [vmem:[%s9282_s2 + $0x168] sm:$0xf0]  ;;  %v4208_v48 = vld [vmem:[%s9282_s2 + $0x1e0] sm:$0xf]  ;;  %v6102_v49 = vld [vmem:[%s9282_s2 + $0x1e4] sm:$0xf0]  ;;  %v4129_v52 = vor.u32 %v6086_v44, %v4128_v43 }
  0x25   : > { %v6101_v50 = vld [vmem:[%s9282_s2 + $0x1e4] sm:$0xf]  ;;  %v4210_v51 = vld [vmem:[%s9282_s2 + $0x1e8] sm:$0xf0]  ;;  %v4120_v53 = vld [vmem:[%s9282_s2 + $0x150] sm:$0xf]  ;;  %v4133_v54 = vor.u32 %v6085_v45, %v4130_v47  ;;  %v4209_v55 = vor.u32 %v6102_v49, %v4208_v48 }
  0x26   : > { %388 = vmatpush.bf16.msra.mxu0 %v3945_v16  ;;  %v6084_v56 = vld [vmem:[%s9282_s2 + $0x154] sm:$0xf0]  ;;  %v6083_v57 = vld [vmem:[%s9282_s2 + $0x154] sm:$0xf]  ;;  %s9290_s22 = smov (!%p242_p3, %s3910_s22), 1  ;;  %v4213_v58 = vor.u32 %v6101_v50, %v4210_v51  ;;  %vm1478_vm0 = vcmask 1043458  }
  0x27   : > { %401 = vmatpush.bf16.msra.mxu1 %v3949_v19  ;;  %494 = vmatpush.bf16.msra.mxu2 %v4009_v20  ;;  %v4122_v59 = vld [vmem:[%s9282_s2 + $0x158] sm:$0xf0]  ;;  %v4200_v60 = vld [vmem:[%s9282_s2 + $0x1d0] sm:$0xf]  ;;  %v6100_v61 = vld [vmem:[%s9282_s2 + $0x1d4] sm:$0xf0]  ;;  %v4121_v0 = vor.u32 %v6084_v56, %v4120_v53 }
  0x28   : > { %507 = vmatpush.bf16.msra.mxu3 %v4013_v24  ;;  %v6099_v62 = vld [vmem:[%s9282_s2 + $0x1d4] sm:$0xf]  ;;  %v4202_v63 = vld [vmem:[%s9282_s2 + $0x1d8] sm:$0xf0]  ;;  %s6475_s23 = smul.u32 20, %s9290_s22  ;;  %v4125_v3 = vor.u32 %v6083_v57, %v4122_v59  ;;  %v4201_v4 = vor.u32 %v6100_v61, %v4200_v60  ;;  %vm1481_vm2 = vcmask 1047558  }
  0x29   : > { %v4112_v1 = vld [vmem:[%s9282_s2 + $0x140] sm:$0xf]  ;;  %v6082_v2 = vld [vmem:[%s9282_s2 + $0x144] sm:$0xf0]  ;;  %v6081_v5 = vld [vmem:[%s9282_s2 + $0x144] sm:$0xf]  ;;  %v4205_v8 = vor.u32 %v6099_v62, %v4202_v63 }
  0x2a   : > { %389 = vmatpush.bf16.msra.mxu0 %v3937_v31  ;;  %v4114_v6 = vld [vmem:[%s9282_s2 + $0x148] sm:$0xf0]  ;;  %v4192_v7 = vld [vmem:[%s9282_s2 + $0x1c0] sm:$0xf]  ;;  %s6827_s12 = scalar_lea.vmem %s9281_s1, %s6475_s23  ;;  %v6098_v9 = vld [vmem:[%s9282_s2 + $0x1c4] sm:$0xf0]  ;;  %v4113_v15 = vor.u32 %v6082_v2, %v4112_v1 }
  0x2b   : > { %402 = vmatpush.bf16.msra.mxu1 %v3941_v35  ;;  %495 = vmatpush.bf16.msra.mxu2 %v4001_v36  ;;  %v273_v10 = vld [vmem:[%s6827_s12 + $0x4] sm:$0x3]  ;;  %v256_v11 = vld [vmem:[%s6827_s12] sm:$0x3]  ;;  %v4194_v13 = vld [vmem:[%s9282_s2 + $0x1c8] sm:$0xf0]  ;;  %v4117_v16 = vor.u32 %v6081_v5, %v4114_v6  ;;  %v4193_v17 = vor.u32 %v6098_v9, %v4192_v7 }
  0x2c   : > { %508 = vmatpush.bf16.msra.mxu3 %v4005_v39  ;;  %v6097_v12 = vld [vmem:[%s9282_s2 + $0x1c4] sm:$0xf]  ;;  %v292_v14 = vunpack.c.l.b16 %v273_v10  ;;  %v4104_v19 = vld [vmem:[%s9282_s2 + $0x130] sm:$0xf]  ;;  %v6080_v20 = vld [vmem:[%s9282_s2 + $0x134] sm:$0xf0]  ;;  %v532_v32 = vunpack.c.l.b16 %v256_v11 }
  0x2d   : > { %v4197_v21 = vor.u32 %v6097_v12, %v4194_v13  ;;  %v6079_v22 = vld [vmem:[%s9282_s2 + $0x134] sm:$0xf]  ;;  %v4106_v23 = vld [vmem:[%s9282_s2 + $0x138] sm:$0xf0]  ;;  %v4184_v26 = vld [vmem:[%s9282_s2 + $0x1b0] sm:$0xf]  ;;  %v4105_v28 = vor.u32 %v6080_v20, %v4104_v19 }
  0x2e   : > { %622 = vmatpush.bf16.msrb.mxu0 %v4137_v40  ;;  %496 = vmatmul.bf16.vlgmr.msra.gmra.mxu2 %v256_v11  ;;  %v293_v18 = vpack.c.b16 %v292_v14, %v292_v14  ;;  %v6096_v27 = vld [vmem:[%s9282_s2 + $0x1b4] sm:$0xf0]  ;;  %v6095_v29 = vld [vmem:[%s9282_s2 + $0x1b4] sm:$0xf]  ;;  %v4186_v30 = vld [vmem:[%s9282_s2 + $0x1b8] sm:$0xf0]  ;;  %v4109_v35 = vor.u32 %v6079_v22, %v4106_v23 }
  0x2f   : > { %635 = vmatpush.bf16.msrb.mxu1 %v4141_v41  ;;  %753 = vmatpush.bf16.msrb.mxu2 %v4217_v42  ;;  %v4096_v33 = vld [vmem:[%s9282_s2 + $0x120] sm:$0xf]  ;;  %v6078_v34 = vld [vmem:[%s9282_s2 + $0x124] sm:$0xf0]  ;;  %v4185_v36 = vor.u32 %v6096_v27, %v4184_v26  ;;  %v6077_v37 = vld [vmem:[%s9282_s2 + $0x124] sm:$0xf]  ;;  %v4189_v39 = vor.u32 %v6095_v29, %v4186_v30 }
  0x30   : > { %766 = vmatpush.bf16.msrb.mxu3 %v4221_v46  ;;  %v295_v24 = vshrl.u32 %v293_v18, 16  ;;  %v297_v25 = vshll.u32 %v293_v18, 16  ;;  %v4098_v40 = vld [vmem:[%s9282_s2 + $0x128] sm:$0xf0]  ;;  %v4176_v41 = vld [vmem:[%s9282_s2 + $0x1a0] sm:$0xf]  ;;  %v4097_v43 = vor.u32 %v6078_v34, %v4096_v33  ;;  %v6888_v46 = vpack.c.b16 %v532_v32, %v532_v32 }
  0x31   : > { %509 = vmatmul.bf16.vlgmr.msra.gmra.mxu3 %v256_v11  ;;  %v6094_v42 = vld [vmem:[%s9282_s2 + $0x1a4] sm:$0xf0]  ;;  %v6093_v44 = vld [vmem:[%s9282_s2 + $0x1a4] sm:$0xf]  ;;  %v4178_v45 = vld [vmem:[%s9282_s2 + $0x1a8] sm:$0xf0]  ;;  %v4101_v49 = vor.u32 %v6077_v37, %v4098_v40 }
  0x32   : > { %623 = vmatpush.bf16.msrb.mxu0 %v4129_v52  ;;  %v299_v31 = vrot.slane %v297_v25, 1  ;;  %v4088_v47 = vld [vmem:[%s9282_s2 + $0x110] sm:$0xf]  ;;  %v6076_v48 = vld [vmem:[%s9282_s2 + $0x114] sm:$0xf0]  ;;  %v4177_v50 = vor.u32 %v6094_v42, %v4176_v41  ;;  %v537_v1 = vshll.u32 %v6888_v46, 16 }
  0x33   : > { %636 = vmatpush.bf16.msrb.mxu1 %v4133_v54  ;;  %754 = vmatpush.bf16.msrb.mxu2 %v4209_v55  ;;  %v6075_v51 = vld [vmem:[%s9282_s2 + $0x114] sm:$0xf]  ;;  %v4090_v52 = vld [vmem:[%s9282_s2 + $0x118] sm:$0xf0]  ;;  %v4168_v53 = vld [vmem:[%s9282_s2 + $0x190] sm:$0xf]  ;;  %v4181_v54 = vor.u32 %v6093_v44, %v4178_v45 }
  0x34   : > { %767 = vmatpush.bf16.msrb.mxu3 %v4213_v58  ;;  %v300_v38 = vor.u32 %v299_v31, %v295_v24  ;;  %v6092_v55 = vld [vmem:[%s9282_s2 + $0x194] sm:$0xf0]  ;;  %v6091_v56 = vld [vmem:[%s9282_s2 + $0x194] sm:$0xf]  ;;  %v650_v57 = vld [vmem:[%s6827_s12 + $0x8] sm:$0x6]  ;;  %v4089_v58 = vor.u32 %v6076_v48, %v4088_v47  ;;  %v4093_v2 = vor.u32 %v6075_v51, %v4090_v52 }
  0x35   : > { %v4170_v59 = vld [vmem:[%s9282_s2 + $0x198] sm:$0xf0]  ;;  %v4080_v60 = vld [vmem:[%s9282_s2 + $0x100] sm:$0xf]  ;;  %v6074_v61 = vld [vmem:[%s9282_s2 + $0x104] sm:$0xf0]  ;;  %v669_v7 = vunpack.c.l.b16 %v650_v57 }
  0x36   : > { %624 = vmatpush.bf16.msrb.mxu0 %v4121_v0  ;;  %403 = vmatmul.bf16.vlgmr.msra.gmra.mxu1 %v300_v38  ;;  %v6073_v62 = vld [vmem:[%s9282_s2 + $0x104] sm:$0xf]  ;;  %v4082_v63 = vld [vmem:[%s9282_s2 + $0x108] sm:$0xf0]  ;;  %v4160_v0 = vld [vmem:[%s9282_s2 + $0x180] sm:$0xf]  ;;  %v4081_v12 = vor.u32 %v6074_v61, %v4080_v60 }
  0x37   : > { %637 = vmatpush.bf16.msrb.mxu1 %v4125_v3  ;;  %755 = vmatpush.bf16.msrb.mxu2 %v4201_v4  ;;  %v4169_v3 = vor.u32 %v6092_v55, %v4168_v53  ;;  %v6090_v4 = vld [vmem:[%s9282_s2 + $0x184] sm:$0xf0]  ;;  %v4296_v5 = vld [vmem:[%s9282_s2 + $0x270] sm:$0xf]  ;;  %v6120_v6 = vld [vmem:[%s9282_s2 + $0x274] sm:$0xf0]  ;;  %v6965_v23 = vpack.c.b16 %v669_v7, %v669_v7 }
  0x38   : > { %768 = vmatpush.bf16.msrb.mxu3 %v4205_v8  ;;  %390 = vmatmul.bf16.vlgmr.msra.gmra.mxu0 %v300_v38  ;;  %v4173_v8 = vor.u32 %v6091_v56, %v4170_v59  ;;  %v6089_v9 = vld [vmem:[%s9282_s2 + $0x184] sm:$0xf]  ;;  %v4162_v10 = vld [vmem:[%s9282_s2 + $0x188] sm:$0xf0]  ;;  %v6119_v11 = vld [vmem:[%s9282_s2 + $0x274] sm:$0xf]  ;;  %v4161_v22 = vor.u32 %v6090_v4, %v4160_v0 }
  0x39   : > { %v4298_v13 = vld [vmem:[%s9282_s2 + $0x278] sm:$0xf0]  ;;  %v4376_v14 = vld [vmem:[%s9282_s2 + $0x2f0] sm:$0xf]  ;;  %v535_v19 = vshrl.u32 %v6888_v46, 16  ;;  %v539_v20 = vrot.slane %v537_v1, 1  ;;  %v4165_v24 = vor.u32 %v6089_v9, %v4162_v10 }
  0x3a   : > { %625 = vmatpush.bf16.msrb.mxu0 %v4113_v15  ;;  %v6136_v15 = vld [vmem:[%s9282_s2 + $0x2f4] sm:$0xf0]  ;;  %v4378_v18 = vld [vmem:[%s9282_s2 + $0x2f8] sm:$0xf0]  ;;  %v4301_v25 = vor.u32 %v6119_v11, %v4298_v13  ;;  %v4288_v26 = vld [vmem:[%s9282_s2 + $0x260] sm:$0xf] }
  0x3b   : > { %638 = vmatpush.bf16.msrb.mxu1 %v4117_v16  ;;  %756 = vmatpush.bf16.msrb.mxu2 %v4193_v17  ;;  %v4297_v16 = vor.u32 %v6120_v6, %v4296_v5  ;;  %v6135_v17 = vld [vmem:[%s9282_s2 + $0x2f4] sm:$0xf]  ;;  %v6118_v27 = vld [vmem:[%s9282_s2 + $0x264] sm:$0xf0]  ;;  %v6117_v30 = vld [vmem:[%s9282_s2 + $0x264] sm:$0xf]  ;;  %v540_v33 = vor.u32 %v539_v20, %v535_v19 }
  0x3c   : > { %769 = vmatpush.bf16.msrb.mxu3 %v4197_v21  ;;  %v4085_v21 = vor.u32 %v6073_v62, %v4082_v63  ;;  %v4381_v29 = vor.u32 %v6135_v17, %v4378_v18  ;;  %v4290_v31 = vld [vmem:[%s9282_s2 + $0x268] sm:$0xf0]  ;;  %v4368_v32 = vld [vmem:[%s9282_s2 + $0x2e0] sm:$0xf]  ;;  %v6134_v34 = vld [vmem:[%s9282_s2 + $0x2e4] sm:$0xf0]  ;;  %v4289_v38 = vor.u32 %v6118_v27, %v4288_v26 }
  0x3d   : > { %v671_v37 = vrot.slane %v6965_v23, 1  ;;  %v4280_v40 = vld [vmem:[%s9282_s2 + $0x250] sm:$0xf]  ;;  %v6116_v41 = vld [vmem:[%s9282_s2 + $0x254] sm:$0xf0]  ;;  %v4369_v42 = vor.u32 %v6134_v34, %v4368_v32  ;;  %vm3843_vm9 = vcmask 1041408  }
  0x3e   : > { %626 = vmatpush.bf16.msrb.mxu0 %v4105_v28  ;;  %v4377_v28 = vor.u32 %v6136_v15, %v4376_v14  ;;  %v6115_v44 = vld [vmem:[%s9282_s2 + $0x254] sm:$0xf]  ;;  %v4282_v45 = vld [vmem:[%s9282_s2 + $0x258] sm:$0xf0]  ;;  %v4360_v46 = vld [vmem:[%s9282_s2 + $0x2d0] sm:$0xf] }
  0x3f   : > { %639 = vmatpush.bf16.msrb.mxu1 %v4109_v35  ;;  %757 = vmatpush.bf16.msrb.mxu2 %v4185_v36  ;;  %v6133_v35 = vld [vmem:[%s9282_s2 + $0x2e4] sm:$0xf]  ;;  %v4370_v36 = vld [vmem:[%s9282_s2 + $0x2e8] sm:$0xf0]  ;;  %v6132_v47 = vld [vmem:[%s9282_s2 + $0x2d4] sm:$0xf0]  ;;  %v4285_v51 = vor.u32 %v6115_v44, %v4282_v45 }
  0x40   : > { %770 = vmatpush.bf16.msrb.mxu3 %v4189_v39  ;;  %v4293_v39 = vor.u32 %v6117_v30, %v4290_v31  ;;  %v6131_v48 = vld [vmem:[%s9282_s2 + $0x2d4] sm:$0xf]  ;;  %v4272_v52 = vld [vmem:[%s9282_s2 + $0x240] sm:$0xf]  ;;  %v6114_v53 = vld [vmem:[%s9282_s2 + $0x244] sm:$0xf0] }
  0x41   : > { %v6113_v56 = vld [vmem:[%s9282_s2 + $0x244] sm:$0xf]  ;;  %v4274_v57 = vld [vmem:[%s9282_s2 + $0x248] sm:$0xf0]  ;;  %v6130_v59 = vld [vmem:[%s9282_s2 + $0x2c4] sm:$0xf0]  ;;  %v4273_v62 = vor.u32 %v6114_v53, %v4272_v52 }
  0x42   : > { %627 = vmatpush.bf16.msrb.mxu0 %v4097_v43  ;;  %v4373_v43 = vor.u32 %v6133_v35, %v4370_v36  ;;  %v6129_v60 = vld [vmem:[%s9282_s2 + $0x2c4] sm:$0xf]  ;;  %v4354_v61 = vld [vmem:[%s9282_s2 + $0x2c8] sm:$0xf0]  ;;  %v4277_v63 = vor.u32 %v6113_v56, %v4274_v57  ;;  %v4264_v0 = vld [vmem:[%s9282_s2 + $0x230] sm:$0xf] }
  0x43   : > { %640 = vmatpush.bf16.msrb.mxu1 %v4101_v49  ;;  %758 = vmatpush.bf16.msrb.mxu2 %v4177_v50  ;;  %v4362_v49 = vld [vmem:[%s9282_s2 + $0x2d8] sm:$0xf0]  ;;  %v4281_v50 = vor.u32 %v6116_v41, %v4280_v40  ;;  %v6112_v1 = vld [vmem:[%s9282_s2 + $0x234] sm:$0xf0]  ;;  %v4357_v4 = vor.u32 %v6129_v60, %v4354_v61  ;;  %v4344_v6 = vld [vmem:[%s9282_s2 + $0x2b0] sm:$0xf] }
  0x44   : > { %771 = vmatpush.bf16.msrb.mxu3 %v4181_v54  ;;  %v4361_v54 = vor.u32 %v6132_v47, %v4360_v46  ;;  %v4365_v55 = vor.u32 %v6131_v48, %v4362_v49  ;;  %v4266_v5 = vld [vmem:[%s9282_s2 + $0x238] sm:$0xf0]  ;;  %v781_v7 = vld [vmem:[%s6827_s12 + $0xc] sm:$0x6]  ;;  %v6127_v9 = vld [vmem:[%s9282_s2 + $0x2b4] sm:$0xf]  ;;  %v4265_v11 = vor.u32 %v6112_v1, %v4264_v0 }
  0x45   : > { %v4346_v10 = vld [vmem:[%s9282_s2 + $0x2b8] sm:$0xf0]  ;;  %v4256_v13 = vld [vmem:[%s9282_s2 + $0x220] sm:$0xf]  ;;  %v6110_v14 = vld [vmem:[%s9282_s2 + $0x224] sm:$0xf0]  ;;  %v800_v15 = vunpack.c.l.b16 %v781_v7 }
  0x46   : > { %628 = vmatpush.bf16.msrb.mxu0 %v4089_v58  ;;  %v4352_v58 = vld [vmem:[%s9282_s2 + $0x2c0] sm:$0xf]  ;;  %v4349_v17 = vor.u32 %v6127_v9, %v4346_v10  ;;  %v6109_v18 = vld [vmem:[%s9282_s2 + $0x224] sm:$0xf]  ;;  %v4258_v19 = vld [vmem:[%s9282_s2 + $0x228] sm:$0xf0] }
  0x47   : > { %641 = vmatpush.bf16.msrb.mxu1 %v4093_v2  ;;  %759 = vmatpush.bf16.msrb.mxu2 %v4169_v3  ;;  %v6111_v2 = vld [vmem:[%s9282_s2 + $0x234] sm:$0xf]  ;;  %v4353_v3 = vor.u32 %v6130_v59, %v4352_v58  ;;  %v4336_v20 = vld [vmem:[%s9282_s2 + $0x2a0] sm:$0xf]  ;;  %v4261_v26 = vor.u32 %v6109_v18, %v4258_v19  ;;  %v4248_v27 = vld [vmem:[%s9282_s2 + $0x210] sm:$0xf] }
  0x48   : > { %772 = vmatpush.bf16.msrb.mxu3 %v4173_v8  ;;  %v6128_v8 = vld [vmem:[%s9282_s2 + $0x2b4] sm:$0xf0]  ;;  %v6107_v32 = vld [vmem:[%s9282_s2 + $0x214] sm:$0xf]  ;;  %v4328_v34 = vld [vmem:[%s9282_s2 + $0x290] sm:$0xf] }
  0x49   : > { %v6124_v35 = vld [vmem:[%s9282_s2 + $0x294] sm:$0xf0]  ;;  %v6123_v36 = vld [vmem:[%s9282_s2 + $0x294] sm:$0xf]  ;;  %v6105_v40 = vld [vmem:[%s9282_s2 + $0x204] sm:$0xf] }
  0x4a   : > { %629 = vmatpush.bf16.msrb.mxu0 %v4081_v12  ;;  %v4269_v12 = vor.u32 %v6111_v2, %v4266_v5  ;;  %v4242_v41 = vld [vmem:[%s9282_s2 + $0x208] sm:$0xf0]  ;;  %v4320_v44 = vld [vmem:[%s9282_s2 + $0x280] sm:$0xf]  ;;  %v6122_v45 = vld [vmem:[%s9282_s2 + $0x284] sm:$0xf0]  ;;  %v4329_v48 = vor.u32 %v6124_v35, %v4328_v34 }
  0x4b   : > { %642 = vmatpush.bf16.msrb.mxu1 %v4085_v21  ;;  %760 = vmatpush.bf16.msrb.mxu2 %v4161_v22  ;;  %v6126_v21 = vld [vmem:[%s9282_s2 + $0x2a4] sm:$0xf0]  ;;  %v6125_v22 = vld [vmem:[%s9282_s2 + $0x2a4] sm:$0xf]  ;;  %v937_v52 = vshrl.u32 %v6965_v23, 16  ;;  %v940_v53 = vshll.u32 %v6965_v23, 16  ;;  %v4245_v60 = vor.u32 %v6105_v40, %v4242_v41  ;;  %v4321_v1 = vor.u32 %v6122_v45, %v4320_v44 }
  0x4c   : > { %773 = vmatpush.bf16.msrb.mxu3 %v4165_v24  ;;  %v4338_v24 = vld [vmem:[%s9282_s2 + $0x2a8] sm:$0xf0]  ;;  %v4337_v30 = vor.u32 %v6126_v21, %v4336_v20  ;;  %v6151_v56 = vld [vmem:[%s9282_s2 + $0x374] sm:$0xf]  ;;  %v4458_v57 = vld [vmem:[%s9282_s2 + $0x378] sm:$0xf0] }
  0x4d   : > { %630 = vmatmul.bf16.vlgmr.msrb.gmra.mxu0 %v540_v33  ;;  %v4341_v31 = vor.u32 %v6125_v22, %v4338_v24  ;;  %v4536_v23 = vld [vmem:[%s9282_s2 + $0x3f0] sm:$0xf]  ;;  %v6168_v58 = vld [vmem:[%s9282_s2 + $0x3f4] sm:$0xf0]  ;;  %v6167_v61 = vld [vmem:[%s9282_s2 + $0x3f4] sm:$0xf] }
  0x4e   : > { %891 = vmatpush.bf16.msra.mxu0 %v4297_v16  ;;  %643 = vmatmul.bf16.vlgmr.msrb.gmra.mxu1 %v540_v33  ;;  %v4345_v16 = vor.u32 %v6128_v8, %v4344_v6  ;;  %v4250_v33 = vld [vmem:[%s9282_s2 + $0x218] sm:$0xf0]  ;;  %v4461_v6 = vor.u32 %v6151_v56, %v4458_v57  ;;  %v4448_v7 = vld [vmem:[%s9282_s2 + $0x360] sm:$0xf]  ;;  %v6150_v8 = vld [vmem:[%s9282_s2 + $0x364] sm:$0xf0]  ;;  %v4537_v9 = vor.u32 %v6168_v58, %v4536_v23 }
  0x4f   : > { %904 = vmatpush.bf16.msra.mxu1 %v4301_v25  ;;  %1025 = vmatpush.bf16.msra.mxu2 %v4377_v28  ;;  %v4257_v25 = vor.u32 %v6110_v14, %v4256_v13  ;;  %v6108_v28 = vld [vmem:[%s9282_s2 + $0x214] sm:$0xf0]  ;;  %v4528_v13 = vld [vmem:[%s9282_s2 + $0x3e0] sm:$0xf]  ;;  %v4449_v19 = vor.u32 %v6150_v8, %v4448_v7  ;;  %v4440_v21 = vld [vmem:[%s9282_s2 + $0x350] sm:$0xf] }
  0x50   : > { %1038 = vmatpush.bf16.msra.mxu3 %v4381_v29  ;;  %761 = vmatmul.bf16.vlgmr.msrb.gmra.mxu2 %v671_v37  ;;  %v801_v29 = vpack.c.b16 %v800_v15, %v800_v15  ;;  %v6166_v15 = vld [vmem:[%s9282_s2 + $0x3e4] sm:$0xf0]  ;;  %v6148_v22 = vld [vmem:[%s9282_s2 + $0x354] sm:$0xf0]  ;;  %v4432_v34 = vld [vmem:[%s9282_s2 + $0x340] sm:$0xf] }
  0x51   : > { %774 = vmatmul.bf16.vlgmr.msrb.gmra.mxu3 %v671_v37  ;;  %v4330_v37 = vld [vmem:[%s9282_s2 + $0x298] sm:$0xf0]  ;;  %v4529_v24 = vor.u32 %v6166_v15, %v4528_v13  ;;  %v6146_v35 = vld [vmem:[%s9282_s2 + $0x344] sm:$0xf0]  ;;  %v4512_v40 = vld [vmem:[%s9282_s2 + $0x3c0] sm:$0xf] }
  0x52   : > { %892 = vmatpush.bf16.msra.mxu0 %v4289_v38  ;;  %v4240_v38 = vld [vmem:[%s9282_s2 + $0x200] sm:$0xf]  ;;  %v803_v46 = vshrl.u32 %v801_v29, 16  ;;  %v806_v47 = vshll.u32 %v801_v29, 16  ;;  %v4333_v49 = vor.u32 %v6123_v36, %v4330_v37  ;;  %v6164_v29 = vld [vmem:[%s9282_s2 + $0x3d4] sm:$0xf0]  ;;  %v4433_v44 = vor.u32 %v6146_v35, %v4432_v34 }
  0x53   : > { %905 = vmatpush.bf16.msra.mxu1 %v4293_v39  ;;  %1026 = vmatpush.bf16.msra.mxu2 %v4369_v42  ;;  %v6106_v39 = vld [vmem:[%s9282_s2 + $0x204] sm:$0xf0]  ;;  %v4249_v42 = vor.u32 %v6108_v28, %v4248_v27  ;;  %v4442_v27 = vld [vmem:[%s9282_s2 + $0x358] sm:$0xf0]  ;;  %v4520_v28 = vld [vmem:[%s9282_s2 + $0x3d0] sm:$0xf] }
  0x54   : > { %1039 = vmatpush.bf16.msra.mxu3 %v4373_v43  ;;  %v4253_v43 = vor.u32 %v6107_v32, %v4250_v33  ;;  %v4241_v59 = vor.u32 %v6106_v39, %v4240_v38  ;;  %v808_v0 = vrot.slane %v806_v47, 2  ;;  %v4441_v32 = vor.u32 %v6148_v22, %v4440_v21  ;;  %v6145_v38 = vld [vmem:[%s9282_s2 + $0x344] sm:$0xf]  ;;  %v4434_v39 = vld [vmem:[%s9282_s2 + $0x348] sm:$0xf0]  ;;  %s6040_s17 = sshll.u32 %s9290_s22, 2 }
  0x55   : > { %v4521_v36 = vor.u32 %v6164_v29, %v4520_v28  ;;  %v6162_v41 = vld [vmem:[%s9282_s2 + $0x3c4] sm:$0xf0]  ;;  %v4437_v45 = vor.u32 %v6145_v38, %v4434_v39  ;;  %v6144_v47 = vld [vmem:[%s9282_s2 + $0x334] sm:$0xf0]  ;;  %v4506_v56 = vld [vmem:[%s9282_s2 + $0x3b8] sm:$0xf0]  ;;  %s251_s20 = scalar_lea.vmem %s9286_s6, %s6040_s17 }
  0x56   : > { %893 = vmatpush.bf16.msra.mxu0 %v4281_v50  ;;  %v6121_v50 = vld [vmem:[%s9282_s2 + $0x284] sm:$0xf]  ;;  %v4408_v8 = vld [vmem:[%s9282_s2 + $0x310] sm:$0xf]  ;;  %v4410_v13 = vld [vmem:[%s9282_s2 + $0x318] sm:$0xf0] }
  0x57   : > { %906 = vmatpush.bf16.msra.mxu1 %v4285_v51  ;;  %1027 = vmatpush.bf16.msra.mxu2 %v4361_v54  ;;  %v4322_v51 = vld [vmem:[%s9282_s2 + $0x288] sm:$0xf0]  ;;  %v4456_v54 = vld [vmem:[%s9282_s2 + $0x370] sm:$0xf]  ;;  %v1191_v15 = vld [vmem:[%s6827_s12 + $0x4] sm:$0xc] }
  0x58   : > { %1040 = vmatpush.bf16.msra.mxu3 %v4365_v55  ;;  %v6152_v55 = vld [vmem:[%s9282_s2 + $0x374] sm:$0xf0]  ;;  %v4325_v2 = vor.u32 %v6121_v50, %v4322_v51  ;;  %v6143_v51 = vld [vmem:[%s9282_s2 + $0x334] sm:$0xf]  ;;  %v1210_v28 = vunpack.c.l.b16 %v1191_v15  ;;  %v4482_v34 = vld [vmem:[%s9282_s2 + $0x388] sm:$0xf0] }
  0x59   : > { %v4457_v5 = vor.u32 %v6152_v55, %v4456_v54  ;;  %v6160_v54 = vld [vmem:[%s9282_s2 + $0x3b4] sm:$0xf0]  ;;  %v6159_v55 = vld [vmem:[%s9282_s2 + $0x3b4] sm:$0xf]  ;;  %v4616_v35 = vld [vmem:[%s9282_s2 + $0x470] sm:$0xf] }
  0x5a   : > { %894 = vmatpush.bf16.msra.mxu0 %v4273_v62  ;;  %v4538_v62 = vld [vmem:[%s9282_s2 + $0x3f8] sm:$0xf0]  ;;  %vm1479_vm1 = vsmask.f32 3328  ;;  %vm1482_vm3 = vsmask.f32 7424 }
  0x5b   : > { %907 = vmatpush.bf16.msra.mxu1 %v4277_v63  ;;  %1028 = vmatpush.bf16.msra.mxu2 %v4353_v3  ;;  %v805_v63 = vrot.slane %v803_v46, 1  ;;  %v939_v3 = vrot.slane %v937_v52, 1  ;;  %v4541_v10 = vor.u32 %v6167_v61, %v4538_v62  ;;  %v4424_v46 = vld [vmem:[%s9282_s2 + $0x330] sm:$0xf]  ;;  %v4426_v52 = vld [vmem:[%s9282_s2 + $0x338] sm:$0xf0]  ;;  %v4509_v62 = vor.u32 %v6159_v55, %v4506_v56  ;;  %vm8252_vm6 = vmand %vm1478_vm0, %vm1479_vm1 }
  0x5c   : > { %1041 = vmatpush.bf16.msra.mxu3 %v4357_v4  ;;  %v942_v4 = vrot.slane %v940_v53, 2  ;;  %v4504_v53 = vld [vmem:[%s9282_s2 + $0x3b0] sm:$0xf]  ;;  %v4425_v23 = vor.u32 %v6144_v47, %v4424_v46  ;;  %v4429_v58 = vor.u32 %v6143_v51, %v4426_v52  ;;  %v4618_v38 = vld [vmem:[%s9282_s2 + $0x478] sm:$0xf0]  ;;  %vm1483_vm7 = vmand %vm1481_vm2, %vm1482_vm3 }
  0x5d   : > { %v809_v14 = vor.u32 %v808_v0, %v805_v63  ;;  %v4505_v61 = vor.u32 %v6160_v54, %v4504_v53  ;;  %v6141_v63 = vld [vmem:[%s9282_s2 + $0x324] sm:$0xf]  ;;  %v4418_v0 = vld [vmem:[%s9282_s2 + $0x328] sm:$0xf0]  ;;  %v4600_v56 = vld [vmem:[%s9282_s2 + $0x450] sm:$0xf] }
  0x5e   : > { %895 = vmatpush.bf16.msra.mxu0 %v4265_v11  ;;  %v6149_v11 = vld [vmem:[%s9282_s2 + $0x364] sm:$0xf]  ;;  %v943_v18 = vor.u32 %v942_v4, %v939_v3  ;;  %v4498_v4 = vld [vmem:[%s9282_s2 + $0x3a8] sm:$0xf0]  ;;  %v4421_v7 = vor.u32 %v6141_v63, %v4418_v0  ;;  %v4592_v63 = vld [vmem:[%s9282_s2 + $0x440] sm:$0xf] }
  0x5f   : > { %908 = vmatpush.bf16.msra.mxu1 %v4269_v12  ;;  %1029 = vmatpush.bf16.msra.mxu2 %v4345_v16  ;;  %v4450_v12 = vld [vmem:[%s9282_s2 + $0x368] sm:$0xf0]  ;;  %v6165_v16 = vld [vmem:[%s9282_s2 + $0x3e4] sm:$0xf]  ;;  %v6178_v0 = vld [vmem:[%s9282_s2 + $0x444] sm:$0xf0] }
  0x60   : > { %1042 = vmatpush.bf16.msra.mxu3 %v4349_v17  ;;  %v4530_v17 = vld [vmem:[%s9282_s2 + $0x3e8] sm:$0xf0]  ;;  %v4453_v20 = vor.u32 %v6149_v11, %v4450_v12  ;;  %v6157_v3 = vld [vmem:[%s9282_s2 + $0x3a4] sm:$0xf]  ;;  %vm1484_vm8 = vmor %vm1483_vm7, %vm8252_vm6  ;;  %vm3849_vm10 = vsmask.f32 1280 }
  0x61   : > { %v4501_v12 = vor.u32 %v6157_v3, %v4498_v4  ;;  %v6181_v51 = vld [vmem:[%s9282_s2 + $0x464] sm:$0xf]  ;;  %v4610_v52 = vld [vmem:[%s9282_s2 + $0x468] sm:$0xf0]  ;;  %v4593_v3 = vor.u32 %v6178_v0, %v4592_v63  ;;  %v4698_v63 = vld [vmem:[%s9284_s4 + $0x158] sm:$0xf0] }
  0x62   : > { %896 = vmatpush.bf16.msra.mxu0 %v4257_v25  ;;  %v4533_v25 = vor.u32 %v6165_v16, %v4530_v17  ;;  %v6156_v16 = vld [vmem:[%s9282_s2 + $0x394] sm:$0xf0]  ;;  %v6155_v17 = vld [vmem:[%s9282_s2 + $0x394] sm:$0xf]  ;;  %v4613_v55 = vor.u32 %v6181_v51, %v4610_v52  ;;  %v6229_v52 = vld [vmem:[%s9284_s4 + $0x164] sm:$0xf] }
  0x63   : > { %909 = vmatpush.bf16.msra.mxu1 %v4261_v26  ;;  %1030 = vmatpush.bf16.msra.mxu2 %v4337_v30  ;;  %v6147_v26 = vld [vmem:[%s9282_s2 + $0x354] sm:$0xf]  ;;  %vm3850_vm13 = vmand %vm3843_vm9, %vm3849_vm10 }
  0x64   : > { %1043 = vmatpush.bf16.msra.mxu3 %v4341_v31  ;;  %v6163_v30 = vld [vmem:[%s9282_s2 + $0x3d4] sm:$0xf]  ;;  %v4522_v31 = vld [vmem:[%s9282_s2 + $0x3d8] sm:$0xf0]  ;;  %v4445_v33 = vor.u32 %v6147_v26, %v4442_v27  ;;  %v6137_v26 = vld [vmem:[%s9282_s2 + $0x304] sm:$0xf] }
  0x65   : > { %v4525_v37 = vor.u32 %v6163_v30, %v4522_v31  ;;  %v4402_v27 = vld [vmem:[%s9282_s2 + $0x308] sm:$0xf0]  ;;  %v4480_v31 = vld [vmem:[%s9282_s2 + $0x380] sm:$0xf]  ;;  %vm3851_vm14 = vmor %vm8252_vm6, %vm3850_vm13 }
  0x66   : > { %897 = vmatpush.bf16.msra.mxu0 %v4249_v42  ;;  %v6161_v42 = vld [vmem:[%s9282_s2 + $0x3c4] sm:$0xf] }
  0x67   : > { %910 = vmatpush.bf16.msra.mxu1 %v4253_v43  ;;  %1031 = vmatpush.bf16.msra.mxu2 %v4329_v48  ;;  %v4514_v43 = vld [vmem:[%s9282_s2 + $0x3c8] sm:$0xf0]  ;;  %v1053_v48 = vld [vmem:[%s6827_s12] sm:$0x6] }
  0x68   : > { %1044 = vmatpush.bf16.msra.mxu3 %v4333_v49  ;;  %v4513_v49 = vor.u32 %v6162_v41, %v4512_v40  ;;  %v4517_v50 = vor.u32 %v6161_v42, %v4514_v43  ;;  %v1072_v57 = vunpack.c.l.b16 %v1053_v48  ;;  %v4405_v42 = vor.u32 %v6137_v26, %v4402_v27  ;;  %v4608_v48 = vld [vmem:[%s9282_s2 + $0x460] sm:$0xf]  ;;  %v6170_v27 = vld [vmem:[%s9282_s2 + $0x404] sm:$0xf0] }
  0x69   : > { %v1211_v43 = vpack.c.b16 %v1210_v28, %v1210_v28  ;;  %v4560_v26 = vld [vmem:[%s9282_s2 + $0x400] sm:$0xf]  ;;  %v6169_v28 = vld [vmem:[%s9282_s2 + $0x404] sm:$0xf] }
  0x6a   : > { %898 = vmatpush.bf16.msra.mxu0 %v4241_v59  ;;  %v4416_v59 = vld [vmem:[%s9282_s2 + $0x320] sm:$0xf] }
  0x6b   : > { %911 = vmatpush.bf16.msra.mxu1 %v4245_v60  ;;  %1032 = vmatpush.bf16.msra.mxu2 %v4321_v1  ;;  %v6142_v60 = vld [vmem:[%s9282_s2 + $0x324] sm:$0xf0]  ;;  %v4496_v1 = vld [vmem:[%s9282_s2 + $0x3a0] sm:$0xf]  ;;  %v1212_v53 = vrot.slane %v1211_v43, 2 }
  0x6c   : > { %1045 = vmatpush.bf16.msra.mxu3 %v4325_v2  ;;  %v6158_v2 = vld [vmem:[%s9282_s2 + $0x3a4] sm:$0xf0]  ;;  %v6247_v43 = vld [vmem:[%s9284_s4 + $0x1f4] sm:$0xf] }
  0x6d   : > { %899 = vmatmul.bf16.vlgmr.msra.gmra.mxu0 %v809_v14  ;;  %v4497_v11 = vor.u32 %v6158_v2, %v4496_v1  ;;  %v6177_v1 = vld [vmem:[%s9282_s2 + $0x444] sm:$0xf]  ;;  %v4594_v2 = vld [vmem:[%s9282_s2 + $0x448] sm:$0xf0] }
  0x6e   : > { %1163 = vmatpush.bf16.msrb.mxu0 %v4457_v5  ;;  %912 = vmatmul.bf16.vlgmr.msra.gmra.mxu1 %v809_v14  ;;  %v1073_v5 = vpack.c.b16 %v1072_v57, %v1072_v57  ;;  %v4488_v14 = vld [vmem:[%s9282_s2 + $0x390] sm:$0xf]  ;;  %v6180_v57 = vld [vmem:[%s9282_s2 + $0x454] sm:$0xf0]  ;;  %v4597_v4 = vor.u32 %v6177_v1, %v4594_v2  ;;  %v6243_v2 = vld [vmem:[%s9284_s4 + $0x1d4] sm:$0xf] }
  0x6f   : > { %1176 = vmatpush.bf16.msrb.mxu1 %v4461_v6  ;;  %1294 = vmatpush.bf16.msrb.mxu2 %v4537_v9  ;;  %v4417_v6 = vor.u32 %v6142_v60, %v4416_v59  ;;  %v6140_v9 = vld [vmem:[%s9282_s2 + $0x314] sm:$0xf0]  ;;  %v4489_v29 = vor.u32 %v6156_v16, %v4488_v14  ;;  %v4602_v59 = vld [vmem:[%s9282_s2 + $0x458] sm:$0xf0]  ;;  %v1466_v60 = vld [vmem:[%s9280_s0] sm:$0x7] }
  0x70   : > { %1307 = vmatpush.bf16.msrb.mxu3 %v4541_v10  ;;  %1033 = vmatmul.bf16.vlgmr.msra.gmra.mxu2 %v943_v18  ;;  %v6139_v10 = vld [vmem:[%s9282_s2 + $0x314] sm:$0xf]  ;;  %v1078_v21 = vshll.u32 %v1073_v5, 16  ;;  %v4409_v22 = vor.u32 %v6140_v9, %v4408_v8  ;;  %v4586_v8 = vld [vmem:[%s9282_s2 + $0x438] sm:$0xf0] }
  0x71   : > { %1046 = vmatmul.bf16.vlgmr.msra.gmra.mxu3 %v943_v18  ;;  %v4490_v18 = vld [vmem:[%s9282_s2 + $0x398] sm:$0xf0]  ;;  %v4578_v14 = vld [vmem:[%s9282_s2 + $0x428] sm:$0xf0] }
  0x72   : > { %1164 = vmatpush.bf16.msrb.mxu0 %v4449_v19  ;;  %v4400_v19 = vld [vmem:[%s9282_s2 + $0x300] sm:$0xf]  ;;  %v4493_v30 = vor.u32 %v6155_v17, %v4490_v18  ;;  %v1080_v40 = vrot.slane %v1078_v21, 2  ;;  %v4568_v17 = vld [vmem:[%s9282_s2 + $0x410] sm:$0xf] }
  0x73   : > { %1177 = vmatpush.bf16.msrb.mxu1 %v4453_v20  ;;  %1295 = vmatpush.bf16.msrb.mxu2 %v4529_v24  ;;  %v1075_v20 = vshrl.u32 %v1073_v5, 16  ;;  %v4413_v24 = vor.u32 %v6139_v10, %v4410_v13  ;;  %v4584_v5 = vld [vmem:[%s9282_s2 + $0x430] sm:$0xf]  ;;  %v6173_v13 = vld [vmem:[%s9282_s2 + $0x424] sm:$0xf] }
  0x74   : > { %1308 = vmatpush.bf16.msrb.mxu3 %v4533_v25  ;;  %v6138_v25 = vld [vmem:[%s9282_s2 + $0x304] sm:$0xf0]  ;;  %v4581_v16 = vor.u32 %v6173_v13, %v4578_v14  ;;  %v1322_v18 = vld [vmem:[%s6827_s12] sm:$0xc]  ;;  %v4570_v21 = vld [vmem:[%s9282_s2 + $0x418] sm:$0xf0] }
  0x75   : > { %v1077_v39 = vrot.slane %v1075_v20, 1  ;;  %v4401_v41 = vor.u32 %v6138_v25, %v4400_v19  ;;  %v6172_v19 = vld [vmem:[%s9282_s2 + $0x414] sm:$0xf0]  ;;  %v6171_v20 = vld [vmem:[%s9282_s2 + $0x414] sm:$0xf] }
  0x76   : > { %1165 = vmatpush.bf16.msrb.mxu0 %v4441_v32  ;;  %v6154_v32 = vld [vmem:[%s9282_s2 + $0x384] sm:$0xf0]  ;;  %v4573_v25 = vor.u32 %v6171_v20, %v4570_v21  ;;  %v6241_v13 = vld [vmem:[%s9284_s4 + $0x1c4] sm:$0xf]  ;;  %v4744_v21 = vld [vmem:[%s9284_s4 + $0x1b0] sm:$0xf] }
  0x77   : > { %1178 = vmatpush.bf16.msrb.mxu1 %v4445_v33  ;;  %1296 = vmatpush.bf16.msrb.mxu2 %v4521_v36  ;;  %v6153_v33 = vld [vmem:[%s9282_s2 + $0x384] sm:$0xf]  ;;  %v6184_v36 = vld [vmem:[%s9282_s2 + $0x474] sm:$0xf0] }
  0x78   : > { %1309 = vmatpush.bf16.msrb.mxu3 %v4525_v37  ;;  %v6183_v37 = vld [vmem:[%s9282_s2 + $0x474] sm:$0xf]  ;;  %v4617_v46 = vor.u32 %v6184_v36, %v4616_v35  ;;  %v6232_v35 = vld [vmem:[%s9284_s4 + $0x174] sm:$0xf0]  ;;  %v4776_v36 = vld [vmem:[%s9284_s4 + $0x1f0] sm:$0xf] }
  0x79   : > { %v4621_v47 = vor.u32 %v6183_v37, %v4618_v38  ;;  %v6248_v38 = vld [vmem:[%s9284_s4 + $0x1f4] sm:$0xf0] }
  0x7a   : > { %1166 = vmatpush.bf16.msrb.mxu0 %v4433_v44  ;;  %v4481_v44 = vor.u32 %v6154_v32, %v4480_v31  ;;  %v4561_v31 = vor.u32 %v6170_v27, %v4560_v26  ;;  %v4682_v26 = vld [vmem:[%s9284_s4 + $0x138] sm:$0xf0]  ;;  %v6239_v27 = vld [vmem:[%s9284_s4 + $0x1b4] sm:$0xf] }
  0x7b   : > { %1179 = vmatpush.bf16.msrb.mxu1 %v4437_v45  ;;  %1297 = vmatpush.bf16.msrb.mxu2 %v4513_v49  ;;  %v4485_v45 = vor.u32 %v6153_v33, %v4482_v34  ;;  %v1081_v49 = vor.u32 %v1080_v40, %v1077_v39  ;;  %v4712_v34 = vld [vmem:[%s9284_s4 + $0x170] sm:$0xf]  ;;  %v6231_v39 = vld [vmem:[%s9284_s4 + $0x174] sm:$0xf]  ;;  %v4714_v40 = vld [vmem:[%s9284_s4 + $0x178] sm:$0xf0] }
  0x7c   : > { %1310 = vmatpush.bf16.msrb.mxu3 %v4517_v50  ;;  %v6182_v50 = vld [vmem:[%s9282_s2 + $0x464] sm:$0xf0]  ;;  %v4713_v37 = vor.u32 %v6232_v35, %v4712_v34 }
  0x7d   : > { %v4609_v54 = vor.u32 %v6182_v50, %v4608_v48  ;;  %v4768_v48 = vld [vmem:[%s9284_s4 + $0x1e0] sm:$0xf] }
  0x7e   : > { %1167 = vmatpush.bf16.msrb.mxu0 %v4425_v23  ;;  %v6494_v23 = vmov 0  }
  0x7f   : > { %1180 = vmatpush.bf16.msrb.mxu1 %v4429_v58  ;;  %1298 = vmatpush.bf16.msrb.mxu2 %v4505_v61  ;;  %253 = vst [vmem:[#allocation2] sm:$0xff] %v6494_v23  ;;  %v6179_v58 = vld [vmem:[%s9282_s2 + $0x454] sm:$0xf]  ;;  %v4601_v61 = vor.u32 %v6180_v57, %v4600_v56  ;;  %v4770_v56 = vld [vmem:[%s9284_s4 + $0x1e8] sm:$0xf0] }
  0x80   : > { %1311 = vmatpush.bf16.msrb.mxu3 %v4509_v62  ;;  %254 = vst [vmem:[#allocation2 + $0x8] sm:$0x33] %v6494_v23  ;;  %6485 = vset.pattern.permute.xlu0 %v6494_v23  ;;  %v4605_v62 = vor.u32 %v6179_v58, %v4602_v59  ;;  %v4696_v23 = vld [vmem:[%s9284_s4 + $0x150] sm:$0xf]  ;;  %v6228_v58 = vld [vmem:[%s9284_s4 + $0x154] sm:$0xf0] }
  0x81   : > { %1469 = vperm.xlu0 %6485, %v1466_v60   ;;  %v4760_v59 = vld [vmem:[%s9284_s4 + $0x1d0] sm:$0xf]  ;;  %v4697_v60 = vor.u32 %v6228_v58, %v4696_v23 }
  0x82   : > { %1168 = vmatpush.bf16.msrb.mxu0 %v4417_v6  ;;  %v6176_v6 = vld [vmem:[%s9282_s2 + $0x434] sm:$0xf0] }
  0x83   : > { %1181 = vmatpush.bf16.msrb.mxu1 %v4421_v7  ;;  %1299 = vmatpush.bf16.msrb.mxu2 %v4497_v11  ;;  %v6175_v7 = vld [vmem:[%s9282_s2 + $0x434] sm:$0xf]  ;;  %v4585_v9 = vor.u32 %v6176_v6, %v4584_v5  ;;  %v4576_v11 = vld [vmem:[%s9282_s2 + $0x420] sm:$0xf]  ;;  %v6226_v6 = vld [vmem:[%s9284_s4 + $0x144] sm:$0xf0] }
  0x84   : > { %1312 = vmatpush.bf16.msrb.mxu3 %v4501_v12  ;;  %v4589_v10 = vor.u32 %v6175_v7, %v4586_v8  ;;  %v6174_v12 = vld [vmem:[%s9282_s2 + $0x424] sm:$0xf0]  ;;  %v4752_v7 = vld [vmem:[%s9284_s4 + $0x1c0] sm:$0xf] }
  0x85   : > { %v4577_v15 = vor.u32 %v6174_v12, %v4576_v11  ;;  %v6242_v8 = vld [vmem:[%s9284_s4 + $0x1c4] sm:$0xf0]  ;;  %v6225_v11 = vld [vmem:[%s9284_s4 + $0x144] sm:$0xf]  ;;  %v4690_v12 = vld [vmem:[%s9284_s4 + $0x148] sm:$0xf0] }
  0x86   : > { %1169 = vmatpush.bf16.msrb.mxu0 %v4409_v22  ;;  %v1341_v22 = vunpack.c.l.b16 %v1322_v18  ;;  %v4680_v18 = vld [vmem:[%s9284_s4 + $0x130] sm:$0xf] }
  0x87   : > { %1182 = vmatpush.bf16.msrb.mxu1 %v4413_v24  ;;  %1300 = vmatpush.bf16.msrb.mxu2 %v4489_v29  ;;  %v4569_v24 = vor.u32 %v6172_v19, %v4568_v17  ;;  %v4562_v29 = vld [vmem:[%s9282_s2 + $0x408] sm:$0xf0]  ;;  %v6224_v19 = vld [vmem:[%s9284_s4 + $0x134] sm:$0xf0] }
  0x88   : > { %1313 = vmatpush.bf16.msrb.mxu3 %v4493_v30  ;;  %v1342_v30 = vpack.c.b16 %v1341_v22, %v1341_v22  ;;  %v4565_v32 = vor.u32 %v6169_v28, %v4562_v29  ;;  %v4754_v17 = vld [vmem:[%s9284_s4 + $0x1c8] sm:$0xf0]  ;;  %v6240_v22 = vld [vmem:[%s9284_s4 + $0x1b4] sm:$0xf0]  ;;  %v4746_v28 = vld [vmem:[%s9284_s4 + $0x1b8] sm:$0xf0] }
  0x89   : > { %v4757_v20 = vor.u32 %v6241_v13, %v4754_v17  ;;  %v4745_v29 = vor.u32 %v6240_v22, %v4744_v21  ;;  %v4904_v13 = vld [vmem:[%s9284_s4 + $0xf0] sm:$0xf]  ;;  %v4842_v17 = vld [vmem:[%s9284_s4 + $0x78] sm:$0xf0] }
  0x8a   : > { %1170 = vmatpush.bf16.msrb.mxu0 %v4401_v41  ;;  %v1343_v33 = vrot.slane %v1342_v30, 2  ;;  %v4777_v41 = vor.u32 %v6248_v38, %v4776_v36  ;;  %v4749_v36 = vor.u32 %v6239_v27, %v4746_v28  ;;  %v6221_v38 = vld [vmem:[%s9284_s4 + $0x124] sm:$0xf]  ;;  %v4906_v21 = vld [vmem:[%s9284_s4 + $0xf8] sm:$0xf0] }
  0x8b   : > { %1183 = vmatpush.bf16.msrb.mxu1 %v4405_v42  ;;  %1301 = vmatpush.bf16.msrb.mxu2 %v4481_v44  ;;  %v4717_v42 = vor.u32 %v6231_v39, %v4714_v40  ;;  %v4778_v44 = vld [vmem:[%s9284_s4 + $0x1f8] sm:$0xf0]  ;;  %v4674_v39 = vld [vmem:[%s9284_s4 + $0x128] sm:$0xf0] }
  0x8c   : > { %1314 = vmatpush.bf16.msrb.mxu3 %v4485_v45  ;;  %v4704_v45 = vld [vmem:[%s9284_s4 + $0x160] sm:$0xf] }
  0x8d   : > { %1171 = vmatmul.bf16.vlgmr.msrb.gmra.mxu0 %v1081_v49 }
  0x8e   : > { %1425 = vmatpush.bf16.msra.mxu0 %v4617_v46  ;;  %1184 = vmatmul.bf16.vlgmr.msrb.gmra.mxu1 %v1081_v49  ;;  %v4781_v46 = vor.u32 %v6247_v43, %v4778_v44  ;;  %v6246_v49 = vld [vmem:[%s9284_s4 + $0x1e4] sm:$0xf0]  ;;  %v4738_v43 = vld [vmem:[%s9284_s4 + $0x1a8] sm:$0xf0] }
  0x8f   : > { %1438 = vmatpush.bf16.msra.mxu1 %v4621_v47  ;;  %1302 = vmatmul.bf16.vlgmr.msrb.gmra.mxu2 %v1212_v53  ;;  %v6230_v47 = vld [vmem:[%s9284_s4 + $0x164] sm:$0xf0]  ;;  %v4769_v51 = vor.u32 %v6246_v49, %v4768_v48  ;;  %v6220_v48 = vld [vmem:[%s9284_s4 + $0x114] sm:$0xf0]  ;;  %v4728_v49 = vld [vmem:[%s9284_s4 + $0x190] sm:$0xf] }
  0x90   : > { %1315 = vmatmul.bf16.vlgmr.msrb.gmra.mxu3 %v1212_v53  ;;  %1736 = vmatpush.bf16.msra.mxu2 %v4713_v37  ;;  %v4705_v50 = vor.u32 %v6230_v47, %v4704_v45  ;;  %v4706_v53 = vld [vmem:[%s9284_s4 + $0x168] sm:$0xf0]  ;;  %v6238_v37 = vld [vmem:[%s9284_s4 + $0x1a4] sm:$0xf0]  ;;  %v4664_v47 = vld [vmem:[%s9284_s4 + $0x110] sm:$0xf] }
  0x91   : > { %1749 = vmatpush.bf16.msra.mxu3 %v4777_v41  ;;  %v4665_v23 = vor.u32 %v6220_v48, %v4664_v47  ;;  %v6195_v47 = vld [vmem:[%s9284_s4 + $0x54] sm:$0xf]  ;;  %v4826_v48 = vld [vmem:[%s9284_s4 + $0x58] sm:$0xf0] }
  0x92   : > { %1426 = vmatpush.bf16.msra.mxu0 %v4609_v54  ;;  %v6245_v54 = vld [vmem:[%s9284_s4 + $0x1e4] sm:$0xf] }
  0x93   : > { %1439 = vmatpush.bf16.msra.mxu1 %v4613_v55  ;;  %v4709_v55 = vor.u32 %v6229_v52, %v4706_v53  ;;  %v4773_v57 = vor.u32 %v6245_v54, %v4770_v56  ;;  %v6236_v53 = vld [vmem:[%s9284_s4 + $0x194] sm:$0xf0]  ;;  %v6219_v54 = vld [vmem:[%s9284_s4 + $0x114] sm:$0xf] }
  0x94   : > { %1737 = vmatpush.bf16.msra.mxu2 %v4705_v50  ;;  %v6235_v56 = vld [vmem:[%s9284_s4 + $0x194] sm:$0xf]  ;;  %v4729_v58 = vor.u32 %v6236_v53, %v4728_v49  ;;  %v4816_v53 = vld [vmem:[%s9284_s4 + $0x40] sm:$0xf] }
  0x95   : > { %1750 = vmatpush.bf16.msra.mxu3 %v4769_v51 }
  0x96   : > { %1427 = vmatpush.bf16.msra.mxu0 %v4601_v61  ;;  %v6244_v61 = vld [vmem:[%s9284_s4 + $0x1d4] sm:$0xf0] }
  0x97   : > { %1440 = vmatpush.bf16.msra.mxu1 %v4605_v62  ;;  %v6227_v62 = vld [vmem:[%s9284_s4 + $0x154] sm:$0xf]  ;;  %v4761_v0 = vor.u32 %v6244_v61, %v4760_v59  ;;  %v6218_v61 = vld [vmem:[%s9284_s4 + $0x104] sm:$0xf0] }
  0x98   : > { %v4701_v1 = vor.u32 %v6227_v62, %v4698_v63  ;;  %1738 = vmatpush.bf16.msra.mxu2 %v4697_v60  ;;  %v4656_v60 = vld [vmem:[%s9284_s4 + $0x100] sm:$0xf] }
  0x99   : > { %1751 = vmatpush.bf16.msra.mxu3 %v4761_v0  ;;  %v4720_v62 = vld [vmem:[%s9284_s4 + $0x180] sm:$0xf] }
  0x9a   : > { %1428 = vmatpush.bf16.msra.mxu0 %v4593_v3  ;;  %v4762_v3 = vld [vmem:[%s9284_s4 + $0x1d8] sm:$0xf0] }
  0x9b   : > { %1441 = vmatpush.bf16.msra.mxu1 %v4597_v4  ;;  %v4688_v4 = vld [vmem:[%s9284_s4 + $0x140] sm:$0xf]  ;;  %v4765_v5 = vor.u32 %v6243_v2, %v4762_v3  ;;  %v6234_v2 = vld [vmem:[%s9284_s4 + $0x184] sm:$0xf0]  ;;  %v6217_v3 = vld [vmem:[%s9284_s4 + $0x104] sm:$0xf] }
  0x9e   : > { %1429 = vmatpush.bf16.msra.mxu0 %v4585_v9  ;;  %v4689_v9 = vor.u32 %v6226_v6, %v4688_v4  ;;  %v4658_v4 = vld [vmem:[%s9284_s4 + $0x108] sm:$0xf0] }
  0x9f   : > { %1442 = vmatpush.bf16.msra.mxu1 %v4589_v10  ;;  %v4753_v10 = vor.u32 %v6242_v8, %v4752_v7  ;;  %v4722_v6 = vld [vmem:[%s9284_s4 + $0x188] sm:$0xf0]  ;;  %v4657_v7 = vor.u32 %v6218_v61, %v4656_v60  ;;  %v4721_v8 = vor.u32 %v6234_v2, %v4720_v62  ;;  %v6210_v60 = vld [vmem:[%s9284_s4 + $0xc4] sm:$0xf0] }
  0xa0   : > { %1739 = vmatpush.bf16.msra.mxu2 %v4689_v9  ;;  %v4661_v9 = vor.u32 %v6217_v3, %v4658_v4  ;;  %v6193_v3 = vld [vmem:[%s9284_s4 + $0x44] sm:$0xf]  ;;  %v4818_v4 = vld [vmem:[%s9284_s4 + $0x48] sm:$0xf0] }
  0xa1   : > { %1752 = vmatpush.bf16.msra.mxu3 %v4753_v10 }
  0xa2   : > { %1430 = vmatpush.bf16.msra.mxu0 %v4577_v15 }
  0xa3   : > { %1443 = vmatpush.bf16.msra.mxu1 %v4581_v16  ;;  %v4693_v16 = vor.u32 %v6225_v11, %v4690_v12  ;;  %v4840_v11 = vld [vmem:[%s9284_s4 + $0x70] sm:$0xf]  ;;  %v6200_v12 = vld [vmem:[%s9284_s4 + $0x74] sm:$0xf0] }
  0xa5   : > { %1753 = vmatpush.bf16.msra.mxu3 %v4745_v29 }
  0xa6   : > { %1431 = vmatpush.bf16.msra.mxu0 %v4569_v24  ;;  %v6223_v24 = vld [vmem:[%s9284_s4 + $0x134] sm:$0xf] }
  0xa7   : > { %1444 = vmatpush.bf16.msra.mxu1 %v4573_v25  ;;  %v4681_v25 = vor.u32 %v6224_v19, %v4680_v18  ;;  %v4685_v30 = vor.u32 %v6223_v24, %v4682_v26  ;;  %v4832_v24 = vld [vmem:[%s9284_s4 + $0x60] sm:$0xf] }
  0xa8   : > { %v4896_v26 = vld [vmem:[%s9284_s4 + $0xe0] sm:$0xf] }
  0xa9   : > { %1740 = vmatpush.bf16.msra.mxu2 %v4681_v25  ;;  %v6198_v25 = vld [vmem:[%s9284_s4 + $0x64] sm:$0xf0] }
  0xaa   : > { %1432 = vmatpush.bf16.msra.mxu0 %v4561_v31  ;;  %v4672_v31 = vld [vmem:[%s9284_s4 + $0x120] sm:$0xf]  ;;  %v4833_v29 = vor.u32 %v6198_v25, %v4832_v24 }
  0xab   : > { %1445 = vmatpush.bf16.msra.mxu1 %v4565_v32  ;;  %v6222_v32 = vld [vmem:[%s9284_s4 + $0x124] sm:$0xf0] }
  0xac   : > { %v4673_v44 = vor.u32 %v6222_v32, %v4672_v31  ;;  %v6197_v31 = vld [vmem:[%s9284_s4 + $0x64] sm:$0xf]  ;;  %v4834_v32 = vld [vmem:[%s9284_s4 + $0x68] sm:$0xf0] }
  0xad   : > { %1433 = vmatmul.bf16.vlgmr.msra.gmra.mxu0 %v1343_v33 }
  0xae   : > { %1446 = vmatmul.bf16.vlgmr.msra.gmra.mxu1 %v1343_v33  ;;  %1762 = vmatpush.bf16.msrb.mxu0 %v4717_v42  ;;  %v4736_v33 = vld [vmem:[%s9284_s4 + $0x1a0] sm:$0xf]  ;;  %v6237_v42 = vld [vmem:[%s9284_s4 + $0x1a4] sm:$0xf] }
  0xaf   : > { %1775 = vmatpush.bf16.msrb.mxu1 %v4781_v46  ;;  %v4737_v45 = vor.u32 %v6238_v37, %v4736_v33  ;;  %v4677_v46 = vor.u32 %v6221_v38, %v4674_v39  ;;  %v4741_v52 = vor.u32 %v6237_v42, %v4738_v43  ;;  %1741 = vmatpush.bf16.msra.mxu2 %v4673_v44  ;;  %v4898_v37 = vld [vmem:[%s9284_s4 + $0xe8] sm:$0xf0]  ;;  %v1489_v42 = vld [vmem:[#allocation2] sm:$0x33]  ;;  %v4888_v43 = vld [vmem:[%s9284_s4 + $0xd0] sm:$0xf] }
  0xb0   : > { %v4837_v38 = vor.u32 %v6197_v31, %v4834_v32  ;;  %v1556_v44 = vunpack.c.l.b16 %v1489_v42 }
  0xb1   : > { %v497_v14 = vpop.f32.mrf.mxu2  ;;  %1754 = vmatpush.bf16.msra.mxu3 %v4737_v45 }
  0xb2   : > { %1763 = vmatpush.bf16.msrb.mxu0 %v4709_v55  ;;  %v4666_v55 = vld [vmem:[%s9284_s4 + $0x118] sm:$0xf0] }
  0xb3   : > { %1776 = vmatpush.bf16.msrb.mxu1 %v4773_v57  ;;  %v404_v35 = vpop.f32.mrf.mxu1  ;;  %v4730_v57 = vld [vmem:[%s9284_s4 + $0x198] sm:$0xf0]  ;;  %v4669_v59 = vor.u32 %v6219_v54, %v4666_v55  ;;  %1742 = vmatpush.bf16.msra.mxu2 %v4665_v23  ;;  %v7706_v54 = vpack.c.b16 %v1556_v44, %v1556_v44  ;;  %v1557_v55 = vunpack.c.h.b16 %v1489_v42  ;;  %v4792_v44 = vld [vmem:[%s9284_s4 + $0x10] sm:$0xf] }
  0xb4   : > { %v510_v15 = vpop.f32.mrf.mxu3 }
  0xb5   : > { %v391_v34 = vpop.f32.mrf.mxu0  ;;  %v7573_v41 = vadd.f32 %v510_v15, %v404_v35  ;;  %1755 = vmatpush.bf16.msra.mxu3 %v4729_v58  ;;  %v6216_v15 = vld [vmem:[%s9284_s4 + $0xf4] sm:$0xf0]  ;;  %v6194_v58 = vld [vmem:[%s9284_s4 + $0x44] sm:$0xf0] }
  0xb6   : > { %1764 = vmatpush.bf16.msrb.mxu0 %v4701_v1  ;;  %v7571_v40 = vadd.f32 %v497_v14, %v391_v34  ;;  %v4733_v1 = vor.u32 %v6235_v56, %v4730_v57  ;;  %v4841_v14 = vor.u32 %v6200_v12, %v4840_v11  ;;  %v4905_v18 = vor.u32 %v6216_v15, %v4904_v13  ;;  %v6192_v13 = vld [vmem:[%s9284_s4 + $0x34] sm:$0xf0] }
  0xb7   : > { %1777 = vmatpush.bf16.msrb.mxu1 %v4765_v5  ;;  %v6233_v5 = vld [vmem:[%s9284_s4 + $0x184] sm:$0xf]  ;;  %1743 = vmatpush.bf16.msra.mxu2 %v4657_v7  ;;  %v4882_v7 = vld [vmem:[%s9284_s4 + $0xc8] sm:$0xf0]  ;;  %v7738_v11 = vpack.c.b16 %v1557_v55, %v1557_v55  ;;  %v6208_v15 = vld [vmem:[%s9284_s4 + $0xb4] sm:$0xf0] }
  0xb8   : > { %v4725_v10 = vor.u32 %v6233_v5, %v4722_v6  ;;  %v6209_v5 = vld [vmem:[%s9284_s4 + $0xc4] sm:$0xf]  ;;  %v4821_v6 = vor.u32 %v6193_v3, %v4818_v4 }
  0xb9   : > { %v499_v50 = vpop.f32.mrf.mxu2  ;;  %1756 = vmatpush.bf16.msra.mxu3 %v4721_v8  ;;  %v1561_v8 = vshrl.u32 %v7706_v54, 16  ;;  %v4885_v12 = vor.u32 %v6209_v5, %v4882_v7  ;;  %v1570_v24 = vshll.u32 %v7738_v11, 16  ;;  %v6264_v7 = vld [vmem:[%s9284_s4 + $0x274] sm:$0xf0] }
  0xba   : > { %1765 = vmatpush.bf16.msrb.mxu0 %v4693_v16  ;;  %v6199_v16 = vld [vmem:[%s9284_s4 + $0x74] sm:$0xf]  ;;  %v4829_v50 = vor.u32 %v6195_v47, %v4826_v48  ;;  %v6204_v48 = vld [vmem:[%s9284_s4 + $0x94] sm:$0xf0] }
  0xbb   : > { %1778 = vmatpush.bf16.msrb.mxu1 %v4757_v20  ;;  %v406_v0 = vpop.f32.mrf.mxu1  ;;  %v4845_v19 = vor.u32 %v6199_v16, %v4842_v17  ;;  %v6215_v20 = vld [vmem:[%s9284_s4 + $0xf4] sm:$0xf]  ;;  %1950 = vmatpush.bf16.msrb.mxu2 %v4841_v14  ;;  %v4872_v14 = vld [vmem:[%s9284_s4 + $0xb0] sm:$0xf]  ;;  %v1572_v32 = vrot.slane %v1570_v24, 1 }
  0xbc   : > { %v512_v51 = vpop.f32.mrf.mxu3  ;;  %v4909_v22 = vor.u32 %v6215_v20, %v4906_v21  ;;  %v6191_v17 = vld [vmem:[%s9284_s4 + $0x34] sm:$0xf]  ;;  %v4874_v21 = vld [vmem:[%s9284_s4 + $0xb8] sm:$0xf0]  ;;  %v6278_v24 = vld [vmem:[%s9284_s4 + $0x2e4] sm:$0xf0] }
  0xbd   : > { %v393_v63 = vpop.f32.mrf.mxu0  ;;  %1963 = vmatpush.bf16.msrb.mxu3 %v4905_v18  ;;  %v6211_v51 = vld [vmem:[%s9284_s4 + $0xd4] sm:$0xf]  ;;  %v4810_v18 = vld [vmem:[%s9284_s4 + $0x38] sm:$0xf0] }
  0xbe   : > { %1766 = vmatpush.bf16.msrb.mxu0 %v4685_v30  ;;  %v6214_v30 = vld [vmem:[%s9284_s4 + $0xe4] sm:$0xf0]  ;;  %v6207_v20 = vld [vmem:[%s9284_s4 + $0xb4] sm:$0xf] }
  0xbf   : > { %1779 = vmatpush.bf16.msrb.mxu1 %v4749_v36  ;;  %v4897_v35 = vor.u32 %v6214_v30, %v4896_v26  ;;  %v6213_v36 = vld [vmem:[%s9284_s4 + $0xe4] sm:$0xf]  ;;  %1951 = vmatpush.bf16.msrb.mxu2 %v4833_v29  ;;  %v4873_v26 = vor.u32 %v6208_v15, %v4872_v14  ;;  %v6190_v29 = vld [vmem:[%s9284_s4 + $0x24] sm:$0xf0]  ;;  %v4864_v30 = vld [vmem:[%s9284_s4 + $0xa0] sm:$0xf]  ;;  %v4877_v31 = vor.u32 %v6207_v20, %v4874_v21 }
  0xc0   : > { %v4901_v39 = vor.u32 %v6213_v36, %v4898_v37  ;;  %v4802_v37 = vld [vmem:[%s9284_s4 + $0x28] sm:$0xf0]  ;;  %v5002_v14 = vld [vmem:[%s9284_s4 + $0x278] sm:$0xf0]  ;;  %v4992_v20 = vld [vmem:[%s9284_s4 + $0x260] sm:$0xf] }
  0xc1   : > { %1964 = vmatpush.bf16.msrb.mxu3 %v4897_v35  ;;  %v6262_v21 = vld [vmem:[%s9284_s4 + $0x264] sm:$0xf0] }
  0xc2   : > { %1767 = vmatpush.bf16.msrb.mxu0 %v4677_v46  ;;  %v6212_v46 = vld [vmem:[%s9284_s4 + $0xd4] sm:$0xf0] }
  0xc3   : > { %1780 = vmatpush.bf16.msrb.mxu1 %v4741_v52  ;;  %v4889_v49 = vor.u32 %v6212_v46, %v4888_v43  ;;  %v4890_v52 = vld [vmem:[%s9284_s4 + $0xd8] sm:$0xf0]  ;;  %v4856_v46 = vld [vmem:[%s9284_s4 + $0x90] sm:$0xf] }
  0xc4   : > { %v4893_v23 = vor.u32 %v6211_v51, %v4890_v52  ;;  %v6203_v51 = vld [vmem:[%s9284_s4 + $0x94] sm:$0xf]  ;;  %v4858_v52 = vld [vmem:[%s9284_s4 + $0x98] sm:$0xf0]  ;;  %v4857_v55 = vor.u32 %v6204_v48, %v4856_v46  ;;  %v5040_v48 = vld [vmem:[%s9284_s4 + $0x2c0] sm:$0xf] }
  0xc5   : > { %1965 = vmatpush.bf16.msrb.mxu3 %v4889_v49  ;;  %v6187_v49 = vld [vmem:[%s9284_s4 + $0x14] sm:$0xf] }
  0xc6   : > { %1768 = vmatpush.bf16.msrb.mxu0 %v4669_v59  ;;  %v4880_v59 = vld [vmem:[%s9284_s4 + $0xc0] sm:$0xf] }
  0xc7   : > { %1781 = vmatpush.bf16.msrb.mxu1 %v4733_v1  ;;  %v4817_v1 = vor.u32 %v6194_v58, %v4816_v53  ;;  %v4881_v2 = vor.u32 %v6210_v60, %v4880_v59  ;;  %v4848_v58 = vld [vmem:[%s9284_s4 + $0x80] sm:$0xf]  ;;  %v4861_v59 = vor.u32 %v6203_v51, %v4858_v52  ;;  %v6202_v60 = vld [vmem:[%s9284_s4 + $0x84] sm:$0xf0]  ;;  %v6257_v52 = vld [vmem:[%s9284_s4 + $0x244] sm:$0xf] }
  0xc8   : > { %v4849_v4 = vor.u32 %v6202_v60, %v4848_v58  ;;  %v4968_v60 = vld [vmem:[%s9284_s4 + $0x230] sm:$0xf] }
  0xc9   : > { %1966 = vmatpush.bf16.msrb.mxu3 %v4881_v2  ;;  %v4850_v2 = vld [vmem:[%s9284_s4 + $0x88] sm:$0xf0] }
  0xca   : > { %1769 = vmatpush.bf16.msrb.mxu0 %v4661_v9  ;;  %v631_v27 = vpop.f32.mrf.mxu0  ;;  %v1563_v9 = vshll.u32 %v7706_v54, 16 }
  0xcb   : > { %v644_v28 = vpop.f32.mrf.mxu1  ;;  %1782 = vmatpush.bf16.msrb.mxu1 %v4725_v10  ;;  %v648_v33 = vadd.f32 %v631_v27, %v7571_v40  ;;  %v4824_v40 = vld [vmem:[%s9284_s4 + $0x50] sm:$0xf]  ;;  %v4813_v27 = vor.u32 %v6191_v17, %v4810_v18  ;;  %v6279_v17 = vld [vmem:[%s9284_s4 + $0x2f4] sm:$0xf]  ;;  %v5066_v18 = vld [vmem:[%s9284_s4 + $0x2f8] sm:$0xf0] }
  0xcc   : > { %v649_v34 = vadd.f32 %v644_v28, %v7573_v41  ;;  %v6196_v41 = vld [vmem:[%s9284_s4 + $0x54] sm:$0xf0]  ;;  %v4808_v10 = vld [vmem:[%s9284_s4 + $0x30] sm:$0xf]  ;;  %v1565_v16 = vrot.slane %v1563_v9, 1 }
  0xcd   : > { %v4825_v45 = vor.u32 %v6196_v41, %v4824_v40  ;;  %v4800_v28 = vld [vmem:[%s9284_s4 + $0x20] sm:$0xf]  ;;  %1967 = vmatpush.bf16.msrb.mxu3 %v4873_v26  ;;  %v4994_v26 = vld [vmem:[%s9284_s4 + $0x268] sm:$0xf0] }
  0xce   : > { %1976 = vmatpush.bf16.msra.mxu0 %v4845_v19  ;;  %v4809_v19 = vor.u32 %v6192_v13, %v4808_v10  ;;  %v1566_v25 = vor.u32 %v1565_v16, %v1561_v8  ;;  %v4801_v40 = vor.u32 %v6190_v29, %v4800_v28  ;;  %v5064_v8 = vld [vmem:[%s9284_s4 + $0x2f0] sm:$0xf]  ;;  %v6263_v13 = vld [vmem:[%s9284_s4 + $0x274] sm:$0xf]  ;;  %v4993_v29 = vor.u32 %v6262_v21, %v4992_v20  ;;  %v6269_v20 = vld [vmem:[%s9284_s4 + $0x2a4] sm:$0xf] }
  0xcf   : > { %1989 = vmatpush.bf16.msra.mxu1 %v4909_v22  ;;  %1952 = vmatpush.bf16.msrb.mxu2 %v4825_v45  ;;  %v1568_v22 = vshrl.u32 %v7738_v11, 16  ;;  %v6188_v45 = vld [vmem:[%s9284_s4 + $0x14] sm:$0xf0]  ;;  %v5005_v16 = vor.u32 %v6263_v13, %v5002_v14  ;;  %v5024_v13 = vld [vmem:[%s9284_s4 + $0x2a0] sm:$0xf] }
  0xd0   : > { %1744 = vmatmul.bf16.vlgmr.msra.gmra.mxu2 %v1566_v25  ;;  %1770 = vmatmul.bf16.vlgmr.msrb.gmra.mxu0 %v1566_v25  ;;  %v4793_v53 = vor.u32 %v6188_v45, %v4792_v44  ;;  %v6261_v25 = vld [vmem:[%s9284_s4 + $0x264] sm:$0xf]  ;;  %v5050_v44 = vld [vmem:[%s9284_s4 + $0x2d8] sm:$0xf0]  ;;  %v4976_v45 = vld [vmem:[%s9284_s4 + $0x240] sm:$0xf] }
  0xd1   : > { %v1573_v42 = vor.u32 %v1572_v32, %v1568_v22  ;;  %v5056_v22 = vld [vmem:[%s9284_s4 + $0x2e0] sm:$0xf]  ;;  %v5026_v21 = vld [vmem:[%s9284_s4 + $0x2a8] sm:$0xf0] }
  0xd2   : > { %1977 = vmatpush.bf16.msra.mxu0 %v4837_v38  ;;  %v633_v63 = vpop.f32.mrf.mxu0  ;;  %v6205_v38 = vld [vmem:[%s9284_s4 + $0xa4] sm:$0xf]  ;;  %v5057_v32 = vor.u32 %v6278_v24, %v5056_v22 }
  0xd3   : > { %1990 = vmatpush.bf16.msra.mxu1 %v4901_v39  ;;  %v762_v56 = vpop.f32.mrf.mxu2  ;;  %v646_v0 = vpop.f32.mrf.mxu1  ;;  %1953 = vmatpush.bf16.msrb.mxu2 %v4817_v1  ;;  %v4866_v39 = vld [vmem:[%s9284_s4 + $0xa8] sm:$0xf0]  ;;  %v6185_v63 = vld [vmem:[%s9284_s4 + $0x4] sm:$0xf] }
  0xd4   : > { %v775_v57 = vpop.f32.mrf.mxu3  ;;  %v7717_v61 = vadd.f32 %v762_v56, %v648_v33  ;;  %v6206_v33 = vld [vmem:[%s9284_s4 + $0xa4] sm:$0xf0]  ;;  %1757 = vmatmul.bf16.vlgmr.msra.gmra.mxu3 %v1573_v42  ;;  %v4869_v47 = vor.u32 %v6205_v38, %v4866_v39  ;;  %1783 = vmatmul.bf16.vlgmr.msrb.gmra.mxu1 %v1573_v42  ;;  %v4786_v0 = vld [vmem:[%s9284_s4 + $0x8] sm:$0xf0]  ;;  %v6201_v1 = vld [vmem:[%s9284_s4 + $0x84] sm:$0xf] }
  0xd5   : > { %v7719_v62 = vadd.f32 %v775_v57, %v649_v34  ;;  %v6189_v34 = vld [vmem:[%s9284_s4 + $0x24] sm:$0xf]  ;;  %v4865_v41 = vor.u32 %v6206_v33, %v4864_v30  ;;  %v4784_v57 = vld [vmem:[%s9284_s4] sm:$0xf]  ;;  %v4789_v5 = vor.u32 %v6185_v63, %v4786_v0  ;;  %v4853_v9 = vor.u32 %v6201_v1, %v4850_v2  ;;  %v6259_v39 = vld [vmem:[%s9284_s4 + $0x254] sm:$0xf] }
  0xd6   : > { %1978 = vmatpush.bf16.msra.mxu0 %v4829_v50  ;;  %v4805_v43 = vor.u32 %v6189_v34, %v4802_v37  ;;  %v4794_v50 = vld [vmem:[%s9284_s4 + $0x18] sm:$0xf0]  ;;  %v6277_v30 = vld [vmem:[%s9284_s4 + $0x2e4] sm:$0xf]  ;;  %v4997_v33 = vor.u32 %v6261_v25, %v4994_v26  ;;  %v5048_v37 = vld [vmem:[%s9284_s4 + $0x2d0] sm:$0xf] }
  0xd7   : > { %1991 = vmatpush.bf16.msra.mxu1 %v4893_v23  ;;  %1954 = vmatpush.bf16.msrb.mxu2 %v4809_v19  ;;  %v4797_v56 = vor.u32 %v6187_v49, %v4794_v50  ;;  %v6186_v23 = vld [vmem:[%s9284_s4 + $0x4] sm:$0xf0]  ;;  %v5069_v19 = vor.u32 %v6279_v17, %v5066_v18  ;;  %v4986_v42 = vld [vmem:[%s9284_s4 + $0x258] sm:$0xf0]  ;;  %v6256_v63 = vld [vmem:[%s9284_s4 + $0x234] sm:$0xf0] }
  0xd8   : > { %1968 = vmatpush.bf16.msrb.mxu3 %v4865_v41  ;;  %v4785_v3 = vor.u32 %v6186_v23, %v4784_v57  ;;  %v4989_v41 = vor.u32 %v6259_v39, %v4986_v42  ;;  %v6274_v49 = vld [vmem:[%s9284_s4 + $0x2c4] sm:$0xf0]  ;;  %v5032_v0 = vld [vmem:[%s9284_s4 + $0x2b0] sm:$0xf]  ;;  %v6272_v2 = vld [vmem:[%s9284_s4 + $0x2b4] sm:$0xf0] }
  0xd9   : > { %v5041_v58 = vor.u32 %v6274_v49, %v5040_v48  ;;  %v4962_v17 = vld [vmem:[%s9284_s4 + $0x228] sm:$0xf0]  ;;  %v4952_v26 = vld [vmem:[%s9284_s4 + $0x210] sm:$0xf]  ;;  %v4944_v39 = vld [vmem:[%s9284_s4 + $0x200] sm:$0xf] }
  0xda   : > { %1979 = vmatpush.bf16.msra.mxu0 %v4821_v6  ;;  %v5000_v6 = vld [vmem:[%s9284_s4 + $0x270] sm:$0xf]  ;;  %v6250_v42 = vld [vmem:[%s9284_s4 + $0x204] sm:$0xf0] }
  0xdb   : > { %1992 = vmatpush.bf16.msra.mxu1 %v4885_v12  ;;  %v764_v35 = vpop.f32.mrf.mxu2  ;;  %1955 = vmatpush.bf16.msrb.mxu2 %v4801_v40  ;;  %v5001_v10 = vor.u32 %v6264_v7, %v5000_v6  ;;  %v6280_v12 = vld [vmem:[%s9284_s4 + $0x2f4] sm:$0xf0]  ;;  %v5034_v6 = vld [vmem:[%s9284_s4 + $0x2b8] sm:$0xf0]  ;;  %v4969_v7 = vor.u32 %v6256_v63, %v4968_v60  ;;  %v4945_v48 = vor.u32 %v6250_v42, %v4944_v39  ;;  %v5160_v49 = vld [vmem:[%s9284_s4 + $0x370] sm:$0xf] }
  0xdc   : > { %v777_v36 = vpop.f32.mrf.mxu3  ;;  %1969 = vmatpush.bf16.msrb.mxu3 %v4857_v55  ;;  %v5065_v15 = vor.u32 %v6280_v12, %v5064_v8  ;;  %v4984_v35 = vld [vmem:[%s9284_s4 + $0x250] sm:$0xf]  ;;  %v6273_v55 = vld [vmem:[%s9284_s4 + $0x2c4] sm:$0xf]  ;;  %v5033_v8 = vor.u32 %v6272_v2, %v5032_v0  ;;  %v6254_v12 = vld [vmem:[%s9284_s4 + $0x224] sm:$0xf0] }
  0xdd   : > { %v6260_v36 = vld [vmem:[%s9284_s4 + $0x254] sm:$0xf0]  ;;  %v6311_v60 = vld [vmem:[%s9284_s4 + $0x3f4] sm:$0xf]  ;;  %v5226_v63 = vld [vmem:[%s9284_s4 + $0x3f8] sm:$0xf0] }
  0xde   : > { %1980 = vmatpush.bf16.msra.mxu0 %v4813_v27  ;;  %v4985_v38 = vor.u32 %v6260_v36, %v4984_v35  ;;  %v6267_v35 = vld [vmem:[%s9284_s4 + $0x294] sm:$0xf]  ;;  %v5018_v36 = vld [vmem:[%s9284_s4 + $0x298] sm:$0xf0]  ;;  %v5229_v2 = vor.u32 %v6311_v60, %v5226_v63  ;;  %v6306_v42 = vld [vmem:[%s9284_s4 + $0x3c4] sm:$0xf0] }
  0xdf   : > { %1993 = vmatpush.bf16.msra.mxu1 %v4877_v31  ;;  %1956 = vmatpush.bf16.msrb.mxu2 %v4793_v53  ;;  %v5058_v31 = vld [vmem:[%s9284_s4 + $0x2e8] sm:$0xf0]  ;;  %v5120_v60 = vld [vmem:[%s9284_s4 + $0x320] sm:$0xf]  ;;  %v6286_v63 = vld [vmem:[%s9284_s4 + $0x324] sm:$0xf0] }
  0xe0   : > { %1970 = vmatpush.bf16.msrb.mxu3 %v4849_v4  ;;  %v5061_v34 = vor.u32 %v6277_v30, %v5058_v31  ;;  %v4978_v53 = vld [vmem:[%s9284_s4 + $0x248] sm:$0xf0]  ;;  %v4970_v4 = vld [vmem:[%s9284_s4 + $0x238] sm:$0xf0]  ;;  %v5016_v30 = vld [vmem:[%s9284_s4 + $0x290] sm:$0xf]  ;;  %v5029_v31 = vor.u32 %v6269_v20, %v5026_v21 }
  0xe1   : > { %v5208_v21 = vld [vmem:[%s9284_s4 + $0x3d0] sm:$0xf] }
  0xe2   : > { %1981 = vmatpush.bf16.msra.mxu0 %v4805_v43  ;;  %v6275_v43 = vld [vmem:[%s9284_s4 + $0x2d4] sm:$0xf] }
  0xe3   : > { %1994 = vmatpush.bf16.msra.mxu1 %v4869_v47  ;;  %1957 = vmatpush.bf16.msrb.mxu2 %v4785_v3  ;;  %v5053_v46 = vor.u32 %v6275_v43, %v5050_v44  ;;  %v6258_v47 = vld [vmem:[%s9284_s4 + $0x244] sm:$0xf0]  ;;  %v6255_v3 = vld [vmem:[%s9284_s4 + $0x234] sm:$0xf]  ;;  %v6249_v44 = vld [vmem:[%s9284_s4 + $0x204] sm:$0xf] }
  0xe4   : > { %2218 = vmatpush.bf16.msra.mxu3 %v5065_v15  ;;  %v4977_v23 = vor.u32 %v6258_v47, %v4976_v45  ;;  %v6270_v15 = vld [vmem:[%s9284_s4 + $0x2a4] sm:$0xf0]  ;;  %v4946_v45 = vld [vmem:[%s9284_s4 + $0x208] sm:$0xf0] }
  0xe5   : > { %1971 = vmatmul.bf16.vlgmr.msrb.gmra.mxu3 %v7738_v11  ;;  %v5025_v24 = vor.u32 %v6270_v15, %v5024_v13  ;;  %v6266_v43 = vld [vmem:[%s9284_s4 + $0x284] sm:$0xf0]  ;;  %v5010_v47 = vld [vmem:[%s9284_s4 + $0x288] sm:$0xf0]  ;;  %v6309_v13 = vld [vmem:[%s9284_s4 + $0x3e4] sm:$0xf] }
  0xe6   : > { %1982 = vmatpush.bf16.msra.mxu0 %v4797_v56  ;;  %1958 = vmatmul.bf16.vlgmr.msrb.gmra.mxu2 %v7706_v54 }
  0xe7   : > { %1995 = vmatpush.bf16.msra.mxu1 %v4861_v59  ;;  %2205 = vmatpush.bf16.msra.mxu2 %v5001_v10  ;;  %v4981_v59 = vor.u32 %v6257_v52, %v4978_v53  ;;  %v4960_v10 = vld [vmem:[%s9284_s4 + $0x220] sm:$0xf]  ;;  %v6296_v52 = vld [vmem:[%s9284_s4 + $0x374] sm:$0xf0]  ;;  %v5224_v53 = vld [vmem:[%s9284_s4 + $0x3f0] sm:$0xf] }
  0xe8   : > { %2219 = vmatpush.bf16.msra.mxu3 %v5057_v32  ;;  %v4961_v22 = vor.u32 %v6254_v12, %v4960_v10  ;;  %v6268_v32 = vld [vmem:[%s9284_s4 + $0x294] sm:$0xf0]  ;;  %v5154_v12 = vld [vmem:[%s9284_s4 + $0x368] sm:$0xf0] }
  0xea   : > { %1983 = vmatpush.bf16.msra.mxu0 %v4789_v5  ;;  %v7877_v27 = vpop.f32.mrf.mxu0  ;;  %v6271_v5 = vld [vmem:[%s9284_s4 + $0x2b4] sm:$0xf] }
  0xeb   : > { %v7879_v28 = vpop.f32.mrf.mxu1  ;;  %1996 = vmatpush.bf16.msra.mxu1 %v4853_v9  ;;  %2206 = vmatpush.bf16.msra.mxu2 %v4993_v29  ;;  %v4973_v9 = vor.u32 %v6255_v3, %v4970_v4  ;;  %v5037_v14 = vor.u32 %v6271_v5, %v5034_v6  ;;  %v6252_v29 = vld [vmem:[%s9284_s4 + $0x214] sm:$0xf0]  ;;  %v5152_v3 = vld [vmem:[%s9284_s4 + $0x360] sm:$0xf]  ;;  %v6294_v4 = vld [vmem:[%s9284_s4 + $0x364] sm:$0xf0] }
  0xec   : > { %v5153_v10 = vor.u32 %v6294_v4, %v5152_v3  ;;  %v6302_v4 = vld [vmem:[%s9284_s4 + $0x3a4] sm:$0xf0] }
  0xed   : > { %1984 = vmatmul.bf16.vlgmr.msra.gmra.mxu0 %v7706_v54  ;;  %v6276_v54 = vld [vmem:[%s9284_s4 + $0x2d4] sm:$0xf0] }
  0xee   : > { %2231 = vmatpush.bf16.msrb.mxu0 %v5005_v16  ;;  %v5049_v40 = vor.u32 %v6276_v54, %v5048_v37  ;;  %1997 = vmatmul.bf16.vlgmr.msra.gmra.mxu1 %v7738_v11  ;;  %v5042_v11 = vld [vmem:[%s9284_s4 + $0x2c8] sm:$0xf0]  ;;  %v6253_v16 = vld [vmem:[%s9284_s4 + $0x224] sm:$0xf]  ;;  %v4953_v37 = vor.u32 %v6252_v29, %v4952_v26  ;;  %v5146_v26 = vld [vmem:[%s9284_s4 + $0x358] sm:$0xf0] }
  0xef   : > { %2244 = vmatpush.bf16.msrb.mxu1 %v5069_v19  ;;  %2207 = vmatpush.bf16.msra.mxu2 %v4985_v38  ;;  %v5045_v1 = vor.u32 %v6273_v55, %v5042_v11  ;;  %v4965_v25 = vor.u32 %v6253_v16, %v4962_v17  ;;  %v5017_v38 = vor.u32 %v6268_v32, %v5016_v30  ;;  %v5162_v11 = vld [vmem:[%s9284_s4 + $0x378] sm:$0xf0]  ;;  %v6307_v32 = vld [vmem:[%s9284_s4 + $0x3d4] sm:$0xf] }
  0xf0   : > { %2220 = vmatpush.bf16.msra.mxu3 %v5049_v40  ;;  %v5008_v40 = vld [vmem:[%s9284_s4 + $0x280] sm:$0xf] }
  0xf1   : > { %v5009_v55 = vor.u32 %v6266_v43, %v5008_v40  ;;  %v6289_v40 = vld [vmem:[%s9284_s4 + $0x344] sm:$0xf] }
  0xf2   : > { %2232 = vmatpush.bf16.msrb.mxu0 %v4997_v33  ;;  %v902_v56 = vpop.f32.mrf.mxu0  ;;  %v6251_v33 = vld [vmem:[%s9284_s4 + $0x214] sm:$0xf] }
  0xf3   : > { %2245 = vmatpush.bf16.msrb.mxu1 %v5061_v34  ;;  %v7926_v50 = vpop.f32.mrf.mxu2  ;;  %v915_v57 = vpop.f32.mrf.mxu1  ;;  %2208 = vmatpush.bf16.msra.mxu2 %v4977_v23  ;;  %v4954_v34 = vld [vmem:[%s9284_s4 + $0x218] sm:$0xf0]  ;;  %v4949_v56 = vor.u32 %v6249_v44, %v4946_v45  ;;  %v6295_v23 = vld [vmem:[%s9284_s4 + $0x374] sm:$0xf]  ;;  %v6305_v45 = vld [vmem:[%s9284_s4 + $0x3c4] sm:$0xf] }
  0xf4   : > { %v7928_v51 = vpop.f32.mrf.mxu3  ;;  %2221 = vmatpush.bf16.msra.mxu3 %v5041_v58  ;;  %v4957_v54 = vor.u32 %v6251_v33, %v4954_v34  ;;  %v6312_v57 = vld [vmem:[%s9284_s4 + $0x3f4] sm:$0xf0]  ;;  %v5210_v33 = vld [vmem:[%s9284_s4 + $0x3d8] sm:$0xf0] }
  0xf5   : > { %v5225_v0 = vor.u32 %v6312_v57, %v5224_v53  ;;  %v6304_v53 = vld [vmem:[%s9284_s4 + $0x3b4] sm:$0xf0] }
  0xf6   : > { %2233 = vmatpush.bf16.msrb.mxu0 %v4989_v41  ;;  %v5021_v41 = vor.u32 %v6267_v35, %v5018_v36  ;;  %v5213_v36 = vor.u32 %v6307_v32, %v5210_v33  ;;  %v5104_v32 = vld [vmem:[%s9284_s4 + $0x300] sm:$0xf]  ;;  %v6282_v33 = vld [vmem:[%s9284_s4 + $0x304] sm:$0xf0] }
  0xf7   : > { %2246 = vmatpush.bf16.msrb.mxu1 %v5053_v46  ;;  %2209 = vmatpush.bf16.msra.mxu2 %v4969_v7  ;;  %v6265_v46 = vld [vmem:[%s9284_s4 + $0x284] sm:$0xf]  ;;  %v5216_v7 = vld [vmem:[%s9284_s4 + $0x3e0] sm:$0xf] }
  0xf8   : > { %2222 = vmatpush.bf16.msra.mxu3 %v5033_v8  ;;  %v5013_v58 = vor.u32 %v6265_v46, %v5010_v47  ;;  %v6310_v8 = vld [vmem:[%s9284_s4 + $0x3e4] sm:$0xf0]  ;;  %v5202_v46 = vld [vmem:[%s9284_s4 + $0x3c8] sm:$0xf0] }
  0xf9   : > { %v5217_v15 = vor.u32 %v6310_v8, %v5216_v7  ;;  %v5205_v47 = vor.u32 %v6305_v45, %v5202_v46  ;;  %v6285_v7 = vld [vmem:[%s9284_s4 + $0x324] sm:$0xf]  ;;  %v5122_v8 = vld [vmem:[%s9284_s4 + $0x328] sm:$0xf0] }
  0xfa   : > { %2234 = vmatpush.bf16.msrb.mxu0 %v4981_v59  ;;  %v5161_v59 = vor.u32 %v6296_v52, %v5160_v49  ;;  %v6288_v49 = vld [vmem:[%s9284_s4 + $0x334] sm:$0xf0]  ;;  %v5192_v52 = vld [vmem:[%s9284_s4 + $0x3b0] sm:$0xf] }
  0xfb   : > { %2247 = vmatpush.bf16.msrb.mxu1 %v5045_v1  ;;  %v1036_v18 = vpop.f32.mrf.mxu2  ;;  %2210 = vmatpush.bf16.msra.mxu2 %v4961_v22  ;;  %v5165_v1 = vor.u32 %v6295_v23, %v5162_v11  ;;  %v6308_v22 = vld [vmem:[%s9284_s4 + $0x3d4] sm:$0xf0]  ;;  %v6303_v23 = vld [vmem:[%s9284_s4 + $0x3b4] sm:$0xf]  ;;  %v5194_v11 = vld [vmem:[%s9284_s4 + $0x3b8] sm:$0xf0] }
  0xfc   : > { %v1049_v19 = vpop.f32.mrf.mxu3  ;;  %2223 = vmatpush.bf16.msra.mxu3 %v5025_v24  ;;  %v5144_v18 = vld [vmem:[%s9284_s4 + $0x350] sm:$0xf]  ;;  %v5209_v24 = vor.u32 %v6308_v22, %v5208_v21  ;;  %v5197_v3 = vor.u32 %v6303_v23, %v5194_v11  ;;  %v5114_v21 = vld [vmem:[%s9284_s4 + $0x318] sm:$0xf0]  ;;  %v6299_v22 = vld [vmem:[%s9284_s4 + $0x394] sm:$0xf] }
  0xfd   : > { %v6292_v19 = vld [vmem:[%s9284_s4 + $0x354] sm:$0xf0] }
  0xfe   : > { %2235 = vmatpush.bf16.msrb.mxu0 %v4973_v9  ;;  %v6293_v9 = vld [vmem:[%s9284_s4 + $0x364] sm:$0xf]  ;;  %v5145_v20 = vor.u32 %v6292_v19, %v5144_v18  ;;  %v6300_v19 = vld [vmem:[%s9284_s4 + $0x394] sm:$0xf0] }
  0xff   : > { %2248 = vmatpush.bf16.msrb.mxu1 %v5037_v14  ;;  %2211 = vmatpush.bf16.msra.mxu2 %v4953_v37  ;;  %v5218_v14 = vld [vmem:[%s9284_s4 + $0x3e8] sm:$0xf0]  ;;  %v5157_v16 = vor.u32 %v6293_v9, %v5154_v12  ;;  %v5136_v37 = vld [vmem:[%s9284_s4 + $0x340] sm:$0xf]  ;;  %v6301_v9 = vld [vmem:[%s9284_s4 + $0x3a4] sm:$0xf]  ;;  %v5121_v12 = vor.u32 %v6286_v63, %v5120_v60 }
 0x100   : > { %2224 = vmatpush.bf16.msra.mxu3 %v5017_v38  ;;  %v5221_v17 = vor.u32 %v6309_v13, %v5218_v14  ;;  %v6290_v38 = vld [vmem:[%s9284_s4 + $0x344] sm:$0xf0]  ;;  %v5125_v14 = vor.u32 %v6285_v7, %v5122_v8 }
 0x101   : > { %v5137_v39 = vor.u32 %v6290_v38, %v5136_v37  ;;  %v6298_v38 = vld [vmem:[%s9284_s4 + $0x384] sm:$0xf0] }
 0x102   : > { %2236 = vmatpush.bf16.msrb.mxu0 %v4965_v25  ;;  %v6291_v25 = vld [vmem:[%s9284_s4 + $0x354] sm:$0xf] }
 0x103   : > { %2249 = vmatpush.bf16.msrb.mxu1 %v5029_v31  ;;  %2212 = vmatpush.bf16.msra.mxu2 %v4945_v48  ;;  %v5149_v31 = vor.u32 %v6291_v25, %v5146_v26  ;;  %v5128_v48 = vld [vmem:[%s9284_s4 + $0x330] sm:$0xf] }
 0x104   : > { %2225 = vmatpush.bf16.msra.mxu3 %v5009_v55  ;;  %v6287_v55 = vld [vmem:[%s9284_s4 + $0x334] sm:$0xf]  ;;  %v5129_v57 = vor.u32 %v6288_v49, %v5128_v48 }
 0x106   : > { %2237 = vmatpush.bf16.msrb.mxu0 %v4957_v54  ;;  %v5200_v54 = vld [vmem:[%s9284_s4 + $0x3c0] sm:$0xf] }
 0x107   : > { %2250 = vmatpush.bf16.msrb.mxu1 %v5021_v41  ;;  %2470 = vmatpush.bf16.msrb.mxu2 %v5161_v59  ;;  %v5138_v41 = vld [vmem:[%s9284_s4 + $0x348] sm:$0xf0]  ;;  %v5201_v43 = vor.u32 %v6306_v42, %v5200_v54  ;;  %v6281_v54 = vld [vmem:[%s9284_s4 + $0x304] sm:$0xf]  ;;  %v5105_v42 = vor.u32 %v6282_v33, %v5104_v32  ;;  %v5376_v33 = vld [vmem:[%s9284_s4 + $0x4e0] sm:$0xf] }
 0x108   : > { %2483 = vmatpush.bf16.msrb.mxu3 %v5225_v0  ;;  %v5141_v44 = vor.u32 %v6289_v40, %v5138_v41  ;;  %v5184_v0 = vld [vmem:[%s9284_s4 + $0x3a0] sm:$0xf] }
 0x109   : > { %v5185_v13 = vor.u32 %v6302_v4, %v5184_v0  ;;  %v255_v40 = vld [vmem:[%s9283_s3] sm:$0x3] }
 0x10a   : > { %v8069_v5 = vpop.f32.mrf.mxu0  ;;  %2238 = vmatpush.bf16.msrb.mxu0 %v4949_v56  ;;  %v5130_v56 = vld [vmem:[%s9284_s4 + $0x338] sm:$0xf0]  ;;  %v1455_v48 = vperm.slane %v255_v40, 1 }
 0x10b   : > { %v8071_v6 = vpop.f32.mrf.mxu1  ;;  %2251 = vmatpush.bf16.msrb.mxu1 %v5013_v58  ;;  %2471 = vmatpush.bf16.msrb.mxu2 %v5153_v10  ;;  %v5193_v58 = vor.u32 %v6304_v53, %v5192_v52  ;;  %v5133_v59 = vor.u32 %v6287_v55, %v5130_v56  ;;  %v5186_v10 = vld [vmem:[%s9284_s4 + $0x3a8] sm:$0xf0] }
 0x10c   : > { %2484 = vmatpush.bf16.msrb.mxu3 %v5217_v15  ;;  %v5112_v15 = vld [vmem:[%s9284_s4 + $0x310] sm:$0xf]  ;;  %v5189_v18 = vor.u32 %v6301_v9, %v5186_v10  ;;  %v6328_v10 = vld [vmem:[%s9284_s4 + $0x474] sm:$0xf0] }
 0x10d   : > { %v5320_v9 = vld [vmem:[%s9284_s4 + $0x470] sm:$0xf] }
 0x10e   : > { %2496 = vmatpush.bf16.msra.mxu0 %v5165_v1 }
 0x10f   : > { %2509 = vmatpush.bf16.msra.mxu1 %v5229_v2  ;;  %2472 = vmatpush.bf16.msrb.mxu2 %v5145_v20  ;;  %v6283_v20 = vld [vmem:[%s9284_s4 + $0x314] sm:$0xf] }
 0x110   : > { %2485 = vmatpush.bf16.msrb.mxu3 %v5209_v24  ;;  %v5178_v24 = vld [vmem:[%s9284_s4 + $0x398] sm:$0xf0] }
 0x111   : > { %v5181_v37 = vor.u32 %v6299_v22, %v5178_v24  ;;  %v5321_v22 = vor.u32 %v6328_v10, %v5320_v9  ;;  %v6336_v9 = vld [vmem:[%s9284_s4 + $0x4b4] sm:$0xf0]  ;;  %v6319_v10 = vld [vmem:[%s9284_s4 + $0x434] sm:$0xf] }
 0x112   : > { %2497 = vmatpush.bf16.msra.mxu0 %v5157_v16  ;;  %v8109_v29 = vpop.f32.mrf.mxu2  ;;  %v1174_v34 = vpop.f32.mrf.mxu0  ;;  %v6284_v16 = vld [vmem:[%s9284_s4 + $0x314] sm:$0xf0] }
 0x113   : > { %v8111_v30 = vpop.f32.mrf.mxu3  ;;  %2510 = vmatpush.bf16.msra.mxu1 %v5221_v17  ;;  %v1187_v35 = vpop.f32.mrf.mxu1  ;;  %2473 = vmatpush.bf16.msrb.mxu2 %v5137_v39  ;;  %v5176_v17 = vld [vmem:[%s9284_s4 + $0x390] sm:$0xf]  ;;  %v5113_v25 = vor.u32 %v6284_v16, %v5112_v15  ;;  %v5168_v34 = vld [vmem:[%s9284_s4 + $0x380] sm:$0xf]  ;;  %v5106_v39 = vld [vmem:[%s9284_s4 + $0x308] sm:$0xf0] }
 0x114   : > { %2486 = vmatpush.bf16.msrb.mxu3 %v5201_v43  ;;  %v5177_v26 = vor.u32 %v6300_v19, %v5176_v17  ;;  %v917_v35 = vadd.f32 %v7877_v27, %v7717_v61  ;;  %v6297_v61 = vld [vmem:[%s9284_s4 + $0x384] sm:$0xf]  ;;  %v5169_v41 = vor.u32 %v6298_v38, %v5168_v34  ;;  %v5109_v43 = vor.u32 %v6281_v54, %v5106_v39  ;;  %v5322_v17 = vld [vmem:[%s9284_s4 + $0x478] sm:$0xf0]  ;;  %v6342_v34 = vld [vmem:[%s9284_s4 + $0x4e4] sm:$0xf0] }
 0x115   : > { %v5386_v19 = vld [vmem:[%s9284_s4 + $0x4f8] sm:$0xf0]  ;;  %v5378_v38 = vld [vmem:[%s9284_s4 + $0x4e8] sm:$0xf0]  ;;  %v5304_v54 = vld [vmem:[%s9284_s4 + $0x450] sm:$0xf] }
 0x116   : > { %2498 = vmatpush.bf16.msra.mxu0 %v5149_v31  ;;  %v5117_v31 = vor.u32 %v6283_v20, %v5114_v21  ;;  %v1051_v27 = vadd.f32 %v7926_v50, %v917_v35  ;;  %v6325_v35 = vld [vmem:[%s9284_s4 + $0x464] sm:$0xf] }
 0x117   : > { %2511 = vmatpush.bf16.msra.mxu1 %v5213_v36  ;;  %2474 = vmatpush.bf16.msrb.mxu2 %v5129_v57  ;;  %v918_v36 = vadd.f32 %v7879_v28, %v7719_v62  ;;  %v5170_v62 = vld [vmem:[%s9284_s4 + $0x388] sm:$0xf0] }
 0x118   : > { %2487 = vmatpush.bf16.msrb.mxu3 %v5193_v58  ;;  %v5173_v46 = vor.u32 %v6297_v61, %v5170_v62  ;;  %v5377_v61 = vor.u32 %v6342_v34, %v5376_v33  ;;  %v6324_v62 = vld [vmem:[%s9284_s4 + $0x454] sm:$0xf0]  ;;  %v5346_v33 = vld [vmem:[%s9284_s4 + $0x4a8] sm:$0xf0] }
 0x119   : > { %v1052_v28 = vadd.f32 %v7928_v51, %v918_v36  ;;  %v5314_v36 = vld [vmem:[%s9284_s4 + $0x468] sm:$0xf0] }
 0x11a   : > { %2499 = vmatpush.bf16.msra.mxu0 %v5141_v44  ;;  %v1305_v1 = vpop.f32.mrf.mxu2  ;;  %v1189_v44 = vadd.f32 %v8069_v5, %v1051_v27  ;;  %v5368_v27 = vld [vmem:[%s9284_s4 + $0x4d0] sm:$0xf] }
 0x11b   : > { %v1318_v2 = vpop.f32.mrf.mxu3  ;;  %2512 = vmatpush.bf16.msra.mxu1 %v5205_v47  ;;  %2475 = vmatpush.bf16.msrb.mxu2 %v5121_v12  ;;  %v1190_v45 = vadd.f32 %v8071_v6, %v1052_v28  ;;  %v1454_v47 = vperm.slane %v255_v40, 0  ;;  %v1470_v6 = vpop.permute.xlu0 %1469  ;;  %v1485_v1 = vld [vmem:[#allocation2] sm:$0xcc]  ;;  %v5384_v12 = vld [vmem:[%s9284_s4 + $0x4f0] sm:$0xf] }
 0x11c   : > { %2488 = vmatpush.bf16.msrb.mxu3 %v5185_v13  ;;  %v1320_v50 = vadd.f32 %v8109_v29, %v1189_v44  ;;  %v6344_v13 = vld [vmem:[%s9284_s4 + $0x4f4] sm:$0xf0]  ;;  %v6339_v44 = vld [vmem:[%s9284_s4 + $0x4d4] sm:$0xf] }
 0x11d   : > { %v1321_v51 = vadd.f32 %v8111_v30, %v1190_v45  ;;  %v5385_v24 = vor.u32 %v6344_v13, %v5384_v12  ;;  %v6340_v28 = vld [vmem:[%s9284_s4 + $0x4d4] sm:$0xf0]  ;;  %v5370_v45 = vld [vmem:[%s9284_s4 + $0x4d8] sm:$0xf0]  ;;  %v6335_v13 = vld [vmem:[%s9284_s4 + $0x4b4] sm:$0xf] }
 0x11e   : > { %2500 = vmatpush.bf16.msra.mxu0 %v5133_v59  ;;  %v5290_v12 = vld [vmem:[%s9284_s4 + $0x438] sm:$0xf0] }
 0x11f   : > { %2513 = vmatpush.bf16.msra.mxu1 %v5197_v3  ;;  %2476 = vmatpush.bf16.msrb.mxu2 %v5113_v25  ;;  %v5312_v25 = vld [vmem:[%s9284_s4 + $0x460] sm:$0xf] }
 0x120   : > { %2489 = vmatpush.bf16.msrb.mxu3 %v5177_v26  ;;  %v6326_v26 = vld [vmem:[%s9284_s4 + $0x464] sm:$0xf0] }
 0x121   : > { %v5313_v39 = vor.u32 %v6326_v26, %v5312_v25  ;;  %v6334_v25 = vld [vmem:[%s9284_s4 + $0x4a4] sm:$0xf0]  ;;  %v6317_v26 = vld [vmem:[%s9284_s4 + $0x424] sm:$0xf] }
 0x122   : > { %2501 = vmatpush.bf16.msra.mxu0 %v5125_v14  ;;  %v6327_v14 = vld [vmem:[%s9284_s4 + $0x474] sm:$0xf] }
 0x123   : > { %2514 = vmatpush.bf16.msra.mxu1 %v5189_v18  ;;  %2477 = vmatpush.bf16.msrb.mxu2 %v5105_v42  ;;  %v6343_v18 = vld [vmem:[%s9284_s4 + $0x4f4] sm:$0xf]  ;;  %v5317_v42 = vor.u32 %v6325_v35, %v5314_v36  ;;  %v5272_v36 = vld [vmem:[%s9284_s4 + $0x410] sm:$0xf] }
 0x124   : > { %2490 = vmatpush.bf16.msrb.mxu3 %v5169_v41  ;;  %v5389_v32 = vor.u32 %v6343_v18, %v5386_v19  ;;  %v6323_v41 = vld [vmem:[%s9284_s4 + $0x454] sm:$0xf]  ;;  %v5280_v19 = vld [vmem:[%s9284_s4 + $0x420] sm:$0xf] }
 0x126   : > { %2502 = vmatpush.bf16.msra.mxu0 %v5117_v31  ;;  %v5325_v31 = vor.u32 %v6327_v14, %v5322_v17  ;;  %v5354_v14 = vld [vmem:[%s9284_s4 + $0x4b8] sm:$0xf0] }
 0x127   : > { %2515 = vmatpush.bf16.msra.mxu1 %v5181_v37  ;;  %v6341_v37 = vld [vmem:[%s9284_s4 + $0x4e4] sm:$0xf] }
 0x128   : > { %v5381_v40 = vor.u32 %v6341_v37, %v5378_v38  ;;  %v6316_v37 = vld [vmem:[%s9284_s4 + $0x414] sm:$0xf0] }
 0x12a   : > { %v1434_v49 = vpop.f32.mrf.mxu0  ;;  %2503 = vmatpush.bf16.msra.mxu0 %v5109_v43  ;;  %v5306_v43 = vld [vmem:[%s9284_s4 + $0x458] sm:$0xf0] }
 0x12b   : > { %v1447_v52 = vpop.f32.mrf.mxu1  ;;  %v1451_v53 = vadd.f32 %v1434_v49, %v1320_v50  ;;  %2516 = vmatpush.bf16.msra.mxu1 %v5173_v46  ;;  %v5305_v46 = vor.u32 %v6324_v62, %v5304_v54  ;;  %v5369_v50 = vor.u32 %v6340_v28, %v5368_v27  ;;  %v6338_v49 = vld [vmem:[%s9284_s4 + $0x4c4] sm:$0xf0]  ;;  %v6315_v62 = vld [vmem:[%s9284_s4 + $0x414] sm:$0xf]  ;;  %v5274_v27 = vld [vmem:[%s9284_s4 + $0x418] sm:$0xf0] }
 0x12c   : > { %v1452_v55 = vadd.f32 %v1447_v52, %v1321_v51  ;;  %v5296_v51 = vld [vmem:[%s9284_s4 + $0x440] sm:$0xf]  ;;  %v6331_v28 = vld [vmem:[%s9284_s4 + $0x494] sm:$0xf] }
 0x12d   : > { %v1458_v56 = vadd.f32 %v1454_v47, %v1451_v53  ;;  %v6322_v47 = vld [vmem:[%s9284_s4 + $0x444] sm:$0xf0] }
 0x12e   : > { %v1459_v5 = vadd.f32 %v1455_v48, %v1452_v55  ;;  %v5360_v48 = vld [vmem:[%s9284_s4 + $0x4c0] sm:$0xf] }
 0x12f   : > { %vm1460_vm4 = vcmp.ge.f32.partialorder %v1458_v56, 0.0  ;;  %v1462_v29 = vmul.f32 0.1, %v1458_v56 }
 0x130   : > { %vm1461_vm5 = vcmp.ge.f32.partialorder %v1459_v5, 0.0  ;;  %v1463_v30 = vmul.f32 0.1, %v1459_v5 }
 0x131   : > { %v1464_v23 = vsel %vm1460_vm4, %v1458_v56, %v1462_v29  ;;  %v6321_v29 = vld [vmem:[%s9284_s4 + $0x444] sm:$0xf] }
 0x132   : > { %v1465_v11 = vsel %vm1461_vm5, %v1459_v5, %v1463_v30  ;;  %v1472_v58 = vmul.f32 %v1470_v6, %v1464_v23  ;;  %v1436_v60 = vpop.f32.mrf.mxu0  ;;  %v5309_v5 = vor.u32 %v6323_v41, %v5306_v43  ;;  %v5298_v30 = vld [vmem:[%s9284_s4 + $0x448] sm:$0xf0]  ;;  %v6337_v23 = vld [vmem:[%s9284_s4 + $0x4c4] sm:$0xf]  ;;  %v5273_v43 = vor.u32 %v6316_v37, %v5272_v36  ;;  %v6355_v36 = vld [vmem:[%s9284_s4 + $0x554] sm:$0xf] }
 0x133   : > { %v1473_v59 = vmul.f32 %v1470_v6, %v1465_v11  ;;  %v1449_v63 = vpop.f32.mrf.mxu1  ;;  %v5373_v6 = vor.u32 %v6339_v44, %v5370_v45  ;;  %v5362_v11 = vld [vmem:[%s9284_s4 + $0x4c8] sm:$0xf0]  ;;  %v5288_v60 = vld [vmem:[%s9284_s4 + $0x430] sm:$0xf]  ;;  %v6314_v45 = vld [vmem:[%s9284_s4 + $0x404] sm:$0xf0] }
 0x135   : > { %v1474_v0 = vpack.c.bf16 %v1473_v59, %v1472_v58  ;;  %v5297_v58 = vor.u32 %v6322_v47, %v5296_v51  ;;  %v5361_v59 = vor.u32 %v6338_v49, %v5360_v48  ;;  %v5277_v51 = vor.u32 %v6315_v62, %v5274_v27  ;;  %v6313_v48 = vld [vmem:[%s9284_s4 + $0x404] sm:$0xf]  ;;  %v5266_v49 = vld [vmem:[%s9284_s4 + $0x408] sm:$0xf0] }
 0x137   : > { %v1476_v2 = vrot.slane %v1474_v0, 6 }
 0x139   : > { %v1486_v3 = vsel %vm1484_vm8, %v1476_v2, %v1485_v1 }
 0x13a   : > { %1487 = vst [vmem:[#allocation2] sm:$0xcc] %v1486_v3  ;;  %v6320_v3 = vld [vmem:[%s9284_s4 + $0x434] sm:$0xf0] }
 0x141   : > { %v2002_v4 = vld [vmem:[#allocation2] sm:$0x66] }
 0x142   : > { %v2037_v7 = vunpack.c.l.b16 %v2002_v4  ;;  %v2038_v8 = vunpack.c.h.b16 %v2002_v4  ;;  %v5301_v4 = vor.u32 %v6321_v29, %v5298_v30  ;;  %v2524_v41 = vld [vmem:[#allocation2] sm:$0xcc]  ;;  %v5544_v29 = vld [vmem:[%s9284_s4 + $0x5f0] sm:$0xf]  ;;  %v6376_v30 = vld [vmem:[%s9284_s4 + $0x5f4] sm:$0xf0] }
 0x144   : > { %v8273_v15 = vpack.c.b16 %v2037_v7, %v2037_v7  ;;  %v8275_v16 = vpack.c.b16 %v2038_v8, %v2038_v8  ;;  %v5365_v7 = vor.u32 %v6337_v23, %v5362_v11  ;;  %v5352_v8 = vld [vmem:[%s9284_s4 + $0x4b0] sm:$0xf]  ;;  %v6359_v23 = vld [vmem:[%s9284_s4 + $0x574] sm:$0xf] }
 0x145   : > { %v5353_v18 = vor.u32 %v6336_v9, %v5352_v8  ;;  %v5472_v8 = vld [vmem:[%s9284_s4 + $0x560] sm:$0xf]  ;;  %v6358_v9 = vld [vmem:[%s9284_s4 + $0x564] sm:$0xf0] }
 0x146   : > { %v2041_v20 = vrot.slane %v8273_v15, 1  ;;  %v2042_v21 = vrot.slane %v8275_v16, 1  ;;  %v2293_v52 = vshrl.u32 %v8273_v15, 16  ;;  %v2296_v53 = vshll.u32 %v8273_v15, 16 }
 0x147   : > { %v2301_v55 = vshrl.u32 %v8275_v16, 16  ;;  %v2304_v56 = vshll.u32 %v8275_v16, 16  ;;  %v5289_v15 = vor.u32 %v6320_v3, %v5288_v60  ;;  %v6375_v60 = vld [vmem:[%s9284_s4 + $0x5f4] sm:$0xf]  ;;  %v5545_v3 = vor.u32 %v6376_v30, %v5544_v29  ;;  %v5512_v30 = vld [vmem:[%s9284_s4 + $0x5b0] sm:$0xf] }
 0x148   : > { %2213 = vmatmul.bf16.vlgmr.msra.gmra.mxu2 %v2041_v20  ;;  %2226 = vmatmul.bf16.vlgmr.msra.gmra.mxu3 %v2042_v21  ;;  %v2295_v63 = vrot.slane %v2293_v52, 1  ;;  %v2298_v0 = vrot.slane %v2296_v53, 2  ;;  %v6329_v52 = vld [vmem:[%s9284_s4 + $0x484] sm:$0xf]  ;;  %v5330_v53 = vld [vmem:[%s9284_s4 + $0x488] sm:$0xf0] }
 0x149   : > { %2239 = vmatmul.bf16.vlgmr.msrb.gmra.mxu0 %v2041_v20  ;;  %2252 = vmatmul.bf16.vlgmr.msrb.gmra.mxu1 %v2042_v21  ;;  %v2303_v1 = vrot.slane %v2301_v55, 1  ;;  %v2306_v2 = vrot.slane %v2304_v56, 2  ;;  %v6318_v20 = vld [vmem:[%s9284_s4 + $0x424] sm:$0xf0]  ;;  %v5293_v21 = vor.u32 %v6319_v10, %v5290_v12  ;;  %v5480_v55 = vld [vmem:[%s9284_s4 + $0x570] sm:$0xf] }
 0x14a   : > { %2727 = vmatpush.bf16.msra.mxu2 %v5321_v22  ;;  %2740 = vmatpush.bf16.msra.mxu3 %v5385_v24  ;;  %v2299_v16 = vor.u32 %v2298_v0, %v2295_v63  ;;  %v5357_v22 = vor.u32 %v6335_v13, %v5354_v14  ;;  %v5344_v24 = vld [vmem:[%s9284_s4 + $0x4a0] sm:$0xf]  ;;  %v5281_v34 = vor.u32 %v6318_v20, %v5280_v19  ;;  %v6360_v56 = vld [vmem:[%s9284_s4 + $0x574] sm:$0xf0]  ;;  %v5546_v63 = vld [vmem:[%s9284_s4 + $0x5f8] sm:$0xf0] }
 0x14b   : > { %2753 = vmatpush.bf16.msrb.mxu0 %v5325_v31  ;;  %2766 = vmatpush.bf16.msrb.mxu1 %v5389_v32  ;;  %v2307_v17 = vor.u32 %v2306_v2, %v2303_v1  ;;  %v5282_v31 = vld [vmem:[%s9284_s4 + $0x428] sm:$0xf0]  ;;  %v6333_v32 = vld [vmem:[%s9284_s4 + $0x4a4] sm:$0xf]  ;;  %v5345_v35 = vor.u32 %v6334_v25, %v5344_v24  ;;  %v5269_v0 = vor.u32 %v6313_v48, %v5266_v49  ;;  %v5536_v13 = vld [vmem:[%s9284_s4 + $0x5e0] sm:$0xf] }
 0x14c   : > { %v5285_v38 = vor.u32 %v6317_v26, %v5282_v31  ;;  %v5349_v54 = vor.u32 %v6333_v32, %v5346_v33  ;;  %v5333_v1 = vor.u32 %v6329_v52, %v5330_v53  ;;  %v5481_v2 = vor.u32 %v6360_v56, %v5480_v55  ;;  %v6374_v14 = vld [vmem:[%s9284_s4 + $0x5e4] sm:$0xf0]  ;;  %v5464_v26 = vld [vmem:[%s9284_s4 + $0x550] sm:$0xf]  ;;  %v6356_v31 = vld [vmem:[%s9284_s4 + $0x554] sm:$0xf0] }
 0x14d   : > { %v5549_v12 = vor.u32 %v6375_v60, %v5546_v63  ;;  %v1771_v20 = vpop.f32.mrf.mxu0  ;;  %v5473_v24 = vor.u32 %v6358_v9, %v5472_v8  ;;  %v5537_v25 = vor.u32 %v6374_v14, %v5536_v13  ;;  %v5522_v48 = vld [vmem:[%s9284_s4 + $0x5c8] sm:$0xf0]  ;;  %v5448_v56 = vld [vmem:[%s9284_s4 + $0x530] sm:$0xf]  ;;  %v5450_v60 = vld [vmem:[%s9284_s4 + $0x538] sm:$0xf0] }
 0x14e   : > { %2728 = vmatpush.bf16.msra.mxu2 %v5313_v39  ;;  %2741 = vmatpush.bf16.msra.mxu3 %v5377_v61  ;;  %v5336_v39 = vld [vmem:[%s9284_s4 + $0x490] sm:$0xf]  ;;  %v6332_v61 = vld [vmem:[%s9284_s4 + $0x494] sm:$0xf0]  ;;  %v6367_v63 = vld [vmem:[%s9284_s4 + $0x5b4] sm:$0xf] }
 0x14f   : > { %2754 = vmatpush.bf16.msrb.mxu0 %v5317_v42  ;;  %2767 = vmatpush.bf16.msrb.mxu1 %v5381_v40  ;;  %v5338_v42 = vld [vmem:[%s9284_s4 + $0x498] sm:$0xf0]  ;;  %v5264_v40 = vld [vmem:[%s9284_s4 + $0x400] sm:$0xf]  ;;  %v5337_v44 = vor.u32 %v6332_v61, %v5336_v39  ;;  %v6371_v39 = vld [vmem:[%s9284_s4 + $0x5d4] sm:$0xf] }
 0x150   : > { %v5341_v47 = vor.u32 %v6331_v28, %v5338_v42  ;;  %v5265_v11 = vor.u32 %v6314_v45, %v5264_v40  ;;  %v5530_v61 = vld [vmem:[%s9284_s4 + $0x5d8] sm:$0xf0]  ;;  %v5465_v28 = vor.u32 %v6356_v31, %v5464_v26  ;;  %v5456_v40 = vld [vmem:[%s9284_s4 + $0x540] sm:$0xf]  ;;  %v6350_v8 = vld [vmem:[%s9284_s4 + $0x524] sm:$0xf0] }
 0x151   : > { %v5520_v45 = vld [vmem:[%s9284_s4 + $0x5c0] sm:$0xf]  ;;  %v6366_v13 = vld [vmem:[%s9284_s4 + $0x5a4] sm:$0xf0]  ;;  %v6349_v14 = vld [vmem:[%s9284_s4 + $0x524] sm:$0xf] }
 0x152   : > { %2729 = vmatpush.bf16.msra.mxu2 %v5305_v46  ;;  %2742 = vmatpush.bf16.msra.mxu3 %v5369_v50  ;;  %v5328_v46 = vld [vmem:[%s9284_s4 + $0x480] sm:$0xf]  ;;  %v6330_v50 = vld [vmem:[%s9284_s4 + $0x484] sm:$0xf0] }
 0x153   : > { %2755 = vmatpush.bf16.msrb.mxu0 %v5309_v5  ;;  %2768 = vmatpush.bf16.msrb.mxu1 %v5373_v6  ;;  %v2559_v5 = vunpack.c.l.b16 %v2524_v41  ;;  %v2560_v6 = vunpack.c.h.b16 %v2524_v41  ;;  %v1745_v19 = vpop.f32.mrf.mxu2  ;;  %v6354_v41 = vld [vmem:[%s9284_s4 + $0x544] sm:$0xf0] }
 0x154   : > { %v5457_v53 = vor.u32 %v6354_v41, %v5456_v40 }
 0x155   : > { %v1773_v52 = vpop.f32.mrf.mxu0 }
 0x156   : > { %2730 = vmatpush.bf16.msra.mxu2 %v5297_v58  ;;  %2743 = vmatpush.bf16.msra.mxu3 %v5361_v59  ;;  %v5329_v58 = vor.u32 %v6330_v50, %v5328_v46  ;;  %v5482_v59 = vld [vmem:[%s9284_s4 + $0x578] sm:$0xf0]  ;;  %v6370_v46 = vld [vmem:[%s9284_s4 + $0x5c4] sm:$0xf0]  ;;  %v6353_v50 = vld [vmem:[%s9284_s4 + $0x544] sm:$0xf] }
 0x157   : > { %2756 = vmatpush.bf16.msrb.mxu0 %v5301_v4  ;;  %2769 = vmatpush.bf16.msrb.mxu1 %v5365_v7  ;;  %v8484_v4 = vpack.c.b16 %v2559_v5, %v2559_v5  ;;  %v8486_v7 = vpack.c.b16 %v2560_v6, %v2560_v6  ;;  %v5485_v10 = vor.u32 %v6359_v23, %v5482_v59  ;;  %v1758_v37 = vpop.f32.mrf.mxu3  ;;  %v6352_v5 = vld [vmem:[%s9284_s4 + $0x534] sm:$0xf0]  ;;  %v5648_v52 = vld [vmem:[%s9284_s4 + $0x670] sm:$0xf] }
 0x158   : > { %2478 = vmatmul.bf16.vlgmr.msrb.gmra.mxu2 %v2299_v16  ;;  %2491 = vmatmul.bf16.vlgmr.msrb.gmra.mxu3 %v2307_v17  ;;  %v8538_v62 = vadd.f32 %v1758_v37, %v1745_v19  ;;  %v5521_v55 = vor.u32 %v6370_v46, %v5520_v45  ;;  %v6368_v23 = vld [vmem:[%s9284_s4 + $0x5b4] sm:$0xf0]  ;;  %v6346_v45 = vld [vmem:[%s9284_s4 + $0x504] sm:$0xf0]  ;;  %v5488_v46 = vld [vmem:[%s9284_s4 + $0x580] sm:$0xf] }
 0x159   : > { %2504 = vmatmul.bf16.vlgmr.msra.gmra.mxu0 %v2299_v16  ;;  %2517 = vmatmul.bf16.vlgmr.msra.gmra.mxu1 %v2307_v17  ;;  %v5474_v16 = vld [vmem:[%s9284_s4 + $0x568] sm:$0xf0]  ;;  %v6373_v17 = vld [vmem:[%s9284_s4 + $0x5e4] sm:$0xf]  ;;  %v2826_v40 = vshll.u32 %v8486_v7, 16 }
 0x15a   : > { %2731 = vmatpush.bf16.msra.mxu2 %v5289_v15  ;;  %2744 = vmatpush.bf16.msra.mxu3 %v5353_v18  ;;  %v6357_v15 = vld [vmem:[%s9284_s4 + $0x564] sm:$0xf]  ;;  %v5538_v18 = vld [vmem:[%s9284_s4 + $0x5e8] sm:$0xf0] }
 0x15b   : > { %2757 = vmatpush.bf16.msrb.mxu0 %v5293_v21  ;;  %2770 = vmatpush.bf16.msrb.mxu1 %v5357_v22  ;;  %v2563_v21 = vrot.slane %v8484_v4, 2  ;;  %v2564_v22 = vrot.slane %v8486_v7, 2  ;;  %v5477_v32 = vor.u32 %v6357_v15, %v5474_v16  ;;  %v5541_v33 = vor.u32 %v6373_v17, %v5538_v18  ;;  %v1747_v49 = vpop.f32.mrf.mxu2  ;;  %v5442_v15 = vld [vmem:[%s9284_s4 + $0x528] sm:$0xf0]  ;;  %v6365_v16 = vld [vmem:[%s9284_s4 + $0x5a4] sm:$0xf] }
 0x15c   : > { %v5506_v17 = vld [vmem:[%s9284_s4 + $0x5a8] sm:$0xf0]  ;;  %v5445_v31 = vor.u32 %v6349_v14, %v5442_v15  ;;  %v6392_v14 = vld [vmem:[%s9284_s4 + $0x664] sm:$0xf0] }
 0x15d   : > { %v5490_v49 = vld [vmem:[%s9284_s4 + $0x588] sm:$0xf0] }
 0x15e   : > { %2732 = vmatpush.bf16.msra.mxu2 %v5281_v34  ;;  %2745 = vmatpush.bf16.msra.mxu3 %v5345_v35  ;;  %v5528_v34 = vld [vmem:[%s9284_s4 + $0x5d0] sm:$0xf]  ;;  %v6372_v35 = vld [vmem:[%s9284_s4 + $0x5d4] sm:$0xf0] }
 0x15f   : > { %2758 = vmatpush.bf16.msrb.mxu0 %v5285_v38  ;;  %2771 = vmatpush.bf16.msrb.mxu1 %v5349_v54  ;;  %v1784_v38 = vpop.f32.mrf.mxu1  ;;  %v5466_v54 = vld [vmem:[%s9284_s4 + $0x558] sm:$0xf0]  ;;  %v5529_v42 = vor.u32 %v6372_v35, %v5528_v34  ;;  %v6364_v34 = vld [vmem:[%s9284_s4 + $0x594] sm:$0xf0]  ;;  %v6347_v35 = vld [vmem:[%s9284_s4 + $0x514] sm:$0xf] }
 0x160   : > { %v8540_v27 = vadd.f32 %v1784_v38, %v1771_v20 }
 0x162   : > { %2733 = vmatpush.bf16.msra.mxu2 %v5273_v43  ;;  %2746 = vmatpush.bf16.msra.mxu3 %v5337_v44  ;;  %v5469_v43 = vor.u32 %v6355_v36, %v5466_v54  ;;  %v5533_v44 = vor.u32 %v6371_v39, %v5530_v61  ;;  %v5434_v54 = vld [vmem:[%s9284_s4 + $0x518] sm:$0xf0]  ;;  %v6363_v39 = vld [vmem:[%s9284_s4 + $0x594] sm:$0xf] }
 0x163   : > { %2759 = vmatpush.bf16.msrb.mxu0 %v5277_v51  ;;  %2772 = vmatpush.bf16.msrb.mxu1 %v5341_v47  ;;  %v5458_v51 = vld [vmem:[%s9284_s4 + $0x548] sm:$0xf0]  ;;  %v6369_v47 = vld [vmem:[%s9284_s4 + $0x5c4] sm:$0xf]  ;;  %v5498_v61 = vld [vmem:[%s9284_s4 + $0x598] sm:$0xf0] }
 0x164   : > { %v5461_v6 = vor.u32 %v6353_v50, %v5458_v51  ;;  %v5525_v29 = vor.u32 %v6369_v47, %v5522_v48  ;;  %v5501_v50 = vor.u32 %v6363_v39, %v5498_v61  ;;  %v6345_v51 = vld [vmem:[%s9284_s4 + $0x504] sm:$0xf]  ;;  %v5426_v47 = vld [vmem:[%s9284_s4 + $0x508] sm:$0xf0]  ;;  %v6405_v39 = vld [vmem:[%s9284_s4 + $0x6d4] sm:$0xf] }
 0x165   : > { %v6361_v48 = vld [vmem:[%s9284_s4 + $0x584] sm:$0xf]  ;;  %v5698_v61 = vld [vmem:[%s9284_s4 + $0x6d8] sm:$0xf0] }
 0x166   : > { %2734 = vmatpush.bf16.msra.mxu2 %v5265_v11  ;;  %2747 = vmatpush.bf16.msra.mxu3 %v5329_v58  ;;  %v6351_v11 = vld [vmem:[%s9284_s4 + $0x534] sm:$0xf]  ;;  %v1760_v58 = vpop.f32.mrf.mxu3 }
 0x167   : > { %2760 = vmatpush.bf16.msrb.mxu0 %v5269_v0  ;;  %2773 = vmatpush.bf16.msrb.mxu1 %v5333_v1  ;;  %v1786_v59 = vpop.f32.mrf.mxu1  ;;  %v5514_v0 = vld [vmem:[%s9284_s4 + $0x5b8] sm:$0xf0]  ;;  %v5449_v1 = vor.u32 %v6352_v5, %v5448_v56  ;;  %v5453_v9 = vor.u32 %v6351_v11, %v5450_v60  ;;  %v6410_v56 = vld [vmem:[%s9284_s4 + $0x6f4] sm:$0xf0]  ;;  %v6393_v5 = vld [vmem:[%s9284_s4 + $0x674] sm:$0xf]  ;;  %v5429_v60 = vor.u32 %v6345_v51, %v5426_v47 }
 0x168   : > { %v5650_v11 = vld [vmem:[%s9284_s4 + $0x678] sm:$0xf0]  ;;  %v6409_v58 = vld [vmem:[%s9284_s4 + $0x6f4] sm:$0xf]  ;;  %v5690_v51 = vld [vmem:[%s9284_s4 + $0x6c8] sm:$0xf0] }
 0x169   : > { %2735 = vmatmul.bf16.vlgmr.msra.gmra.mxu2 %v2563_v21  ;;  %2748 = vmatmul.bf16.vlgmr.msra.gmra.mxu3 %v2564_v22  ;;  %v1959_v18 = vpop.f32.mrf.mxu2  ;;  %v5714_v59 = vld [vmem:[%s9284_s4 + $0x6f8] sm:$0xf0]  ;;  %v5653_v15 = vor.u32 %v6393_v5, %v5650_v11  ;;  %v6402_v5 = vld [vmem:[%s9284_s4 + $0x6b4] sm:$0xf0] }
 0x16a   : > { %2992 = vmatpush.bf16.msrb.mxu2 %v5481_v2  ;;  %3005 = vmatpush.bf16.msrb.mxu3 %v5545_v3  ;;  %v5513_v2 = vor.u32 %v6368_v23, %v5512_v30  ;;  %v5440_v3 = vld [vmem:[%s9284_s4 + $0x520] sm:$0xf]  ;;  %v1985_v19 = vpop.f32.mrf.mxu0  ;;  %v1960_v26 = vadd.f32 %v1959_v18, %v8538_v62  ;;  %v6408_v18 = vld [vmem:[%s9284_s4 + $0x6e4] sm:$0xf0] }
 0x16b   : > { %3018 = vmatpush.bf16.msra.mxu0 %v5485_v10  ;;  %3031 = vmatpush.bf16.msra.mxu1 %v5549_v12  ;;  %v5517_v10 = vor.u32 %v6367_v63, %v5514_v0  ;;  %v5504_v12 = vld [vmem:[%s9284_s4 + $0x5a0] sm:$0xf]  ;;  %v5441_v20 = vor.u32 %v6350_v8, %v5440_v3  ;;  %v1986_v36 = vadd.f32 %v1985_v19, %v8540_v27  ;;  %v6391_v19 = vld [vmem:[%s9284_s4 + $0x664] sm:$0xf] }
 0x16c   : > { %2761 = vmatmul.bf16.vlgmr.msrb.gmra.mxu0 %v2563_v21  ;;  %2774 = vmatmul.bf16.vlgmr.msrb.gmra.mxu1 %v2564_v22  ;;  %v5505_v21 = vor.u32 %v6366_v13, %v5504_v12  ;;  %v5432_v22 = vld [vmem:[%s9284_s4 + $0x510] sm:$0xf]  ;;  %v5424_v27 = vld [vmem:[%s9284_s4 + $0x500] sm:$0xf]  ;;  %v5493_v63 = vor.u32 %v6361_v48, %v5490_v49  ;;  %v2828_v12 = vrot.slane %v2826_v40, 3 }
 0x16d   : > { %v5425_v30 = vor.u32 %v6346_v45, %v5424_v27  ;;  %v5640_v13 = vld [vmem:[%s9284_s4 + $0x660] sm:$0xf]  ;;  %v6388_v40 = vld [vmem:[%s9284_s4 + $0x644] sm:$0xf0]  ;;  %v5616_v49 = vld [vmem:[%s9284_s4 + $0x630] sm:$0xf] }
 0x16e   : > { %2993 = vmatpush.bf16.msrb.mxu2 %v5473_v24  ;;  %3006 = vmatpush.bf16.msrb.mxu3 %v5537_v25  ;;  %v6348_v24 = vld [vmem:[%s9284_s4 + $0x514] sm:$0xf0]  ;;  %v2815_v25 = vshrl.u32 %v8484_v4, 16  ;;  %v1972_v37 = vpop.f32.mrf.mxu3  ;;  %v5688_v45 = vld [vmem:[%s9284_s4 + $0x6c0] sm:$0xf] }
 0x16f   : > { %3019 = vmatpush.bf16.msra.mxu0 %v5477_v32  ;;  %3032 = vmatpush.bf16.msra.mxu1 %v5541_v33  ;;  %v5509_v32 = vor.u32 %v6365_v16, %v5506_v17  ;;  %v5496_v33 = vld [vmem:[%s9284_s4 + $0x590] sm:$0xf]  ;;  %v1998_v38 = vpop.f32.mrf.mxu1  ;;  %v8641_v62 = vadd.f32 %v1972_v37, %v1960_v26  ;;  %v5717_v16 = vor.u32 %v6409_v58, %v5714_v59  ;;  %v5704_v17 = vld [vmem:[%s9284_s4 + $0x6e0] sm:$0xf]  ;;  %v6406_v37 = vld [vmem:[%s9284_s4 + $0x6d4] sm:$0xf0] }
 0x170   : > { %v8649_v41 = vadd.f32 %v1998_v38, %v1986_v36  ;;  %v2817_v0 = vrot.slane %v2815_v25, 2  ;;  %v5641_v26 = vor.u32 %v6392_v14, %v5640_v13  ;;  %v5696_v36 = vld [vmem:[%s9284_s4 + $0x6d0] sm:$0xf]  ;;  %v6389_v38 = vld [vmem:[%s9284_s4 + $0x654] sm:$0xf] }
 0x171   : > { %v5608_v59 = vld [vmem:[%s9284_s4 + $0x620] sm:$0xf]  ;;  %v5600_v14 = vld [vmem:[%s9284_s4 + $0x610] sm:$0xf] }
 0x172   : > { %2994 = vmatpush.bf16.msrb.mxu2 %v5465_v28  ;;  %3007 = vmatpush.bf16.msrb.mxu3 %v5529_v42  ;;  %v2818_v28 = vshll.u32 %v8484_v4, 16  ;;  %v2823_v42 = vshrl.u32 %v8486_v7, 16  ;;  %v6362_v4 = vld [vmem:[%s9284_s4 + $0x584] sm:$0xf0]  ;;  %v5437_v7 = vor.u32 %v6347_v35, %v5434_v54  ;;  %v5634_v54 = vld [vmem:[%s9284_s4 + $0x658] sm:$0xf0] }
 0x173   : > { %3020 = vmatpush.bf16.msra.mxu0 %v5469_v43  ;;  %3033 = vmatpush.bf16.msra.mxu1 %v5533_v44  ;;  %v5433_v43 = vor.u32 %v6348_v24, %v5432_v22  ;;  %v5497_v44 = vor.u32 %v6364_v34, %v5496_v33  ;;  %v5489_v23 = vor.u32 %v6362_v4, %v5488_v46  ;;  %v5706_v22 = vld [vmem:[%s9284_s4 + $0x6e8] sm:$0xf0]  ;;  %v6390_v33 = vld [vmem:[%s9284_s4 + $0x654] sm:$0xf0]  ;;  %v6404_v46 = vld [vmem:[%s9284_s4 + $0x6c4] sm:$0xf0] }
 0x174   : > { %v6387_v4 = vld [vmem:[%s9284_s4 + $0x644] sm:$0xf]  ;;  %v5689_v48 = vor.u32 %v6404_v46, %v5688_v45  ;;  %v6442_v45 = vld [vmem:[%s9284_s4 + $0x7f4] sm:$0xf0]  ;;  %v6425_v46 = vld [vmem:[%s9284_s4 + $0x774] sm:$0xf] }
 0x176   : > { %2995 = vmatpush.bf16.msrb.mxu2 %v5457_v53  ;;  %3008 = vmatpush.bf16.msrb.mxu3 %v5521_v55  ;;  %v6394_v53 = vld [vmem:[%s9284_s4 + $0x674] sm:$0xf0]  ;;  %v5712_v55 = vld [vmem:[%s9284_s4 + $0x6f0] sm:$0xf] }
 0x177   : > { %3021 = vmatpush.bf16.msra.mxu0 %v5461_v6  ;;  %3034 = vmatpush.bf16.msra.mxu1 %v5525_v29  ;;  %v1961_v6 = vpop.f32.mrf.mxu2  ;;  %v1987_v29 = vpop.f32.mrf.mxu0  ;;  %v5649_v8 = vor.u32 %v6394_v53, %v5648_v52  ;;  %v6386_v52 = vld [vmem:[%s9284_s4 + $0x634] sm:$0xf0] }
 0x178   : > { %v2000_v3 = vpop.f32.mrf.mxu1  ;;  %v6385_v6 = vld [vmem:[%s9284_s4 + $0x634] sm:$0xf]  ;;  %v5618_v29 = vld [vmem:[%s9284_s4 + $0x638] sm:$0xf0]  ;;  %v5617_v11 = vor.u32 %v6386_v52, %v5616_v49 }
 0x179   : > { %v6383_v3 = vld [vmem:[%s9284_s4 + $0x624] sm:$0xf] }
 0x17a   : > { %2996 = vmatpush.bf16.msrb.mxu2 %v5449_v1  ;;  %3009 = vmatpush.bf16.msrb.mxu3 %v5513_v2  ;;  %v2820_v1 = vrot.slane %v2818_v28, 3  ;;  %v1974_v2 = vpop.f32.mrf.mxu3  ;;  %v5697_v28 = vor.u32 %v6406_v37, %v5696_v36  ;;  %v6379_v37 = vld [vmem:[%s9284_s4 + $0x604] sm:$0xf] }
 0x17b   : > { %3022 = vmatpush.bf16.msra.mxu0 %v5453_v9  ;;  %3035 = vmatpush.bf16.msra.mxu1 %v5517_v10  ;;  %v5713_v9 = vor.u32 %v6410_v56, %v5712_v55  ;;  %v2825_v10 = vrot.slane %v2823_v42, 2  ;;  %v5624_v42 = vld [vmem:[%s9284_s4 + $0x640] sm:$0xf]  ;;  %v5680_v56 = vld [vmem:[%s9284_s4 + $0x6b0] sm:$0xf] }
 0x17c   : > { %v2821_v24 = vor.u32 %v2820_v1, %v2817_v0  ;;  %v5625_v47 = vor.u32 %v6388_v40, %v5624_v42  ;;  %v5681_v58 = vor.u32 %v6402_v5, %v5680_v56  ;;  %v5672_v1 = vld [vmem:[%s9284_s4 + $0x6a0] sm:$0xf]  ;;  %v6400_v2 = vld [vmem:[%s9284_s4 + $0x6a4] sm:$0xf0]  ;;  %v5658_v42 = vld [vmem:[%s9284_s4 + $0x688] sm:$0xf0] }
 0x17d   : > { %v2829_v25 = vor.u32 %v2828_v12, %v2825_v10  ;;  %v5674_v10 = vld [vmem:[%s9284_s4 + $0x6a8] sm:$0xf0]  ;;  %v5673_v13 = vor.u32 %v6400_v2, %v5672_v1  ;;  %v5808_v40 = vld [vmem:[%s9284_s4 + $0x770] sm:$0xf]  ;;  %v5800_v5 = vld [vmem:[%s9284_s4 + $0x760] sm:$0xf] }
 0x17e   : > { %2997 = vmatpush.bf16.msrb.mxu2 %v5441_v20  ;;  %3010 = vmatpush.bf16.msrb.mxu3 %v5505_v21  ;;  %v5642_v20 = vld [vmem:[%s9284_s4 + $0x668] sm:$0xf0]  ;;  %v6407_v21 = vld [vmem:[%s9284_s4 + $0x6e4] sm:$0xf] }
 0x17f   : > { %3023 = vmatpush.bf16.msra.mxu0 %v5445_v31  ;;  %3036 = vmatpush.bf16.msra.mxu1 %v5509_v32  ;;  %v5705_v31 = vor.u32 %v6408_v18, %v5704_v17  ;;  %v5632_v32 = vld [vmem:[%s9284_s4 + $0x650] sm:$0xf]  ;;  %v5645_v34 = vor.u32 %v6391_v19, %v5642_v20  ;;  %v5709_v35 = vor.u32 %v6407_v21, %v5706_v22  ;;  %v6398_v19 = vld [vmem:[%s9284_s4 + $0x694] sm:$0xf0]  ;;  %v6381_v20 = vld [vmem:[%s9284_s4 + $0x614] sm:$0xf] }
 0x180   : > { %v5633_v27 = vor.u32 %v6390_v33, %v5632_v32  ;;  %v5664_v18 = vld [vmem:[%s9284_s4 + $0x690] sm:$0xf]  ;;  %v5602_v21 = vld [vmem:[%s9284_s4 + $0x618] sm:$0xf0]  ;;  %v6397_v22 = vld [vmem:[%s9284_s4 + $0x694] sm:$0xf] }
 0x181   : > { %v6380_v32 = vld [vmem:[%s9284_s4 + $0x604] sm:$0xf0]  ;;  %v5656_v33 = vld [vmem:[%s9284_s4 + $0x680] sm:$0xf] }
 0x182   : > { %2998 = vmatpush.bf16.msrb.mxu2 %v5433_v43  ;;  %3011 = vmatpush.bf16.msrb.mxu3 %v5497_v44  ;;  %v5637_v43 = vor.u32 %v6389_v38, %v5634_v54  ;;  %v5701_v44 = vor.u32 %v6405_v39, %v5698_v61  ;;  %v5594_v38 = vld [vmem:[%s9284_s4 + $0x608] sm:$0xf0]  ;;  %v6395_v54 = vld [vmem:[%s9284_s4 + $0x684] sm:$0xf]  ;;  %v5584_v39 = vld [vmem:[#allocation2] sm:$0x8] }
 0x183   : > { %3024 = vmatpush.bf16.msra.mxu0 %v5437_v7  ;;  %3037 = vmatpush.bf16.msra.mxu1 %v5501_v50  ;;  %v5626_v7 = vld [vmem:[%s9284_s4 + $0x648] sm:$0xf0]  ;;  %v6403_v50 = vld [vmem:[%s9284_s4 + $0x6c4] sm:$0xf]  ;;  %v6378_v61 = vld [vmem:[#allocation2 + $0x4] sm:$0x10]  ;;  %v5661_v49 = vor.u32 %v6395_v54, %v5658_v42 }
 0x184   : > { %v5629_v53 = vor.u32 %v6387_v4, %v5626_v7  ;;  %v5693_v55 = vor.u32 %v6403_v50, %v5690_v51  ;;  %v5810_v50 = vld [vmem:[%s9284_s4 + $0x778] sm:$0xf0]  ;;  %v6441_v51 = vld [vmem:[%s9284_s4 + $0x7f4] sm:$0xf]  ;;  %v6418_v54 = vld [vmem:[%s9284_s4 + $0x734] sm:$0xf0] }
 0x185   : > { %v6417_v42 = vld [vmem:[%s9284_s4 + $0x734] sm:$0xf] }
 0x186   : > { %2999 = vmatpush.bf16.msrb.mxu2 %v5425_v30  ;;  %3012 = vmatpush.bf16.msrb.mxu3 %v5489_v23  ;;  %v6401_v30 = vld [vmem:[%s9284_s4 + $0x6b4] sm:$0xf]  ;;  %v5682_v23 = vld [vmem:[%s9284_s4 + $0x6b8] sm:$0xf0] }
 0x187   : > { %3025 = vmatpush.bf16.msra.mxu0 %v5429_v60  ;;  %3038 = vmatpush.bf16.msra.mxu1 %v5493_v63  ;;  %v6384_v60 = vld [vmem:[%s9284_s4 + $0x624] sm:$0xf0]  ;;  %v5621_v63 = vor.u32 %v6385_v6, %v5618_v29  ;;  %v5685_v0 = vor.u32 %v6401_v30, %v5682_v23  ;;  %v5813_v29 = vor.u32 %v6425_v46, %v5810_v50  ;;  %v5864_v23 = vld [vmem:[%s9284_s4 + $0x7e0] sm:$0xf] }
 0x188   : > { %v5609_v12 = vor.u32 %v6384_v60, %v5608_v59  ;;  %v6424_v6 = vld [vmem:[%s9284_s4 + $0x764] sm:$0xf0]  ;;  %v5802_v59 = vld [vmem:[%s9284_s4 + $0x768] sm:$0xf0]  ;;  %v6439_v60 = vld [vmem:[%s9284_s4 + $0x7e4] sm:$0xf] }
 0x189   : > { %3000 = vmatmul.bf16.vlgmr.msrb.gmra.mxu2 %v2821_v24  ;;  %3013 = vmatmul.bf16.vlgmr.msrb.gmra.mxu3 %v2829_v25  ;;  %v5801_v2 = vor.u32 %v6424_v6, %v5800_v5  ;;  %v5834_v5 = vld [vmem:[%s9284_s4 + $0x7a8] sm:$0xf0] }
 0x18a   : > { %3253 = vmatpush.bf16.msra.mxu2 %v5649_v8  ;;  %3266 = vmatpush.bf16.msra.mxu3 %v5713_v9  ;;  %v5610_v8 = vld [vmem:[%s9284_s4 + $0x628] sm:$0xf0]  ;;  %v6399_v9 = vld [vmem:[%s9284_s4 + $0x6a4] sm:$0xf] }
 0x18b   : > { %3279 = vmatpush.bf16.msrb.mxu0 %v5653_v15  ;;  %3292 = vmatpush.bf16.msrb.mxu1 %v5717_v16  ;;  %v6382_v15 = vld [vmem:[%s9284_s4 + $0x614] sm:$0xf0]  ;;  %v5613_v16 = vor.u32 %v6383_v3, %v5610_v8  ;;  %v5677_v17 = vor.u32 %v6399_v9, %v5674_v10  ;;  %v5792_v8 = vld [vmem:[%s9284_s4 + $0x750] sm:$0xf] }
 0x18c   : > { %3026 = vmatmul.bf16.vlgmr.msra.gmra.mxu0 %v2821_v24  ;;  %3039 = vmatmul.bf16.vlgmr.msra.gmra.mxu1 %v2829_v25  ;;  %v5666_v24 = vld [vmem:[%s9284_s4 + $0x698] sm:$0xf0]  ;;  %v5592_v25 = vld [vmem:[%s9284_s4 + $0x600] sm:$0xf]  ;;  %v6422_v9 = vld [vmem:[%s9284_s4 + $0x754] sm:$0xf0] }
 0x18d   : > { %v5669_v36 = vor.u32 %v6397_v22, %v5666_v24  ;;  %v5593_v4 = vor.u32 %v6380_v32, %v5592_v25  ;;  %v6420_v22 = vld [vmem:[%s9284_s4 + $0x744] sm:$0xf0]  ;;  %v6419_v32 = vld [vmem:[%s9284_s4 + $0x744] sm:$0xf] }
 0x18e   : > { %3254 = vmatpush.bf16.msra.mxu2 %v5641_v26  ;;  %3267 = vmatpush.bf16.msra.mxu3 %v5705_v31  ;;  %v5601_v26 = vor.u32 %v6382_v15, %v5600_v14  ;;  %v5665_v31 = vor.u32 %v6398_v19, %v5664_v18  ;;  %v6438_v14 = vld [vmem:[%s9284_s4 + $0x7d4] sm:$0xf0]  ;;  %v6421_v15 = vld [vmem:[%s9284_s4 + $0x754] sm:$0xf]  ;;  %v5858_v18 = vld [vmem:[%s9284_s4 + $0x7d8] sm:$0xf0]  ;;  %v5793_v19 = vor.u32 %v6422_v9, %v5792_v8 }
 0x18f   : > { %3280 = vmatpush.bf16.msrb.mxu0 %v5645_v34  ;;  %3293 = vmatpush.bf16.msrb.mxu1 %v5709_v35  ;;  %v6396_v34 = vld [vmem:[%s9284_s4 + $0x684] sm:$0xf0]  ;;  %v5605_v35 = vor.u32 %v6381_v20, %v5602_v21  ;;  %v5784_v21 = vld [vmem:[%s9284_s4 + $0x740] sm:$0xf] }
 0x190   : > { %v5657_v7 = vor.u32 %v6396_v34, %v5656_v33  ;;  %v5786_v33 = vld [vmem:[%s9284_s4 + $0x748] sm:$0xf0]  ;;  %v6435_v34 = vld [vmem:[%s9284_s4 + $0x7c4] sm:$0xf] }
 0x192   : > { %3255 = vmatpush.bf16.msra.mxu2 %v5633_v27  ;;  %3268 = vmatpush.bf16.msra.mxu3 %v5697_v28  ;;  %v6377_v27 = vld [vmem:[#allocation2 + $0x4] sm:$0x8]  ;;  %v5586_v28 = vld [vmem:[#allocation2 + $0x8] sm:$0x10] }
 0x193   : > { %3281 = vmatpush.bf16.msrb.mxu0 %v5637_v43  ;;  %3294 = vmatpush.bf16.msrb.mxu1 %v5701_v44  ;;  %v6426_v43 = vld [vmem:[%s9284_s4 + $0x774] sm:$0xf0]  ;;  %v5872_v44 = vld [vmem:[%s9284_s4 + $0x7f0] sm:$0xf]  ;;  %v8890_v56 = vor.u32 %v6377_v27, %v5586_v28 }
 0x194   : > { %v5809_v52 = vor.u32 %v6426_v43, %v5808_v40  ;;  %v5840_v27 = vld [vmem:[%s9284_s4 + $0x7b0] sm:$0xf]  ;;  %v6434_v28 = vld [vmem:[%s9284_s4 + $0x7b4] sm:$0xf0]  ;;  %v5778_v40 = vld [vmem:[%s9284_s4 + $0x738] sm:$0xf0] }
 0x195   : > { %v3090_v1 = vrot.slane %v8890_v56, 3  ;;  %v6433_v43 = vld [vmem:[%s9284_s4 + $0x7b4] sm:$0xf]  ;;  %v5841_v46 = vor.u32 %v6434_v28, %v5840_v27  ;;  %v5781_v50 = vor.u32 %v6417_v42, %v5778_v40  ;;  %v5960_v40 = vld [vmem:[%s9284_s4 + $0x860] sm:$0xf] }
 0x196   : > { %3256 = vmatpush.bf16.msra.mxu2 %v5625_v47  ;;  %3269 = vmatpush.bf16.msra.mxu3 %v5689_v48  ;;  %v5874_v47 = vld [vmem:[%s9284_s4 + $0x7f8] sm:$0xf0]  ;;  %v5597_v48 = vor.u32 %v6379_v37, %v5594_v38  ;;  %v5776_v38 = vld [vmem:[%s9284_s4 + $0x730] sm:$0xf] }
 0x197   : > { %3282 = vmatpush.bf16.msrb.mxu0 %v5629_v53  ;;  %3295 = vmatpush.bf16.msrb.mxu1 %v5693_v55  ;;  %v5873_v53 = vor.u32 %v6442_v45, %v5872_v44  ;;  %v8888_v55 = vor.u32 %v6378_v61, %v5584_v39  ;;  %v5877_v30 = vor.u32 %v6441_v51, %v5874_v47  ;;  %v5842_v44 = vld [vmem:[%s9284_s4 + $0x7b8] sm:$0xf0]  ;;  %v5832_v47 = vld [vmem:[%s9284_s4 + $0x7a0] sm:$0xf] }
 0x198   : > { %v5789_v39 = vor.u32 %v6419_v32, %v5786_v33  ;;  %v5777_v45 = vor.u32 %v6418_v54, %v5776_v38  ;;  %v5845_v51 = vor.u32 %v6433_v43, %v5842_v44  ;;  %v6456_v43 = vld [vmem:[%s9284_s4 + $0x864] sm:$0xf0] }
 0x199   : > { %v3341_v8 = vshrl.u32 %v8888_v55, 16  ;;  %v3344_v9 = vshll.u32 %v8888_v55, 16 }
 0x19a   : > { %3257 = vmatpush.bf16.msra.mxu2 %v5617_v11  ;;  %3270 = vmatpush.bf16.msra.mxu3 %v5681_v58  ;;  %v6440_v11 = vld [vmem:[%s9284_s4 + $0x7e4] sm:$0xf0]  ;;  %v6423_v58 = vld [vmem:[%s9284_s4 + $0x764] sm:$0xf] }
 0x19b   : > { %3283 = vmatpush.bf16.msrb.mxu0 %v5621_v63  ;;  %3296 = vmatpush.bf16.msrb.mxu1 %v5685_v0  ;;  %v5866_v63 = vld [vmem:[%s9284_s4 + $0x7e8] sm:$0xf0]  ;;  %v3089_v0 = vrot.slane %v8888_v55, 3  ;;  %v5865_v3 = vor.u32 %v6440_v11, %v5864_v23  ;;  %v5805_v10 = vor.u32 %v6423_v58, %v5802_v59  ;;  %v6414_v23 = vld [vmem:[%s9284_s4 + $0x714] sm:$0xf0]  ;;  %v3343_v54 = vrot.slane %v3341_v8, 3 }
 0x19c   : > { %v5824_v59 = vld [vmem:[%s9284_s4 + $0x790] sm:$0xf]  ;;  %v6428_v55 = vld [vmem:[%s9284_s4 + $0x784] sm:$0xf0]  ;;  %v5944_v8 = vld [vmem:[%s9284_s4 + $0x840] sm:$0xf] }
 0x19e   : > { %3258 = vmatpush.bf16.msra.mxu2 %v5609_v12  ;;  %3271 = vmatpush.bf16.msra.mxu3 %v5673_v13  ;;  %v5869_v12 = vor.u32 %v6439_v60, %v5866_v63  ;;  %v5856_v13 = vld [vmem:[%s9284_s4 + $0x7d0] sm:$0xf]  ;;  %v6430_v60 = vld [vmem:[%s9284_s4 + $0x794] sm:$0xf0]  ;;  %v6413_v63 = vld [vmem:[%s9284_s4 + $0x714] sm:$0xf] }
 0x19f   : > { %3284 = vmatpush.bf16.msrb.mxu0 %v5613_v16  ;;  %3297 = vmatpush.bf16.msrb.mxu1 %v5677_v17  ;;  %v5794_v16 = vld [vmem:[%s9284_s4 + $0x758] sm:$0xf0]  ;;  %v6437_v17 = vld [vmem:[%s9284_s4 + $0x7d4] sm:$0xf]  ;;  %v5857_v20 = vor.u32 %v6438_v14, %v5856_v13  ;;  %v5825_v14 = vor.u32 %v6430_v60, %v5824_v59 }
 0x1a0   : > { %v5797_v24 = vor.u32 %v6421_v15, %v5794_v16  ;;  %v5861_v25 = vor.u32 %v6437_v17, %v5858_v18  ;;  %v6412_v15 = vld [vmem:[%s9284_s4 + $0x704] sm:$0xf0]  ;;  %v5816_v16 = vld [vmem:[%s9284_s4 + $0x780] sm:$0xf]  ;;  %v6411_v18 = vld [vmem:[%s9284_s4 + $0x704] sm:$0xf] }
 0x1a1   : > { %v5817_v33 = vor.u32 %v6428_v55, %v5816_v16  ;;  %v5954_v59 = vld [vmem:[%s9284_s4 + $0x858] sm:$0xf0]  ;;  %v6469_v60 = vld [vmem:[%s9284_s4 + $0x8d4] sm:$0xf]  ;;  %v6451_v16 = vld [vmem:[%s9284_s4 + $0x844] sm:$0xf] }
 0x1a2   : > { %3259 = vmatpush.bf16.msra.mxu2 %v5601_v26  ;;  %3272 = vmatpush.bf16.msra.mxu3 %v5665_v31  ;;  %v5848_v26 = vld [vmem:[%s9284_s4 + $0x7c0] sm:$0xf]  ;;  %v6436_v31 = vld [vmem:[%s9284_s4 + $0x7c4] sm:$0xf0]  ;;  %v5946_v55 = vld [vmem:[%s9284_s4 + $0x848] sm:$0xf0] }
 0x1a3   : > { %3285 = vmatpush.bf16.msrb.mxu0 %v5605_v35  ;;  %3298 = vmatpush.bf16.msrb.mxu1 %v5669_v36  ;;  %v5850_v35 = vld [vmem:[%s9284_s4 + $0x7c8] sm:$0xf0]  ;;  %v5785_v36 = vor.u32 %v6420_v22, %v5784_v21  ;;  %v5849_v37 = vor.u32 %v6436_v31, %v5848_v26  ;;  %v5968_v22 = vld [vmem:[%s9284_s4 + $0x870] sm:$0xf]  ;;  %v6474_v26 = vld [vmem:[%s9284_s4 + $0x8f4] sm:$0xf0] }
 0x1a4   : > { %v5853_v61 = vor.u32 %v6435_v34, %v5850_v35  ;;  %v5818_v21 = vld [vmem:[%s9284_s4 + $0x788] sm:$0xf0]  ;;  %v6457_v31 = vld [vmem:[%s9284_s4 + $0x874] sm:$0xf]  ;;  %v5970_v34 = vld [vmem:[%s9284_s4 + $0x878] sm:$0xf0] }
 0x1a5   : > { %v6473_v35 = vld [vmem:[%s9284_s4 + $0x8f4] sm:$0xf]  ;;  %v5973_v44 = vor.u32 %v6457_v31, %v5970_v34 }
 0x1a6   : > { %3260 = vmatpush.bf16.msra.mxu2 %v5593_v4  ;;  %3273 = vmatpush.bf16.msra.mxu3 %v5657_v7  ;;  %v5768_v4 = vld [vmem:[%s9284_s4 + $0x720] sm:$0xf]  ;;  %v6416_v7 = vld [vmem:[%s9284_s4 + $0x724] sm:$0xf0] }
 0x1a7   : > { %3286 = vmatpush.bf16.msrb.mxu0 %v5597_v48  ;;  %3299 = vmatpush.bf16.msrb.mxu1 %v5661_v49  ;;  %v6432_v48 = vld [vmem:[%s9284_s4 + $0x7a4] sm:$0xf0]  ;;  %v6415_v49 = vld [vmem:[%s9284_s4 + $0x724] sm:$0xf]  ;;  %v5769_v6 = vor.u32 %v6416_v7, %v5768_v4 }
 0x1a8   : > { %v6472_v4 = vld [vmem:[%s9284_s4 + $0x8e4] sm:$0xf0]  ;;  %v6455_v7 = vld [vmem:[%s9284_s4 + $0x864] sm:$0xf] }
 0x1a9   : > { %3261 = vmatmul.bf16.vlgmr.msra.gmra.mxu2 %v3089_v0  ;;  %3274 = vmatmul.bf16.vlgmr.msra.gmra.mxu3 %v3090_v1 }
 0x1aa   : > { %3518 = vmatpush.bf16.msrb.mxu2 %v5809_v52  ;;  %3531 = vmatpush.bf16.msrb.mxu3 %v5873_v53  ;;  %v5770_v52 = vld [vmem:[%s9284_s4 + $0x728] sm:$0xf0]  ;;  %v6431_v53 = vld [vmem:[%s9284_s4 + $0x7a4] sm:$0xf] }
 0x1ab   : > { %3544 = vmatpush.bf16.msra.mxu0 %v5813_v29  ;;  %3557 = vmatpush.bf16.msra.mxu1 %v5877_v30  ;;  %v5833_v29 = vor.u32 %v6432_v48, %v5832_v47  ;;  %v5760_v30 = vld [vmem:[%s9284_s4 + $0x710] sm:$0xf]  ;;  %v5773_v11 = vor.u32 %v6415_v49, %v5770_v52  ;;  %v5837_v58 = vor.u32 %v6431_v53, %v5834_v5  ;;  %v6026_v47 = vld [vmem:[%s9284_s4 + $0x8e8] sm:$0xf0] }
 0x1ac   : > { %3287 = vmatmul.bf16.vlgmr.msrb.gmra.mxu0 %v3089_v0  ;;  %3300 = vmatmul.bf16.vlgmr.msrb.gmra.mxu1 %v3090_v1  ;;  %v5762_v0 = vld [vmem:[%s9284_s4 + $0x718] sm:$0xf0]  ;;  %v6429_v1 = vld [vmem:[%s9284_s4 + $0x794] sm:$0xf]  ;;  %v5761_v13 = vor.u32 %v6414_v23, %v5760_v30  ;;  %v5961_v52 = vor.u32 %v6456_v43, %v5960_v40  ;;  %v5952_v5 = vld [vmem:[%s9284_s4 + $0x850] sm:$0xf] }
 0x1ad   : > { %v5765_v17 = vor.u32 %v6413_v63, %v5762_v0  ;;  %v6016_v23 = vld [vmem:[%s9284_s4 + $0x8d0] sm:$0xf]  ;;  %v6018_v63 = vld [vmem:[%s9284_s4 + $0x8d8] sm:$0xf0] }
 0x1ae   : > { %3519 = vmatpush.bf16.msrb.mxu2 %v5801_v2  ;;  %3532 = vmatpush.bf16.msrb.mxu3 %v5865_v3  ;;  %v5826_v2 = vld [vmem:[%s9284_s4 + $0x798] sm:$0xf0]  ;;  %v5752_v3 = vld [vmem:[%s9284_s4 + $0x700] sm:$0xf] }
 0x1af   : > { %3545 = vmatpush.bf16.msra.mxu0 %v5805_v10  ;;  %3558 = vmatpush.bf16.msra.mxu1 %v5869_v12  ;;  %v3349_v10 = vshrl.u32 %v8890_v56, 16  ;;  %v3352_v12 = vshll.u32 %v8890_v56, 16  ;;  %v5829_v56 = vor.u32 %v6429_v1, %v5826_v2  ;;  %v5753_v32 = vor.u32 %v6412_v15, %v5752_v3  ;;  %v6468_v15 = vld [vmem:[%s9284_s4 + $0x8c4] sm:$0xf0] }
 0x1b1   : > { %v3351_v28 = vrot.slane %v3349_v10, 3  ;;  %v3354_v42 = vrot.slane %v3352_v12, 4  ;;  %v6021_v12 = vor.u32 %v6469_v60, %v6018_v63 }
 0x1b2   : > { %3520 = vmatpush.bf16.msrb.mxu2 %v5793_v19  ;;  %3533 = vmatpush.bf16.msrb.mxu3 %v5857_v20  ;;  %v5754_v19 = vld [vmem:[%s9284_s4 + $0x708] sm:$0xf0]  ;;  %v6427_v20 = vld [vmem:[%s9284_s4 + $0x784] sm:$0xf] }
 0x1b3   : > { %3546 = vmatpush.bf16.msra.mxu0 %v5797_v24  ;;  %3559 = vmatpush.bf16.msra.mxu1 %v5861_v25  ;;  %v6458_v24 = vld [vmem:[%s9284_s4 + $0x874] sm:$0xf0]  ;;  %v6032_v25 = vld [vmem:[%s9284_s4 + $0x8f0] sm:$0xf]  ;;  %v5821_v38 = vor.u32 %v6427_v20, %v5818_v21  ;;  %v3355_v49 = vor.u32 %v3354_v42, %v3351_v28  ;;  %v5928_v28 = vld [vmem:[%s9284_s4 + $0x820] sm:$0xf] }
 0x1b4   : > { %v6033_v27 = vor.u32 %v6474_v26, %v6032_v25  ;;  %v5936_v21 = vld [vmem:[%s9284_s4 + $0x830] sm:$0xf]  ;;  %v6448_v42 = vld [vmem:[%s9284_s4 + $0x824] sm:$0xf0] }
 0x1b6   : > { %3521 = vmatpush.bf16.msrb.mxu2 %v5785_v36  ;;  %3534 = vmatpush.bf16.msrb.mxu3 %v5849_v37  ;;  %v6034_v36 = vld [vmem:[%s9284_s4 + $0x8f8] sm:$0xf0]  ;;  %v5757_v37 = vor.u32 %v6411_v18, %v5754_v19 }
 0x1b7   : > { %3547 = vmatpush.bf16.msra.mxu0 %v5789_v39  ;;  %3560 = vmatpush.bf16.msra.mxu1 %v5853_v61  ;;  %v3346_v39 = vrot.slane %v3344_v9, 4  ;;  %v5969_v61 = vor.u32 %v6458_v24, %v5968_v22  ;;  %v6452_v9 = vld [vmem:[%s9284_s4 + $0x844] sm:$0xf0]  ;;  %v6450_v22 = vld [vmem:[%s9284_s4 + $0x834] sm:$0xf0]  ;;  %v5949_v24 = vor.u32 %v6451_v16, %v5946_v55 }
 0x1b8   : > { %v5945_v19 = vor.u32 %v6452_v9, %v5944_v8  ;;  %v6459_v16 = vld [vmem:[%s9284_s4 + $0x884] sm:$0xf]  ;;  %v5978_v55 = vld [vmem:[%s9284_s4 + $0x888] sm:$0xf0] }
 0x1b9   : > { %v3347_v48 = vor.u32 %v3346_v39, %v3343_v54  ;;  %v5937_v54 = vor.u32 %v6450_v22, %v5936_v21 }
 0x1ba   : > { %3522 = vmatpush.bf16.msrb.mxu2 %v5777_v45  ;;  %3535 = vmatpush.bf16.msrb.mxu3 %v5841_v46  ;;  %v6037_v45 = vor.u32 %v6473_v35, %v6034_v36  ;;  %v6024_v46 = vld [vmem:[%s9284_s4 + $0x8e0] sm:$0xf]  ;;  %v5938_v35 = vld [vmem:[%s9284_s4 + $0x838] sm:$0xf0]  ;;  %v6465_v36 = vld [vmem:[%s9284_s4 + $0x8b4] sm:$0xf] }
 0x1bb   : > { %3548 = vmatpush.bf16.msra.mxu0 %v5781_v50  ;;  %3561 = vmatpush.bf16.msra.mxu1 %v5845_v51  ;;  %v5962_v50 = vld [vmem:[%s9284_s4 + $0x868] sm:$0xf0]  ;;  %v6471_v51 = vld [vmem:[%s9284_s4 + $0x8e4] sm:$0xf]  ;;  %v6025_v53 = vor.u32 %v6472_v4, %v6024_v46 }
 0x1bc   : > { %v6029_v30 = vor.u32 %v6471_v51, %v6026_v47  ;;  %v5930_v46 = vld [vmem:[%s9284_s4 + $0x828] sm:$0xf0]  ;;  %v6463_v4 = vld [vmem:[%s9284_s4 + $0x8a4] sm:$0xf]  ;;  %v5920_v47 = vld [vmem:[%s9284_s4 + $0x810] sm:$0xf] }
 0x1be   : > { %3523 = vmatpush.bf16.msrb.mxu2 %v5769_v6  ;;  %3536 = vmatpush.bf16.msrb.mxu3 %v5833_v29  ;;  %v6454_v6 = vld [vmem:[%s9284_s4 + $0x854] sm:$0xf0]  ;;  %v5965_v29 = vor.u32 %v6455_v7, %v5962_v50  ;;  %v5994_v7 = vld [vmem:[%s9284_s4 + $0x8a8] sm:$0xf0]  ;;  %v5929_v50 = vor.u32 %v6448_v42, %v5928_v28 }
 0x1bf   : > { %3549 = vmatpush.bf16.msra.mxu0 %v5773_v11  ;;  %3562 = vmatpush.bf16.msra.mxu1 %v5837_v58  ;;  %v6470_v11 = vld [vmem:[%s9284_s4 + $0x8d4] sm:$0xf0]  ;;  %v6453_v58 = vld [vmem:[%s9284_s4 + $0x854] sm:$0xf]  ;;  %v5953_v0 = vor.u32 %v6454_v6, %v5952_v5  ;;  %v5984_v6 = vld [vmem:[%s9284_s4 + $0x890] sm:$0xf] }
 0x1c0   : > { %v6017_v1 = vor.u32 %v6470_v11, %v6016_v23  ;;  %v5957_v10 = vor.u32 %v6453_v58, %v5954_v59  ;;  %v5922_v23 = vld [vmem:[%s9284_s4 + $0x818] sm:$0xf0]  ;;  %v6461_v11 = vld [vmem:[%s9284_s4 + $0x894] sm:$0xf] }
 0x1c1   : > { %v5986_v58 = vld [vmem:[%s9284_s4 + $0x898] sm:$0xf0] }
 0x1c2   : > { %3524 = vmatpush.bf16.msrb.mxu2 %v5761_v13  ;;  %3537 = vmatpush.bf16.msrb.mxu3 %v5825_v14  ;;  %v6008_v14 = vld [vmem:[%s9284_s4 + $0x8c0] sm:$0xf]  ;;  %v5989_v9 = vor.u32 %v6461_v11, %v5986_v58 }
 0x1c3   : > { %3550 = vmatpush.bf16.msra.mxu0 %v5765_v17  ;;  %3563 = vmatpush.bf16.msra.mxu1 %v5829_v56  ;;  %v6467_v17 = vld [vmem:[%s9284_s4 + $0x8c4] sm:$0xf]  ;;  %v6010_v56 = vld [vmem:[%s9284_s4 + $0x8c8] sm:$0xf0]  ;;  %v6009_v20 = vor.u32 %v6468_v15, %v6008_v14 }
 0x1c4   : > { %v6013_v25 = vor.u32 %v6467_v17, %v6010_v56  ;;  %v6443_v14 = vld [vmem:[%s9284_s4 + $0x804] sm:$0xf]  ;;  %v5914_v15 = vld [vmem:[%s9284_s4 + $0x808] sm:$0xf0] }
 0x1c5   : > { %v5917_v22 = vor.u32 %v6443_v14, %v5914_v15  ;;  %v1488_v15 = vld [vmem:[%s9285_s5] sm:$0x3] }
 0x1c6   : > { %3525 = vmatpush.bf16.msrb.mxu2 %v5753_v32  ;;  %3538 = vmatpush.bf16.msrb.mxu3 %v5817_v33  ;;  %v2240_v2 = vpop.f32.mrf.mxu0  ;;  %v2253_v3 = vpop.f32.mrf.mxu1  ;;  %v6466_v32 = vld [vmem:[%s9284_s4 + $0x8b4] sm:$0xf0]  ;;  %v6449_v33 = vld [vmem:[%s9284_s4 + $0x834] sm:$0xf] }
 0x1c7   : > { %3551 = vmatpush.bf16.msra.mxu0 %v5757_v37  ;;  %3564 = vmatpush.bf16.msra.mxu1 %v5821_v38  ;;  %v2254_v13 = vadd.f32 %v2253_v3, %v2240_v2  ;;  %v6002_v37 = vld [vmem:[%s9284_s4 + $0x8b8] sm:$0xf0]  ;;  %v5941_v40 = vor.u32 %v6449_v33, %v5938_v35  ;;  %v6444_v2 = vld [vmem:[%s9284_s4 + $0x804] sm:$0xf0] }
 0x1c8   : > { %v6005_v43 = vor.u32 %v6465_v36, %v6002_v37  ;;  %v3572_v3 = vld [vmem:[#allocation2 + $0x8] sm:$0x33] }
 0x1c9   : > { %3526 = vmatmul.bf16.vlgmr.msrb.gmra.mxu2 %v3347_v48  ;;  %3539 = vmatmul.bf16.vlgmr.msrb.gmra.mxu3 %v3355_v49  ;;  %v9163_v18 = vadd.f32 %v2254_v13, %v8649_v41  ;;  %v6000_v41 = vld [vmem:[%s9284_s4 + $0x8b0] sm:$0xf]  ;;  %v6460_v13 = vld [vmem:[%s9284_s4 + $0x884] sm:$0xf0]  ;;  %v3607_v56 = vunpack.c.l.b16 %v3572_v3 }
 0x1ca   : > { %3773 = vmatpush.bf16.msra.mxu2 %v5969_v61  ;;  %3786 = vmatpush.bf16.msra.mxu3 %v6033_v27  ;;  %v6001_v39 = vor.u32 %v6466_v32, %v6000_v41 }
 0x1cb   : > { %3799 = vmatpush.bf16.msrb.mxu0 %v5973_v44  ;;  %3812 = vmatpush.bf16.msrb.mxu1 %v6037_v45  ;;  %v2214_v26 = vpop.f32.mrf.mxu2  ;;  %v2227_v31 = vpop.f32.mrf.mxu3  ;;  %v6464_v44 = vld [vmem:[%s9284_s4 + $0x8a4] sm:$0xf0]  ;;  %v6447_v45 = vld [vmem:[%s9284_s4 + $0x824] sm:$0xf]  ;;  %v3609_v41 = vpack.c.b16 %v3607_v56, %v3607_v56 }
 0x1cc   : > { %3552 = vmatmul.bf16.vlgmr.msra.gmra.mxu0 %v3347_v48  ;;  %3565 = vmatmul.bf16.vlgmr.msra.gmra.mxu1 %v3355_v49  ;;  %v2228_v34 = vadd.f32 %v2227_v31, %v2214_v26  ;;  %v6446_v48 = vld [vmem:[%s9284_s4 + $0x814] sm:$0xf0]  ;;  %v5933_v49 = vor.u32 %v6447_v45, %v5930_v46 }
 0x1cd   : > { %v5921_v59 = vor.u32 %v6446_v48, %v5920_v47 }
 0x1ce   : > { %3774 = vmatpush.bf16.msra.mxu2 %v5961_v52  ;;  %3787 = vmatpush.bf16.msra.mxu3 %v6025_v53  ;;  %v9190_v38 = vadd.f32 %v2228_v34, %v8641_v62  ;;  %v2242_v61 = vpop.f32.mrf.mxu0  ;;  %v2255_v27 = vpop.f32.mrf.mxu1  ;;  %v5992_v62 = vld [vmem:[%s9284_s4 + $0x8a0] sm:$0xf]  ;;  %v5997_v52 = vor.u32 %v6463_v4, %v5994_v7 }
 0x1cf   : > { %3800 = vmatpush.bf16.msrb.mxu0 %v5965_v29  ;;  %3813 = vmatpush.bf16.msrb.mxu1 %v6029_v30  ;;  %v5993_v51 = vor.u32 %v6464_v44, %v5992_v62  ;;  %v6462_v29 = vld [vmem:[%s9284_s4 + $0x894] sm:$0xf0]  ;;  %v6445_v30 = vld [vmem:[%s9284_s4 + $0x814] sm:$0xf] }
 0x1d0   : > { %v5985_v60 = vor.u32 %v6462_v29, %v5984_v6  ;;  %v5925_v8 = vor.u32 %v6445_v30, %v5922_v23 }
 0x1d2   : > { %3775 = vmatpush.bf16.msra.mxu2 %v5953_v0  ;;  %3788 = vmatpush.bf16.msra.mxu3 %v6017_v1  ;;  %v5912_v1 = vld [vmem:[%s9284_s4 + $0x800] sm:$0xf] }
 0x1d3   : > { %3801 = vmatpush.bf16.msrb.mxu0 %v5957_v10  ;;  %3814 = vmatpush.bf16.msrb.mxu1 %v6021_v12  ;;  %v2216_v53 = vpop.f32.mrf.mxu2  ;;  %v2229_v5 = vpop.f32.mrf.mxu3  ;;  %v5976_v12 = vld [vmem:[%s9284_s4 + $0x880] sm:$0xf] }
 0x1d4   : > { %v5977_v21 = vor.u32 %v6460_v13, %v5976_v12 }
 0x1d6   : > { %3776 = vmatpush.bf16.msra.mxu2 %v5945_v19  ;;  %3789 = vmatpush.bf16.msra.mxu3 %v6009_v20  ;;  %v2505_v63 = vpop.f32.mrf.mxu0  ;;  %v2518_v0 = vpop.f32.mrf.mxu1  ;;  %v3608_v19 = vunpack.c.h.b16 %v3572_v3  ;;  %v5913_v20 = vor.u32 %v6444_v2, %v5912_v1 }
 0x1d7   : > { %3802 = vmatpush.bf16.msrb.mxu0 %v5949_v24  ;;  %3815 = vmatpush.bf16.msrb.mxu1 %v6013_v25  ;;  %v2519_v10 = vadd.f32 %v2518_v0, %v2505_v63  ;;  %v5981_v24 = vor.u32 %v6459_v16, %v5978_v55 }
 0x1d8   : > { %v3610_v32 = vpack.c.b16 %v3608_v19, %v3608_v19 }
 0x1d9   : > { %v2523_v17 = vadd.f32 %v2519_v10, %v9163_v18 }
 0x1da   : > { %3777 = vmatpush.bf16.msra.mxu2 %v5937_v54  ;;  %3790 = vmatpush.bf16.msra.mxu3 %v6001_v39 }
 0x1db   : > { %3803 = vmatpush.bf16.msrb.mxu0 %v5941_v40  ;;  %3816 = vmatpush.bf16.msrb.mxu1 %v6005_v43  ;;  %v2479_v25 = vpop.f32.mrf.mxu2  ;;  %v2492_v26 = vpop.f32.mrf.mxu3 }
 0x1dc   : > { %v2493_v31 = vadd.f32 %v2492_v26, %v2479_v25 }
 0x1de   : > { %3778 = vmatpush.bf16.msra.mxu2 %v5929_v50  ;;  %3791 = vmatpush.bf16.msra.mxu3 %v5993_v51  ;;  %v2522_v33 = vadd.f32 %v2493_v31, %v9190_v38  ;;  %v2507_v18 = vpop.f32.mrf.mxu0  ;;  %v2520_v34 = vpop.f32.mrf.mxu1 }
 0x1df   : > { %3804 = vmatpush.bf16.msrb.mxu0 %v5933_v49  ;;  %3817 = vmatpush.bf16.msrb.mxu1 %v5997_v52 }
 0x1e2   : > { %3779 = vmatpush.bf16.msra.mxu2 %v5921_v59  ;;  %3792 = vmatpush.bf16.msra.mxu3 %v5985_v60 }
 0x1e3   : > { %3805 = vmatpush.bf16.msrb.mxu0 %v5925_v8  ;;  %3818 = vmatpush.bf16.msrb.mxu1 %v5989_v9  ;;  %v2481_v35 = vpop.f32.mrf.mxu2  ;;  %v2494_v36 = vpop.f32.mrf.mxu3 }
 0x1e6   : > { %3780 = vmatpush.bf16.msra.mxu2 %v5913_v20  ;;  %3793 = vmatpush.bf16.msra.mxu3 %v5977_v21  ;;  %v3829_v21 = vperm.slane %v1488_v15, 1 }
 0x1e7   : > { %3806 = vmatpush.bf16.msrb.mxu0 %v5917_v22  ;;  %3819 = vmatpush.bf16.msrb.mxu1 %v5981_v24 }
 0x1e9   : > { %3781 = vmatmul.bf16.vlgmr.msra.gmra.mxu2 %v3609_v41  ;;  %3794 = vmatmul.bf16.vlgmr.msra.gmra.mxu3 %v3610_v32  ;;  %v2762_v37 = vpop.f32.mrf.mxu0  ;;  %v2775_v54 = vpop.f32.mrf.mxu1 }
 0x1ea   : > { %3807 = vmatmul.bf16.vlgmr.msrb.gmra.mxu0 %v3609_v41  ;;  %3820 = vmatmul.bf16.vlgmr.msrb.gmra.mxu1 %v3610_v32  ;;  %v2776_v39 = vadd.f32 %v2775_v54, %v2762_v37 }
 0x1ec   : > { %v2780_v61 = vadd.f32 %v2776_v39, %v2523_v17  ;;  %v2736_v27 = vpop.f32.mrf.mxu2  ;;  %v2749_v28 = vpop.f32.mrf.mxu3 }
 0x1ed   : > { %v2750_v42 = vadd.f32 %v2749_v28, %v2736_v27 }
 0x1ef   : > { %v2779_v40 = vadd.f32 %v2750_v42, %v2522_v33  ;;  %v3828_v33 = vperm.slane %v1488_v15, 0 }
 0x1f1   : > { %v2764_v43 = vpop.f32.mrf.mxu0  ;;  %v2777_v38 = vpop.f32.mrf.mxu1 }
 0x1f2   : > { %v3852_v43 = vld [vmem:[%s251_s20] sm:$0xf] }
 0x1f4   : > { %v2738_v62 = vpop.f32.mrf.mxu2  ;;  %v2751_v44 = vpop.f32.mrf.mxu3 }
 0x209   : > { %v3027_v45 = vpop.f32.mrf.mxu0  ;;  %v3040_v46 = vpop.f32.mrf.mxu1 }
 0x20a   : > { %v3041_v4 = vadd.f32 %v3040_v46, %v3027_v45 }
 0x20c   : > { %v3045_v7 = vadd.f32 %v3041_v4, %v2780_v61  ;;  %v3001_v50 = vpop.f32.mrf.mxu2  ;;  %v3014_v51 = vpop.f32.mrf.mxu3 }
 0x20d   : > { %v3015_v47 = vadd.f32 %v3014_v51, %v3001_v50 }
 0x20f   : > { %v3044_v48 = vadd.f32 %v3015_v47, %v2779_v40 }
 0x211   : > { %v3029_v49 = vpop.f32.mrf.mxu0  ;;  %v3042_v52 = vpop.f32.mrf.mxu1 }
 0x214   : > { %v3003_v53 = vpop.f32.mrf.mxu2  ;;  %v3016_v5 = vpop.f32.mrf.mxu3 }
 0x229   : > { %v3288_v6 = vpop.f32.mrf.mxu0  ;;  %v3301_v29 = vpop.f32.mrf.mxu1 }
 0x22a   : > { %v3302_v12 = vadd.f32 %v3301_v29, %v3288_v6 }
 0x22c   : > { %v3262_v30 = vpop.f32.mrf.mxu2  ;;  %v3275_v23 = vpop.f32.mrf.mxu3  ;;  %v3306_v14 = vadd.f32 %v3302_v12, %v3045_v7 }
 0x22d   : > { %v3276_v16 = vadd.f32 %v3275_v23, %v3262_v30 }
 0x22f   : > { %v3305_v24 = vadd.f32 %v3276_v16, %v3044_v48 }
 0x231   : > { %v3290_v11 = vpop.f32.mrf.mxu0  ;;  %v3303_v58 = vpop.f32.mrf.mxu1 }
 0x234   : > { %v3264_v59 = vpop.f32.mrf.mxu2  ;;  %v3277_v60 = vpop.f32.mrf.mxu3 }
 0x249   : > { %v3553_v63 = vpop.f32.mrf.mxu0  ;;  %v3566_v0 = vpop.f32.mrf.mxu1 }
 0x24a   : > { %v3567_v13 = vadd.f32 %v3566_v0, %v3553_v63 }
 0x24c   : > { %v3527_v1 = vpop.f32.mrf.mxu2  ;;  %v3540_v2 = vpop.f32.mrf.mxu3  ;;  %v3571_v56 = vadd.f32 %v3567_v13, %v3306_v14 }
 0x24d   : > { %v3541_v20 = vadd.f32 %v3540_v2, %v3527_v1 }
 0x24f   : > { %v3570_v31 = vadd.f32 %v3541_v20, %v3305_v24 }
 0x251   : > { %v3555_v3 = vpop.f32.mrf.mxu0  ;;  %v3568_v8 = vpop.f32.mrf.mxu1 }
 0x254   : > { %v3529_v9 = vpop.f32.mrf.mxu2  ;;  %v3542_v10 = vpop.f32.mrf.mxu3 }
 0x267   : > { %v3808_v55 = vpop.f32.mrf.mxu0  ;;  %v3821_v17 = vpop.f32.mrf.mxu1 }
 0x268   : > { %v3822_v19 = vadd.f32 %v3821_v17, %v3808_v55 }
 0x26a   : > { %v3826_v22 = vadd.f32 %v3822_v19, %v3571_v56 }
 0x26c   : > { %v3782_v25 = vpop.f32.mrf.mxu2  ;;  %v3795_v26 = vpop.f32.mrf.mxu3  ;;  %v3833_v41 = vadd.f32 %v3829_v21, %v3826_v22 }
 0x26d   : > { %v3796_v32 = vadd.f32 %v3795_v26, %v3782_v25 }
 0x26e   : > { %v3837_v36 = vmul.f32 0.1, %v3833_v41  ;;  %vm3835_vm11 = vcmp.ge.f32.partialorder %v3833_v41, 0.0 }
 0x26f   : > { %v3825_v18 = vadd.f32 %v3796_v32, %v3570_v31  ;;  %v3810_v34 = vpop.f32.mrf.mxu0  ;;  %v3823_v35 = vpop.f32.mrf.mxu1 }
 0x270   : > { %v3839_v27 = vsel %vm3835_vm11, %v3833_v41, %v3837_v36 }
 0x271   : > { %v3832_v37 = vadd.f32 %v3828_v33, %v3825_v18 }
 0x273   : > { %vm3834_vm12 = vcmp.ge.f32.partialorder %v3832_v37, 0.0  ;;  %v3836_v54 = vmul.f32 0.1, %v3832_v37 }
 0x274   : > { %v3784_v39 = vpop.f32.mrf.mxu2  ;;  %v3797_v61 = vpop.f32.mrf.mxu3 }
 0x275   : > { %v3838_v28 = vsel %vm3834_vm12, %v3832_v37, %v3836_v54 }
 0x276   : > { %v3840_v42 = vpack.c.bf16 %v3839_v27, %v3838_v28 }
 0x278   : > { %v3842_v40 = vrot.slane %v3840_v42, 2 }
 0x27a   : > { %v3846_v38 = vsel %vm3843_vm9, %v3840_v42, %v3842_v40 }
 0x27b   : > { %v3853_v62 = vsel %vm3851_vm14, %v3846_v38, %v3852_v43 }
 0x27c   : > { %3854 = vst [vmem:[%s251_s20] sm:$0xf] %v3853_v62 }
 0x27d PF: > { %s16_s21 = sadd.s32 1, %s6492_s21  }
 0x27e   : > { %p13_p4 = scmp.ge.s32.totalorder %s16_s21, 4  }
 0x280   :  { %15 = sbr.rel (!%p13_p4) target bundleno = 1 (0x1), region = 90 }

</bundles_post_ra>
